<compile_context>
chip_gen: v5e
topology: v5e:2x2
jax: 0.10.0
libtpu: 0.0.40
codegen_flags: <defaults>
</compile_context>

<pallas_src>
import functools

import jax
import jax.numpy as jnp
from jax.experimental import pallas as pl
from jax.experimental.pallas import tpu as pltpu


_ACTS = ("relu", "relu", "none", "relu", "relu", "sigmoid")


def _round_up(n, m):
    return ((n + m - 1) // m) * m


def _autoencoder_kernel(x_ref, *refs):
    """Fused 6-layer MLP for one batch tile; weights are VMEM-resident."""
    o_ref = refs[-1]
    wb_refs = refs[:-1]  # w0,b0, w1,b1, ..., w5,b5
    n_layers = len(wb_refs) // 2

    h = x_ref[...]  # bf16 activations
    for li in range(n_layers):
        w_ref = wb_refs[2 * li]
        b_ref = wb_refs[2 * li + 1]
        # bf16 x bf16 on the MXU, f32 accumulation.
        y = jnp.dot(h, w_ref[...], preferred_element_type=jnp.float32)
        y = y + b_ref[...]                      # (1, N) broadcasts over rows
        act = _ACTS[li]
        if act == "relu":
            y = jnp.maximum(y, 0.0)
        elif act == "sigmoid":
            y = jax.nn.sigmoid(y)
        if li + 1 < n_layers:
            h = y.astype(jnp.bfloat16)          # single cast, after activation
        else:
            o_ref[...] = y.astype(o_ref.dtype)


def _fused_autoencoder_call(x_pad, flat_params, tile_m):
    """One pallas_call over the whole (padded) autoencoder, batch-tiled."""
    m_pad, k_pad = x_pad.shape
    n_out_pad = flat_params[-2].shape[1]        # last weight's output dim
    grid = (m_pad // tile_m,)

    in_specs = [pl.BlockSpec((tile_m, k_pad), lambda i: (i, 0))]
    for p in flat_params:
        # Whole array, constant block index -> DMA'd once, resident across
        # every batch tile (no per-tile weight re-stream).
        in_specs.append(pl.BlockSpec(p.shape, lambda i: (0, 0)))

    out_specs = pl.BlockSpec((tile_m, n_out_pad), lambda i: (i, 0))

    return pl.pallas_call(
        _autoencoder_kernel,
        out_shape=jax.ShapeDtypeStruct((m_pad, n_out_pad), jnp.float32),
        grid=grid,
        in_specs=in_specs,
        out_specs=out_specs,
        compiler_params=pltpu.CompilerParams(
            dimension_semantics=("parallel",)),
    )(x_pad, *flat_params)


def init_autoencoder_params(key, input_dim, hidden_dim):
    """Deterministic synthetic params matching the nn.Module layer shapes.

    Weights are stored (in_features, out_features) so y = x @ W + b, which is
    equivalent to PyTorch's x @ weight.T + bias with weight=(out, in).
    """
    dims = [
        (input_dim, 1000),   # encoder[0]
        (1000, 500),         # encoder[2]
        (500, hidden_dim),   # encoder[4]
        (hidden_dim, 500),   # decoder[0]
        (500, 1000),         # decoder[2]
        (1000, input_dim),   # decoder[4]
    ]
    params = []
    for fan_in, fan_out in dims:
        key, kw, kb = jax.random.split(key, 3)
        scale = 1.0 / jnp.sqrt(jnp.float32(fan_in))
        w = jax.random.uniform(kw, (fan_in, fan_out), jnp.float32, -scale, scale)
        b = jax.random.uniform(kb, (fan_out,), jnp.float32, -scale, scale)
        params.append((w, b))
    return params


def pad_and_cast_params(params, weight_dtype=jnp.bfloat16):
    """Zero-pad every layer to lane-dense (multiple-of-128) dims, cast W to bf16."""
    padded = []
    for w, b in params:
        k, n = w.shape
        kp, np_ = _round_up(k, 128), _round_up(n, 128)
        w_p = jnp.zeros((kp, np_), weight_dtype)
        w_p = w_p.at[:k, :n].set(w.astype(weight_dtype))
        b_p = jnp.zeros((1, np_), jnp.float32)
        b_p = b_p.at[0, :n].set(b.astype(jnp.float32))
        padded.append((w_p, b_p))
    return padded


@functools.partial(jax.jit, static_argnames=("out_dim",))
def autoencoder_forward(x, padded_params, *, out_dim):
    """Pad input, run the fused Pallas kernel, slice padding off the output."""
    m, k = x.shape
    kp = padded_params[0][0].shape[0]
    # bf16 packs 16 rows per vreg; use 128-row tiles once the batch is large
    # enough to fill the MXU's M dimension, otherwise a single 16-row tile.
    mp = _round_up(max(m, 16), 16)
    tile_m = 128 if mp >= 128 else mp
    mp = _round_up(mp, tile_m)
    x_pad = jnp.zeros((mp, kp), jnp.bfloat16)
    x_pad = x_pad.at[:m, :k].set(x.astype(jnp.bfloat16))
    flat = []
    for w_p, b_p in padded_params:
        flat.extend((w_p, b_p))
    out_pad = _fused_autoencoder_call(x_pad, flat, tile_m)
    return out_pad[:m, :out_dim]


def reference_forward(x, params):
    """Pure-JAX f32 reference of the PyTorch module's forward."""
    h = x
    for li, (w, b) in enumerate(params):
        h = h @ w + b
        if _ACTS[li] == "relu":
            h = jnp.maximum(h, 0.0)
        elif _ACTS[li] == "sigmoid":
            h = jax.nn.sigmoid(h)
    return h


if __name__ == "__main__":
    key = jax.random.PRNGKey(0)
    k_params, k_x, k_x2 = jax.random.split(key, 3)

    batch = 8
    input_dim = 256
    hidden_dim = 32

    params = init_autoencoder_params(k_params, input_dim, hidden_dim)
    padded_params = pad_and_cast_params(params)

    # Small-batch (single-tile, latency) path.
    x = jax.random.normal(k_x, (batch, input_dim), jnp.float32)
    out = autoencoder_forward(x, padded_params, out_dim=input_dim)
    out = jax.block_until_ready(out)

    assert out.shape == (batch, input_dim), out.shape
    assert out.dtype == jnp.float32
    # Sigmoid output lies in [0, 1].
    assert bool(jnp.all(out >= 0.0)) and bool(jnp.all(out <= 1.0))
    # Match the f32 reference within bf16-weight tolerance.
    ref = reference_forward(x, params)
    max_err = float(jnp.max(jnp.abs(out - ref)))
    assert max_err < 5e-2, max_err

    # Larger batch exercises the multi-tile grid with VMEM-resident weights.
    batch2 = 300
    x2 = jax.random.normal(k_x2, (batch2, input_dim), jnp.float32)
    out2 = jax.block_until_ready(
        autoencoder_forward(x2, padded_params, out_dim=input_dim))
    assert out2.shape == (batch2, input_dim), out2.shape
    ref2 = reference_forward(x2, params)
    max_err2 = float(jnp.max(jnp.abs(out2 - ref2)))
    assert max_err2 < 5e-2, max_err2

    print("KERNEL_OK")
</pallas_src>

<mosaic_0001>
module attributes {stable_mosaic.version = 11 : i64} {
  func.func @_autoencoder_kernel(%arg0: i32, %arg1: memref<16x256xbf16, #tpu.memory_space<vmem>>, %arg2: memref<256x1024xbf16, #tpu.memory_space<vmem>>, %arg3: memref<1x1024xf32, #tpu.memory_space<vmem>>, %arg4: memref<1024x512xbf16, #tpu.memory_space<vmem>>, %arg5: memref<1x512xf32, #tpu.memory_space<vmem>>, %arg6: memref<512x128xbf16, #tpu.memory_space<vmem>>, %arg7: memref<1x128xf32, #tpu.memory_space<vmem>>, %arg8: memref<128x512xbf16, #tpu.memory_space<vmem>>, %arg9: memref<1x512xf32, #tpu.memory_space<vmem>>, %arg10: memref<512x1024xbf16, #tpu.memory_space<vmem>>, %arg11: memref<1x1024xf32, #tpu.memory_space<vmem>>, %arg12: memref<1024x256xbf16, #tpu.memory_space<vmem>>, %arg13: memref<1x256xf32, #tpu.memory_space<vmem>>, %arg14: memref<16x256xf32, #tpu.memory_space<vmem>>) attributes {dimension_semantics = [#tpu.dimension_semantics<parallel>], iteration_bounds = array<i64: 1>, scalar_prefetch = 0 : i64, scratch_operands = 0 : i64, tpu.core_type = #tpu.core_type<tc>, window_params = [{transform_indices = @transform_0, window_bounds = array<i64: 16, 256>}, {pipeline_mode = #tpu.pipeline_mode<synchronous>, transform_indices = @transform_1, window_bounds = array<i64: 256, 1024>}, {pipeline_mode = #tpu.pipeline_mode<synchronous>, transform_indices = @transform_2, window_bounds = array<i64: 1, 1024>}, {pipeline_mode = #tpu.pipeline_mode<synchronous>, transform_indices = @transform_3, window_bounds = array<i64: 1024, 512>}, {pipeline_mode = #tpu.pipeline_mode<synchronous>, transform_indices = @transform_4, window_bounds = array<i64: 1, 512>}, {pipeline_mode = #tpu.pipeline_mode<synchronous>, transform_indices = @transform_5, window_bounds = array<i64: 512, 128>}, {pipeline_mode = #tpu.pipeline_mode<synchronous>, transform_indices = @transform_6, window_bounds = array<i64: 1, 128>}, {pipeline_mode = #tpu.pipeline_mode<synchronous>, transform_indices = @transform_7, window_bounds = array<i64: 128, 512>}, {pipeline_mode = #tpu.pipeline_mode<synchronous>, transform_indices = @transform_8, window_bounds = array<i64: 1, 512>}, {pipeline_mode = #tpu.pipeline_mode<synchronous>, transform_indices = @transform_9, window_bounds = array<i64: 512, 1024>}, {pipeline_mode = #tpu.pipeline_mode<synchronous>, transform_indices = @transform_10, window_bounds = array<i64: 1, 1024>}, {pipeline_mode = #tpu.pipeline_mode<synchronous>, transform_indices = @transform_11, window_bounds = array<i64: 1024, 256>}, {pipeline_mode = #tpu.pipeline_mode<synchronous>, transform_indices = @transform_12, window_bounds = array<i64: 1, 256>}, {transform_indices = @transform_13, window_bounds = array<i64: 16, 256>}]} {
    %c0 = arith.constant 0 : index
    %c0_0 = arith.constant 0 : index
    %0 = vector.load %arg1[%c0, %c0_0] : memref<16x256xbf16, #tpu.memory_space<vmem>>, vector<16x256xbf16>
    %c0_1 = arith.constant 0 : index
    %c0_2 = arith.constant 0 : index
    %1 = vector.load %arg2[%c0_1, %c0_2] : memref<256x1024xbf16, #tpu.memory_space<vmem>>, vector<256x1024xbf16>
    %cst = arith.constant dense<0.000000e+00> : vector<16x1024xf32>
    %2 = tpu.matmul %0, %1, %cst {dimension_numbers = #tpu.dot_dimension_numbers<[1], [0], [0], [1], [0, 0, 1, 1], [], []>} : vector<16x256xbf16>, vector<256x1024xbf16>, vector<16x1024xf32> -> vector<16x1024xf32>
    %c0_3 = arith.constant 0 : index
    %c0_4 = arith.constant 0 : index
    %3 = vector.load %arg3[%c0_3, %c0_4] : memref<1x1024xf32, #tpu.memory_space<vmem>>, vector<1x1024xf32>
    %4 = vector.broadcast %3 : vector<1x1024xf32> to vector<16x1024xf32>
    %5 = arith.addf %2, %4 : vector<16x1024xf32>
    %cst_5 = arith.constant 0.000000e+00 : f32
    %6 = vector.broadcast %cst_5 : f32 to vector<16x1024xf32>
    %7 = arith.maximumf %5, %6 : vector<16x1024xf32>
    %8 = arith.truncf %7 : vector<16x1024xf32> to vector<16x1024xbf16>
    %c0_6 = arith.constant 0 : index
    %c0_7 = arith.constant 0 : index
    %9 = vector.load %arg4[%c0_6, %c0_7] : memref<1024x512xbf16, #tpu.memory_space<vmem>>, vector<1024x512xbf16>
    %cst_8 = arith.constant dense<0.000000e+00> : vector<16x512xf32>
    %10 = tpu.matmul %8, %9, %cst_8 {dimension_numbers = #tpu.dot_dimension_numbers<[1], [0], [0], [1], [0, 0, 1, 1], [], []>} : vector<16x1024xbf16>, vector<1024x512xbf16>, vector<16x512xf32> -> vector<16x512xf32>
    %c0_9 = arith.constant 0 : index
    %c0_10 = arith.constant 0 : index
    %11 = vector.load %arg5[%c0_9, %c0_10] : memref<1x512xf32, #tpu.memory_space<vmem>>, vector<1x512xf32>
    %12 = vector.broadcast %11 : vector<1x512xf32> to vector<16x512xf32>
    %13 = arith.addf %10, %12 : vector<16x512xf32>
    %cst_11 = arith.constant 0.000000e+00 : f32
    %14 = vector.broadcast %cst_11 : f32 to vector<16x512xf32>
    %15 = arith.maximumf %13, %14 : vector<16x512xf32>
    %16 = arith.truncf %15 : vector<16x512xf32> to vector<16x512xbf16>
    %c0_12 = arith.constant 0 : index
    %c0_13 = arith.constant 0 : index
    %17 = vector.load %arg6[%c0_12, %c0_13] : memref<512x128xbf16, #tpu.memory_space<vmem>>, vector<512x128xbf16>
    %cst_14 = arith.constant dense<0.000000e+00> : vector<16x128xf32>
    %18 = tpu.matmul %16, %17, %cst_14 {dimension_numbers = #tpu.dot_dimension_numbers<[1], [0], [0], [1], [0, 0, 1, 1], [], []>} : vector<16x512xbf16>, vector<512x128xbf16>, vector<16x128xf32> -> vector<16x128xf32>
    %c0_15 = arith.constant 0 : index
    %c0_16 = arith.constant 0 : index
    %19 = vector.load %arg7[%c0_15, %c0_16] : memref<1x128xf32, #tpu.memory_space<vmem>>, vector<1x128xf32>
    %20 = vector.broadcast %19 : vector<1x128xf32> to vector<16x128xf32>
    %21 = arith.addf %18, %20 : vector<16x128xf32>
    %22 = arith.truncf %21 : vector<16x128xf32> to vector<16x128xbf16>
    %c0_17 = arith.constant 0 : index
    %c0_18 = arith.constant 0 : index
    %23 = vector.load %arg8[%c0_17, %c0_18] : memref<128x512xbf16, #tpu.memory_space<vmem>>, vector<128x512xbf16>
    %cst_19 = arith.constant dense<0.000000e+00> : vector<16x512xf32>
    %24 = tpu.matmul %22, %23, %cst_19 {dimension_numbers = #tpu.dot_dimension_numbers<[1], [0], [0], [1], [0, 0, 1, 1], [], []>} : vector<16x128xbf16>, vector<128x512xbf16>, vector<16x512xf32> -> vector<16x512xf32>
    %c0_20 = arith.constant 0 : index
    %c0_21 = arith.constant 0 : index
    %25 = vector.load %arg9[%c0_20, %c0_21] : memref<1x512xf32, #tpu.memory_space<vmem>>, vector<1x512xf32>
    %26 = vector.broadcast %25 : vector<1x512xf32> to vector<16x512xf32>
    %27 = arith.addf %24, %26 : vector<16x512xf32>
    %cst_22 = arith.constant 0.000000e+00 : f32
    %28 = vector.broadcast %cst_22 : f32 to vector<16x512xf32>
    %29 = arith.maximumf %27, %28 : vector<16x512xf32>
    %30 = arith.truncf %29 : vector<16x512xf32> to vector<16x512xbf16>
    %c0_23 = arith.constant 0 : index
    %c0_24 = arith.constant 0 : index
    %31 = vector.load %arg10[%c0_23, %c0_24] : memref<512x1024xbf16, #tpu.memory_space<vmem>>, vector<512x1024xbf16>
    %cst_25 = arith.constant dense<0.000000e+00> : vector<16x1024xf32>
    %32 = tpu.matmul %30, %31, %cst_25 {dimension_numbers = #tpu.dot_dimension_numbers<[1], [0], [0], [1], [0, 0, 1, 1], [], []>} : vector<16x512xbf16>, vector<512x1024xbf16>, vector<16x1024xf32> -> vector<16x1024xf32>
    %c0_26 = arith.constant 0 : index
    %c0_27 = arith.constant 0 : index
    %33 = vector.load %arg11[%c0_26, %c0_27] : memref<1x1024xf32, #tpu.memory_space<vmem>>, vector<1x1024xf32>
    %34 = vector.broadcast %33 : vector<1x1024xf32> to vector<16x1024xf32>
    %35 = arith.addf %32, %34 : vector<16x1024xf32>
    %cst_28 = arith.constant 0.000000e+00 : f32
    %36 = vector.broadcast %cst_28 : f32 to vector<16x1024xf32>
    %37 = arith.maximumf %35, %36 : vector<16x1024xf32>
    %38 = arith.truncf %37 : vector<16x1024xf32> to vector<16x1024xbf16>
    %c0_29 = arith.constant 0 : index
    %c0_30 = arith.constant 0 : index
    %39 = vector.load %arg12[%c0_29, %c0_30] : memref<1024x256xbf16, #tpu.memory_space<vmem>>, vector<1024x256xbf16>
    %cst_31 = arith.constant dense<0.000000e+00> : vector<16x256xf32>
    %40 = tpu.matmul %38, %39, %cst_31 {dimension_numbers = #tpu.dot_dimension_numbers<[1], [0], [0], [1], [0, 0, 1, 1], [], []>} : vector<16x1024xbf16>, vector<1024x256xbf16>, vector<16x256xf32> -> vector<16x256xf32>
    %c0_32 = arith.constant 0 : index
    %c0_33 = arith.constant 0 : index
    %41 = vector.load %arg13[%c0_32, %c0_33] : memref<1x256xf32, #tpu.memory_space<vmem>>, vector<1x256xf32>
    %42 = vector.broadcast %41 : vector<1x256xf32> to vector<16x256xf32>
    %43 = arith.addf %40, %42 : vector<16x256xf32>
    %44 = arith.negf %43 : vector<16x256xf32>
    %45 = math.exp %44 : vector<16x256xf32>
    %cst_34 = arith.constant 1.000000e+00 : f32
    %46 = vector.broadcast %cst_34 : f32 to vector<16x256xf32>
    %47 = arith.addf %46, %45 : vector<16x256xf32>
    %48 = arith.divf %46, %47 : vector<16x256xf32>
    %c0_35 = arith.constant 0 : index
    %c0_36 = arith.constant 0 : index
    %49 = vector.load %arg14[%c0_35, %c0_36] : memref<16x256xf32, #tpu.memory_space<vmem>>, vector<16x256xf32>
    tpu.vector_store %arg14[%c0_35, %c0_36], %48 {strides = array<i32>} : memref<16x256xf32, #tpu.memory_space<vmem>>, vector<16x256xf32>,
    return
  }
  func.func @transform_0(%arg0: i32) -> (i32, i32) {
    %c0_i32 = arith.constant 0 : i32
    %c0_i32_0 = arith.constant 0 : i32
    return %arg0, %c0_i32 : i32, i32
  }
  func.func @transform_1(%arg0: i32) -> (i32, i32) {
    %c0_i32 = arith.constant 0 : i32
    %c0_i32_0 = arith.constant 0 : i32
    %c0_i32_1 = arith.constant 0 : i32
    return %c0_i32, %c0_i32_0 : i32, i32
  }
  func.func @transform_2(%arg0: i32) -> (i32, i32) {
    %c0_i32 = arith.constant 0 : i32
    %c0_i32_0 = arith.constant 0 : i32
    %c0_i32_1 = arith.constant 0 : i32
    return %c0_i32, %c0_i32_0 : i32, i32
  }
  func.func @transform_3(%arg0: i32) -> (i32, i32) {
    %c0_i32 = arith.constant 0 : i32
    %c0_i32_0 = arith.constant 0 : i32
    %c0_i32_1 = arith.constant 0 : i32
    return %c0_i32, %c0_i32_0 : i32, i32
  }
  func.func @transform_4(%arg0: i32) -> (i32, i32) {
    %c0_i32 = arith.constant 0 : i32
    %c0_i32_0 = arith.constant 0 : i32
    %c0_i32_1 = arith.constant 0 : i32
    return %c0_i32, %c0_i32_0 : i32, i32
  }
  func.func @transform_5(%arg0: i32) -> (i32, i32) {
    %c0_i32 = arith.constant 0 : i32
    %c0_i32_0 = arith.constant 0 : i32
    %c0_i32_1 = arith.constant 0 : i32
    return %c0_i32, %c0_i32_0 : i32, i32
  }
  func.func @transform_6(%arg0: i32) -> (i32, i32) {
    %c0_i32 = arith.constant 0 : i32
    %c0_i32_0 = arith.constant 0 : i32
    %c0_i32_1 = arith.constant 0 : i32
    return %c0_i32, %c0_i32_0 : i32, i32
  }
  func.func @transform_7(%arg0: i32) -> (i32, i32) {
    %c0_i32 = arith.constant 0 : i32
    %c0_i32_0 = arith.constant 0 : i32
    %c0_i32_1 = arith.constant 0 : i32
    return %c0_i32, %c0_i32_0 : i32, i32
  }
  func.func @transform_8(%arg0: i32) -> (i32, i32) {
    %c0_i32 = arith.constant 0 : i32
    %c0_i32_0 = arith.constant 0 : i32
    %c0_i32_1 = arith.constant 0 : i32
    return %c0_i32, %c0_i32_0 : i32, i32
  }
  func.func @transform_9(%arg0: i32) -> (i32, i32) {
    %c0_i32 = arith.constant 0 : i32
    %c0_i32_0 = arith.constant 0 : i32
    %c0_i32_1 = arith.constant 0 : i32
    return %c0_i32, %c0_i32_0 : i32, i32
  }
  func.func @transform_10(%arg0: i32) -> (i32, i32) {
    %c0_i32 = arith.constant 0 : i32
    %c0_i32_0 = arith.constant 0 : i32
    %c0_i32_1 = arith.constant 0 : i32
    return %c0_i32, %c0_i32_0 : i32, i32
  }
  func.func @transform_11(%arg0: i32) -> (i32, i32) {
    %c0_i32 = arith.constant 0 : i32
    %c0_i32_0 = arith.constant 0 : i32
    %c0_i32_1 = arith.constant 0 : i32
    return %c0_i32, %c0_i32_0 : i32, i32
  }
  func.func @transform_12(%arg0: i32) -> (i32, i32) {
    %c0_i32 = arith.constant 0 : i32
    %c0_i32_0 = arith.constant 0 : i32
    %c0_i32_1 = arith.constant 0 : i32
    return %c0_i32, %c0_i32_0 : i32, i32
  }
  func.func @transform_13(%arg0: i32) -> (i32, i32) {
    %c0_i32 = arith.constant 0 : i32
    %c0_i32_0 = arith.constant 0 : i32
    return %arg0, %c0_i32 : i32, i32
  }
}

</mosaic_0001>

<bundles_post_ra>
// kernel: autoencoder_forward.1
= control target key start
LH: loop header
LB: loop body
LE: loop exit
PB: predicated region body
PF: predicated region fallthrough
CT: control target
= control target key end

     0   :  { %18 = vsyncpa [#allocation3], 0  ;;  %s11660_s0 = inlined_call_operand.vmem [shape: bf16[16,256], index: 0, kind: input, shape index: {}]   ;;  %s11661_s1 = inlined_call_operand.hbm [shape: bf16[256,1024], index: 1, kind: input, shape index: {}]   ;;  %s11662_s2 = inlined_call_operand.vmem [shape: f32[1,1024], index: 2, kind: input, shape index: {}]   ;;  %s11663_s3 = inlined_call_operand.hbm [shape: bf16[1024,512], index: 3, kind: input, shape index: {}]   ;;  %s11664_s4 = inlined_call_operand.vmem [shape: f32[1,512], index: 4, kind: input, shape index: {}]   ;;  %s11665_s5 = inlined_call_operand.hbm [shape: bf16[512,128], index: 5, kind: input, shape index: {}]   ;;  %s11666_s6 = inlined_call_operand.vmem [shape: f32[1,128], index: 6, kind: input, shape index: {}]   ;;  %s11667_s7 = inlined_call_operand.hbm [shape: bf16[128,512], index: 7, kind: input, shape index: {}]   ;;  %s11668_s8 = inlined_call_operand.vmem [shape: f32[1,512], index: 8, kind: input, shape index: {}]   ;;  %s11669_s9 = inlined_call_operand.hbm [shape: bf16[512,1024], index: 9, kind: input, shape index: {}]   ;;  %s11670_s10 = inlined_call_operand.vmem [shape: f32[1,1024], index: 10, kind: input, shape index: {}]   ;;  %s11671_s11 = inlined_call_operand.hbm [shape: bf16[1024,256], index: 11, kind: input, shape index: {}]   ;;  %s11672_s12 = inlined_call_operand.vmem [shape: f32[1,256], index: 12, kind: input, shape index: {}]   ;;  %s11673_s13 = inlined_call_operand.vmem [shape: f32[16,256], index: 13, kind: output, shape index: {}]  }
   0x1   :  { %19 = vsyncpa [#allocation5], 0 }
   0x2   :  { %20 = vsyncpa [#allocation8], 0  ;;  %s43_s27 = sshll.u32 %s11663_s3, 4  ;;  %s44_s27 = int_to_ptr.hbm [resolvable:$true] %s43_s27 }
   0x3   :  { %21 = vsyncpa [#allocation11], 0  ;;  %s11247_s28 = smov [#allocation4]   ;;  %s73_s15 = sshll.u32 %s11667_s7, 4  ;;  %s74_s15 = int_to_ptr.hbm [resolvable:$true] %s73_s15 }
   0x4   :  { %s45_s29 = sshll.u32 %s11247_s28, 4  ;;  %s11248_s16 = smov 256   ;;  %s46_s29 = int_to_ptr.vmem [resolvable:$true] %s45_s29 }
   0x5   :  { %s11249_s17 = smov 16   ;;  %s11250_s18 = smov [#allocation7]  }
   0x6   :  { %51 = dma.hbm_to_vmem [thread:$0]  %s44_s27, 32768, %s46_s29, [#allocation5], %s11248_s16, %s11248_s16, %s11249_s17  }
   0x7   :  { %s75_s19 = sshll.u32 %s11250_s18, 4  ;;  %s28_s22 = sshll.u32 %s11661_s1, 4  ;;  %s76_s19 = int_to_ptr.vmem [resolvable:$true] %s75_s19  ;;  %s29_s22 = int_to_ptr.hbm [resolvable:$true] %s28_s22 }
   0x8   :  { %81 = dma.hbm_to_vmem [thread:$0]  %s74_s15, 4096, %s76_s19, [#allocation8], %s11248_s16, %s11248_s16, %s11249_s17  }
   0x9   :  { %s11251_s3 = smov [#allocation2]   ;;  %s58_s7 = sshll.u32 %s11665_s5, 4  ;;  %s59_s7 = int_to_ptr.hbm [resolvable:$true] %s58_s7 }
   0xa   :  { %s30_s23 = sshll.u32 %s11251_s3, 4  ;;  %s11252_s26 = smov 512   ;;  %s31_s23 = int_to_ptr.vmem [resolvable:$true] %s30_s23 }
   0xb   :  { %s11253_s28 = smov 32   ;;  %s11254_s27 = smov [#allocation6]  }
   0xc   :  { %36 = dma.hbm_to_vmem [thread:$0]  %s29_s22, 16384, %s31_s23, [#allocation3], %s11252_s26, %s11252_s26, %s11253_s28  }
   0xd   :  { %s60_s29 = sshll.u32 %s11254_s27, 4  ;;  %s11255_s30 = smov 64   ;;  %s61_s29 = int_to_ptr.vmem [resolvable:$true] %s60_s29 }
   0xe   :  { %s11256_s14 = smov 4   ;;  %s88_s15 = sshll.u32 %s11669_s9, 4  ;;  %s89_s15 = int_to_ptr.hbm [resolvable:$true] %s88_s15 }
   0xf   :  { %66 = dma.hbm_to_vmem [thread:$0]  %s59_s7, 4096, %s61_s29, [#allocation5], %s11255_s30, %s11255_s30, %s11256_s14  }
  0x10   :  { %s11257_s16 = smov [#allocation9]   ;;  %s103_s20 = sshll.u32 %s11671_s11, 4  ;;  %s104_s20 = int_to_ptr.hbm [resolvable:$true] %s103_s20 }
  0x11   :  { %s90_s17 = sshll.u32 %s11257_s16, 4  ;;  %s11258_s21 = smov [#allocation10]   ;;  %s91_s17 = int_to_ptr.vmem [resolvable:$true] %s90_s17 }
  0x12   :  { %96 = dma.hbm_to_vmem [thread:$0]  %s89_s15, 32768, %s91_s17, [#allocation8], %s11252_s26, %s11252_s26, %s11253_s28  }
  0x13   :  { %s105_s22 = sshll.u32 %s11258_s21, 4  ;;  %s11259_s3 = smov 128   ;;  %s106_s22 = int_to_ptr.vmem [resolvable:$true] %s105_s22 }
  0x14   :  { %s11260_s23 = smov 8  }
  0x15   :  { %111 = dma.hbm_to_vmem [thread:$0]  %s104_s20, 16384, %s106_s22, [#allocation11], %s11259_s3, %s11259_s3, %s11260_s23  }
  0x16   :  { %11239 = dma.done.wait [#allocation3], 16384  }
  0x17   :  { %11240 = vsyncadd [#allocation3], 4294950912 }
  0x18   :  { %11241 = dma.done.wait [#allocation5], 36864  }
  0x19   :  { %11242 = vsyncadd [#allocation5], 4294930432 }
  0x1a   :  { %11243 = dma.done.wait [#allocation8], 36864  }
  0x1b   :  { %11244 = vsyncadd [#allocation8], 4294930432 }
  0x1c   :  { %11245 = dma.done.wait [#allocation11], 16384  }
  0x1d   :  { %11246 = vsyncadd [#allocation11], 4294950912  ;;  %v7123_v0 = vld [vmem:[#allocation2 + $0x1c0] sm:$0xf]  ;;  %v10287_v5 = vld [vmem:[#allocation2 + $0x1c4] sm:$0xf] }
  0x1e   :  { %v10291_v1 = vld [vmem:[#allocation2 + $0x1dc] sm:$0xf0]  ;;  %v7125_v6 = vld [vmem:[#allocation2 + $0x1e0] sm:$0xf0] }
  0x1f   :  { %v7379_v2 = vld [vmem:[#allocation2 + $0x3c0] sm:$0xf]  ;;  %v7124_v3 = vor.u32 %v10291_v1, %v7123_v0  ;;  %v7128_v8 = vor.u32 %v10287_v5, %v7125_v6  ;;  %v10351_v9 = vld [vmem:[#allocation2 + $0x3c4] sm:$0xf] }
  0x20   :  { %v10355_v4 = vld [vmem:[#allocation2 + $0x3dc] sm:$0xf0]  ;;  %v7381_v10 = vld [vmem:[#allocation2 + $0x3e0] sm:$0xf0] }
  0x21   :  { %v7380_v7 = vor.u32 %v10355_v4, %v7379_v2  ;;  %v7091_v11 = vld [vmem:[#allocation2 + $0x180] sm:$0xf]  ;;  %936 = vmatpush.bf16.msra.mxu0 %v7124_v3  ;;  %v7384_v12 = vor.u32 %v10351_v9, %v7381_v10  ;;  %964 = vmatpush.bf16.msra.mxu2 %v7128_v8  ;;  %v10279_v18 = vld [vmem:[#allocation2 + $0x184] sm:$0xf] }
  0x22   :  { %v10283_v13 = vld [vmem:[#allocation2 + $0x19c] sm:$0xf0]  ;;  %v7093_v19 = vld [vmem:[#allocation2 + $0x1a0] sm:$0xf0] }
  0x23   :  { %v7347_v14 = vld [vmem:[#allocation2 + $0x380] sm:$0xf]  ;;  %950 = vmatpush.bf16.msra.mxu1 %v7380_v7  ;;  %v7092_v16 = vor.u32 %v10283_v13, %v7091_v11  ;;  %v10343_v20 = vld [vmem:[#allocation2 + $0x384] sm:$0xf]  ;;  %978 = vmatpush.bf16.msra.mxu3 %v7384_v12  ;;  %v7096_v21 = vor.u32 %v10279_v18, %v7093_v19 }
  0x24   :  { %v10347_v15 = vld [vmem:[#allocation2 + $0x39c] sm:$0xf0]  ;;  %v7349_v22 = vld [vmem:[#allocation2 + $0x3a0] sm:$0xf0] }
  0x25   :  { %v7348_v17 = vor.u32 %v10347_v15, %v7347_v14  ;;  %v7059_v23 = vld [vmem:[#allocation2 + $0x140] sm:$0xf]  ;;  %v7352_v25 = vor.u32 %v10343_v20, %v7349_v22  ;;  %v10271_v28 = vld [vmem:[#allocation2 + $0x144] sm:$0xf]  ;;  %937 = vmatpush.bf16.msra.mxu0 %v7092_v16  ;;  %965 = vmatpush.bf16.msra.mxu2 %v7096_v21 }
  0x26   :  { %v10275_v24 = vld [vmem:[#allocation2 + $0x15c] sm:$0xf0]  ;;  %v7061_v30 = vld [vmem:[#allocation2 + $0x160] sm:$0xf0] }
  0x27   :  { %v7315_v26 = vld [vmem:[#allocation2 + $0x340] sm:$0xf]  ;;  %v7060_v29 = vor.u32 %v10275_v24, %v7059_v23  ;;  %v10335_v31 = vld [vmem:[#allocation2 + $0x344] sm:$0xf]  ;;  %951 = vmatpush.bf16.msra.mxu1 %v7348_v17  ;;  %v7064_v34 = vor.u32 %v10271_v28, %v7061_v30  ;;  %979 = vmatpush.bf16.msra.mxu3 %v7352_v25  ;;  %v7131_v28 = vld [vmem:[#allocation2 + $0x1c8] sm:$0xf] }
  0x28   :  { %v10339_v27 = vld [vmem:[#allocation2 + $0x35c] sm:$0xf0]  ;;  %v7317_v32 = vld [vmem:[#allocation2 + $0x360] sm:$0xf0]  ;;  %v7387_v30 = vld [vmem:[#allocation2 + $0x3c8] sm:$0xf] }
  0x29   :  { %v7316_v33 = vor.u32 %v10339_v27, %v7315_v26  ;;  %v7027_v35 = vld [vmem:[#allocation2 + $0x100] sm:$0xf]  ;;  %v7320_v38 = vor.u32 %v10335_v31, %v7317_v32  ;;  %v10263_v40 = vld [vmem:[#allocation2 + $0x104] sm:$0xf]  ;;  %938 = vmatpush.bf16.msra.mxu0 %v7060_v29  ;;  %966 = vmatpush.bf16.msra.mxu2 %v7064_v34  ;;  %v10292_v29 = vld [vmem:[#allocation2 + $0x1e4] sm:$0xf0] }
  0x2a   :  { %v10267_v36 = vld [vmem:[#allocation2 + $0x11c] sm:$0xf0]  ;;  %v7029_v41 = vld [vmem:[#allocation2 + $0x120] sm:$0xf0]  ;;  %v10356_v32 = vld [vmem:[#allocation2 + $0x3e4] sm:$0xf0] }
  0x2b   :  { %v7283_v37 = vld [vmem:[#allocation2 + $0x300] sm:$0xf]  ;;  %v10327_v42 = vld [vmem:[#allocation2 + $0x304] sm:$0xf]  ;;  %v7028_v44 = vor.u32 %v10267_v36, %v7027_v35  ;;  %952 = vmatpush.bf16.msra.mxu1 %v7316_v33  ;;  %v7032_v46 = vor.u32 %v10263_v40, %v7029_v41  ;;  %980 = vmatpush.bf16.msra.mxu3 %v7320_v38  ;;  %v10288_v33 = vld [vmem:[#allocation2 + $0x1cc] sm:$0xf]  ;;  %v7132_v40 = vor.u32 %v10292_v29, %v7131_v28 }
  0x2c   :  { %v10331_v39 = vld [vmem:[#allocation2 + $0x31c] sm:$0xf0]  ;;  %v7285_v43 = vld [vmem:[#allocation2 + $0x320] sm:$0xf0]  ;;  %v7133_v34 = vld [vmem:[#allocation2 + $0x1e8] sm:$0xf0] }
  0x2d   :  { %v7284_v45 = vor.u32 %v10331_v39, %v7283_v37  ;;  %v6995_v47 = vld [vmem:[#allocation2 + $0xc0] sm:$0xf]  ;;  %v7288_v50 = vor.u32 %v10327_v42, %v7285_v43  ;;  %v10255_v52 = vld [vmem:[#allocation2 + $0xc4] sm:$0xf]  ;;  %939 = vmatpush.bf16.msra.mxu0 %v7028_v44  ;;  %967 = vmatpush.bf16.msra.mxu2 %v7032_v46  ;;  %v10352_v37 = vld [vmem:[#allocation2 + $0x3cc] sm:$0xf]  ;;  %v7388_v43 = vor.u32 %v10356_v32, %v7387_v30 }
  0x2e   :  { %v10259_v48 = vld [vmem:[#allocation2 + $0xdc] sm:$0xf0]  ;;  %v6997_v53 = vld [vmem:[#allocation2 + $0xe0] sm:$0xf0]  ;;  %v7389_v38 = vld [vmem:[#allocation2 + $0x3e8] sm:$0xf0]  ;;  %v7136_v44 = vor.u32 %v10288_v33, %v7133_v34 }
  0x2f   :  { %v7251_v49 = vld [vmem:[#allocation2 + $0x2c0] sm:$0xf]  ;;  %v10319_v54 = vld [vmem:[#allocation2 + $0x2c4] sm:$0xf]  ;;  %v6996_v56 = vor.u32 %v10259_v48, %v6995_v47  ;;  %953 = vmatpush.bf16.msra.mxu1 %v7284_v45  ;;  %v7000_v58 = vor.u32 %v10255_v52, %v6997_v53  ;;  %981 = vmatpush.bf16.msra.mxu3 %v7288_v50  ;;  %v7099_v41 = vld [vmem:[#allocation2 + $0x188] sm:$0xf]  ;;  %v7392_v48 = vor.u32 %v10352_v37, %v7389_v38 }
  0x30   :  { %v10323_v51 = vld [vmem:[#allocation2 + $0x2dc] sm:$0xf0]  ;;  %v7253_v55 = vld [vmem:[#allocation2 + $0x2e0] sm:$0xf0]  ;;  %v10284_v42 = vld [vmem:[#allocation2 + $0x1a4] sm:$0xf0] }
  0x31   :  { %v7252_v57 = vor.u32 %v10323_v51, %v7251_v49  ;;  %v6963_v59 = vld [vmem:[#allocation2 + $0x80] sm:$0xf]  ;;  %v7256_v62 = vor.u32 %v10319_v54, %v7253_v55  ;;  %v10247_v0 = vld [vmem:[#allocation2 + $0x84] sm:$0xf]  ;;  %940 = vmatpush.bf16.msra.mxu0 %v6996_v56  ;;  %968 = vmatpush.bf16.msra.mxu2 %v7000_v58  ;;  %v7355_v45 = vld [vmem:[#allocation2 + $0x388] sm:$0xf]  ;;  %v7100_v55 = vor.u32 %v10284_v42, %v7099_v41 }
  0x32   :  { %v10251_v60 = vld [vmem:[#allocation2 + $0x9c] sm:$0xf0]  ;;  %v6965_v1 = vld [vmem:[#allocation2 + $0xa0] sm:$0xf0]  ;;  %v10348_v46 = vld [vmem:[#allocation2 + $0x3a4] sm:$0xf0] }
  0x33   :  { %v7219_v61 = vld [vmem:[#allocation2 + $0x280] sm:$0xf]  ;;  %v10311_v2 = vld [vmem:[#allocation2 + $0x284] sm:$0xf]  ;;  %v6964_v4 = vor.u32 %v10251_v60, %v6963_v59  ;;  %954 = vmatpush.bf16.msra.mxu1 %v7252_v57  ;;  %v6968_v6 = vor.u32 %v10247_v0, %v6965_v1  ;;  %982 = vmatpush.bf16.msra.mxu3 %v7256_v62  ;;  %v10280_v47 = vld [vmem:[#allocation2 + $0x18c] sm:$0xf]  ;;  %v7356_v58 = vor.u32 %v10348_v46, %v7355_v45 }
  0x34   :  { %v10315_v63 = vld [vmem:[#allocation2 + $0x29c] sm:$0xf0]  ;;  %v7221_v3 = vld [vmem:[#allocation2 + $0x2a0] sm:$0xf0]  ;;  %v7101_v49 = vld [vmem:[#allocation2 + $0x1a8] sm:$0xf0] }
  0x35   :  { %v7220_v5 = vor.u32 %v10315_v63, %v7219_v61  ;;  %v6931_v7 = vld [vmem:[#allocation2 + $0x40] sm:$0xf]  ;;  %v7224_v10 = vor.u32 %v10311_v2, %v7221_v3  ;;  %v10239_v12 = vld [vmem:[#allocation2 + $0x44] sm:$0xf]  ;;  %941 = vmatpush.bf16.msra.mxu0 %v6964_v4  ;;  %969 = vmatpush.bf16.msra.mxu2 %v6968_v6  ;;  %v10344_v50 = vld [vmem:[#allocation2 + $0x38c] sm:$0xf]  ;;  %v7104_v59 = vor.u32 %v10280_v47, %v7101_v49 }
  0x36   :  { %v10243_v8 = vld [vmem:[#allocation2 + $0x5c] sm:$0xf0]  ;;  %v6933_v13 = vld [vmem:[#allocation2 + $0x60] sm:$0xf0]  ;;  %v7357_v51 = vld [vmem:[#allocation2 + $0x3a8] sm:$0xf0] }
  0x37   :  { %v7187_v9 = vld [vmem:[#allocation2 + $0x240] sm:$0xf]  ;;  %v10303_v14 = vld [vmem:[#allocation2 + $0x244] sm:$0xf]  ;;  %v6932_v16 = vor.u32 %v10243_v8, %v6931_v7  ;;  %955 = vmatpush.bf16.msra.mxu1 %v7220_v5  ;;  %v6936_v20 = vor.u32 %v10239_v12, %v6933_v13  ;;  %983 = vmatpush.bf16.msra.mxu3 %v7224_v10  ;;  %v10230_v53 = vld [vmem:[%s11660_s0 + $0x4] sm:$0xf0]  ;;  %v7360_v0 = vor.u32 %v10344_v50, %v7357_v51 }
  0x38   :  { %v10307_v11 = vld [vmem:[#allocation2 + $0x25c] sm:$0xf0]  ;;  %v7189_v15 = vld [vmem:[#allocation2 + $0x260] sm:$0xf0]  ;;  %v6893_v57 = vld [vmem:[%s11660_s0 + $0x8] sm:$0xf0] }
  0x39   :  { %v6899_v17 = vld [vmem:[#allocation2] sm:$0xf]  ;;  %v7188_v19 = vor.u32 %v10307_v11, %v7187_v9  ;;  %v10231_v23 = vld [vmem:[#allocation2 + $0x4] sm:$0xf]  ;;  %v7192_v24 = vor.u32 %v10303_v14, %v7189_v15  ;;  %942 = vmatpush.bf16.msra.mxu0 %v6932_v16  ;;  %970 = vmatpush.bf16.msra.mxu2 %v6936_v20  ;;  %v7067_v60 = vld [vmem:[#allocation2 + $0x148] sm:$0xf] }
  0x3a   :  { %v10235_v18 = vld [vmem:[#allocation2 + $0x1c] sm:$0xf0]  ;;  %v6901_v25 = vld [vmem:[#allocation2 + $0x20] sm:$0xf0]  ;;  %v10276_v61 = vld [vmem:[#allocation2 + $0x164] sm:$0xf0] }
  0x3b   :  { %v7155_v21 = vld [vmem:[#allocation2 + $0x200] sm:$0xf]  ;;  %v10295_v26 = vld [vmem:[#allocation2 + $0x204] sm:$0xf]  ;;  %v6900_v31 = vor.u32 %v10235_v18, %v6899_v17  ;;  %956 = vmatpush.bf16.msra.mxu1 %v7188_v19  ;;  %v6904_v36 = vor.u32 %v10231_v23, %v6901_v25  ;;  %984 = vmatpush.bf16.msra.mxu3 %v7192_v24  ;;  %v7323_v62 = vld [vmem:[#allocation2 + $0x348] sm:$0xf]  ;;  %v7068_v6 = vor.u32 %v10276_v61, %v7067_v60 }
  0x3c   :  { %v10299_v22 = vld [vmem:[#allocation2 + $0x21c] sm:$0xf0]  ;;  %v7157_v27 = vld [vmem:[#allocation2 + $0x220] sm:$0xf0]  ;;  %v10340_v1 = vld [vmem:[#allocation2 + $0x364] sm:$0xf0] }
  0x3d   :  { %v7156_v35 = vor.u32 %v10299_v22, %v7155_v21  ;;  %v7160_v39 = vor.u32 %v10295_v26, %v7157_v27  ;;  %943 = vmatpush.bf16.msra.mxu0 %v6900_v31  ;;  %971 = vmatpush.bf16.msra.mxu2 %v6904_v36  ;;  %v6891_v52 = vld [vmem:[%s11660_s0] sm:$0xf]  ;;  %v10229_v54 = vld [vmem:[%s11660_s0 + $0x4] sm:$0xf]  ;;  %v10272_v2 = vld [vmem:[#allocation2 + $0x14c] sm:$0xf]  ;;  %v7324_v7 = vor.u32 %v10340_v1, %v7323_v62 }
  0x3e   :  { %v11358_v56 = vor.u32 %v10230_v53, %v6891_v52  ;;  %v11363_v63 = vor.u32 %v10229_v54, %v6893_v57  ;;  %v7069_v3 = vld [vmem:[#allocation2 + $0x168] sm:$0xf0]  ;;  %v7035_v9 = vld [vmem:[#allocation2 + $0x108] sm:$0xf] }
  0x3f   :  { %957 = vmatpush.bf16.msra.mxu1 %v7156_v35  ;;  %985 = vmatpush.bf16.msra.mxu3 %v7160_v39  ;;  %v10336_v4 = vld [vmem:[#allocation2 + $0x34c] sm:$0xf]  ;;  %v7072_v8 = vor.u32 %v10272_v2, %v7069_v3  ;;  %v10268_v10 = vld [vmem:[#allocation2 + $0x124] sm:$0xf0] }
  0x40   :  { %972 = vmatmul.bf16.vlgmr.msra.gmra.mxu2 %v11358_v56  ;;  %v7325_v5 = vld [vmem:[#allocation2 + $0x368] sm:$0xf0]  ;;  %944 = vmatmul.bf16.vlgmr.msra.gmra.mxu0 %v11358_v56  ;;  %v7291_v11 = vld [vmem:[#allocation2 + $0x308] sm:$0xf]  ;;  %v7036_v18 = vor.u32 %v10268_v10, %v7035_v9  ;;  %v10289_v9 = vld [vmem:[#allocation2 + $0x1d4] sm:$0xf] }
  0x41   :  { %992 = vmatpush.bf16.msrb.mxu0 %v7132_v40  ;;  %1020 = vmatpush.bf16.msrb.mxu2 %v7136_v44  ;;  %v7328_v12 = vor.u32 %v10336_v4, %v7325_v5  ;;  %v10332_v13 = vld [vmem:[#allocation2 + $0x324] sm:$0xf0]  ;;  %v10264_v14 = vld [vmem:[#allocation2 + $0x10c] sm:$0xf]  ;;  %v7139_v4 = vld [vmem:[#allocation2 + $0x1d0] sm:$0xf] }
  0x42   :  { %986 = vmatmul.bf16.vlgmr.msra.gmra.mxu3 %v11363_v63  ;;  %958 = vmatmul.bf16.vlgmr.msra.gmra.mxu1 %v11363_v63  ;;  %v7037_v15 = vld [vmem:[#allocation2 + $0x128] sm:$0xf0]  ;;  %v7292_v19 = vor.u32 %v10332_v13, %v7291_v11  ;;  %v7003_v21 = vld [vmem:[#allocation2 + $0xc8] sm:$0xf]  ;;  %v10293_v5 = vld [vmem:[#allocation2 + $0x1ec] sm:$0xf0] }
  0x43   :  { %1006 = vmatpush.bf16.msrb.mxu1 %v7388_v43  ;;  %1034 = vmatpush.bf16.msrb.mxu3 %v7392_v48  ;;  %v10328_v16 = vld [vmem:[#allocation2 + $0x30c] sm:$0xf]  ;;  %v7040_v20 = vor.u32 %v10264_v14, %v7037_v15  ;;  %v10260_v22 = vld [vmem:[#allocation2 + $0xe4] sm:$0xf0]  ;;  %v7141_v10 = vld [vmem:[#allocation2 + $0x1f0] sm:$0xf0] }
  0x44   :  { %v7293_v17 = vld [vmem:[#allocation2 + $0x328] sm:$0xf0]  ;;  %v7259_v23 = vld [vmem:[#allocation2 + $0x2c8] sm:$0xf]  ;;  %v7004_v30 = vor.u32 %v10260_v22, %v7003_v21  ;;  %v10353_v13 = vld [vmem:[#allocation2 + $0x3d4] sm:$0xf] }
  0x45   :  { %993 = vmatpush.bf16.msrb.mxu0 %v7100_v55  ;;  %1021 = vmatpush.bf16.msrb.mxu2 %v7104_v59  ;;  %v7296_v24 = vor.u32 %v10328_v16, %v7293_v17  ;;  %v10324_v25 = vld [vmem:[#allocation2 + $0x2e4] sm:$0xf0]  ;;  %v10256_v26 = vld [vmem:[#allocation2 + $0xcc] sm:$0xf]  ;;  %v7397_v14 = vld [vmem:[#allocation2 + $0x3f0] sm:$0xf0]  ;;  %v7140_v16 = vor.u32 %v10293_v5, %v7139_v4 }
  0x46   :  { %v7005_v27 = vld [vmem:[#allocation2 + $0xe8] sm:$0xf0]  ;;  %v7260_v31 = vor.u32 %v10324_v25, %v7259_v23  ;;  %v6971_v33 = vld [vmem:[#allocation2 + $0x88] sm:$0xf]  ;;  %v7363_v21 = vld [vmem:[#allocation2 + $0x390] sm:$0xf]  ;;  %v7400_v22 = vor.u32 %v10353_v13, %v7397_v14 }
  0x47   :  { %1007 = vmatpush.bf16.msrb.mxu1 %v7356_v58  ;;  %1035 = vmatpush.bf16.msrb.mxu3 %v7360_v0  ;;  %v10320_v28 = vld [vmem:[#allocation2 + $0x2cc] sm:$0xf]  ;;  %v7008_v32 = vor.u32 %v10256_v26, %v7005_v27  ;;  %v10252_v34 = vld [vmem:[#allocation2 + $0xa4] sm:$0xf0]  ;;  %v10349_v23 = vld [vmem:[#allocation2 + $0x3ac] sm:$0xf0] }
  0x48   :  { %v7261_v29 = vld [vmem:[#allocation2 + $0x2e8] sm:$0xf0]  ;;  %v7227_v35 = vld [vmem:[#allocation2 + $0x288] sm:$0xf]  ;;  %v6972_v42 = vor.u32 %v10252_v34, %v6971_v33  ;;  %v7109_v25 = vld [vmem:[#allocation2 + $0x1b0] sm:$0xf0] }
  0x49   :  { %994 = vmatpush.bf16.msrb.mxu0 %v7068_v6  ;;  %1022 = vmatpush.bf16.msrb.mxu2 %v7072_v8  ;;  %v7264_v36 = vor.u32 %v10320_v28, %v7261_v29  ;;  %v10316_v37 = vld [vmem:[#allocation2 + $0x2a4] sm:$0xf0]  ;;  %v10248_v38 = vld [vmem:[#allocation2 + $0x8c] sm:$0xf]  ;;  %v7395_v6 = vld [vmem:[#allocation2 + $0x3d0] sm:$0xf]  ;;  %v7364_v29 = vor.u32 %v10349_v23, %v7363_v21 }
  0x4a   :  { %v6973_v39 = vld [vmem:[#allocation2 + $0xa8] sm:$0xf0]  ;;  %v7228_v43 = vor.u32 %v10316_v37, %v7227_v35  ;;  %v6939_v45 = vld [vmem:[#allocation2 + $0x48] sm:$0xf]  ;;  %v10357_v8 = vld [vmem:[#allocation2 + $0x3ec] sm:$0xf0] }
  0x4b   :  { %1008 = vmatpush.bf16.msrb.mxu1 %v7324_v7  ;;  %1036 = vmatpush.bf16.msrb.mxu3 %v7328_v12  ;;  %v10312_v40 = vld [vmem:[#allocation2 + $0x28c] sm:$0xf]  ;;  %v6976_v44 = vor.u32 %v10248_v38, %v6973_v39  ;;  %v10244_v46 = vld [vmem:[#allocation2 + $0x64] sm:$0xf0]  ;;  %v7396_v17 = vor.u32 %v10357_v8, %v7395_v6  ;;  %v10345_v26 = vld [vmem:[#allocation2 + $0x394] sm:$0xf] }
  0x4c   :  { %v7229_v41 = vld [vmem:[#allocation2 + $0x2a8] sm:$0xf0]  ;;  %v7195_v47 = vld [vmem:[#allocation2 + $0x248] sm:$0xf]  ;;  %v6940_v54 = vor.u32 %v10244_v46, %v6939_v45  ;;  %v7365_v27 = vld [vmem:[#allocation2 + $0x3b0] sm:$0xf0] }
  0x4d   :  { %995 = vmatpush.bf16.msrb.mxu0 %v7036_v18  ;;  %1023 = vmatpush.bf16.msrb.mxu2 %v7040_v20  ;;  %v7232_v48 = vor.u32 %v10312_v40, %v7229_v41  ;;  %v10308_v49 = vld [vmem:[#allocation2 + $0x264] sm:$0xf0]  ;;  %v10240_v50 = vld [vmem:[#allocation2 + $0x4c] sm:$0xf]  ;;  %v7144_v18 = vor.u32 %v10289_v9, %v7141_v10  ;;  %v10285_v20 = vld [vmem:[#allocation2 + $0x1ac] sm:$0xf0]  ;;  %v7368_v34 = vor.u32 %v10345_v26, %v7365_v27 }
  0x4e   :  { %v6941_v51 = vld [vmem:[#allocation2 + $0x68] sm:$0xf0]  ;;  %v6907_v55 = vld [vmem:[#allocation2 + $0x8] sm:$0xf]  ;;  %v7196_v58 = vor.u32 %v10308_v49, %v7195_v47  ;;  %v7331_v33 = vld [vmem:[#allocation2 + $0x350] sm:$0xf] }
  0x4f   :  { %1009 = vmatpush.bf16.msrb.mxu1 %v7292_v19  ;;  %1037 = vmatpush.bf16.msrb.mxu3 %v7296_v24  ;;  %v10304_v52 = vld [vmem:[#allocation2 + $0x24c] sm:$0xf]  ;;  %v10236_v57 = vld [vmem:[#allocation2 + $0x24] sm:$0xf0]  ;;  %v6944_v59 = vor.u32 %v10240_v50, %v6941_v51  ;;  %v7107_v19 = vld [vmem:[#allocation2 + $0x190] sm:$0xf] }
  0x50   :  { %v7197_v53 = vld [vmem:[#allocation2 + $0x268] sm:$0xf0]  ;;  %v7163_v60 = vld [vmem:[#allocation2 + $0x208] sm:$0xf]  ;;  %v6908_v7 = vor.u32 %v10236_v57, %v6907_v55  ;;  %v10281_v24 = vld [vmem:[#allocation2 + $0x194] sm:$0xf]  ;;  %v7108_v28 = vor.u32 %v10285_v20, %v7107_v19 }
  0x51   :  { %996 = vmatpush.bf16.msrb.mxu0 %v7004_v30  ;;  %1024 = vmatpush.bf16.msrb.mxu2 %v7008_v32  ;;  %v10300_v61 = vld [vmem:[#allocation2 + $0x224] sm:$0xf0]  ;;  %v10232_v62 = vld [vmem:[#allocation2 + $0xc] sm:$0xf]  ;;  %v7200_v0 = vor.u32 %v10304_v52, %v7197_v53  ;;  %v7112_v30 = vor.u32 %v10281_v24, %v7109_v25  ;;  %v10277_v32 = vld [vmem:[#allocation2 + $0x16c] sm:$0xf0] }
  0x52   :  { %v6909_v1 = vld [vmem:[#allocation2 + $0x28] sm:$0xf0]  ;;  %v7164_v11 = vor.u32 %v10300_v61, %v7163_v60  ;;  %v10341_v35 = vld [vmem:[#allocation2 + $0x36c] sm:$0xf0]  ;;  %v7077_v37 = vld [vmem:[#allocation2 + $0x170] sm:$0xf0] }
  0x53   :  { %1010 = vmatpush.bf16.msrb.mxu1 %v7260_v31  ;;  %1038 = vmatpush.bf16.msrb.mxu3 %v7264_v36  ;;  %v10296_v2 = vld [vmem:[#allocation2 + $0x20c] sm:$0xf]  ;;  %v6912_v12 = vor.u32 %v10232_v62, %v6909_v1  ;;  %v7075_v31 = vld [vmem:[#allocation2 + $0x150] sm:$0xf]  ;;  %v10273_v36 = vld [vmem:[#allocation2 + $0x154] sm:$0xf]  ;;  %v7332_v41 = vor.u32 %v10341_v35, %v7331_v33 }
  0x54   :  { %v7165_v3 = vld [vmem:[#allocation2 + $0x228] sm:$0xf0]  ;;  %v10337_v38 = vld [vmem:[#allocation2 + $0x354] sm:$0xf]  ;;  %v7076_v40 = vor.u32 %v10277_v32, %v7075_v31  ;;  %v7299_v45 = vld [vmem:[#allocation2 + $0x310] sm:$0xf] }
  0x55   :  { %997 = vmatpush.bf16.msrb.mxu0 %v6972_v42  ;;  %1025 = vmatpush.bf16.msrb.mxu2 %v6976_v44  ;;  %v7168_v15 = vor.u32 %v10296_v2, %v7165_v3  ;;  %v7333_v39 = vld [vmem:[#allocation2 + $0x370] sm:$0xf0]  ;;  %v7080_v42 = vor.u32 %v10273_v36, %v7077_v37  ;;  %v10269_v44 = vld [vmem:[#allocation2 + $0x12c] sm:$0xf0] }
  0x56   :  { %v7336_v46 = vor.u32 %v10337_v38, %v7333_v39  ;;  %v10333_v47 = vld [vmem:[#allocation2 + $0x32c] sm:$0xf0]  ;;  %v7045_v49 = vld [vmem:[#allocation2 + $0x130] sm:$0xf0]  ;;  %v7147_v38 = vld [vmem:[#allocation2 + $0x1d8] sm:$0xf] }
  0x57   :  { %1011 = vmatpush.bf16.msrb.mxu1 %v7228_v43  ;;  %1039 = vmatpush.bf16.msrb.mxu3 %v7232_v48  ;;  %v7043_v43 = vld [vmem:[#allocation2 + $0x110] sm:$0xf]  ;;  %v10265_v48 = vld [vmem:[#allocation2 + $0x114] sm:$0xf]  ;;  %v7300_v53 = vor.u32 %v10333_v47, %v7299_v45  ;;  %v10294_v39 = vld [vmem:[#allocation2 + $0x1f4] sm:$0xf0] }
  0x58   :  { %v10329_v50 = vld [vmem:[#allocation2 + $0x314] sm:$0xf]  ;;  %v7044_v52 = vor.u32 %v10269_v44, %v7043_v43  ;;  %v7011_v55 = vld [vmem:[#allocation2 + $0xd0] sm:$0xf]  ;;  %v10290_v43 = vld [vmem:[#allocation2 + $0x1dc] sm:$0xf] }
  0x59   :  { %998 = vmatpush.bf16.msrb.mxu0 %v6940_v54  ;;  %1026 = vmatpush.bf16.msrb.mxu2 %v6944_v59  ;;  %v7301_v51 = vld [vmem:[#allocation2 + $0x330] sm:$0xf0]  ;;  %v7048_v54 = vor.u32 %v10265_v48, %v7045_v49  ;;  %v10261_v57 = vld [vmem:[#allocation2 + $0xec] sm:$0xf0]  ;;  %v7149_v44 = vld [vmem:[#allocation2 + $0x1f8] sm:$0xf0] }
  0x5a   :  { %v7304_v59 = vor.u32 %v10329_v50, %v7301_v51  ;;  %v10325_v60 = vld [vmem:[#allocation2 + $0x2ec] sm:$0xf0]  ;;  %v10257_v61 = vld [vmem:[#allocation2 + $0xd4] sm:$0xf]  ;;  %v7012_v2 = vor.u32 %v10261_v57, %v7011_v55  ;;  %v10354_v47 = vld [vmem:[#allocation2 + $0x3dc] sm:$0xf]  ;;  %v7148_v50 = vor.u32 %v10294_v39, %v7147_v38 }
  0x5b   :  { %1012 = vmatpush.bf16.msrb.mxu1 %v7196_v58  ;;  %1040 = vmatpush.bf16.msrb.mxu3 %v7200_v0  ;;  %v7267_v58 = vld [vmem:[#allocation2 + $0x2d0] sm:$0xf]  ;;  %v7013_v62 = vld [vmem:[#allocation2 + $0xf0] sm:$0xf0]  ;;  %v7405_v48 = vld [vmem:[#allocation2 + $0x3f8] sm:$0xf0] }
  0x5c   :  { %v10321_v0 = vld [vmem:[#allocation2 + $0x2d4] sm:$0xf]  ;;  %v7268_v3 = vor.u32 %v10325_v60, %v7267_v58  ;;  %v7016_v4 = vor.u32 %v10257_v61, %v7013_v62  ;;  %v6979_v5 = vld [vmem:[#allocation2 + $0x90] sm:$0xf]  ;;  %v7371_v55 = vld [vmem:[#allocation2 + $0x398] sm:$0xf]  ;;  %v7408_v57 = vor.u32 %v10354_v47, %v7405_v48 }
  0x5d   :  { %999 = vmatpush.bf16.msrb.mxu0 %v6908_v7  ;;  %1027 = vmatpush.bf16.msrb.mxu2 %v6912_v12  ;;  %v7269_v1 = vld [vmem:[#allocation2 + $0x2f0] sm:$0xf0]  ;;  %v10253_v6 = vld [vmem:[#allocation2 + $0xac] sm:$0xf0]  ;;  %v10350_v58 = vld [vmem:[#allocation2 + $0x3b4] sm:$0xf0] }
  0x5e   :  { %v7235_v7 = vld [vmem:[#allocation2 + $0x290] sm:$0xf]  ;;  %v7272_v8 = vor.u32 %v10321_v0, %v7269_v1  ;;  %v10249_v10 = vld [vmem:[#allocation2 + $0x94] sm:$0xf]  ;;  %v6980_v14 = vor.u32 %v10253_v6, %v6979_v5  ;;  %v7117_v60 = vld [vmem:[#allocation2 + $0x1b8] sm:$0xf0]  ;;  %v7372_v1 = vor.u32 %v10350_v58, %v7371_v55 }
  0x5f   :  { %1013 = vmatpush.bf16.msrb.mxu1 %v7164_v11  ;;  %1041 = vmatpush.bf16.msrb.mxu3 %v7168_v15  ;;  %v10317_v9 = vld [vmem:[#allocation2 + $0x2ac] sm:$0xf0]  ;;  %v6981_v11 = vld [vmem:[#allocation2 + $0xb0] sm:$0xf0]  ;;  %v10346_v61 = vld [vmem:[#allocation2 + $0x39c] sm:$0xf] }
  0x60   :  { %1000 = vmatmul.bf16.vlgmr.msrb.gmra.mxu0 %v11358_v56  ;;  %1028 = vmatmul.bf16.vlgmr.msrb.gmra.mxu2 %v11358_v56  ;;  %v10313_v12 = vld [vmem:[#allocation2 + $0x294] sm:$0xf]  ;;  %v7236_v15 = vor.u32 %v10317_v9, %v7235_v7  ;;  %v7203_v19 = vld [vmem:[#allocation2 + $0x250] sm:$0xf]  ;;  %v7373_v62 = vld [vmem:[#allocation2 + $0x3b8] sm:$0xf0] }
  0x61   :  { %1048 = vmatpush.bf16.msra.mxu0 %v7140_v16  ;;  %1076 = vmatpush.bf16.msra.mxu2 %v7144_v18  ;;  %v7237_v13 = vld [vmem:[#allocation2 + $0x2b0] sm:$0xf0]  ;;  %v6984_v16 = vor.u32 %v10249_v10, %v6981_v11  ;;  %v10245_v18 = vld [vmem:[#allocation2 + $0x6c] sm:$0xf0]  ;;  %v7339_v5 = vld [vmem:[#allocation2 + $0x358] sm:$0xf]  ;;  %v7376_v6 = vor.u32 %v10346_v61, %v7373_v62 }
  0x62   :  { %1014 = vmatmul.bf16.vlgmr.msrb.gmra.mxu1 %v11363_v63  ;;  %1042 = vmatmul.bf16.vlgmr.msrb.gmra.mxu3 %v11363_v63  ;;  %v7240_v20 = vor.u32 %v10313_v12, %v7237_v13  ;;  %v10309_v21 = vld [vmem:[#allocation2 + $0x26c] sm:$0xf0]  ;;  %v6949_v23 = vld [vmem:[#allocation2 + $0x70] sm:$0xf0]  ;;  %v10342_v7 = vld [vmem:[#allocation2 + $0x374] sm:$0xf0] }
  0x63   :  { %1062 = vmatpush.bf16.msra.mxu1 %v7396_v17  ;;  %1090 = vmatpush.bf16.msra.mxu3 %v7400_v22  ;;  %v6947_v17 = vld [vmem:[#allocation2 + $0x50] sm:$0xf]  ;;  %v10241_v22 = vld [vmem:[#allocation2 + $0x54] sm:$0xf]  ;;  %v7085_v9 = vld [vmem:[#allocation2 + $0x178] sm:$0xf0]  ;;  %v7340_v13 = vor.u32 %v10342_v7, %v7339_v5 }
  0x64   :  { %v10305_v24 = vld [vmem:[#allocation2 + $0x254] sm:$0xf]  ;;  %v6948_v26 = vor.u32 %v10245_v18, %v6947_v17  ;;  %v6915_v27 = vld [vmem:[#allocation2 + $0x10] sm:$0xf]  ;;  %v10338_v10 = vld [vmem:[#allocation2 + $0x35c] sm:$0xf] }
  0x65   :  { %1049 = vmatpush.bf16.msra.mxu0 %v7108_v28  ;;  %1077 = vmatpush.bf16.msra.mxu2 %v7112_v30  ;;  %v7205_v25 = vld [vmem:[#allocation2 + $0x270] sm:$0xf0]  ;;  %v10237_v28 = vld [vmem:[#allocation2 + $0x2c] sm:$0xf0]  ;;  %v6952_v30 = vor.u32 %v10241_v22, %v6949_v23  ;;  %v7341_v11 = vld [vmem:[#allocation2 + $0x378] sm:$0xf0] }
  0x66   :  { %v7171_v31 = vld [vmem:[#allocation2 + $0x210] sm:$0xf]  ;;  %v10233_v33 = vld [vmem:[#allocation2 + $0x14] sm:$0xf]  ;;  %v7307_v17 = vld [vmem:[#allocation2 + $0x318] sm:$0xf]  ;;  %v7344_v18 = vor.u32 %v10338_v10, %v7341_v11 }
  0x67   :  { %1063 = vmatpush.bf16.msra.mxu1 %v7364_v29  ;;  %1091 = vmatpush.bf16.msra.mxu3 %v7368_v34  ;;  %v7204_v29 = vor.u32 %v10309_v21, %v7203_v19  ;;  %v10301_v32 = vld [vmem:[#allocation2 + $0x22c] sm:$0xf0]  ;;  %v7208_v34 = vor.u32 %v10305_v24, %v7205_v25  ;;  %v6917_v35 = vld [vmem:[#allocation2 + $0x30] sm:$0xf0]  ;;  %v10334_v19 = vld [vmem:[#allocation2 + $0x334] sm:$0xf0] }
  0x68   :  { %v10297_v36 = vld [vmem:[#allocation2 + $0x214] sm:$0xf]  ;;  %v7172_v45 = vor.u32 %v10301_v32, %v7171_v31  ;;  %v7053_v21 = vld [vmem:[#allocation2 + $0x138] sm:$0xf0]  ;;  %v7308_v25 = vor.u32 %v10334_v19, %v7307_v17  ;;  %v10326_v31 = vld [vmem:[#allocation2 + $0x2f4] sm:$0xf0] }
  0x69   :  { %1050 = vmatpush.bf16.msra.mxu0 %v7076_v40  ;;  %1078 = vmatpush.bf16.msra.mxu2 %v7080_v42  ;;  %v7173_v37 = vld [vmem:[#allocation2 + $0x230] sm:$0xf0]  ;;  %v7403_v40 = vld [vmem:[#allocation2 + $0x3d8] sm:$0xf]  ;;  %v10330_v22 = vld [vmem:[#allocation2 + $0x31c] sm:$0xf] }
  0x6a   :  { %v10358_v42 = vld [vmem:[#allocation2 + $0x3f4] sm:$0xf0]  ;;  %v7176_v49 = vor.u32 %v10297_v36, %v7173_v37  ;;  %v7309_v23 = vld [vmem:[#allocation2 + $0x338] sm:$0xf0]  ;;  %v7523_v10 = vld [vmem:[#allocation4 + $0xe0] sm:$0xf] }
  0x6b   :  { %1064 = vmatpush.bf16.msra.mxu1 %v7332_v41  ;;  %1092 = vmatpush.bf16.msra.mxu3 %v7336_v46  ;;  %v6916_v41 = vor.u32 %v10237_v28, %v6915_v27  ;;  %v6920_v46 = vor.u32 %v10233_v33, %v6917_v35  ;;  %v7404_v51 = vor.u32 %v10358_v42, %v7403_v40  ;;  %v7019_v27 = vld [vmem:[#allocation2 + $0xd8] sm:$0xf]  ;;  %v10258_v32 = vld [vmem:[#allocation2 + $0xdc] sm:$0xf]  ;;  %v10389_v11 = vld [vmem:[#allocation4 + $0xec] sm:$0xf0] }
  0x6c   :  { %v10262_v28 = vld [vmem:[#allocation2 + $0xf4] sm:$0xf0]  ;;  %v7021_v33 = vld [vmem:[#allocation2 + $0xf8] sm:$0xf0]  ;;  %v7507_v19 = vld [vmem:[#allocation4 + $0xc0] sm:$0xf] }
  0x6d   :  { %1051 = vmatpush.bf16.msra.mxu0 %v7044_v52  ;;  %1079 = vmatpush.bf16.msra.mxu2 %v7048_v54  ;;  %v7152_v52 = vor.u32 %v10290_v43, %v7149_v44  ;;  %v10286_v54 = vld [vmem:[#allocation2 + $0x1b4] sm:$0xf0]  ;;  %v7277_v35 = vld [vmem:[#allocation2 + $0x2f8] sm:$0xf0]  ;;  %v7020_v36 = vor.u32 %v10262_v28, %v7019_v27  ;;  %v7024_v38 = vor.u32 %v10258_v32, %v7021_v33  ;;  %v7619_v28 = vld [vmem:[#allocation4 + $0x1a0] sm:$0xf] }
  0x6e   :  { %v6987_v39 = vld [vmem:[#allocation2 + $0x98] sm:$0xf]  ;;  %v10250_v44 = vld [vmem:[#allocation2 + $0x9c] sm:$0xf]  ;;  %v10377_v32 = vld [vmem:[#allocation4 + $0x8c] sm:$0xf0] }
  0x6f   :  { %1065 = vmatpush.bf16.msra.mxu1 %v7300_v53  ;;  %1093 = vmatpush.bf16.msra.mxu3 %v7304_v59  ;;  %v7115_v53 = vld [vmem:[#allocation2 + $0x198] sm:$0xf]  ;;  %v10282_v59 = vld [vmem:[#allocation2 + $0x19c] sm:$0xf] }
  0x70   :  { %v7116_v0 = vor.u32 %v10286_v54, %v7115_v53  ;;  %v10254_v40 = vld [vmem:[#allocation2 + $0xb4] sm:$0xf0]  ;;  %v7245_v47 = vld [vmem:[#allocation2 + $0x2b8] sm:$0xf0] }
  0x71   :  { %1052 = vmatpush.bf16.msra.mxu0 %v7012_v2  ;;  %1080 = vmatpush.bf16.msra.mxu2 %v7016_v4  ;;  %v7120_v2 = vor.u32 %v10282_v59, %v7117_v60  ;;  %v10278_v4 = vld [vmem:[#allocation2 + $0x174] sm:$0xf0]  ;;  %v6988_v48 = vor.u32 %v10254_v40, %v6987_v39  ;;  %v6957_v58 = vld [vmem:[#allocation2 + $0x78] sm:$0xf0]  ;;  %v7587_v40 = vld [vmem:[#allocation4 + $0x160] sm:$0xf] }
  0x72   :  { %v10318_v43 = vld [vmem:[#allocation2 + $0x2b4] sm:$0xf0]  ;;  %v10306_v59 = vld [vmem:[#allocation2 + $0x25c] sm:$0xf] }
  0x73   :  { %1066 = vmatpush.bf16.msra.mxu1 %v7268_v3  ;;  %1094 = vmatpush.bf16.msra.mxu3 %v7272_v8  ;;  %v7083_v3 = vld [vmem:[#allocation2 + $0x158] sm:$0xf]  ;;  %v10274_v8 = vld [vmem:[#allocation2 + $0x15c] sm:$0xf] }
  0x74   :  { %v7084_v12 = vor.u32 %v10278_v4, %v7083_v3  ;;  %v7211_v53 = vld [vmem:[#allocation2 + $0x258] sm:$0xf]  ;;  %v7213_v60 = vld [vmem:[#allocation2 + $0x278] sm:$0xf0] }
  0x75   :  { %1053 = vmatpush.bf16.msra.mxu0 %v6980_v14  ;;  %1081 = vmatpush.bf16.msra.mxu2 %v6984_v16  ;;  %v7088_v14 = vor.u32 %v10274_v8, %v7085_v9  ;;  %v10270_v16 = vld [vmem:[#allocation2 + $0x134] sm:$0xf0]  ;;  %v7216_v5 = vor.u32 %v10306_v59, %v7213_v60  ;;  %v6925_v7 = vld [vmem:[#allocation2 + $0x38] sm:$0xf0]  ;;  %v7555_v59 = vld [vmem:[#allocation4 + $0x120] sm:$0xf] }
  0x76   :  { %v10310_v55 = vld [vmem:[#allocation2 + $0x274] sm:$0xf0]  ;;  %v10298_v8 = vld [vmem:[#allocation2 + $0x21c] sm:$0xf]  ;;  %v10397_v60 = vld [vmem:[#allocation4 + $0x12c] sm:$0xf0] }
  0x77   :  { %1067 = vmatpush.bf16.msra.mxu1 %v7236_v15  ;;  %1095 = vmatpush.bf16.msra.mxu3 %v7240_v20  ;;  %v7051_v15 = vld [vmem:[#allocation2 + $0x118] sm:$0xf]  ;;  %v10266_v20 = vld [vmem:[#allocation2 + $0x11c] sm:$0xf] }
  0x78   :  { %v7052_v24 = vor.u32 %v10270_v16, %v7051_v15  ;;  %v6923_v62 = vld [vmem:[#allocation2 + $0x18] sm:$0xf]  ;;  %v7181_v9 = vld [vmem:[#allocation2 + $0x238] sm:$0xf0] }
  0x79   :  { %1054 = vmatpush.bf16.msra.mxu0 %v6948_v26  ;;  %1082 = vmatpush.bf16.msra.mxu2 %v6952_v30  ;;  %v7056_v26 = vor.u32 %v10266_v20, %v7053_v21  ;;  %v7312_v30 = vor.u32 %v10330_v22, %v7309_v23  ;;  %v7179_v3 = vld [vmem:[#allocation2 + $0x218] sm:$0xf]  ;;  %v7184_v17 = vor.u32 %v10298_v8, %v7181_v9  ;;  %v10385_v20 = vld [vmem:[#allocation4 + $0xcc] sm:$0xf0]  ;;  %v7635_v22 = vld [vmem:[#allocation4 + $0x1c0] sm:$0xf] }
  0x7a   :  { %v10302_v4 = vld [vmem:[#allocation2 + $0x234] sm:$0xf0]  ;;  %v10417_v23 = vld [vmem:[#allocation4 + $0x1cc] sm:$0xf0] }
  0x7b   :  { %1068 = vmatpush.bf16.msra.mxu1 %v7204_v29  ;;  %1096 = vmatpush.bf16.msra.mxu3 %v7208_v34  ;;  %v7275_v29 = vld [vmem:[#allocation2 + $0x2d8] sm:$0xf]  ;;  %v10322_v34 = vld [vmem:[#allocation2 + $0x2dc] sm:$0xf]  ;;  %v7180_v15 = vor.u32 %v10302_v4, %v7179_v3  ;;  %v7636_v27 = vor.u32 %v10417_v23, %v7635_v22  ;;  %v10517_v3 = vld [vmem:[#allocation4 + $0x4ec] sm:$0xf0]  ;;  %v7556_v4 = vor.u32 %v10397_v60, %v7555_v59 }
  0x7c   :  { %v7276_v37 = vor.u32 %v10326_v31, %v7275_v29  ;;  %v7280_v42 = vor.u32 %v10322_v34, %v7277_v35  ;;  %v10413_v29 = vld [vmem:[#allocation4 + $0x1ac] sm:$0xf0]  ;;  %v7475_v31 = vld [vmem:[#allocation4 + $0x80] sm:$0xf] }
  0x7d   :  { %1055 = vmatpush.bf16.msra.mxu0 %v6916_v41  ;;  %1083 = vmatpush.bf16.msra.mxu2 %v6920_v46  ;;  %v7243_v41 = vld [vmem:[#allocation2 + $0x298] sm:$0xf]  ;;  %v10314_v46 = vld [vmem:[#allocation2 + $0x29c] sm:$0xf]  ;;  %v7620_v33 = vor.u32 %v10413_v29, %v7619_v28  ;;  %v7603_v34 = vld [vmem:[#allocation4 + $0x180] sm:$0xf] }
  0x7e   :  { %v7248_v54 = vor.u32 %v10314_v46, %v7245_v47  ;;  %v10409_v35 = vld [vmem:[#allocation4 + $0x18c] sm:$0xf0]  ;;  %v7571_v47 = vld [vmem:[#allocation4 + $0x140] sm:$0xf] }
  0x7f   :  { %1069 = vmatpush.bf16.msra.mxu1 %v7172_v45  ;;  %1097 = vmatpush.bf16.msra.mxu3 %v7176_v49  ;;  %v6989_v45 = vld [vmem:[#allocation2 + $0xb8] sm:$0xf0]  ;;  %v7244_v49 = vor.u32 %v10318_v43, %v7243_v41  ;;  %v7604_v39 = vor.u32 %v10409_v35, %v7603_v34  ;;  %v7779_v41 = vld [vmem:[#allocation4 + $0x2e0] sm:$0xf]  ;;  %v10393_v8 = vld [vmem:[#allocation4 + $0x10c] sm:$0xf0] }
  0x80   :  { %1056 = vmatmul.bf16.vlgmr.msra.gmra.mxu0 %v11358_v56  ;;  %1084 = vmatmul.bf16.vlgmr.msra.gmra.mxu2 %v11358_v56  ;;  %v10441_v22 = vld [vmem:[#allocation4 + $0x28c] sm:$0xf0]  ;;  %v7987_v34 = vld [vmem:[#allocation4 + $0x480] sm:$0xf] }
  0x81   :  { %1104 = vmatpush.bf16.msrb.mxu0 %v7148_v50  ;;  %1132 = vmatpush.bf16.msrb.mxu2 %v7152_v52  ;;  %v6992_v50 = vor.u32 %v10250_v44, %v6989_v45  ;;  %v10246_v52 = vld [vmem:[#allocation2 + $0x74] sm:$0xf0]  ;;  %v7443_v44 = vld [vmem:[#allocation4 + $0x40] sm:$0xf]  ;;  %v10369_v45 = vld [vmem:[#allocation4 + $0x4c] sm:$0xf0] }
  0x82   :  { %1070 = vmatmul.bf16.vlgmr.msra.gmra.mxu1 %v11363_v63  ;;  %1098 = vmatmul.bf16.vlgmr.msra.gmra.mxu3 %v11363_v63  ;;  %v10509_v28 = vld [vmem:[#allocation4 + $0x4ac] sm:$0xf0] }
  0x83   :  { %1118 = vmatpush.bf16.msrb.mxu1 %v7404_v51  ;;  %1146 = vmatpush.bf16.msrb.mxu3 %v7408_v57  ;;  %v6955_v51 = vld [vmem:[#allocation2 + $0x58] sm:$0xf]  ;;  %v10242_v57 = vld [vmem:[#allocation2 + $0x5c] sm:$0xf] }
  0x84   :  { %v6956_v61 = vor.u32 %v10246_v52, %v6955_v51  ;;  %v10449_v51 = vld [vmem:[#allocation4 + $0x2cc] sm:$0xf0]  ;;  %v7907_v52 = vld [vmem:[#allocation4 + $0x3e0] sm:$0xf] }
  0x85   :  { %1105 = vmatpush.bf16.msrb.mxu0 %v7116_v0  ;;  %1133 = vmatpush.bf16.msrb.mxu2 %v7120_v2  ;;  %v7212_v0 = vor.u32 %v10310_v55, %v7211_v53  ;;  %v10238_v2 = vld [vmem:[#allocation2 + $0x34] sm:$0xf0]  ;;  %v7427_v53 = vld [vmem:[#allocation4 + $0x20] sm:$0xf] }
  0x87   :  { %1119 = vmatpush.bf16.msrb.mxu1 %v7372_v1  ;;  %1147 = vmatpush.bf16.msrb.mxu3 %v7376_v6  ;;  %v6960_v1 = vor.u32 %v10242_v57, %v6957_v58  ;;  %v10234_v6 = vld [vmem:[#allocation2 + $0x1c] sm:$0xf]  ;;  %v10485_v58 = vld [vmem:[#allocation4 + $0x3ec] sm:$0xf0] }
  0x88   :  { %v6928_v16 = vor.u32 %v10234_v6, %v6925_v7  ;;  %v7747_v6 = vld [vmem:[#allocation4 + $0x2a0] sm:$0xf]  ;;  %v10445_v7 = vld [vmem:[#allocation4 + $0x2ac] sm:$0xf0] }
  0x89   :  { %1106 = vmatpush.bf16.msrb.mxu0 %v7084_v12  ;;  %1134 = vmatpush.bf16.msrb.mxu2 %v7088_v14  ;;  %v6924_v12 = vor.u32 %v10238_v2, %v6923_v62  ;;  %v10421_v14 = vld [vmem:[#allocation4 + $0x1ec] sm:$0xf0]  ;;  %v7411_v62 = vld [vmem:[#allocation4] sm:$0xf]  ;;  %v7748_v9 = vor.u32 %v10445_v7, %v7747_v6 }
  0x8a   :  { %v8035_v2 = vld [vmem:[#allocation4 + $0x4e0] sm:$0xf]  ;;  %v10429_v7 = vld [vmem:[#allocation4 + $0x22c] sm:$0xf0] }
  0x8b   :  { %1120 = vmatpush.bf16.msrb.mxu1 %v7340_v13  ;;  %1148 = vmatpush.bf16.msrb.mxu3 %v7344_v18  ;;  %v7651_v13 = vld [vmem:[#allocation4 + $0x1e0] sm:$0xf]  ;;  %v7524_v18 = vor.u32 %v10389_v11, %v7523_v10  ;;  %v10481_v11 = vld [vmem:[#allocation4 + $0x3cc] sm:$0xf0] }
  0x8c   :  { %v7652_v21 = vor.u32 %v10421_v14, %v7651_v13  ;;  %v7891_v10 = vld [vmem:[#allocation4 + $0x3c0] sm:$0xf]  ;;  %v10549_v13 = vld [vmem:[#allocation4 + $0x5ec] sm:$0xf0] }
  0x8d   :  { %1107 = vmatpush.bf16.msrb.mxu0 %v7052_v24  ;;  %1135 = vmatpush.bf16.msrb.mxu2 %v7056_v26  ;;  %v7508_v24 = vor.u32 %v10385_v20, %v7507_v19  ;;  %v10381_v26 = vld [vmem:[#allocation4 + $0xac] sm:$0xf0]  ;;  %v7892_v14 = vor.u32 %v10481_v11, %v7891_v10  ;;  %v7683_v6 = vld [vmem:[#allocation4 + $0x220] sm:$0xf] }
  0x8e   :  { %v10513_v19 = vld [vmem:[#allocation4 + $0x4cc] sm:$0xf0]  ;;  %v7684_v11 = vor.u32 %v10429_v7, %v7683_v6  ;;  %v10419_v7 = vld [vmem:[#allocation4 + $0x1e4] sm:$0xf] }
  0x8f   :  { %1121 = vmatpush.bf16.msrb.mxu1 %v7308_v25  ;;  %1149 = vmatpush.bf16.msrb.mxu3 %v7312_v30  ;;  %v7491_v25 = vld [vmem:[#allocation4 + $0xa0] sm:$0xf] }
  0x90   :  { %v7492_v30 = vor.u32 %v10381_v26, %v7491_v25  ;;  %v10545_v25 = vld [vmem:[#allocation4 + $0x5cc] sm:$0xf0] }
  0x91   :  { %1108 = vmatpush.bf16.msrb.mxu0 %v7020_v36  ;;  %1136 = vmatpush.bf16.msrb.mxu2 %v7024_v38  ;;  %v7476_v36 = vor.u32 %v10377_v32, %v7475_v31  ;;  %v10373_v38 = vld [vmem:[#allocation4 + $0x6c] sm:$0xf0]  ;;  %v7875_v32 = vld [vmem:[#allocation4 + $0x3a0] sm:$0xf] }
  0x93   :  { %1122 = vmatpush.bf16.msrb.mxu1 %v7276_v37  ;;  %1150 = vmatpush.bf16.msrb.mxu3 %v7280_v42  ;;  %v7459_v37 = vld [vmem:[#allocation4 + $0x60] sm:$0xf]  ;;  %v10453_v42 = vld [vmem:[#allocation4 + $0x2ec] sm:$0xf0] }
  0x94   :  { %v7780_v43 = vor.u32 %v10453_v42, %v7779_v41 }
  0x95   :  { %1109 = vmatpush.bf16.msrb.mxu0 %v6988_v48  ;;  %1137 = vmatpush.bf16.msrb.mxu2 %v6992_v50  ;;  %v10401_v48 = vld [vmem:[#allocation4 + $0x14c] sm:$0xf0]  ;;  %v7763_v50 = vld [vmem:[#allocation4 + $0x2c0] sm:$0xf] }
  0x96   :  { %v7572_v55 = vor.u32 %v10401_v48, %v7571_v47  ;;  %v7764_v57 = vor.u32 %v10449_v51, %v7763_v50  ;;  %v7971_v47 = vld [vmem:[#allocation4 + $0x460] sm:$0xf]  ;;  %v10501_v50 = vld [vmem:[#allocation4 + $0x46c] sm:$0xf0] }
  0x97   :  { %1123 = vmatpush.bf16.msrb.mxu1 %v7244_v49  ;;  %1151 = vmatpush.bf16.msrb.mxu3 %v7248_v54  ;;  %v7444_v49 = vor.u32 %v10369_v45, %v7443_v44  ;;  %v10365_v54 = vld [vmem:[#allocation4 + $0x2c] sm:$0xf0]  ;;  %v7859_v45 = vld [vmem:[#allocation4 + $0x380] sm:$0xf]  ;;  %v7972_v51 = vor.u32 %v10501_v50, %v7971_v47 }
  0x98   :  { %v10525_v50 = vld [vmem:[#allocation4 + $0x52c] sm:$0xf0] }
  0x99   :  { %1110 = vmatpush.bf16.msrb.mxu0 %v6956_v61  ;;  %1138 = vmatpush.bf16.msrb.mxu2 %v6960_v1  ;;  %v7908_v61 = vor.u32 %v10485_v58, %v7907_v52  ;;  %v10361_v1 = vld [vmem:[#allocation4 + $0xc] sm:$0xf0]  ;;  %v7699_v52 = vld [vmem:[#allocation4 + $0x240] sm:$0xf] }
  0x9a   :  { %v10537_v58 = vld [vmem:[#allocation4 + $0x58c] sm:$0xf0] }
  0x9b   :  { %1124 = vmatpush.bf16.msrb.mxu1 %v7212_v0  ;;  %1152 = vmatpush.bf16.msrb.mxu3 %v7216_v5  ;;  %v7428_v0 = vor.u32 %v10365_v54, %v7427_v53  ;;  %v7539_v5 = vld [vmem:[#allocation4 + $0x100] sm:$0xf]  ;;  %v10433_v53 = vld [vmem:[#allocation4 + $0x24c] sm:$0xf0] }
  0x9c   :  { %v8115_v54 = vld [vmem:[#allocation4 + $0x580] sm:$0xf] }
  0x9d   :  { %1111 = vmatpush.bf16.msrb.mxu0 %v6924_v12  ;;  %1139 = vmatpush.bf16.msrb.mxu2 %v6928_v16  ;;  %v8163_v12 = vld [vmem:[#allocation4 + $0x5e0] sm:$0xf]  ;;  %v8036_v16 = vor.u32 %v10517_v3, %v8035_v2  ;;  %v8116_v60 = vor.u32 %v10537_v58, %v8115_v54  ;;  %v10577_v58 = vld [vmem:[#allocation4 + $0x6cc] sm:$0xf0] }
  0x9e   :  { %v8164_v20 = vor.u32 %v10549_v13, %v8163_v12  ;;  %v7955_v3 = vld [vmem:[#allocation4 + $0x440] sm:$0xf]  ;;  %v10533_v12 = vld [vmem:[#allocation4 + $0x56c] sm:$0xf0] }
  0x9f   :  { %1125 = vmatpush.bf16.msrb.mxu1 %v7180_v15  ;;  %1153 = vmatpush.bf16.msrb.mxu3 %v7184_v17  ;;  %v7412_v15 = vor.u32 %v10361_v1, %v7411_v62  ;;  %v8019_v17 = vld [vmem:[#allocation4 + $0x4c0] sm:$0xf]  ;;  %v10469_v62 = vld [vmem:[#allocation4 + $0x36c] sm:$0xf0] }
  0xa0   :  { %1112 = vmatmul.bf16.vlgmr.msrb.gmra.mxu0 %v11358_v56  ;;  %1140 = vmatmul.bf16.vlgmr.msrb.gmra.mxu2 %v11358_v56  ;;  %v10405_v56 = vld [vmem:[#allocation4 + $0x16c] sm:$0xf0]  ;;  %v8020_v26 = vor.u32 %v10513_v19, %v8019_v17  ;;  %v7939_v17 = vld [vmem:[#allocation4 + $0x420] sm:$0xf] }
  0xa1   :  { %2730 = vmatpush.bf16.msra.mxu0 %v7524_v18  ;;  %v7588_v46 = vor.u32 %v10405_v56, %v7587_v40  ;;  %2758 = vmatpush.bf16.msra.mxu2 %v7780_v43  ;;  %v7540_v18 = vor.u32 %v10393_v8, %v7539_v5  ;;  %v10437_v40 = vld [vmem:[#allocation4 + $0x26c] sm:$0xf0]  ;;  %v8131_v56 = vld [vmem:[#allocation4 + $0x5a0] sm:$0xf] }
  0xa2   :  { %1126 = vmatmul.bf16.vlgmr.msrb.gmra.mxu1 %v11363_v63  ;;  %1154 = vmatmul.bf16.vlgmr.msrb.gmra.mxu3 %v11363_v63  ;;  %v7460_v63 = vor.u32 %v10373_v38, %v7459_v37  ;;  %v10505_v37 = vld [vmem:[#allocation4 + $0x48c] sm:$0xf0]  ;;  %v8099_v8 = vld [vmem:[#allocation4 + $0x560] sm:$0xf] }
  0xa3   :  { %2744 = vmatpush.bf16.msra.mxu1 %v7652_v21  ;;  %2772 = vmatpush.bf16.msra.mxu3 %v7908_v61  ;;  %v7731_v21 = vld [vmem:[#allocation4 + $0x280] sm:$0xf]  ;;  %v7988_v38 = vor.u32 %v10505_v37, %v7987_v34 }
  0xa4   :  { %v7732_v23 = vor.u32 %v10441_v22, %v7731_v21  ;;  %v7843_v61 = vld [vmem:[#allocation4 + $0x360] sm:$0xf]  ;;  %v10493_v21 = vld [vmem:[#allocation4 + $0x42c] sm:$0xf0] }
  0xa5   :  { %2731 = vmatpush.bf16.msra.mxu0 %v7508_v24  ;;  %2759 = vmatpush.bf16.msra.mxu2 %v7764_v57  ;;  %v8147_v24 = vld [vmem:[#allocation4 + $0x5c0] sm:$0xf]  ;;  %v7700_v57 = vor.u32 %v10433_v53, %v7699_v52  ;;  %v7844_v2 = vor.u32 %v10469_v62, %v7843_v61  ;;  %v10457_v53 = vld [vmem:[#allocation4 + $0x30c] sm:$0xf0]  ;;  %v7509_v61 = vld [vmem:[#allocation4 + $0xd0] sm:$0xf0] }
  0xa6   :  { %v8148_v29 = vor.u32 %v10545_v25, %v8147_v24  ;;  %v7667_v24 = vld [vmem:[#allocation4 + $0x200] sm:$0xf]  ;;  %v10425_v25 = vld [vmem:[#allocation4 + $0x20c] sm:$0xf0] }
  0xa7   :  { %2745 = vmatpush.bf16.msra.mxu1 %v7636_v27  ;;  %2773 = vmatpush.bf16.msra.mxu3 %v7892_v14  ;;  %v8003_v27 = vld [vmem:[#allocation4 + $0x4a0] sm:$0xf]  ;;  %v8100_v14 = vor.u32 %v10533_v12, %v8099_v8  ;;  %v7653_v8 = vld [vmem:[#allocation4 + $0x1f0] sm:$0xf0]  ;;  %v10379_v12 = vld [vmem:[#allocation4 + $0xa4] sm:$0xf] }
  0xa8   :  { %v8004_v31 = vor.u32 %v10509_v28, %v8003_v27  ;;  %v7668_v28 = vor.u32 %v10425_v25, %v7667_v24  ;;  %v7811_v34 = vld [vmem:[#allocation4 + $0x320] sm:$0xf]  ;;  %v10375_v24 = vld [vmem:[#allocation4 + $0x84] sm:$0xf] }
  0xa9   :  { %2732 = vmatpush.bf16.msra.mxu0 %v7492_v30  ;;  %2760 = vmatpush.bf16.msra.mxu2 %v7748_v9  ;;  %v11384_v30 = vld [vmem:[%s11662_s2] sm:$0xff] }
  0xaa   :  { %v270_v35 = vperm.slane %v11384_v30, 0  ;;  %v7795_v52 = vld [vmem:[#allocation4 + $0x300] sm:$0xf]  ;;  %v272_v25 = vperm.slane %v11384_v30, 2 }
  0xab   :  { %2746 = vmatpush.bf16.msra.mxu1 %v7620_v33  ;;  %v10477_v33 = vld [vmem:[#allocation4 + $0x3ac] sm:$0xf0]  ;;  %v8051_v62 = vld [vmem:[#allocation4 + $0x500] sm:$0xf] }
  0xad   :  { %2733 = vmatpush.bf16.msra.mxu0 %v7476_v36  ;;  %2761 = vmatpush.bf16.msra.mxu2 %v7732_v23  ;;  %v7876_v36 = vor.u32 %v10477_v33, %v7875_v32  ;;  %v7940_v23 = vor.u32 %v10493_v21, %v7939_v17  ;;  %v10415_v17 = vld [vmem:[#allocation4 + $0x1c4] sm:$0xf] }
  0xaf   :  { %2747 = vmatpush.bf16.msra.mxu1 %v7604_v39  ;;  %v7715_v39 = vld [vmem:[#allocation4 + $0x260] sm:$0xf]  ;;  %2774 = vmatpush.bf16.msra.mxu3 %v7876_v36 }
  0xb0   :  { %v7716_v42 = vor.u32 %v10437_v40, %v7715_v39  ;;  %v7923_v39 = vld [vmem:[#allocation4 + $0x400] sm:$0xf]  ;;  %v10489_v40 = vld [vmem:[#allocation4 + $0x40c] sm:$0xf0] }
  0xb1   :  { %2734 = vmatpush.bf16.msra.mxu0 %v7460_v63  ;;  %v10541_v63 = vld [vmem:[#allocation4 + $0x5ac] sm:$0xf0] }
  0xb2   :  { %v8132_v44 = vor.u32 %v10541_v63, %v8131_v56  ;;  %2762 = vmatpush.bf16.msra.mxu2 %v7716_v42  ;;  %v8291_v56 = vld [vmem:[#allocation4 + $0x6e0] sm:$0xf]  ;;  %v7924_v42 = vor.u32 %v10489_v40, %v7923_v39  ;;  %v10581_v63 = vld [vmem:[#allocation4 + $0x6ec] sm:$0xf0]  ;;  %v10371_v40 = vld [vmem:[#allocation4 + $0x64] sm:$0xf] }
  0xb3   :  { %2748 = vmatpush.bf16.msra.mxu1 %v7588_v46  ;;  %v10473_v46 = vld [vmem:[#allocation4 + $0x38c] sm:$0xf0]  ;;  %v8292_v47 = vor.u32 %v10581_v63, %v8291_v56  ;;  %v7461_v63 = vld [vmem:[#allocation4 + $0x70] sm:$0xf0] }
  0xb4   :  { %v10565_v39 = vld [vmem:[#allocation4 + $0x66c] sm:$0xf0] }
  0xb5   :  { %2735 = vmatpush.bf16.msra.mxu0 %v7444_v49  ;;  %v7860_v49 = vor.u32 %v10473_v46, %v7859_v45 }
  0xb6   :  { %2763 = vmatpush.bf16.msra.mxu2 %v7700_v57  ;;  %v8275_v57 = vld [vmem:[#allocation4 + $0x6c0] sm:$0xf] }
  0xb7   :  { %2749 = vmatpush.bf16.msra.mxu1 %v7572_v55  ;;  %v271_v55 = vperm.slane %v11384_v30, 1  ;;  %2775 = vmatpush.bf16.msra.mxu3 %v7860_v49  ;;  %v8067_v49 = vld [vmem:[#allocation4 + $0x520] sm:$0xf] }
  0xb9   :  { %2736 = vmatpush.bf16.msra.mxu0 %v7428_v0 }
  0xba   :  { %2764 = vmatpush.bf16.msra.mxu2 %v7684_v11  ;;  %v10573_v11 = vld [vmem:[#allocation4 + $0x6ac] sm:$0xf0] }
  0xbb   :  { %2750 = vmatpush.bf16.msra.mxu1 %v7556_v4  ;;  %v10497_v4 = vld [vmem:[#allocation4 + $0x44c] sm:$0xf0]  ;;  %2776 = vmatpush.bf16.msra.mxu3 %v7844_v2 }
  0xbc   :  { %v7956_v5 = vor.u32 %v10497_v4, %v7955_v3  ;;  %v10521_v2 = vld [vmem:[#allocation4 + $0x50c] sm:$0xf0]  ;;  %v8419_v3 = vld [vmem:[#allocation4 + $0x7e0] sm:$0xf] }
  0xbd   :  { %2737 = vmatpush.bf16.msra.mxu0 %v7412_v15  ;;  %v945_v41 = vpop.f32.mrf.mxu0  ;;  %v7827_v15 = vld [vmem:[#allocation4 + $0x340] sm:$0xf]  ;;  %v10613_v4 = vld [vmem:[#allocation4 + $0x7ec] sm:$0xf0] }
  0xbe   :  { %v946_v48 = vadd.f32 %v945_v41, %v270_v35  ;;  %2765 = vmatpush.bf16.msra.mxu2 %v7668_v28  ;;  %v8420_v6 = vor.u32 %v10613_v4, %v8419_v3  ;;  %v7589_v4 = vld [vmem:[#allocation4 + $0x170] sm:$0xf0] }
  0xbf   :  { %2751 = vmatpush.bf16.msra.mxu1 %v7540_v18  ;;  %v959_v43 = vpop.f32.mrf.mxu1 }
  0xc0   :  { %v960_v0 = vadd.f32 %v959_v43, %v946_v48  ;;  %v10387_v43 = vld [vmem:[#allocation4 + $0xe4] sm:$0xf] }
  0xc1   :  { %2786 = vmatpush.bf16.msrb.mxu0 %v8036_v16  ;;  %v10465_v16 = vld [vmem:[#allocation4 + $0x34c] sm:$0xf0] }
  0xc2   :  { %v1160_v18 = vmax.f32 %v960_v0, 0.0  ;;  %2814 = vmatpush.bf16.msrb.mxu2 %v8292_v47  ;;  %v10407_v47 = vld [vmem:[#allocation4 + $0x184] sm:$0xf] }
  0xc3   :  { %2800 = vmatpush.bf16.msrb.mxu1 %v8164_v20  ;;  %v973_v59 = vpop.f32.mrf.mxu2  ;;  %v7828_v20 = vor.u32 %v10465_v16, %v7827_v15  ;;  %v8403_v15 = vld [vmem:[#allocation4 + $0x7c0] sm:$0xf]  ;;  %v10609_v16 = vld [vmem:[#allocation4 + $0x7cc] sm:$0xf0] }
  0xc4   :  { %v974_v9 = vadd.f32 %v973_v59, %v271_v55  ;;  %v8276_v59 = vor.u32 %v10577_v58, %v8275_v57  ;;  %v7445_v57 = vld [vmem:[#allocation4 + $0x50] sm:$0xf0] }
  0xc5   :  { %2787 = vmatpush.bf16.msrb.mxu0 %v8020_v26  ;;  %v987_v1 = vpop.f32.mrf.mxu3  ;;  %v947_v10 = vpop.f32.mrf.mxu0  ;;  %v8083_v26 = vld [vmem:[#allocation4 + $0x540] sm:$0xf]  ;;  %2777 = vmatpush.bf16.msra.mxu3 %v7828_v20  ;;  %v7637_v20 = vld [vmem:[#allocation4 + $0x1d0] sm:$0xf0] }
  0xc6   :  { %v948_v13 = vadd.f32 %v947_v10, %v270_v35  ;;  %v988_v27 = vadd.f32 %v987_v1, %v974_v9  ;;  %v10461_v35 = vld [vmem:[#allocation4 + $0x32c] sm:$0xf0]  ;;  %v8259_v9 = vld [vmem:[#allocation4 + $0x6a0] sm:$0xf]  ;;  %2815 = vmatpush.bf16.msrb.mxu2 %v8276_v59  ;;  %v7656_v10 = vor.u32 %v10419_v7, %v7653_v8  ;;  %v7640_v21 = vor.u32 %v10415_v17, %v7637_v20 }
  0xc7   :  { %2801 = vmatpush.bf16.msrb.mxu1 %v8148_v29  ;;  %v961_v19 = vpop.f32.mrf.mxu1  ;;  %v10529_v29 = vld [vmem:[#allocation4 + $0x54c] sm:$0xf0]  ;;  %v8195_v8 = vld [vmem:[#allocation4 + $0x620] sm:$0xf] }
  0xc8   :  { %v962_v22 = vadd.f32 %v961_v19, %v948_v13  ;;  %v8084_v33 = vor.u32 %v10529_v29, %v8083_v26  ;;  %v1161_v45 = vmax.f32 %v988_v27, 0.0  ;;  %v7493_v13 = vld [vmem:[#allocation4 + $0xb0] sm:$0xf0]  ;;  %v8404_v19 = vor.u32 %v10609_v16, %v8403_v15  ;;  %v8387_v29 = vld [vmem:[#allocation4 + $0x7a0] sm:$0xf] }
  0xc9   :  { %2788 = vmatpush.bf16.msrb.mxu0 %v8004_v31  ;;  %v7477_v27 = vld [vmem:[#allocation4 + $0x90] sm:$0xf0]  ;;  %v8339_v17 = vld [vmem:[#allocation4 + $0x740] sm:$0xf] }
  0xca   :  { %v1168_v31 = vmax.f32 %v962_v22, 0.0  ;;  %v8243_v22 = vld [vmem:[#allocation4 + $0x680] sm:$0xf]  ;;  %v7480_v28 = vor.u32 %v10375_v24, %v7477_v27 }
  0xcb   :  { %2802 = vmatpush.bf16.msrb.mxu1 %v8132_v44  ;;  %v975_v32 = vpop.f32.mrf.mxu2  ;;  %v7525_v44 = vld [vmem:[#allocation4 + $0xf0] sm:$0xf0]  ;;  %v8179_v24 = vld [vmem:[#allocation4 + $0x600] sm:$0xf] }
  0xcc   :  { %v976_v36 = vadd.f32 %v975_v32, %v271_v55  ;;  %v11388_v41 = vpack.c.bf16 %v1168_v31, %v1160_v18  ;;  %v7528_v48 = vor.u32 %v10387_v43, %v7525_v44  ;;  %v7796_v55 = vor.u32 %v10457_v53, %v7795_v52  ;;  %v10605_v31 = vld [vmem:[#allocation4 + $0x7ac] sm:$0xf0]  ;;  %v10411_v32 = vld [vmem:[#allocation4 + $0x1a4] sm:$0xf]  ;;  %v8371_v44 = vld [vmem:[#allocation4 + $0x780] sm:$0xf] }
  0xcd   :  { %2789 = vmatpush.bf16.msrb.mxu0 %v7988_v38  ;;  %v989_v37 = vpop.f32.mrf.mxu3  ;;  %v7812_v38 = vor.u32 %v10461_v35, %v7811_v34  ;;  %v7496_v18 = vor.u32 %v10379_v12, %v7493_v13  ;;  %v8388_v34 = vor.u32 %v10605_v31, %v8387_v29  ;;  %v7621_v35 = vld [vmem:[#allocation4 + $0x1b0] sm:$0xf0]  ;;  %v7464_v43 = vor.u32 %v10371_v40, %v7461_v63  ;;  %v10451_v31 = vld [vmem:[#allocation4 + $0x2e4] sm:$0xf]  ;;  %v10589_v40 = vld [vmem:[#allocation4 + $0x72c] sm:$0xf0] }
  0xce   :  { %v990_v46 = vadd.f32 %v989_v37, %v976_v36  ;;  %2738 = vmatmul.bf16.vlgmr.msra.gmra.mxu0 %v11388_v41  ;;  %v7624_v37 = vor.u32 %v10411_v32, %v7621_v35  ;;  %v273_v53 = vperm.slane %v11384_v30, 3  ;;  %v7413_v29 = vld [vmem:[#allocation4 + $0x10] sm:$0xf0] }
  0xcf   :  { %2803 = vmatpush.bf16.msrb.mxu1 %v8116_v60  ;;  %2778 = vmatpush.bf16.msra.mxu3 %v7812_v38  ;;  %v10383_v60 = vld [vmem:[#allocation4 + $0xc4] sm:$0xf]  ;;  %v8227_v38 = vld [vmem:[#allocation4 + $0x660] sm:$0xf]  ;;  %v7781_v35 = vld [vmem:[#allocation4 + $0x2f0] sm:$0xf0] }
  0xd0   :  { %v1169_v54 = vmax.f32 %v990_v46, 0.0  ;;  %v7512_v1 = vor.u32 %v10383_v60, %v7509_v61  ;;  %v8355_v60 = vld [vmem:[#allocation4 + $0x760] sm:$0xf]  ;;  %v10597_v61 = vld [vmem:[#allocation4 + $0x76c] sm:$0xf0] }
  0xd1   :  { %2790 = vmatpush.bf16.msrb.mxu0 %v7972_v51  ;;  %v8068_v51 = vor.u32 %v10525_v50, %v8067_v49  ;;  %v8211_v50 = vld [vmem:[#allocation4 + $0x640] sm:$0xf]  ;;  %v8356_v3 = vor.u32 %v10597_v61, %v8355_v60  ;;  %v7557_v63 = vld [vmem:[#allocation4 + $0x130] sm:$0xf0]  ;;  %v10443_v61 = vld [vmem:[#allocation4 + $0x2a4] sm:$0xf] }
  0xd2   :  { %v11391_v0 = vpack.c.bf16 %v1169_v54, %v1161_v45  ;;  %v10601_v45 = vld [vmem:[#allocation4 + $0x78c] sm:$0xf0] }
  0xd3   :  { %2804 = vmatpush.bf16.msrb.mxu1 %v8100_v14  ;;  %2779 = vmatpush.bf16.msra.mxu3 %v7796_v55  ;;  %v8260_v14 = vor.u32 %v10573_v11, %v8259_v9  ;;  %v8372_v46 = vor.u32 %v10601_v45, %v8371_v44  ;;  %v10367_v55 = vld [vmem:[#allocation4 + $0x44] sm:$0xf]  ;;  %v10557_v9 = vld [vmem:[#allocation4 + $0x62c] sm:$0xf0] }
  0xd4   :  { %2752 = vmatmul.bf16.vlgmr.msra.gmra.mxu1 %v11391_v0  ;;  %v7448_v59 = vor.u32 %v10367_v55, %v7445_v57  ;;  %v8196_v13 = vor.u32 %v10557_v9, %v8195_v8  ;;  %v10483_v57 = vld [vmem:[#allocation4 + $0x3e4] sm:$0xf]  ;;  %v7877_v9 = vld [vmem:[#allocation4 + $0x3b0] sm:$0xf0] }
  0xd5   :  { %2791 = vmatpush.bf16.msrb.mxu0 %v7956_v5  ;;  %v8052_v5 = vor.u32 %v10521_v2, %v8051_v62  ;;  %2816 = vmatpush.bf16.msrb.mxu2 %v8260_v14  ;;  %v10403_v62 = vld [vmem:[#allocation4 + $0x164] sm:$0xf]  ;;  %v7429_v14 = vld [vmem:[#allocation4 + $0x30] sm:$0xf0] }
  0xd6   :  { %v7592_v7 = vor.u32 %v10403_v62, %v7589_v4  ;;  %v7749_v62 = vld [vmem:[#allocation4 + $0x2b0] sm:$0xf0]  ;;  %v10475_v8 = vld [vmem:[#allocation4 + $0x3a4] sm:$0xf] }
  0xd7   :  { %2805 = vmatpush.bf16.msrb.mxu1 %v8084_v33  ;;  %2828 = vmatpush.bf16.msrb.mxu3 %v8420_v6 }
  0xd9   :  { %2792 = vmatpush.bf16.msrb.mxu0 %v7940_v23  ;;  %v10569_v23 = vld [vmem:[#allocation4 + $0x68c] sm:$0xf0] }
  0xda   :  { %v8244_v26 = vor.u32 %v10569_v23, %v8243_v22 }
  0xdb   :  { %2806 = vmatpush.bf16.msrb.mxu1 %v8068_v51  ;;  %2829 = vmatpush.bf16.msrb.mxu3 %v8404_v19  ;;  %v10561_v51 = vld [vmem:[#allocation4 + $0x64c] sm:$0xf0]  ;;  %v10399_v19 = vld [vmem:[#allocation4 + $0x144] sm:$0xf] }
  0xdc   :  { %2817 = vmatpush.bf16.msrb.mxu2 %v8244_v26  ;;  %v8212_v54 = vor.u32 %v10561_v51, %v8211_v50  ;;  %v10585_v50 = vld [vmem:[#allocation4 + $0x70c] sm:$0xf0] }
  0xdd   :  { %2793 = vmatpush.bf16.msrb.mxu0 %v7924_v42  ;;  %v1001_v33 = vpop.f32.mrf.mxu0  ;;  %v8228_v42 = vor.u32 %v10565_v39, %v8227_v38  ;;  %v7784_v38 = vor.u32 %v10451_v31, %v7781_v35  ;;  %v8323_v39 = vld [vmem:[#allocation4 + $0x720] sm:$0xf]  ;;  %v7685_v35 = vld [vmem:[#allocation4 + $0x230] sm:$0xf0] }
  0xde   :  { %v1002_v56 = vadd.f32 %v1001_v33, %v272_v25 }
  0xdf   :  { %2807 = vmatpush.bf16.msrb.mxu1 %v8052_v5  ;;  %v1015_v36 = vpop.f32.mrf.mxu1  ;;  %2830 = vmatpush.bf16.msrb.mxu3 %v8388_v34 }
  0xe0   :  { %2818 = vmatpush.bf16.msrb.mxu2 %v8228_v42  ;;  %v1016_v52 = vadd.f32 %v1015_v36, %v1002_v56  ;;  %v10395_v56 = vld [vmem:[#allocation4 + $0x124] sm:$0xf]  ;;  %v8324_v42 = vor.u32 %v10589_v40, %v8323_v39 }
  0xe1   :  { %2842 = vmatpush.bf16.msra.mxu0 %v7528_v48  ;;  %v7605_v48 = vld [vmem:[#allocation4 + $0x190] sm:$0xf0]  ;;  %v7560_v45 = vor.u32 %v10395_v56, %v7557_v63  ;;  %v10463_v40 = vld [vmem:[#allocation4 + $0x344] sm:$0xf] }
  0xe2   :  { %v7608_v49 = vor.u32 %v10407_v47, %v7605_v48  ;;  %v1162_v11 = vmax.f32 %v1016_v52, 0.0  ;;  %v7765_v47 = vld [vmem:[#allocation4 + $0x2d0] sm:$0xf0]  ;;  %v10391_v52 = vld [vmem:[#allocation4 + $0x104] sm:$0xf] }
  0xe3   :  { %2856 = vmatpush.bf16.msra.mxu1 %v7656_v10  ;;  %2831 = vmatpush.bf16.msrb.mxu3 %v8372_v46  ;;  %v1029_v58 = vpop.f32.mrf.mxu2  ;;  %v10363_v10 = vld [vmem:[#allocation4 + $0x24] sm:$0xf]  ;;  %v7829_v56 = vld [vmem:[#allocation4 + $0x350] sm:$0xf0] }
  0xe4   :  { %2819 = vmatpush.bf16.msrb.mxu2 %v8212_v54  ;;  %v1030_v12 = vadd.f32 %v1029_v58, %v273_v53  ;;  %v7432_v16 = vor.u32 %v10363_v10, %v7429_v14  ;;  %v10447_v46 = vld [vmem:[#allocation4 + $0x2c4] sm:$0xf]  ;;  %v7909_v58 = vld [vmem:[#allocation4 + $0x3f0] sm:$0xf0]  ;;  %v274_v10 = vperm.slane %v11384_v30, 4 }
  0xe5   :  { %2843 = vmatpush.bf16.msra.mxu0 %v7512_v1  ;;  %v1003_v1 = vpop.f32.mrf.mxu0  ;;  %v1043_v2 = vpop.f32.mrf.mxu3  ;;  %v7768_v48 = vor.u32 %v10447_v46, %v7765_v47  ;;  %v7912_v60 = vor.u32 %v10483_v57, %v7909_v58  ;;  %v7717_v14 = vld [vmem:[#allocation4 + $0x270] sm:$0xf0]  ;;  %v10423_v46 = vld [vmem:[#allocation4 + $0x204] sm:$0xf] }
  0xe6   :  { %v1004_v5 = vadd.f32 %v1003_v1, %v272_v25  ;;  %v10553_v25 = vld [vmem:[#allocation4 + $0x60c] sm:$0xf0]  ;;  %v1044_v26 = vadd.f32 %v1043_v2, %v1030_v12  ;;  %v7752_v1 = vor.u32 %v10443_v61, %v7749_v62  ;;  %v10479_v2 = vld [vmem:[#allocation4 + $0x3c4] sm:$0xf]  ;;  %v7880_v12 = vor.u32 %v10475_v8, %v7877_v9  ;;  %v7669_v47 = vld [vmem:[#allocation4 + $0x210] sm:$0xf0] }
  0xe7   :  { %2857 = vmatpush.bf16.msra.mxu1 %v7640_v21  ;;  %v1017_v6 = vpop.f32.mrf.mxu1  ;;  %2832 = vmatpush.bf16.msrb.mxu3 %v8356_v3  ;;  %v7573_v21 = vld [vmem:[#allocation4 + $0x150] sm:$0xf0]  ;;  %v8180_v27 = vor.u32 %v10553_v25, %v8179_v24  ;;  %v275_v24 = vperm.slane %v11384_v30, 5  ;;  %v10467_v25 = vld [vmem:[#allocation4 + $0x364] sm:$0xf] }
  0xe8   :  { %v1018_v15 = vadd.f32 %v1017_v6, %v1004_v5  ;;  %2820 = vmatpush.bf16.msrb.mxu2 %v8196_v13  ;;  %v7576_v23 = vor.u32 %v10399_v19, %v7573_v21  ;;  %v7893_v3 = vld [vmem:[#allocation4 + $0x3d0] sm:$0xf0]  ;;  %v10439_v5 = vld [vmem:[#allocation4 + $0x284] sm:$0xf] }
  0xe9   :  { %2844 = vmatpush.bf16.msra.mxu0 %v7496_v18  ;;  %v10593_v18 = vld [vmem:[#allocation4 + $0x74c] sm:$0xf0]  ;;  %v7896_v4 = vor.u32 %v10479_v2, %v7893_v3  ;;  %v7733_v6 = vld [vmem:[#allocation4 + $0x290] sm:$0xf0]  ;;  %v10435_v13 = vld [vmem:[#allocation4 + $0x264] sm:$0xf] }
  0xea   :  { %v8340_v20 = vor.u32 %v10593_v18, %v8339_v17  ;;  %v1170_v22 = vmax.f32 %v1018_v15, 0.0  ;;  %v10471_v17 = vld [vmem:[#allocation4 + $0x384] sm:$0xf]  ;;  %v7861_v18 = vld [vmem:[#allocation4 + $0x390] sm:$0xf0] }
  0xeb   :  { %2858 = vmatpush.bf16.msra.mxu1 %v7624_v37  ;;  %v1031_v33 = vpop.f32.mrf.mxu2  ;;  %v10431_v21 = vld [vmem:[#allocation4 + $0x244] sm:$0xf]  ;;  %v7813_v58 = vld [vmem:[#allocation4 + $0x330] sm:$0xf0] }
  0xec   :  { %2833 = vmatpush.bf16.msrb.mxu3 %v8340_v20  ;;  %v11396_v32 = vpack.c.bf16 %v1170_v22, %v1162_v11  ;;  %v1032_v36 = vadd.f32 %v1031_v33, %v273_v53  ;;  %2821 = vmatpush.bf16.msrb.mxu2 %v8180_v27  ;;  %v7541_v53 = vld [vmem:[#allocation4 + $0x110] sm:$0xf0]  ;;  %v7864_v20 = vor.u32 %v10471_v17, %v7861_v18  ;;  %v10459_v57 = vld [vmem:[#allocation4 + $0x324] sm:$0xf] }
  0xed   :  { %2845 = vmatpush.bf16.msra.mxu0 %v7480_v28  ;;  %v10359_v28 = vld [vmem:[#allocation4 + $0x4] sm:$0xf]  ;;  %v1045_v37 = vpop.f32.mrf.mxu3  ;;  %v7544_v55 = vor.u32 %v10391_v52, %v7541_v53  ;;  %v7701_v22 = vld [vmem:[#allocation4 + $0x250] sm:$0xf0]  ;;  %v7816_v62 = vor.u32 %v10459_v57, %v7813_v58 }
  0xee   :  { %v7416_v34 = vor.u32 %v10359_v28, %v7413_v29  ;;  %2766 = vmatmul.bf16.vlgmr.msra.gmra.mxu2 %v11396_v32  ;;  %v1046_v44 = vadd.f32 %v1045_v37, %v1032_v36  ;;  %v10511_v52 = vld [vmem:[#allocation4 + $0x4c4] sm:$0xf]  ;;  %v8165_v2 = vld [vmem:[#allocation4 + $0x5f0] sm:$0xf0] }
  0xef   :  { %2859 = vmatpush.bf16.msra.mxu1 %v7608_v49  ;;  %v8307_v49 = vld [vmem:[#allocation4 + $0x700] sm:$0xf]  ;;  %v10507_v8 = vld [vmem:[#allocation4 + $0x4a4] sm:$0xf]  ;;  %v8005_v9 = vld [vmem:[#allocation4 + $0x4b0] sm:$0xf0] }
  0xf0   :  { %2870 = vmatpush.bf16.msra.mxu2 %v7784_v38  ;;  %v1171_v51 = vmax.f32 %v1046_v44, 0.0  ;;  %2834 = vmatpush.bf16.msrb.mxu3 %v8324_v42  ;;  %v8308_v54 = vor.u32 %v10585_v50, %v8307_v49  ;;  %v8037_v44 = vld [vmem:[#allocation4 + $0x4f0] sm:$0xf0]  ;;  %v7672_v49 = vor.u32 %v10423_v46, %v7669_v47  ;;  %v10503_v17 = vld [vmem:[#allocation4 + $0x484] sm:$0xf] }
  0xf1   :  { %2846 = vmatpush.bf16.msra.mxu0 %v7464_v43  ;;  %v1163_v43 = vmax.f32 %v1044_v26, 0.0  ;;  %v7845_v26 = vld [vmem:[#allocation4 + $0x370] sm:$0xf0]  ;;  %v10579_v57 = vld [vmem:[#allocation4 + $0x6e4] sm:$0xf] }
  0xf2   :  { %v7848_v33 = vor.u32 %v10467_v25, %v7845_v26  ;;  %v7989_v18 = vld [vmem:[#allocation4 + $0x490] sm:$0xf0] }
  0xf3   :  { %2860 = vmatpush.bf16.msra.mxu1 %v7592_v7  ;;  %v7736_v7 = vor.u32 %v10439_v5, %v7733_v6  ;;  %v10455_v6 = vld [vmem:[#allocation4 + $0x304] sm:$0xf] }
  0xf4   :  { %2871 = vmatpush.bf16.msra.mxu2 %v7768_v48  ;;  %2835 = vmatpush.bf16.msrb.mxu3 %v8308_v54 }
  0xf5   :  { %2847 = vmatpush.bf16.msra.mxu0 %v7448_v59  ;;  %v11399_v59 = vpack.c.bf16 %v1171_v51, %v1163_v43  ;;  %v10515_v43 = vld [vmem:[#allocation4 + $0x4e4] sm:$0xf] }
  0xf6   :  { %v8040_v51 = vor.u32 %v10515_v43, %v8037_v44  ;;  %v277_v43 = vperm.slane %v11384_v30, 7 }
  0xf7   :  { %2861 = vmatpush.bf16.msra.mxu1 %v7576_v23  ;;  %2780 = vmatmul.bf16.vlgmr.msra.gmra.mxu3 %v11399_v59  ;;  %v7704_v23 = vor.u32 %v10431_v21, %v7701_v22  ;;  %v10539_v21 = vld [vmem:[#allocation4 + $0x5a4] sm:$0xf]  ;;  %v8133_v22 = vld [vmem:[#allocation4 + $0x5b0] sm:$0xf0] }
  0xf8   :  { %2884 = vmatpush.bf16.msra.mxu3 %v7912_v60  ;;  %2872 = vmatpush.bf16.msra.mxu2 %v7752_v1  ;;  %v10547_v1 = vld [vmem:[#allocation4 + $0x5e4] sm:$0xf]  ;;  %v8136_v26 = vor.u32 %v10539_v21, %v8133_v22  ;;  %v8053_v21 = vld [vmem:[#allocation4 + $0x510] sm:$0xf0] }
  0xf9   :  { %2848 = vmatpush.bf16.msra.mxu0 %v7432_v16  ;;  %v7720_v16 = vor.u32 %v10435_v13, %v7717_v14  ;;  %v8008_v14 = vor.u32 %v10507_v8, %v8005_v9  ;;  %v10575_v9 = vld [vmem:[#allocation4 + $0x6c4] sm:$0xf] }
  0xfa   :  { %v10611_v22 = vld [vmem:[#allocation4 + $0x7e4] sm:$0xf] }
  0xfb   :  { %2862 = vmatpush.bf16.msra.mxu1 %v7560_v45  ;;  %v7832_v45 = vor.u32 %v10463_v40, %v7829_v56  ;;  %v8101_v40 = vld [vmem:[#allocation4 + $0x570] sm:$0xf0]  ;;  %v10491_v56 = vld [vmem:[#allocation4 + $0x424] sm:$0xf] }
  0xfc   :  { %2885 = vmatpush.bf16.msra.mxu3 %v7896_v4  ;;  %2873 = vmatpush.bf16.msra.mxu2 %v7736_v7  ;;  %v7797_v7 = vld [vmem:[#allocation4 + $0x310] sm:$0xf0] }
  0xfd   :  { %2849 = vmatpush.bf16.msra.mxu0 %v7416_v34  ;;  %v1057_v11 = vpop.f32.mrf.mxu0  ;;  %v10427_v34 = vld [vmem:[#allocation4 + $0x224] sm:$0xf] }
  0xfe   :  { %v1058_v19 = vadd.f32 %v1057_v11, %v274_v10  ;;  %v7688_v38 = vor.u32 %v10427_v34, %v7685_v35  ;;  %v7800_v11 = vor.u32 %v10455_v6, %v7797_v7  ;;  %v10495_v34 = vld [vmem:[#allocation4 + $0x444] sm:$0xf]  ;;  %v7957_v35 = vld [vmem:[#allocation4 + $0x450] sm:$0xf0] }
  0xff   :  { %2863 = vmatpush.bf16.msra.mxu1 %v7544_v55  ;;  %v1071_v15 = vpop.f32.mrf.mxu1  ;;  %v8021_v55 = vld [vmem:[#allocation4 + $0x4d0] sm:$0xf0] }
 0x100   :  { %2886 = vmatpush.bf16.msra.mxu3 %v7880_v12  ;;  %2874 = vmatpush.bf16.msra.mxu2 %v7720_v16  ;;  %v1072_v27 = vadd.f32 %v1071_v15, %v1058_v19  ;;  %v8024_v5 = vor.u32 %v10511_v52, %v8021_v55  ;;  %v8168_v12 = vor.u32 %v10547_v1, %v8165_v2  ;;  %v10543_v15 = vld [vmem:[#allocation4 + $0x5c4] sm:$0xf]  ;;  %v8149_v16 = vld [vmem:[#allocation4 + $0x5d0] sm:$0xf0] }
 0x101   :  { %v8152_v19 = vor.u32 %v10543_v15, %v8149_v16  ;;  %v7925_v55 = vld [vmem:[#allocation4 + $0x410] sm:$0xf0]  ;;  %v10386_v15 = vld [vmem:[#allocation4 + $0xd4] sm:$0xf0] }
 0x102   :  { %v1164_v42 = vmax.f32 %v1072_v27, 0.0  ;;  %v276_v27 = vperm.slane %v11384_v30, 6  ;;  %v10390_v30 = vld [vmem:[#allocation4 + $0xf4] sm:$0xf0]  ;;  %v8069_v6 = vld [vmem:[#allocation4 + $0x530] sm:$0xf0] }
 0x103   :  { %v1085_v28 = vpop.f32.mrf.mxu2 }
 0x104   :  { %2887 = vmatpush.bf16.msra.mxu3 %v7864_v20  ;;  %2875 = vmatpush.bf16.msra.mxu2 %v7704_v23  ;;  %v1086_v39 = vadd.f32 %v1085_v28, %v275_v24  ;;  %v7992_v20 = vor.u32 %v10503_v17, %v7989_v18  ;;  %v10499_v23 = vld [vmem:[#allocation4 + $0x464] sm:$0xf] }
 0x105   :  { %v1059_v29 = vpop.f32.mrf.mxu0  ;;  %v1099_v31 = vpop.f32.mrf.mxu3 }
 0x106   :  { %v1060_v36 = vadd.f32 %v1059_v29, %v274_v10  ;;  %v1100_v50 = vadd.f32 %v1099_v31, %v1086_v39  ;;  %v10535_v31 = vld [vmem:[#allocation4 + $0x584] sm:$0xf] }
 0x107   :  { %v1073_v37 = vpop.f32.mrf.mxu1  ;;  %v10531_v39 = vld [vmem:[#allocation4 + $0x564] sm:$0xf] }
 0x108   :  { %v1074_v63 = vadd.f32 %v1073_v37, %v1060_v36  ;;  %2888 = vmatpush.bf16.msra.mxu3 %v7848_v33  ;;  %2876 = vmatpush.bf16.msra.mxu2 %v7688_v38  ;;  %v1165_v3 = vmax.f32 %v1100_v50, 0.0  ;;  %v8117_v33 = vld [vmem:[#allocation4 + $0x590] sm:$0xf0]  ;;  %v7960_v38 = vor.u32 %v10495_v34, %v7957_v35  ;;  %v8104_v46 = vor.u32 %v10531_v39, %v8101_v40  ;;  %v10527_v50 = vld [vmem:[#allocation4 + $0x544] sm:$0xf] }
 0x109   :  { %v8120_v36 = vor.u32 %v10535_v31, %v8117_v33  ;;  %v8261_v31 = vld [vmem:[#allocation4 + $0x6b0] sm:$0xf0]  ;;  %v7499_v33 = vld [vmem:[#allocation4 + $0xa8] sm:$0xf]  ;;  %v10382_v34 = vld [vmem:[#allocation4 + $0xb4] sm:$0xf0] }
 0x10a   :  { %v1172_v48 = vmax.f32 %v1074_v63, 0.0  ;;  %v10607_v40 = vld [vmem:[#allocation4 + $0x7c4] sm:$0xf] }
 0x10b   :  { %v1087_v54 = vpop.f32.mrf.mxu2 }
 0x10c   :  { %v11404_v53 = vpack.c.bf16 %v1172_v48, %v1164_v42  ;;  %v1088_v60 = vadd.f32 %v1087_v54, %v275_v24  ;;  %2889 = vmatpush.bf16.msra.mxu3 %v7832_v45  ;;  %2877 = vmatpush.bf16.msra.mxu2 %v7672_v49  ;;  %v7973_v24 = vld [vmem:[#allocation4 + $0x470] sm:$0xf0]  ;;  %v10487_v54 = vld [vmem:[#allocation4 + $0x404] sm:$0xf] }
 0x10d   :  { %v1101_v61 = vpop.f32.mrf.mxu3  ;;  %v7976_v29 = vor.u32 %v10499_v23, %v7973_v24  ;;  %v7941_v42 = vld [vmem:[#allocation4 + $0x430] sm:$0xf0] }
 0x10e   :  { %2794 = vmatmul.bf16.vlgmr.msrb.gmra.mxu0 %v11404_v53  ;;  %v1102_v4 = vadd.f32 %v1101_v61, %v1088_v60  ;;  %v7944_v49 = vor.u32 %v10491_v56, %v7941_v42  ;;  %v8293_v60 = vld [vmem:[#allocation4 + $0x6f0] sm:$0xf0]  ;;  %v7531_v61 = vld [vmem:[#allocation4 + $0xe8] sm:$0xf] }
 0x10f   :  { %2898 = vmatpush.bf16.msrb.mxu0 %v8040_v51  ;;  %v8085_v51 = vld [vmem:[#allocation4 + $0x550] sm:$0xf0]  ;;  %v8296_v7 = vor.u32 %v10579_v57, %v8293_v60  ;;  %v7532_v8 = vor.u32 %v10390_v30, %v7531_v61  ;;  %v10414_v60 = vld [vmem:[#allocation4 + $0x1b4] sm:$0xf0]  ;;  %v7467_v61 = vld [vmem:[#allocation4 + $0x68] sm:$0xf] }
 0x110   :  { %v1173_v10 = vmax.f32 %v1102_v4, 0.0  ;;  %2890 = vmatpush.bf16.msra.mxu3 %v7816_v62  ;;  %v8088_v1 = vor.u32 %v10527_v50, %v8085_v51  ;;  %v7928_v4 = vor.u32 %v10487_v54, %v7925_v55  ;;  %v8421_v23 = vld [vmem:[#allocation4 + $0x7f0] sm:$0xf0]  ;;  %v10374_v30 = vld [vmem:[#allocation4 + $0x74] sm:$0xf0] }
 0x111   :  { %v8405_v56 = vld [vmem:[#allocation4 + $0x7d0] sm:$0xf0] }
 0x112   :  { %v11407_v13 = vpack.c.bf16 %v1173_v10, %v1165_v3  ;;  %v8408_v50 = vor.u32 %v10607_v40, %v8405_v56  ;;  %v8389_v57 = vld [vmem:[#allocation4 + $0x7b0] sm:$0xf0]  ;;  %v10362_v40 = vld [vmem:[#allocation4 + $0x14] sm:$0xf0] }
 0x113   :  { %2899 = vmatpush.bf16.msrb.mxu0 %v8024_v5  ;;  %v10523_v5 = vld [vmem:[#allocation4 + $0x524] sm:$0xf]  ;;  %v8181_v56 = vld [vmem:[#allocation4 + $0x610] sm:$0xf0] }
 0x114   :  { %2808 = vmatmul.bf16.vlgmr.msrb.gmra.mxu1 %v11407_v13  ;;  %2891 = vmatpush.bf16.msra.mxu3 %v7800_v11  ;;  %v8072_v18 = vor.u32 %v10523_v5, %v8069_v6  ;;  %v7468_v5 = vor.u32 %v10374_v30, %v7467_v61  ;;  %v8373_v6 = vld [vmem:[#allocation4 + $0x790] sm:$0xf0]  ;;  %v10514_v61 = vld [vmem:[#allocation4 + $0x4d4] sm:$0xf0] }
 0x115   :  { %2912 = vmatpush.bf16.msrb.mxu1 %v8168_v12  ;;  %v8277_v12 = vld [vmem:[#allocation4 + $0x6d0] sm:$0xf0] }
 0x117   :  { %2900 = vmatpush.bf16.msrb.mxu0 %v8008_v14  ;;  %v7515_v14 = vld [vmem:[#allocation4 + $0xc8] sm:$0xf] }
 0x119   :  { %2913 = vmatpush.bf16.msrb.mxu1 %v8152_v19  ;;  %v10519_v19 = vld [vmem:[#allocation4 + $0x504] sm:$0xf] }
 0x11b   :  { %2901 = vmatpush.bf16.msrb.mxu0 %v7992_v20 }
 0x11d   :  { %v1113_v25 = vpop.f32.mrf.mxu0  ;;  %2914 = vmatpush.bf16.msrb.mxu1 %v8136_v26  ;;  %v7516_v26 = vor.u32 %v10386_v15, %v7515_v14  ;;  %v10559_v14 = vld [vmem:[#allocation4 + $0x644] sm:$0xf]  ;;  %v8213_v15 = vld [vmem:[#allocation4 + $0x650] sm:$0xf0] }
 0x11e   :  { %2850 = vmatmul.bf16.vlgmr.msra.gmra.mxu0 %v11388_v41  ;;  %v1114_v37 = vadd.f32 %v1113_v25, %v276_v27  ;;  %v8280_v25 = vor.u32 %v10575_v9, %v8277_v12  ;;  %v10370_v12 = vld [vmem:[#allocation4 + $0x54] sm:$0xf0] }
 0x11f   :  { %v1127_v28 = vpop.f32.mrf.mxu1  ;;  %2902 = vmatpush.bf16.msrb.mxu0 %v7976_v29  ;;  %v10571_v29 = vld [vmem:[#allocation4 + $0x6a4] sm:$0xf] }
 0x120   :  { %v1128_v47 = vadd.f32 %v1127_v28, %v1114_v37  ;;  %v10422_v28 = vld [vmem:[#allocation4 + $0x1f4] sm:$0xf0]  ;;  %v8056_v37 = vor.u32 %v10519_v19, %v8053_v21  ;;  %v7595_v21 = vld [vmem:[#allocation4 + $0x168] sm:$0xf] }
 0x121   :  { %2915 = vmatpush.bf16.msrb.mxu1 %v8120_v36 }
 0x122   :  { %v1166_v2 = vmax.f32 %v1128_v47, 0.0  ;;  %v8245_v47 = vld [vmem:[#allocation4 + $0x690] sm:$0xf0] }
 0x123   :  { %v1141_v63 = vpop.f32.mrf.mxu2  ;;  %2903 = vmatpush.bf16.msrb.mxu0 %v7960_v38  ;;  %v8424_v38 = vor.u32 %v10611_v22, %v8421_v23  ;;  %v10406_v22 = vld [vmem:[#allocation4 + $0x174] sm:$0xf0]  ;;  %v8216_v23 = vor.u32 %v10559_v14, %v8213_v15  ;;  %v8011_v14 = vld [vmem:[#allocation4 + $0x4a8] sm:$0xf] }
 0x124   :  { %2864 = vmatmul.bf16.vlgmr.msra.gmra.mxu1 %v11391_v0  ;;  %v1142_v62 = vadd.f32 %v1141_v63, %v277_v43  ;;  %v8264_v63 = vor.u32 %v10571_v29, %v8261_v31  ;;  %v7596_v29 = vor.u32 %v10406_v22, %v7595_v21  ;;  %v10591_v31 = vld [vmem:[#allocation4 + $0x744] sm:$0xf]  ;;  %v10510_v15 = vld [vmem:[#allocation4 + $0x4b4] sm:$0xf0]  ;;  %v7899_v22 = vld [vmem:[#allocation4 + $0x3c8] sm:$0xf] }
 0x125   :  { %v1155_v44 = vpop.f32.mrf.mxu3  ;;  %v1115_v45 = vpop.f32.mrf.mxu0  ;;  %2916 = vmatpush.bf16.msrb.mxu1 %v8104_v46  ;;  %v10567_v46 = vld [vmem:[#allocation4 + $0x684] sm:$0xf] }
 0x126   :  { %v1116_v48 = vadd.f32 %v1115_v45, %v276_v27  ;;  %v1156_v16 = vadd.f32 %v1155_v44, %v1142_v62  ;;  %v7659_v27 = vld [vmem:[#allocation4 + $0x1e8] sm:$0xf]  ;;  %v10418_v45 = vld [vmem:[#allocation4 + $0x1d4] sm:$0xf0]  ;;  %v8248_v54 = vor.u32 %v10567_v46, %v8245_v47  ;;  %v10563_v62 = vld [vmem:[#allocation4 + $0x664] sm:$0xf] }
 0x127   :  { %v1129_v52 = vpop.f32.mrf.mxu1  ;;  %2904 = vmatpush.bf16.msrb.mxu0 %v7944_v49  ;;  %v7660_v39 = vor.u32 %v10422_v28, %v7659_v27  ;;  %v7643_v44 = vld [vmem:[#allocation4 + $0x1c8] sm:$0xf]  ;;  %v10378_v49 = vld [vmem:[#allocation4 + $0x94] sm:$0xf0]  ;;  %v8197_v27 = vld [vmem:[#allocation4 + $0x630] sm:$0xf0] }
 0x128   :  { %v1130_v58 = vadd.f32 %v1129_v52, %v1116_v48  ;;  %v1167_v35 = vmax.f32 %v1156_v16, 0.0  ;;  %v7483_v48 = vld [vmem:[#allocation4 + $0x88] sm:$0xf]  ;;  %v7644_v51 = vor.u32 %v10418_v45, %v7643_v44  ;;  %v10603_v52 = vld [vmem:[#allocation4 + $0x7a4] sm:$0xf] }
 0x129   :  { %2917 = vmatpush.bf16.msrb.mxu1 %v8088_v1  ;;  %v7484_v55 = vor.u32 %v10378_v49, %v7483_v48  ;;  %v8229_v1 = vld [vmem:[#allocation4 + $0x670] sm:$0xf0]  ;;  %v7787_v46 = vld [vmem:[#allocation4 + $0x2e8] sm:$0xf]  ;;  %v10454_v47 = vld [vmem:[#allocation4 + $0x2f4] sm:$0xf0] }
 0x12a   :  { %v1174_v3 = vmax.f32 %v1130_v58, 0.0  ;;  %v7627_v58 = vld [vmem:[#allocation4 + $0x1a8] sm:$0xf]  ;;  %v8232_v9 = vor.u32 %v10563_v62, %v8229_v1  ;;  %v10587_v48 = vld [vmem:[#allocation4 + $0x724] sm:$0xf] }
 0x12b   :  { %v1143_v11 = vpop.f32.mrf.mxu2  ;;  %2905 = vmatpush.bf16.msrb.mxu0 %v7928_v4  ;;  %v10599_v4 = vld [vmem:[#allocation4 + $0x784] sm:$0xf]  ;;  %v10450_v1 = vld [vmem:[#allocation4 + $0x2d4] sm:$0xf0] }
 0x12c   :  { %v11414_v10 = vpack.c.bf16 %v1174_v3, %v1166_v2  ;;  %v1144_v17 = vadd.f32 %v1143_v11, %v277_v43  ;;  %v7500_v43 = vor.u32 %v10382_v34, %v7499_v33  ;;  %v8392_v2 = vor.u32 %v10603_v52, %v8389_v57  ;;  %v7451_v11 = vld [vmem:[#allocation4 + $0x48] sm:$0xf]  ;;  %v8341_v34 = vld [vmem:[#allocation4 + $0x750] sm:$0xf0]  ;;  %v10398_v52 = vld [vmem:[#allocation4 + $0x134] sm:$0xf0] }
 0x12d   :  { %v1157_v20 = vpop.f32.mrf.mxu3  ;;  %2918 = vmatpush.bf16.msrb.mxu1 %v8072_v18  ;;  %v7628_v3 = vor.u32 %v10414_v60, %v7627_v58  ;;  %v8376_v16 = vor.u32 %v10599_v4, %v8373_v6  ;;  %v10595_v18 = vld [vmem:[#allocation4 + $0x764] sm:$0xf]  ;;  %v7452_v19 = vor.u32 %v10370_v12, %v7451_v11  ;;  %v8344_v44 = vor.u32 %v10591_v31, %v8341_v34  ;;  %v7771_v58 = vld [vmem:[#allocation4 + $0x2c8] sm:$0xf]  ;;  %v10550_v11 = vld [vmem:[#allocation4 + $0x5f4] sm:$0xf0] }
 0x12e   :  { %2822 = vmatmul.bf16.vlgmr.msrb.gmra.mxu2 %v11414_v10  ;;  %v1158_v24 = vadd.f32 %v1157_v20, %v1144_v17  ;;  %2906 = vmatmul.bf16.vlgmr.msrb.gmra.mxu0 %v11404_v53  ;;  %v8357_v20 = vld [vmem:[#allocation4 + $0x770] sm:$0xf0]  ;;  %v7788_v57 = vor.u32 %v10454_v47, %v7787_v46  ;;  %v8027_v60 = vld [vmem:[#allocation4 + $0x4c8] sm:$0xf]  ;;  %v7772_v12 = vor.u32 %v10450_v1, %v7771_v58 }
 0x12f   :  { %2926 = vmatpush.bf16.msrb.mxu2 %v8296_v7  ;;  %2954 = vmatpush.bf16.msra.mxu0 %v7532_v8  ;;  %v7611_v7 = vld [vmem:[#allocation4 + $0x188] sm:$0xf]  ;;  %v10410_v8 = vld [vmem:[#allocation4 + $0x194] sm:$0xf0]  ;;  %v8360_v28 = vor.u32 %v10595_v18, %v8357_v20 }
 0x130   :  { %v1175_v36 = vmax.f32 %v1158_v24, 0.0  ;;  %v7612_v17 = vor.u32 %v10410_v8, %v7611_v7  ;;  %v7435_v24 = vld [vmem:[#allocation4 + $0x28] sm:$0xf]  ;;  %v8028_v7 = vor.u32 %v10514_v61, %v8027_v60  ;;  %v10486_v8 = vld [vmem:[#allocation4 + $0x3f4] sm:$0xf0] }
 0x131   :  { %2919 = vmatpush.bf16.msrb.mxu1 %v8056_v37  ;;  %v7547_v4 = vld [vmem:[#allocation4 + $0x108] sm:$0xf]  ;;  %v10434_v60 = vld [vmem:[#allocation4 + $0x254] sm:$0xf0] }
 0x132   :  { %v11418_v42 = vpack.c.bf16 %v1175_v36, %v1167_v35  ;;  %v7579_v35 = vld [vmem:[#allocation4 + $0x148] sm:$0xf]  ;;  %v10402_v36 = vld [vmem:[#allocation4 + $0x154] sm:$0xf0] }
 0x133   :  { %2927 = vmatpush.bf16.msrb.mxu2 %v8280_v25  ;;  %2955 = vmatpush.bf16.msra.mxu0 %v7516_v26  ;;  %v10366_v25 = vld [vmem:[#allocation4 + $0x34] sm:$0xf0]  ;;  %v10555_v26 = vld [vmem:[#allocation4 + $0x624] sm:$0xf]  ;;  %v7580_v45 = vor.u32 %v10402_v36, %v7579_v35  ;;  %v7915_v6 = vld [vmem:[#allocation4 + $0x3e8] sm:$0xf] }
 0x134   :  { %2836 = vmatmul.bf16.vlgmr.msrb.gmra.mxu3 %v11418_v42  ;;  %2920 = vmatmul.bf16.vlgmr.msrb.gmra.mxu1 %v11407_v13  ;;  %v7436_v33 = vor.u32 %v10366_v25, %v7435_v24  ;;  %v8200_v37 = vor.u32 %v10555_v26, %v8197_v27  ;;  %v7755_v18 = vld [vmem:[#allocation4 + $0x2a8] sm:$0xf]  ;;  %v7916_v20 = vor.u32 %v10486_v8, %v7915_v6  ;;  %v10482_v24 = vld [vmem:[#allocation4 + $0x3d4] sm:$0xf0] }
 0x135   :  { %2940 = vmatpush.bf16.msrb.mxu3 %v8424_v38  ;;  %2968 = vmatpush.bf16.msra.mxu1 %v7660_v39  ;;  %v10551_v38 = vld [vmem:[#allocation4 + $0x604] sm:$0xf]  ;;  %v7419_v39 = vld [vmem:[#allocation4 + $0x8] sm:$0xf]  ;;  %v10546_v26 = vld [vmem:[#allocation4 + $0x5d4] sm:$0xf0]  ;;  %v7900_v34 = vor.u32 %v10482_v24, %v7899_v22 }
 0x136   :  { %v7420_v49 = vor.u32 %v10362_v40, %v7419_v39  ;;  %v8155_v25 = vld [vmem:[#allocation4 + $0x5c8] sm:$0xf]  ;;  %v10542_v40 = vld [vmem:[#allocation4 + $0x5b4] sm:$0xf0]  ;;  %v10388_v24 = vld [vmem:[#allocation4 + $0xec] sm:$0xf] }
 0x137   :  { %2928 = vmatpush.bf16.msrb.mxu2 %v8264_v63  ;;  %2956 = vmatpush.bf16.msra.mxu0 %v7500_v43  ;;  %v8043_v63 = vld [vmem:[#allocation4 + $0x4e8] sm:$0xf]  ;;  %v10518_v43 = vld [vmem:[#allocation4 + $0x4f4] sm:$0xf0]  ;;  %v8156_v35 = vor.u32 %v10546_v26, %v8155_v25  ;;  %v7533_v25 = vld [vmem:[#allocation4 + $0xf8] sm:$0xf0] }
 0x138   :  { %v7739_v31 = vld [vmem:[#allocation4 + $0x288] sm:$0xf]  ;;  %v10490_v22 = vld [vmem:[#allocation4 + $0x414] sm:$0xf0] }
 0x139   :  { %2941 = vmatpush.bf16.msrb.mxu3 %v8408_v50  ;;  %2969 = vmatpush.bf16.msra.mxu1 %v7644_v51  ;;  %v8325_v50 = vld [vmem:[#allocation4 + $0x730] sm:$0xf0]  ;;  %v7563_v51 = vld [vmem:[#allocation4 + $0x128] sm:$0xf] }
 0x13a   :  { %v8328_v30 = vor.u32 %v10587_v48, %v8325_v50  ;;  %v7564_v62 = vor.u32 %v10398_v52, %v7563_v51  ;;  %v7883_v36 = vld [vmem:[#allocation4 + $0x3a8] sm:$0xf]  ;;  %v10474_v50 = vld [vmem:[#allocation4 + $0x394] sm:$0xf0] }
 0x13b   :  { %2929 = vmatpush.bf16.msrb.mxu2 %v8248_v54  ;;  %2957 = vmatpush.bf16.msra.mxu0 %v7484_v55  ;;  %v8184_v54 = vor.u32 %v10551_v38, %v8181_v56  ;;  %v8044_v55 = vor.u32 %v10518_v43, %v8043_v63  ;;  %v10478_v38 = vld [vmem:[#allocation4 + $0x3b4] sm:$0xf0]  ;;  %v8139_v39 = vld [vmem:[#allocation4 + $0x5a8] sm:$0xf] }
 0x13c   :  { %v7979_v63 = vld [vmem:[#allocation4 + $0x468] sm:$0xf]  ;;  %v10502_v43 = vld [vmem:[#allocation4 + $0x474] sm:$0xf0]  ;;  %v7884_v46 = vor.u32 %v10478_v38, %v7883_v36  ;;  %v8140_v47 = vor.u32 %v10542_v40, %v8139_v39  ;;  %v7536_v38 = vor.u32 %v10388_v24, %v7533_v25  ;;  %v7469_v24 = vld [vmem:[#allocation4 + $0x78] sm:$0xf0] }
 0x13d   :  { %2942 = vmatpush.bf16.msrb.mxu3 %v8392_v2  ;;  %2970 = vmatpush.bf16.msra.mxu1 %v7628_v3  ;;  %v10583_v2 = vld [vmem:[#allocation4 + $0x704] sm:$0xf]  ;;  %v8309_v3 = vld [vmem:[#allocation4 + $0x710] sm:$0xf0]  ;;  %v7867_v48 = vld [vmem:[#allocation4 + $0x388] sm:$0xf] }
 0x13e   :  { %2878 = vmatmul.bf16.vlgmr.msra.gmra.mxu2 %v11396_v32  ;;  %v8123_v51 = vld [vmem:[#allocation4 + $0x588] sm:$0xf]  ;;  %v10538_v52 = vld [vmem:[#allocation4 + $0x594] sm:$0xf0]  ;;  %v7868_v61 = vor.u32 %v10474_v50, %v7867_v48 }
 0x13f   :  { %2958 = vmatpush.bf16.msra.mxu0 %v7468_v5  ;;  %2930 = vmatpush.bf16.msrb.mxu2 %v8232_v9  ;;  %v10394_v5 = vld [vmem:[#allocation4 + $0x114] sm:$0xf0]  ;;  %v8171_v9 = vld [vmem:[#allocation4 + $0x5e8] sm:$0xf] }
 0x140   :  { %v8172_v21 = vor.u32 %v10550_v11, %v8171_v9  ;;  %v7707_v58 = vld [vmem:[#allocation4 + $0x248] sm:$0xf]  ;;  %v10430_v9 = vld [vmem:[#allocation4 + $0x234] sm:$0xf0] }
 0x141   :  { %2943 = vmatpush.bf16.msrb.mxu3 %v8376_v16  ;;  %2971 = vmatpush.bf16.msra.mxu1 %v7612_v17  ;;  %v8312_v16 = vor.u32 %v10583_v2, %v8309_v3  ;;  %v7548_v17 = vor.u32 %v10394_v5, %v7547_v4  ;;  %v10470_v2 = vld [vmem:[#allocation4 + $0x374] sm:$0xf0]  ;;  %v8107_v3 = vld [vmem:[#allocation4 + $0x568] sm:$0xf]  ;;  %v7708_v5 = vor.u32 %v10434_v60, %v7707_v58  ;;  %v10380_v58 = vld [vmem:[#allocation4 + $0xac] sm:$0xf] }
 0x142   :  { %v10534_v4 = vld [vmem:[#allocation4 + $0x574] sm:$0xf0]  ;;  %v7947_v6 = vld [vmem:[#allocation4 + $0x428] sm:$0xf]  ;;  %v7501_v60 = vld [vmem:[#allocation4 + $0xb8] sm:$0xf0] }
 0x143   :  { %2959 = vmatpush.bf16.msra.mxu0 %v7452_v19  ;;  %2931 = vmatpush.bf16.msrb.mxu2 %v8216_v23  ;;  %v10446_v19 = vld [vmem:[#allocation4 + $0x2b4] sm:$0xf0]  ;;  %v8012_v23 = vor.u32 %v10510_v15, %v8011_v14  ;;  %v7691_v8 = vld [vmem:[#allocation4 + $0x228] sm:$0xf] }
 0x144   :  { %2892 = vmatmul.bf16.vlgmr.msra.gmra.mxu3 %v11399_v59  ;;  %v7756_v27 = vor.u32 %v10446_v19, %v7755_v18  ;;  %v7835_v14 = vld [vmem:[#allocation4 + $0x348] sm:$0xf]  ;;  %v10530_v18 = vld [vmem:[#allocation4 + $0x554] sm:$0xf0]  ;;  %v7692_v19 = vor.u32 %v10430_v9, %v7691_v8  ;;  %v7645_v8 = vld [vmem:[#allocation4 + $0x1d8] sm:$0xf0] }
 0x145   :  { %2944 = vmatpush.bf16.msrb.mxu3 %v8360_v28  ;;  %2972 = vmatpush.bf16.msra.mxu1 %v7596_v29  ;;  %v7995_v28 = vld [vmem:[#allocation4 + $0x488] sm:$0xf]  ;;  %v10506_v29 = vld [vmem:[#allocation4 + $0x494] sm:$0xf0]  ;;  %v10376_v9 = vld [vmem:[#allocation4 + $0x8c] sm:$0xf] }
 0x146   :  { %v10526_v36 = vld [vmem:[#allocation4 + $0x534] sm:$0xf0]  ;;  %v8283_v40 = vld [vmem:[#allocation4 + $0x6c8] sm:$0xf] }
 0x147   :  { %2960 = vmatpush.bf16.msra.mxu0 %v7436_v33  ;;  %2932 = vmatpush.bf16.msrb.mxu2 %v8200_v37  ;;  %v10442_v33 = vld [vmem:[#allocation4 + $0x294] sm:$0xf0]  ;;  %v7996_v37 = vor.u32 %v10506_v29, %v7995_v28  ;;  %v8299_v28 = vld [vmem:[#allocation4 + $0x6e8] sm:$0xf] }
 0x148   :  { %v7740_v56 = vor.u32 %v10442_v33, %v7739_v31  ;;  %v10582_v29 = vld [vmem:[#allocation4 + $0x6f4] sm:$0xf0]  ;;  %v7819_v31 = vld [vmem:[#allocation4 + $0x328] sm:$0xf] }
 0x149   :  { %2945 = vmatpush.bf16.msrb.mxu3 %v8344_v44  ;;  %2973 = vmatpush.bf16.msra.mxu1 %v7580_v45  ;;  %v7723_v44 = vld [vmem:[#allocation4 + $0x268] sm:$0xf]  ;;  %v10438_v45 = vld [vmem:[#allocation4 + $0x274] sm:$0xf0]  ;;  %v8300_v39 = vor.u32 %v10582_v29, %v8299_v28 }
 0x14a   :  { %v8059_v48 = vld [vmem:[#allocation4 + $0x508] sm:$0xf]  ;;  %v10566_v29 = vld [vmem:[#allocation4 + $0x674] sm:$0xf0] }
 0x14b   :  { %2961 = vmatpush.bf16.msra.mxu0 %v7420_v49  ;;  %2933 = vmatpush.bf16.msrb.mxu2 %v8184_v54  ;;  %v7980_v49 = vor.u32 %v10502_v43, %v7979_v63  ;;  %v7724_v54 = vor.u32 %v10438_v45, %v7723_v44  ;;  %v7517_v63 = vld [vmem:[#allocation4 + $0xd8] sm:$0xf0]  ;;  %v10578_v45 = vld [vmem:[#allocation4 + $0x6d4] sm:$0xf0]  ;;  %v8427_v50 = vld [vmem:[#allocation4 + $0x7e8] sm:$0xf] }
 0x14c   :  { %v8235_v28 = vld [vmem:[#allocation4 + $0x668] sm:$0xf] }
 0x14d   :  { %2946 = vmatpush.bf16.msrb.mxu3 %v8328_v30  ;;  %2974 = vmatpush.bf16.msra.mxu1 %v7564_v62  ;;  %v8124_v30 = vor.u32 %v10538_v52, %v8123_v51  ;;  %v7851_v62 = vld [vmem:[#allocation4 + $0x368] sm:$0xf]  ;;  %v10614_v52 = vld [vmem:[#allocation4 + $0x7f4] sm:$0xf0] }
 0x14e   :  { %2962 = vmatmul.bf16.vlgmr.msra.gmra.mxu0 %v11388_v41  ;;  %2934 = vmatmul.bf16.vlgmr.msrb.gmra.mxu2 %v11414_v10  ;;  %v7852_v11 = vor.u32 %v10470_v2, %v7851_v62  ;;  %v8428_v62 = vor.u32 %v10614_v52, %v8427_v50  ;;  %v8267_v2 = vld [vmem:[#allocation4 + $0x6a8] sm:$0xf]  ;;  %v7437_v50 = vld [vmem:[#allocation4 + $0x38] sm:$0xf0] }
 0x14f   :  { %3010 = vmatpush.bf16.msrb.mxu0 %v8044_v55  ;;  %2982 = vmatpush.bf16.msra.mxu2 %v7788_v57  ;;  %v7963_v55 = vld [vmem:[#allocation4 + $0x448] sm:$0xf]  ;;  %v10498_v57 = vld [vmem:[#allocation4 + $0x454] sm:$0xf0] }
 0x150   :  { %v7964_v1 = vor.u32 %v10498_v57, %v7963_v55  ;;  %v7661_v55 = vld [vmem:[#allocation4 + $0x1f8] sm:$0xf0]  ;;  %v8284_v57 = vor.u32 %v10578_v45, %v8283_v40 }
 0x151   :  { %2947 = vmatpush.bf16.msrb.mxu3 %v8312_v16  ;;  %2975 = vmatpush.bf16.msra.mxu1 %v7548_v17  ;;  %v10466_v16 = vld [vmem:[#allocation4 + $0x354] sm:$0xf0]  ;;  %v8091_v17 = vld [vmem:[#allocation4 + $0x548] sm:$0xf] }
 0x152   :  { %v7836_v26 = vor.u32 %v10466_v16, %v7835_v14  ;;  %v8251_v16 = vld [vmem:[#allocation4 + $0x688] sm:$0xf] }
 0x153   :  { %3011 = vmatpush.bf16.msrb.mxu0 %v8028_v7  ;;  %2983 = vmatpush.bf16.msra.mxu2 %v7772_v12  ;;  %v10494_v7 = vld [vmem:[#allocation4 + $0x434] sm:$0xf0]  ;;  %v8108_v12 = vor.u32 %v10534_v4, %v8107_v3  ;;  %v8411_v4 = vld [vmem:[#allocation4 + $0x7c8] sm:$0xf] }
 0x154   :  { %2976 = vmatmul.bf16.vlgmr.msra.gmra.mxu1 %v11391_v0  ;;  %2948 = vmatmul.bf16.vlgmr.msrb.gmra.mxu3 %v11418_v42  ;;  %v7948_v15 = vor.u32 %v10494_v7, %v7947_v6  ;;  %v10574_v3 = vld [vmem:[#allocation4 + $0x6b4] sm:$0xf0]  ;;  %v10416_v7 = vld [vmem:[#allocation4 + $0x1cc] sm:$0xf] }
 0x155   :  { %2996 = vmatpush.bf16.msra.mxu3 %v7916_v20  ;;  %3024 = vmatpush.bf16.msrb.mxu1 %v8172_v21  ;;  %v7675_v20 = vld [vmem:[#allocation4 + $0x208] sm:$0xf]  ;;  %v10610_v6 = vld [vmem:[#allocation4 + $0x7d4] sm:$0xf0] }
 0x156   :  { %v7931_v21 = vld [vmem:[#allocation4 + $0x408] sm:$0xf]  ;;  %v8412_v14 = vor.u32 %v10610_v6, %v8411_v4  ;;  %v10516_v4 = vld [vmem:[#allocation4 + $0x4ec] sm:$0xf] }
 0x157   :  { %3012 = vmatpush.bf16.msrb.mxu0 %v8012_v23  ;;  %2984 = vmatpush.bf16.msra.mxu2 %v7756_v27  ;;  %v10426_v23 = vld [vmem:[#allocation4 + $0x214] sm:$0xf0]  ;;  %v8092_v27 = vor.u32 %v10530_v18, %v8091_v17  ;;  %v7932_v33 = vor.u32 %v10490_v22, %v7931_v21  ;;  %v8395_v18 = vld [vmem:[#allocation4 + $0x7a8] sm:$0xf]  ;;  %v10412_v21 = vld [vmem:[#allocation4 + $0x1ac] sm:$0xf] }
 0x158   :  { %v10570_v17 = vld [vmem:[#allocation4 + $0x694] sm:$0xf0]  ;;  %v7629_v22 = vld [vmem:[#allocation4 + $0x1b8] sm:$0xf0] }
 0x159   :  { %2997 = vmatpush.bf16.msra.mxu3 %v7900_v34  ;;  %3025 = vmatpush.bf16.msrb.mxu1 %v8156_v35  ;;  %v10462_v34 = vld [vmem:[#allocation4 + $0x334] sm:$0xf0]  ;;  %v8075_v35 = vld [vmem:[#allocation4 + $0x528] sm:$0xf]  ;;  %v8252_v25 = vor.u32 %v10570_v17, %v8251_v16 }
 0x15a   :  { %v7820_v43 = vor.u32 %v10462_v34, %v7819_v31  ;;  %v8076_v44 = vor.u32 %v10526_v36, %v8075_v35  ;;  %v8379_v31 = vld [vmem:[#allocation4 + $0x788] sm:$0xf]  ;;  %v10602_v34 = vld [vmem:[#allocation4 + $0x794] sm:$0xf0]  ;;  %v10408_v35 = vld [vmem:[#allocation4 + $0x18c] sm:$0xf] }
 0x15b   :  { %3013 = vmatpush.bf16.msrb.mxu0 %v7996_v37  ;;  %2985 = vmatpush.bf16.msra.mxu2 %v7740_v56  ;;  %v7676_v37 = vor.u32 %v10426_v23, %v7675_v20  ;;  %v10384_v56 = vld [vmem:[#allocation4 + $0xcc] sm:$0xf]  ;;  %v10606_v20 = vld [vmem:[#allocation4 + $0x7b4] sm:$0xf0]  ;;  %v7613_v36 = vld [vmem:[#allocation4 + $0x198] sm:$0xf0]  ;;  %v8380_v40 = vor.u32 %v10602_v34, %v8379_v31 }
 0x15c   :  { %v7520_v51 = vor.u32 %v10384_v56, %v7517_v63  ;;  %v10372_v23 = vld [vmem:[#allocation4 + $0x6c] sm:$0xf]  ;;  %v7616_v56 = vor.u32 %v10408_v35, %v7613_v36  ;;  %v8219_v63 = vld [vmem:[#allocation4 + $0x648] sm:$0xf]  ;;  %v10590_v16 = vld [vmem:[#allocation4 + $0x734] sm:$0xf0] }
 0x15d   :  { %2998 = vmatpush.bf16.msra.mxu3 %v7884_v46  ;;  %3026 = vmatpush.bf16.msrb.mxu1 %v8140_v47  ;;  %v7803_v46 = vld [vmem:[#allocation4 + $0x308] sm:$0xf]  ;;  %v10458_v47 = vld [vmem:[#allocation4 + $0x314] sm:$0xf0]  ;;  %v10392_v31 = vld [vmem:[#allocation4 + $0x10c] sm:$0xf] }
 0x15e   :  { %v10484_v35 = vld [vmem:[#allocation4 + $0x3ec] sm:$0xf]  ;;  %v7917_v36 = vld [vmem:[#allocation4 + $0x3f8] sm:$0xf0] }
 0x15f   :  { %3014 = vmatpush.bf16.msrb.mxu0 %v7980_v49  ;;  %2986 = vmatpush.bf16.msra.mxu2 %v7724_v54  ;;  %v10522_v49 = vld [vmem:[#allocation4 + $0x514] sm:$0xf0]  ;;  %v10420_v54 = vld [vmem:[#allocation4 + $0x1ec] sm:$0xf] }
 0x161   :  { %2999 = vmatpush.bf16.msra.mxu3 %v7868_v61  ;;  %3027 = vmatpush.bf16.msrb.mxu1 %v8124_v30  ;;  %v7804_v61 = vor.u32 %v10458_v47, %v7803_v46  ;;  %v8060_v30 = vor.u32 %v10522_v49, %v8059_v48  ;;  %v10598_v46 = vld [vmem:[#allocation4 + $0x774] sm:$0xf0]  ;;  %v10404_v47 = vld [vmem:[#allocation4 + $0x16c] sm:$0xf]  ;;  %v7597_v48 = vld [vmem:[#allocation4 + $0x178] sm:$0xf0] }
 0x162   :  { %v10364_v49 = vld [vmem:[#allocation4 + $0x2c] sm:$0xf] }
 0x163   :  { %3015 = vmatpush.bf16.msrb.mxu0 %v7964_v1  ;;  %2987 = vmatpush.bf16.msra.mxu2 %v7708_v5  ;;  %v7664_v1 = vor.u32 %v10420_v54, %v7661_v55  ;;  %v7504_v5 = vor.u32 %v10380_v58, %v7501_v60  ;;  %v7600_v54 = vor.u32 %v10404_v47, %v7597_v48  ;;  %v8203_v55 = vld [vmem:[#allocation4 + $0x628] sm:$0xf] }
 0x164   :  { %v8347_v58 = vld [vmem:[#allocation4 + $0x748] sm:$0xf]  ;;  %v7440_v60 = vor.u32 %v10364_v49, %v7437_v50  ;;  %v10480_v49 = vld [vmem:[#allocation4 + $0x3cc] sm:$0xf]  ;;  %v7901_v50 = vld [vmem:[#allocation4 + $0x3d8] sm:$0xf0] }
 0x165   :  { %3000 = vmatpush.bf16.msra.mxu3 %v7852_v11  ;;  %3028 = vmatpush.bf16.msrb.mxu1 %v8108_v12  ;;  %v7485_v11 = vld [vmem:[#allocation4 + $0x98] sm:$0xf0]  ;;  %v8268_v12 = vor.u32 %v10574_v3, %v8267_v2 }
 0x166   :  { %v7421_v2 = vld [vmem:[#allocation4 + $0x18] sm:$0xf0] }
 0x167   :  { %3016 = vmatpush.bf16.msrb.mxu0 %v7948_v15  ;;  %2988 = vmatpush.bf16.msra.mxu2 %v7692_v19  ;;  %v7648_v15 = vor.u32 %v10416_v7, %v7645_v8  ;;  %v7488_v19 = vor.u32 %v10376_v9, %v7485_v11  ;;  %v8187_v8 = vld [vmem:[#allocation4 + $0x608] sm:$0xf]  ;;  %v10554_v9 = vld [vmem:[#allocation4 + $0x614] sm:$0xf0]  ;;  %v10452_v11 = vld [vmem:[#allocation4 + $0x2ec] sm:$0xf] }
 0x169   :  { %3001 = vmatpush.bf16.msra.mxu3 %v7836_v26  ;;  %3029 = vmatpush.bf16.msrb.mxu1 %v8092_v27  ;;  %v8396_v26 = vor.u32 %v10606_v20, %v8395_v18  ;;  %v7632_v27 = vor.u32 %v10412_v21, %v7629_v22  ;;  %v10396_v18 = vld [vmem:[#allocation4 + $0x12c] sm:$0xf]  ;;  %v8188_v20 = vor.u32 %v10554_v9, %v8187_v8  ;;  %v8029_v22 = vld [vmem:[#allocation4 + $0x4d8] sm:$0xf0] }
 0x16a   :  { %v10512_v21 = vld [vmem:[#allocation4 + $0x4cc] sm:$0xf]  ;;  %v7725_v9 = vld [vmem:[#allocation4 + $0x278] sm:$0xf0] }
 0x16b   :  { %3017 = vmatpush.bf16.msrb.mxu0 %v7932_v33  ;;  %2989 = vmatpush.bf16.msra.mxu2 %v7676_v37  ;;  %v7472_v33 = vor.u32 %v10372_v23, %v7469_v24  ;;  %v10368_v37 = vld [vmem:[#allocation4 + $0x4c] sm:$0xf]  ;;  %v8032_v34 = vor.u32 %v10512_v21, %v8029_v22  ;;  %v11436_v21 = vpop.f32.mrf.mxu0 }
 0x16c   :  { %v10436_v8 = vld [vmem:[#allocation4 + $0x26c] sm:$0xf] }
 0x16d   :  { %3002 = vmatpush.bf16.msra.mxu3 %v7820_v43  ;;  %3030 = vmatpush.bf16.msrb.mxu1 %v8076_v44  ;;  %v10562_v43 = vld [vmem:[#allocation4 + $0x654] sm:$0xf0]  ;;  %v8363_v44 = vld [vmem:[#allocation4 + $0x768] sm:$0xf]  ;;  %v10432_v22 = vld [vmem:[#allocation4 + $0x24c] sm:$0xf] }
 0x16e   :  { %2990 = vmatmul.bf16.vlgmr.msra.gmra.mxu2 %v11396_v32  ;;  %3018 = vmatmul.bf16.vlgmr.msrb.gmra.mxu0 %v11404_v53  ;;  %v8364_v52 = vor.u32 %v10598_v46, %v8363_v44  ;;  %v7920_v44 = vor.u32 %v10484_v35, %v7917_v36  ;;  %v7757_v46 = vld [vmem:[#allocation4 + $0x2b8] sm:$0xf0]  ;;  %v11438_v35 = vpop.f32.mrf.mxu1 }
 0x16f   :  { %3066 = vmatpush.bf16.msra.mxu0 %v7536_v38  ;;  %3038 = vmatpush.bf16.msrb.mxu2 %v8300_v39  ;;  %v7453_v38 = vld [vmem:[#allocation4 + $0x58] sm:$0xf0]  ;;  %v8236_v39 = vor.u32 %v10566_v29, %v8235_v28  ;;  %v10586_v29 = vld [vmem:[#allocation4 + $0x714] sm:$0xf0] }
 0x170   :  { %v7456_v45 = vor.u32 %v10368_v37, %v7453_v38  ;;  %v10548_v37 = vld [vmem:[#allocation4 + $0x5ec] sm:$0xf]  ;;  %v8173_v38 = vld [vmem:[#allocation4 + $0x5f8] sm:$0xf0] }
 0x171   :  { %3003 = vmatpush.bf16.msra.mxu3 %v7804_v61  ;;  %3031 = vmatpush.bf16.msrb.mxu1 %v8060_v30  ;;  %v10594_v61 = vld [vmem:[#allocation4 + $0x754] sm:$0xf0]  ;;  %v10400_v30 = vld [vmem:[#allocation4 + $0x14c] sm:$0xf]  ;;  %v8176_v47 = vor.u32 %v10548_v37, %v8173_v38  ;;  %v7693_v38 = vld [vmem:[#allocation4 + $0x238] sm:$0xf0] }
 0x172   :  { %v8348_v6 = vor.u32 %v10594_v61, %v8347_v58  ;;  %v10440_v58 = vld [vmem:[#allocation4 + $0x28c] sm:$0xf] }
 0x173   :  { %3067 = vmatpush.bf16.msra.mxu0 %v7520_v51  ;;  %3039 = vmatpush.bf16.msrb.mxu2 %v8284_v57  ;;  %v8220_v51 = vor.u32 %v10562_v43, %v8219_v63  ;;  %v10558_v57 = vld [vmem:[#allocation4 + $0x634] sm:$0xf0]  ;;  %v10428_v37 = vld [vmem:[#allocation4 + $0x22c] sm:$0xf] }
 0x174   :  { %3004 = vmatmul.bf16.vlgmr.msra.gmra.mxu3 %v11399_v59  ;;  %3032 = vmatmul.bf16.vlgmr.msrb.gmra.mxu1 %v11407_v13  ;;  %v8204_v3 = vor.u32 %v10558_v57, %v8203_v55  ;;  %v7997_v55 = vld [vmem:[#allocation4 + $0x498] sm:$0xf0] }
 0x175   :  { %3052 = vmatpush.bf16.msrb.mxu3 %v8428_v62  ;;  %3080 = vmatpush.bf16.msra.mxu1 %v7664_v1  ;;  %v7581_v62 = vld [vmem:[#allocation4 + $0x158] sm:$0xf0]  ;;  %v10360_v1 = vld [vmem:[#allocation4 + $0xc] sm:$0xf] }
 0x176   :  { %v7584_v7 = vor.u32 %v10400_v30, %v7581_v62  ;;  %v10476_v62 = vld [vmem:[#allocation4 + $0x3ac] sm:$0xf] }
 0x177   :  { %3068 = vmatpush.bf16.msra.mxu0 %v7504_v5  ;;  %3040 = vmatpush.bf16.msrb.mxu2 %v8268_v12  ;;  %v8045_v5 = vld [vmem:[#allocation4 + $0x4f8] sm:$0xf0]  ;;  %v7424_v12 = vor.u32 %v10360_v1, %v7421_v2  ;;  %v10540_v2 = vld [vmem:[#allocation4 + $0x5ac] sm:$0xf] }
 0x178   :  { %v8048_v17 = vor.u32 %v10516_v4, %v8045_v5  ;;  %v7885_v1 = vld [vmem:[#allocation4 + $0x3b8] sm:$0xf0]  ;;  %v10500_v4 = vld [vmem:[#allocation4 + $0x46c] sm:$0xf] }
 0x179   :  { %3053 = vmatpush.bf16.msrb.mxu3 %v8412_v14  ;;  %3081 = vmatpush.bf16.msra.mxu1 %v7648_v15  ;;  %v7789_v14 = vld [vmem:[#allocation4 + $0x2f8] sm:$0xf0]  ;;  %v8331_v15 = vld [vmem:[#allocation4 + $0x728] sm:$0xf] }
 0x17a   :  { %v7792_v23 = vor.u32 %v10452_v11, %v7789_v14  ;;  %v8332_v24 = vor.u32 %v10590_v16, %v8331_v15  ;;  %v7981_v5 = vld [vmem:[#allocation4 + $0x478] sm:$0xf0]  ;;  %v10472_v14 = vld [vmem:[#allocation4 + $0x38c] sm:$0xf] }
 0x17b   :  { %3069 = vmatpush.bf16.msra.mxu0 %v7488_v19  ;;  %3041 = vmatpush.bf16.msrb.mxu2 %v8252_v25  ;;  %v7565_v19 = vld [vmem:[#allocation4 + $0x138] sm:$0xf0]  ;;  %v10448_v25 = vld [vmem:[#allocation4 + $0x2cc] sm:$0xf] }
 0x17c   :  { %v7568_v28 = vor.u32 %v10396_v18, %v7565_v19  ;;  %v7869_v15 = vld [vmem:[#allocation4 + $0x398] sm:$0xf0]  ;;  %v10536_v16 = vld [vmem:[#allocation4 + $0x58c] sm:$0xf] }
 0x17d   :  { %3054 = vmatpush.bf16.msrb.mxu3 %v8396_v26  ;;  %3082 = vmatpush.bf16.msra.mxu1 %v7632_v27  ;;  %v7773_v26 = vld [vmem:[#allocation4 + $0x2d8] sm:$0xf0]  ;;  %v8315_v27 = vld [vmem:[#allocation4 + $0x708] sm:$0xf]  ;;  %v10496_v18 = vld [vmem:[#allocation4 + $0x44c] sm:$0xf] }
 0x17e   :  { %v8316_v63 = vor.u32 %v10586_v29, %v8315_v27  ;;  %v7965_v19 = vld [vmem:[#allocation4 + $0x458] sm:$0xf0] }
 0x17f   :  { %3070 = vmatpush.bf16.msra.mxu0 %v7472_v33  ;;  %3042 = vmatpush.bf16.msrb.mxu2 %v8236_v39  ;;  %v7549_v33 = vld [vmem:[#allocation4 + $0x118] sm:$0xf0]  ;;  %v10508_v39 = vld [vmem:[#allocation4 + $0x4ac] sm:$0xf] }
 0x180   :  { %v7552_v43 = vor.u32 %v10392_v31, %v7549_v33  ;;  %v7853_v27 = vld [vmem:[#allocation4 + $0x378] sm:$0xf0]  ;;  %v10492_v31 = vld [vmem:[#allocation4 + $0x42c] sm:$0xf] }
 0x181   :  { %3055 = vmatpush.bf16.msrb.mxu3 %v8380_v40  ;;  %3083 = vmatpush.bf16.msra.mxu1 %v7616_v56  ;;  %v8013_v40 = vld [vmem:[#allocation4 + $0x4b8] sm:$0xf0]  ;;  %v7776_v56 = vor.u32 %v10448_v25, %v7773_v26  ;;  %v7968_v25 = vor.u32 %v10496_v18, %v7965_v19  ;;  %v10468_v26 = vld [vmem:[#allocation4 + $0x36c] sm:$0xf]  ;;  %v11446_v19 = vpop.f32.mrf.mxu3 }
 0x182   :  { %v8016_v48 = vor.u32 %v10508_v39, %v8013_v40  ;;  %v8109_v29 = vld [vmem:[#allocation4 + $0x578] sm:$0xf0]  ;;  %v7856_v36 = vor.u32 %v10468_v26, %v7853_v27  ;;  %v10620_v27 = vld [vmem:[#allocation6 + $0x28] sm:$0xff] }
 0x183   :  { %3071 = vmatpush.bf16.msra.mxu0 %v7456_v45  ;;  %3043 = vmatpush.bf16.msrb.mxu2 %v8220_v51  ;;  %v10444_v45 = vld [vmem:[#allocation4 + $0x2ac] sm:$0xf]  ;;  %v7949_v33 = vld [vmem:[#allocation4 + $0x438] sm:$0xf0] }
 0x184   :  { %v10544_v51 = vld [vmem:[#allocation4 + $0x5cc] sm:$0xf]  ;;  %v7760_v57 = vor.u32 %v10444_v45, %v7757_v46  ;;  %v7952_v40 = vor.u32 %v10492_v31, %v7949_v33  ;;  %v7933_v46 = vld [vmem:[#allocation4 + $0x418] sm:$0xf0] }
 0x185   :  { %3056 = vmatpush.bf16.msrb.mxu3 %v8364_v52  ;;  %3084 = vmatpush.bf16.msra.mxu1 %v7600_v54  ;;  %v8157_v52 = vld [vmem:[#allocation4 + $0x5d8] sm:$0xf0]  ;;  %v10504_v54 = vld [vmem:[#allocation4 + $0x48c] sm:$0xf] }
 0x186   :  { %v8160_v61 = vor.u32 %v10544_v51, %v8157_v52  ;;  %v8000_v30 = vor.u32 %v10504_v54, %v7997_v55  ;;  %v10488_v45 = vld [vmem:[#allocation4 + $0x40c] sm:$0xf]  ;;  %v8301_v55 = vld [vmem:[#allocation4 + $0x6f8] sm:$0xf0] }
 0x187   :  { %3072 = vmatpush.bf16.msra.mxu0 %v7440_v60  ;;  %3044 = vmatpush.bf16.msrb.mxu2 %v8204_v3  ;;  %v7741_v60 = vld [vmem:[#allocation4 + $0x298] sm:$0xf0]  ;;  %v10580_v51 = vld [vmem:[#allocation4 + $0x6ec] sm:$0xf]  ;;  %v7936_v54 = vor.u32 %v10488_v45, %v7933_v46 }
 0x188   :  { %v8141_v3 = vld [vmem:[#allocation4 + $0x5b8] sm:$0xf0] }
 0x189   :  { %3057 = vmatpush.bf16.msrb.mxu3 %v8348_v6  ;;  %3085 = vmatpush.bf16.msra.mxu1 %v7584_v7  ;;  %v7744_v6 = vor.u32 %v10440_v58, %v7741_v60  ;;  %v7888_v7 = vor.u32 %v10476_v62, %v7885_v1  ;;  %v8144_v11 = vor.u32 %v10540_v2, %v8141_v3  ;;  %v11440_v58 = vpop.f32.mrf.mxu0  ;;  %v11442_v60 = vpop.f32.mrf.mxu2  ;;  %v10622_v62 = vld [vmem:[#allocation6 + $0x38] sm:$0xff] }
 0x18a   :  { %v8304_v2 = vor.u32 %v10580_v51, %v8301_v55  ;;  %v8413_v26 = vld [vmem:[#allocation4 + $0x7d8] sm:$0xf0]  ;;  %v10628_v51 = vld [vmem:[#allocation6 + $0x68] sm:$0xff] }
 0x18b   :  { %3073 = vmatpush.bf16.msra.mxu0 %v7424_v12  ;;  %3045 = vmatpush.bf16.msrb.mxu2 %v8188_v20  ;;  %v7984_v12 = vor.u32 %v10500_v4, %v7981_v5  ;;  %v7728_v20 = vor.u32 %v10436_v8, %v7725_v9  ;;  %v10576_v4 = vld [vmem:[#allocation4 + $0x6cc] sm:$0xf]  ;;  %v8285_v5 = vld [vmem:[#allocation4 + $0x6d8] sm:$0xf0] }
 0x18c   :  { %v7805_v8 = vld [vmem:[#allocation4 + $0x318] sm:$0xf0]  ;;  %v10520_v9 = vld [vmem:[#allocation4 + $0x50c] sm:$0xf] }
 0x18d   :  { %3058 = vmatpush.bf16.msrb.mxu3 %v8332_v24  ;;  %3086 = vmatpush.bf16.msra.mxu1 %v7568_v28  ;;  %v10532_v28 = vld [vmem:[#allocation4 + $0x56c] sm:$0xf]  ;;  %v8237_v45 = vld [vmem:[#allocation4 + $0x678] sm:$0xf0] }
 0x18e   :  { %3074 = vmatmul.bf16.vlgmr.msra.gmra.mxu0 %v11388_v41  ;;  %3046 = vmatmul.bf16.vlgmr.msrb.gmra.mxu2 %v11414_v10  ;;  %v7904_v41 = vor.u32 %v10480_v49, %v7901_v50  ;;  %v8112_v39 = vor.u32 %v10532_v28, %v8109_v29  ;;  %v10424_v49 = vld [vmem:[#allocation4 + $0x20c] sm:$0xf]  ;;  %v7677_v50 = vld [vmem:[#allocation4 + $0x218] sm:$0xf0]  ;;  %v11455_v28 = vld [vmem:[%s11664_s4] sm:$0xf] }
 0x18f   :  { %3122 = vmatpush.bf16.msrb.mxu0 %v8048_v17  ;;  %3094 = vmatpush.bf16.msra.mxu2 %v7792_v23  ;;  %v8125_v17 = vld [vmem:[#allocation4 + $0x598] sm:$0xf0]  ;;  %v7680_v1 = vor.u32 %v10424_v49, %v7677_v50  ;;  %v2783_v50 = vpop.f32.mrf.mxu3 }
 0x190   :  { %v7709_v23 = vld [vmem:[#allocation4 + $0x258] sm:$0xf0]  ;;  %v8128_v24 = vor.u32 %v10536_v16, %v8125_v17  ;;  %v10621_v16 = vld [vmem:[#allocation6 + $0x30] sm:$0xff]  ;;  %v8288_v17 = vor.u32 %v10576_v4, %v8285_v5 }
 0x191   :  { %3059 = vmatpush.bf16.msrb.mxu3 %v8316_v63  ;;  %3087 = vmatpush.bf16.msra.mxu1 %v7552_v43  ;;  %v7837_v63 = vld [vmem:[#allocation4 + $0x358] sm:$0xf0]  ;;  %v10528_v43 = vld [vmem:[#allocation4 + $0x54c] sm:$0xf]  ;;  %v2769_v31 = vpop.f32.mrf.mxu2 }
 0x192   :  { %v10630_v29 = vld [vmem:[#allocation6 + $0x78] sm:$0xff] }
 0x193   :  { %3123 = vmatpush.bf16.msrb.mxu0 %v8032_v34  ;;  %3095 = vmatpush.bf16.msra.mxu2 %v7776_v56  ;;  %v7712_v34 = vor.u32 %v10432_v22, %v7709_v23  ;;  %v10464_v56 = vld [vmem:[#allocation4 + $0x34c] sm:$0xf]  ;;  %v8269_v23 = vld [vmem:[#allocation4 + $0x6b8] sm:$0xf0] }
 0x194   :  { %3060 = vmatmul.bf16.vlgmr.msrb.gmra.mxu3 %v11418_v42  ;;  %3088 = vmatmul.bf16.vlgmr.msra.gmra.mxu1 %v11391_v0  ;;  %v7872_v0 = vor.u32 %v10472_v14, %v7869_v15  ;;  %v10612_v14 = vld [vmem:[#allocation4 + $0x7ec] sm:$0xf]  ;;  %v8429_v15 = vld [vmem:[#allocation4 + $0x7f8] sm:$0xf0] }
 0x195   :  { %3108 = vmatpush.bf16.msra.mxu3 %v7920_v44  ;;  %3136 = vmatpush.bf16.msrb.mxu1 %v8176_v47  ;;  %v8093_v44 = vld [vmem:[#allocation4 + $0x558] sm:$0xf0]  ;;  %v7696_v47 = vor.u32 %v10428_v37, %v7693_v38  ;;  %v10572_v22 = vld [vmem:[#allocation4 + $0x6ac] sm:$0xf] }
 0x196   :  { %v8096_v52 = vor.u32 %v10528_v43, %v8093_v44  ;;  %v10604_v38 = vld [vmem:[#allocation4 + $0x7ac] sm:$0xf]  ;;  %v10618_v49 = vld [vmem:[#allocation6 + $0x18] sm:$0xff] }
 0x197   :  { %3124 = vmatpush.bf16.msrb.mxu0 %v8016_v48  ;;  %3096 = vmatpush.bf16.msra.mxu2 %v7760_v57  ;;  %v7840_v48 = vor.u32 %v10464_v56, %v7837_v63  ;;  %v10460_v57 = vld [vmem:[#allocation4 + $0x32c] sm:$0xf]  ;;  %v10629_v56 = vld [vmem:[#allocation6 + $0x70] sm:$0xff] }
 0x198   :  { %v10564_v44 = vld [vmem:[#allocation4 + $0x66c] sm:$0xf] }
 0x199   :  { %3109 = vmatpush.bf16.msra.mxu3 %v7904_v41  ;;  %3137 = vmatpush.bf16.msrb.mxu1 %v8160_v61  ;;  %v7821_v41 = vld [vmem:[#allocation4 + $0x338] sm:$0xf0]  ;;  %v10524_v61 = vld [vmem:[#allocation4 + $0x52c] sm:$0xf] }
 0x19a   :  { %v7824_v3 = vor.u32 %v10460_v57, %v7821_v41  ;;  %v10560_v57 = vld [vmem:[#allocation4 + $0x64c] sm:$0xf]  ;;  %v8221_v41 = vld [vmem:[#allocation4 + $0x658] sm:$0xf0] }
 0x19b   :  { %3125 = vmatpush.bf16.msrb.mxu0 %v8000_v30  ;;  %3097 = vmatpush.bf16.msra.mxu2 %v7744_v6  ;;  %v8077_v30 = vld [vmem:[#allocation4 + $0x538] sm:$0xf0]  ;;  %v10456_v6 = vld [vmem:[#allocation4 + $0x30c] sm:$0xf]  ;;  %v8224_v4 = vor.u32 %v10560_v57, %v8221_v41 }
 0x19c   :  { %v7808_v18 = vor.u32 %v10456_v6, %v7805_v8  ;;  %v10556_v6 = vld [vmem:[#allocation4 + $0x62c] sm:$0xf] }
 0x19d   :  { %3110 = vmatpush.bf16.msra.mxu3 %v7888_v7  ;;  %3138 = vmatpush.bf16.msrb.mxu1 %v8144_v11  ;;  %v8080_v7 = vor.u32 %v10524_v61, %v8077_v30  ;;  %v8061_v11 = vld [vmem:[#allocation4 + $0x518] sm:$0xf0] }
 0x19e   :  { %v8365_v30 = vld [vmem:[#allocation4 + $0x778] sm:$0xf0] }
 0x19f   :  { %3126 = vmatpush.bf16.msrb.mxu0 %v7984_v12  ;;  %3098 = vmatpush.bf16.msra.mxu2 %v7728_v20  ;;  %v11444_v12 = vpop.f32.mrf.mxu1  ;;  %v8064_v20 = vor.u32 %v10520_v9, %v8061_v11  ;;  %v10592_v9 = vld [vmem:[#allocation4 + $0x74c] sm:$0xf]  ;;  %v8349_v11 = vld [vmem:[#allocation4 + $0x758] sm:$0xf0] }
 0x1a1   :  { %3111 = vmatpush.bf16.msra.mxu3 %v7872_v0  ;;  %3139 = vmatpush.bf16.msrb.mxu1 %v8128_v24  ;;  %v8432_v0 = vor.u32 %v10612_v14, %v8429_v15  ;;  %v11449_v24 = vpop.f32.mrf.mxu0  ;;  %v10616_v14 = vld [vmem:[#allocation6 + $0x8] sm:$0xff] }
 0x1a3   :  { %3127 = vmatpush.bf16.msrb.mxu0 %v7968_v25  ;;  %3099 = vmatpush.bf16.msra.mxu2 %v7712_v34  ;;  %v10608_v25 = vld [vmem:[#allocation4 + $0x7cc] sm:$0xf] }
 0x1a4   :  { %v8416_v33 = vor.u32 %v10608_v25, %v8413_v26  ;;  %v10568_v34 = vld [vmem:[#allocation4 + $0x68c] sm:$0xf] }
 0x1a5   :  { %3112 = vmatpush.bf16.msra.mxu3 %v7856_v36  ;;  %3140 = vmatpush.bf16.msrb.mxu1 %v8112_v39  ;;  %v8253_v36 = vld [vmem:[#allocation4 + $0x698] sm:$0xf0]  ;;  %v10588_v26 = vld [vmem:[#allocation4 + $0x72c] sm:$0xf] }
 0x1a6   :  { %v8397_v39 = vld [vmem:[#allocation4 + $0x7b8] sm:$0xf0]  ;;  %v8256_v63 = vor.u32 %v10568_v34, %v8253_v36 }
 0x1a7   :  { %3128 = vmatpush.bf16.msrb.mxu0 %v7952_v40  ;;  %3100 = vmatpush.bf16.msra.mxu2 %v7696_v47  ;;  %v11458_v37 = vpop.f32.mrf.mxu1  ;;  %v10619_v40 = vld [vmem:[#allocation6 + $0x20] sm:$0xff]  ;;  %v8400_v43 = vor.u32 %v10604_v38, %v8397_v39  ;;  %v10600_v47 = vld [vmem:[#allocation4 + $0x78c] sm:$0xf] }
 0x1a8   :  { %v10584_v39 = vld [vmem:[#allocation4 + $0x70c] sm:$0xf] }
 0x1a9   :  { %3113 = vmatpush.bf16.msra.mxu3 %v7840_v48  ;;  %3141 = vmatpush.bf16.msrb.mxu1 %v8096_v52  ;;  %v8381_v48 = vld [vmem:[#allocation4 + $0x798] sm:$0xf0]  ;;  %v2797_v52 = vpop.f32.mrf.mxu0 }
 0x1aa   :  { %v8384_v55 = vor.u32 %v10600_v47, %v8381_v48  ;;  %v10623_v47 = vld [vmem:[#allocation6 + $0x40] sm:$0xff] }
 0x1ab   :  { %3129 = vmatpush.bf16.msrb.mxu0 %v7936_v54  ;;  %3101 = vmatpush.bf16.msra.mxu2 %v7680_v1  ;;  %v8240_v54 = vor.u32 %v10564_v44, %v8237_v45  ;;  %v10627_v1 = vld [vmem:[#allocation6 + $0x60] sm:$0xff] }
 0x1ad   :  { %3114 = vmatpush.bf16.msra.mxu3 %v7824_v3  ;;  %3142 = vmatpush.bf16.msrb.mxu1 %v8080_v7  ;;  %v8205_v7 = vld [vmem:[#allocation4 + $0x638] sm:$0xf0] }
 0x1ae   :  { %3130 = vmatmul.bf16.vlgmr.msrb.gmra.mxu0 %v11404_v53  ;;  %3102 = vmatmul.bf16.vlgmr.msra.gmra.mxu2 %v11396_v32  ;;  %v8272_v53 = vor.u32 %v10572_v22, %v8269_v23  ;;  %v1442_v32 = vperm.slane %v11455_v28, 0  ;;  %v8189_v22 = vld [vmem:[#allocation4 + $0x618] sm:$0xf0] }
 0x1af   :  { %3450 = vmatpush.bf16.msra.mxu0 %v10622_v62  ;;  %3150 = vmatpush.bf16.msrb.mxu2 %v8304_v2  ;;  %v10617_v62 = vld [vmem:[#allocation6 + $0x10] sm:$0xff]  ;;  %v2811_v3 = vpop.f32.mrf.mxu1 }
 0x1b0   :  { %v2740_v46 = vadd.f32 %v11436_v21, %v1442_v32  ;;  %v10596_v21 = vld [vmem:[#allocation4 + $0x76c] sm:$0xf] }
 0x1b1   :  { %3115 = vmatpush.bf16.msra.mxu3 %v7808_v18  ;;  %3143 = vmatpush.bf16.msrb.mxu1 %v8064_v20  ;;  %v8368_v5 = vor.u32 %v10596_v21, %v8365_v30  ;;  %v8208_v18 = vor.u32 %v10556_v6, %v8205_v7  ;;  %v8352_v20 = vor.u32 %v10592_v9, %v8349_v11  ;;  %v2851_v25 = vpop.f32.mrf.mxu0 }
 0x1b2   :  { %v2754_v61 = vadd.f32 %v11438_v35, %v2740_v46 }
 0x1b3   :  { %3451 = vmatpush.bf16.msra.mxu0 %v10621_v16  ;;  %3151 = vmatpush.bf16.msrb.mxu2 %v8288_v17  ;;  %v10626_v16 = vld [vmem:[#allocation6 + $0x58] sm:$0xff] }
 0x1b4   :  { %3116 = vmatmul.bf16.vlgmr.msra.gmra.mxu3 %v11399_v59  ;;  %3144 = vmatmul.bf16.vlgmr.msrb.gmra.mxu1 %v11407_v13  ;;  %v2742_v59 = vadd.f32 %v11440_v58, %v1442_v32  ;;  %v2823_v13 = vpop.f32.mrf.mxu2  ;;  %v2768_v58 = vadd.f32 %v11442_v60, %v2754_v61 }
 0x1b5   :  { %3164 = vmatpush.bf16.msrb.mxu3 %v8432_v0  ;;  %3464 = vmatpush.bf16.msra.mxu1 %v10630_v29  ;;  %v10552_v0 = vld [vmem:[#allocation4 + $0x60c] sm:$0xf]  ;;  %v10615_v29 = vld [vmem:[#allocation6] sm:$0xff] }
 0x1b6   :  { %v2756_v2 = vadd.f32 %v11444_v12, %v2742_v59  ;;  %v2782_v8 = vadd.f32 %v11446_v19, %v2768_v58  ;;  %v1443_v59 = vperm.slane %v11455_v28, 1 }
 0x1b7   :  { %3452 = vmatpush.bf16.msra.mxu0 %v10620_v27  ;;  %3152 = vmatpush.bf16.msrb.mxu2 %v8272_v53  ;;  %v2837_v15 = vpop.f32.mrf.mxu3  ;;  %v8333_v27 = vld [vmem:[#allocation4 + $0x738] sm:$0xf0]  ;;  %v2865_v36 = vpop.f32.mrf.mxu1 }
 0x1b8   :  { %v2770_v35 = vadd.f32 %v2769_v31, %v2756_v2  ;;  %v2796_v60 = vadd.f32 %v11449_v24, %v2782_v8  ;;  %v10625_v31 = vld [vmem:[#allocation6 + $0x50] sm:$0xff]  ;;  %v8192_v24 = vor.u32 %v10552_v0, %v8189_v22  ;;  %v8336_v34 = vor.u32 %v10588_v26, %v8333_v27  ;;  %v10635_v0 = vld [vmem:[#allocation6 + $0xa0] sm:$0xff]  ;;  %v10634_v22 = vld [vmem:[#allocation6 + $0x98] sm:$0xff] }
 0x1b9   :  { %3165 = vmatpush.bf16.msrb.mxu3 %v8416_v33  ;;  %3465 = vmatpush.bf16.msra.mxu1 %v10629_v56  ;;  %v10624_v56 = vld [vmem:[#allocation6 + $0x48] sm:$0xff]  ;;  %v2853_v48 = vpop.f32.mrf.mxu0 }
 0x1ba   :  { %v2784_v12 = vadd.f32 %v2783_v50, %v2770_v35  ;;  %v2810_v19 = vadd.f32 %v11458_v37, %v2796_v60  ;;  %v8317_v37 = vld [vmem:[#allocation4 + $0x718] sm:$0xf0]  ;;  %v2854_v57 = vadd.f32 %v2853_v48, %v1443_v59 }
 0x1bb   :  { %3453 = vmatpush.bf16.msra.mxu0 %v10619_v40  ;;  %3153 = vmatpush.bf16.msrb.mxu2 %v8256_v63  ;;  %v8320_v44 = vor.u32 %v10584_v39, %v8317_v37 }
 0x1bc   :  { %v2825_v17 = vpop.f32.mrf.mxu2  ;;  %v2798_v23 = vadd.f32 %v2797_v52, %v2784_v12  ;;  %v2824_v33 = vadd.f32 %v2823_v13, %v2810_v19  ;;  %v2852_v13 = vadd.f32 %v2851_v25, %v1443_v59  ;;  %v10633_v19 = vld [vmem:[#allocation6 + $0x90] sm:$0xff]  ;;  %v10632_v25 = vld [vmem:[#allocation6 + $0x88] sm:$0xff] }
 0x1bd   :  { %3166 = vmatpush.bf16.msrb.mxu3 %v8400_v43  ;;  %3466 = vmatpush.bf16.msra.mxu1 %v10628_v51 }
 0x1be   :  { %v2812_v53 = vadd.f32 %v2811_v3, %v2798_v23  ;;  %v2838_v32 = vadd.f32 %v2837_v15, %v2824_v33  ;;  %v1444_v33 = vperm.slane %v11455_v28, 2 }
 0x1bf   :  { %3454 = vmatpush.bf16.msra.mxu0 %v10618_v49  ;;  %3154 = vmatpush.bf16.msrb.mxu2 %v8240_v54  ;;  %v2839_v40 = vpop.f32.mrf.mxu3  ;;  %v2867_v51 = vpop.f32.mrf.mxu1 }
 0x1c0   :  { %v2826_v38 = vadd.f32 %v2825_v17, %v2812_v53  ;;  %v3178_v45 = vmax.f32 %v2838_v32, 0.0  ;;  %v2868_v61 = vadd.f32 %v2867_v51, %v2854_v57  ;;  %v10637_v17 = vld [vmem:[#allocation6 + $0xb0] sm:$0xff] }
 0x1c1   :  { %3167 = vmatpush.bf16.msrb.mxu3 %v8384_v55  ;;  %3467 = vmatpush.bf16.msra.mxu1 %v10627_v1  ;;  %v2907_v54 = vpop.f32.mrf.mxu0  ;;  %v2866_v55 = vadd.f32 %v2865_v36, %v2852_v13 }
 0x1c2   :  { %v2840_v63 = vadd.f32 %v2839_v40, %v2826_v38 }
 0x1c3   :  { %3455 = vmatpush.bf16.msra.mxu0 %v10617_v62  ;;  %3155 = vmatpush.bf16.msrb.mxu2 %v8224_v4 }
 0x1c4   :  { %v2879_v43 = vpop.f32.mrf.mxu2  ;;  %v3182_v46 = vmax.f32 %v2840_v63, 0.0 }
 0x1c5   :  { %3168 = vmatpush.bf16.msrb.mxu3 %v8368_v5  ;;  %3468 = vmatpush.bf16.msra.mxu1 %v10626_v16 }
 0x1c6   :  { %v3186_v49 = vpack.c.bf16 %v3182_v46, %v3178_v45 }
 0x1c7   :  { %3456 = vmatpush.bf16.msra.mxu0 %v10616_v14  ;;  %3156 = vmatpush.bf16.msrb.mxu2 %v8208_v18  ;;  %v2893_v50 = vpop.f32.mrf.mxu3  ;;  %v2921_v21 = vpop.f32.mrf.mxu1  ;;  %v10638_v14 = vld [vmem:[#allocation6 + $0xb8] sm:$0xff] }
 0x1c9   :  { %3169 = vmatpush.bf16.msrb.mxu3 %v8352_v20  ;;  %3469 = vmatpush.bf16.msra.mxu1 %v10625_v31  ;;  %v2909_v3 = vpop.f32.mrf.mxu0  ;;  %v10636_v20 = vld [vmem:[#allocation6 + $0xa8] sm:$0xff] }
 0x1cb   :  { %3457 = vmatpush.bf16.msra.mxu0 %v10615_v29  ;;  %3157 = vmatpush.bf16.msrb.mxu2 %v8192_v24  ;;  %v10631_v29 = vld [vmem:[#allocation6 + $0x80] sm:$0xff] }
 0x1cc   :  { %v2881_v52 = vpop.f32.mrf.mxu2 }
 0x1cd   :  { %3170 = vmatpush.bf16.msrb.mxu3 %v8336_v34  ;;  %3470 = vmatpush.bf16.msra.mxu1 %v10624_v56  ;;  %v2882_v1 = vadd.f32 %v2881_v52, %v2868_v61  ;;  %v10646_v61 = vld [vmem:[#allocation6 + $0xf8] sm:$0xff] }
 0x1ce   :  { %3158 = vmatmul.bf16.vlgmr.msrb.gmra.mxu2 %v11414_v10  ;;  %3458 = vmatmul.bf16.vlgmr.msra.gmra.mxu0 %v3186_v49  ;;  %v2880_v10 = vadd.f32 %v2879_v43, %v2866_v55 }
 0x1cf   :  { %v2895_v41 = vpop.f32.mrf.mxu3  ;;  %v2923_v6 = vpop.f32.mrf.mxu1  ;;  %3478 = vmatpush.bf16.msra.mxu2 %v10638_v14 }
 0x1d0   :  { %v2894_v62 = vadd.f32 %v2893_v50, %v2880_v10  ;;  %v2896_v2 = vadd.f32 %v2895_v41, %v2882_v1 }
 0x1d1   :  { %3171 = vmatpush.bf16.msrb.mxu3 %v8320_v44  ;;  %3471 = vmatpush.bf16.msra.mxu1 %v10623_v47  ;;  %v2963_v23 = vpop.f32.mrf.mxu0 }
 0x1d2   :  { %v2908_v58 = vadd.f32 %v2907_v54, %v2894_v62  ;;  %v2910_v5 = vadd.f32 %v2909_v3, %v2896_v2  ;;  %v2964_v36 = vadd.f32 %v2963_v23, %v1444_v33  ;;  %v10644_v2 = vld [vmem:[#allocation6 + $0xe8] sm:$0xff]  ;;  %v10642_v3 = vld [vmem:[#allocation6 + $0xd8] sm:$0xff] }
 0x1d3   :  { %3479 = vmatpush.bf16.msra.mxu2 %v10637_v17 }
 0x1d4   :  { %3172 = vmatmul.bf16.vlgmr.msrb.gmra.mxu3 %v11418_v42  ;;  %v2935_v30 = vpop.f32.mrf.mxu2  ;;  %v2922_v42 = vadd.f32 %v2921_v21, %v2908_v58  ;;  %v2924_v35 = vadd.f32 %v2923_v6, %v2910_v5  ;;  %v10645_v21 = vld [vmem:[#allocation6 + $0xf0] sm:$0xff]  ;;  %v10643_v58 = vld [vmem:[#allocation6 + $0xe0] sm:$0xff] }
 0x1d5   :  { %3492 = vmatpush.bf16.msra.mxu3 %v10646_v61 }
 0x1d6   :  { %v2936_v8 = vadd.f32 %v2935_v30, %v2922_v42  ;;  %v10640_v42 = vld [vmem:[#allocation6 + $0xc8] sm:$0xff] }
 0x1d7   :  { %v2949_v4 = vpop.f32.mrf.mxu3  ;;  %3480 = vmatpush.bf16.msra.mxu2 %v10636_v20  ;;  %v2977_v26 = vpop.f32.mrf.mxu1 }
 0x1d8   :  { %v2950_v9 = vadd.f32 %v2949_v4, %v2936_v8  ;;  %v2978_v38 = vadd.f32 %v2977_v26, %v2964_v36  ;;  %v10641_v4 = vld [vmem:[#allocation6 + $0xd0] sm:$0xff]  ;;  %v10639_v8 = vld [vmem:[#allocation6 + $0xc0] sm:$0xff] }
 0x1d9   :  { %v2965_v31 = vpop.f32.mrf.mxu0  ;;  %3493 = vmatpush.bf16.msra.mxu3 %v10645_v21  ;;  %v8667_v21 = vld [vmem:[#allocation7 + $0xc8] sm:$0xf] }
 0x1da   :  { %v3179_v12 = vmax.f32 %v2950_v9, 0.0  ;;  %v2966_v39 = vadd.f32 %v2965_v31, %v1444_v33 }
 0x1db   :  { %3481 = vmatpush.bf16.msra.mxu2 %v10635_v0 }
 0x1dc   :  { %v2937_v7 = vpop.f32.mrf.mxu2 }
 0x1dd   :  { %v2938_v11 = vadd.f32 %v2937_v7, %v2924_v35  ;;  %3494 = vmatpush.bf16.msra.mxu3 %v10644_v2  ;;  %v8669_v2 = vld [vmem:[#allocation7 + $0xd8] sm:$0xf0] }
 0x1df   :  { %v2951_v15 = vpop.f32.mrf.mxu3  ;;  %3482 = vmatpush.bf16.msra.mxu2 %v10634_v22  ;;  %v2979_v24 = vpop.f32.mrf.mxu1 }
 0x1e0   :  { %v2952_v16 = vadd.f32 %v2951_v15, %v2938_v11  ;;  %v2980_v40 = vadd.f32 %v2979_v24, %v2966_v39  ;;  %v1445_v11 = vperm.slane %v11455_v28, 3 }
 0x1e1   :  { %3495 = vmatpush.bf16.msra.mxu3 %v10643_v58  ;;  %v8643_v58 = vld [vmem:[#allocation7 + $0xa0] sm:$0xf] }
 0x1e2   :  { %v3183_v60 = vmax.f32 %v2952_v16, 0.0 }
 0x1e3   :  { %3483 = vmatpush.bf16.msra.mxu2 %v10633_v19 }
 0x1e4   :  { %v3187_v18 = vpack.c.bf16 %v3183_v60, %v3179_v12 }
 0x1e5   :  { %3496 = vmatpush.bf16.msra.mxu3 %v10642_v3  ;;  %v10669_v3 = vld [vmem:[#allocation7 + $0xac] sm:$0xf0] }
 0x1e6   :  { %3472 = vmatmul.bf16.vlgmr.msra.gmra.mxu1 %v3187_v18 }
 0x1e7   :  { %3484 = vmatpush.bf16.msra.mxu2 %v10632_v25 }
 0x1e9   :  { %3497 = vmatpush.bf16.msra.mxu3 %v10641_v4 }
 0x1eb   :  { %3485 = vmatpush.bf16.msra.mxu2 %v10631_v29  ;;  %v3019_v32 = vpop.f32.mrf.mxu0 }
 0x1ed   :  { %3498 = vmatpush.bf16.msra.mxu3 %v10640_v42  ;;  %v8645_v42 = vld [vmem:[#allocation7 + $0xb0] sm:$0xf0] }
 0x1f1   :  { %v2991_v27 = vpop.f32.mrf.mxu2  ;;  %v3033_v63 = vpop.f32.mrf.mxu1  ;;  %3499 = vmatpush.bf16.msra.mxu3 %v10639_v8  ;;  %v10670_v8 = vld [vmem:[#allocation7 + $0xb4] sm:$0xf0] }
 0x1f2   :  { %v2992_v56 = vadd.f32 %v2991_v27, %v2978_v38 }
 0x1f3   :  { %v3021_v48 = vpop.f32.mrf.mxu0 }
 0x1f7   :  { %v3005_v53 = vpop.f32.mrf.mxu3 }
 0x1f8   :  { %v3006_v43 = vadd.f32 %v3005_v53, %v2992_v56 }
 0x1f9   :  { %v2993_v34 = vpop.f32.mrf.mxu2  ;;  %v3035_v59 = vpop.f32.mrf.mxu1 }
 0x1fa   :  { %v2994_v44 = vadd.f32 %v2993_v34, %v2980_v40  ;;  %v3020_v47 = vadd.f32 %v3019_v32, %v3006_v43  ;;  %v8675_v43 = vld [vmem:[#allocation7 + $0xe0] sm:$0xf] }
 0x1fc   :  { %v3034_v51 = vadd.f32 %v3033_v63, %v3020_v47  ;;  %v8677_v47 = vld [vmem:[#allocation7 + $0xf0] sm:$0xf0] }
 0x1ff   :  { %v3007_v37 = vpop.f32.mrf.mxu3 }
 0x200   :  { %v3008_v46 = vadd.f32 %v3007_v37, %v2994_v44  ;;  %v10677_v44 = vld [vmem:[#allocation7 + $0xec] sm:$0xf0] }
 0x202   :  { %v3022_v50 = vadd.f32 %v3021_v48, %v3008_v46  ;;  %v8676_v46 = vor.u32 %v10677_v44, %v8675_v43  ;;  %v8683_v48 = vld [vmem:[#allocation7 + $0xe8] sm:$0xf]  ;;  %v8597_v43 = vld [vmem:[#allocation7 + $0x50] sm:$0xf0] }
 0x203   :  { %v8603_v44 = vld [vmem:[#allocation7 + $0x48] sm:$0xf] }
 0x204   :  { %v3036_v54 = vadd.f32 %v3035_v59, %v3022_v50  ;;  %v10676_v59 = vld [vmem:[#allocation7 + $0xec] sm:$0xf]  ;;  %3709 = vmatpush.bf16.msrb.mxu0 %v8676_v46 }
 0x20b   :  { %v3075_v5 = vpop.f32.mrf.mxu0 }
 0x20c   :  { %v3076_v16 = vadd.f32 %v3075_v5, %v1445_v11  ;;  %v10667_v5 = vld [vmem:[#allocation7 + $0xa4] sm:$0xf] }
 0x211   :  { %v3047_v45 = vpop.f32.mrf.mxu2  ;;  %v3089_v6 = vpop.f32.mrf.mxu1 }
 0x212   :  { %v3048_v13 = vadd.f32 %v3047_v45, %v3034_v51  ;;  %v3090_v60 = vadd.f32 %v3089_v6, %v3076_v16  ;;  %v10675_v45 = vld [vmem:[#allocation7 + $0xe4] sm:$0xf]  ;;  %v8651_v6 = vld [vmem:[#allocation7 + $0xa8] sm:$0xf]  ;;  %v10665_v16 = vld [vmem:[#allocation7 + $0x8c] sm:$0xf0] }
 0x213   :  { %v3077_v35 = vpop.f32.mrf.mxu0  ;;  %v8680_v50 = vor.u32 %v10675_v45, %v8677_v47  ;;  %v10658_v45 = vld [vmem:[#allocation7 + $0x54] sm:$0xf0] }
 0x214   :  { %v3078_v17 = vadd.f32 %v3077_v35, %v1445_v11  ;;  %v10668_v35 = vld [vmem:[#allocation7 + $0xac] sm:$0xf]  ;;  %v8648_v11 = vor.u32 %v10667_v5, %v8645_v42  ;;  %v8604_v47 = vor.u32 %v10658_v45, %v8603_v44  ;;  %v10650_v5 = vld [vmem:[#allocation7 + $0x14] sm:$0xf0]  ;;  %v9363_v44 = vld [vmem:[#allocation9 + $0x540] sm:$0xf] }
 0x215   :  { %3723 = vmatpush.bf16.msrb.mxu1 %v8680_v50  ;;  %v8579_v50 = vld [vmem:[#allocation7 + $0x20] sm:$0xf] }
 0x216   :  { %v10851_v45 = vld [vmem:[#allocation9 + $0x55c] sm:$0xf0] }
 0x217   :  { %v3061_v49 = vpop.f32.mrf.mxu3 }
 0x218   :  { %v3062_v55 = vadd.f32 %v3061_v49, %v3048_v13  ;;  %v10678_v49 = vld [vmem:[#allocation7 + $0xf4] sm:$0xf0]  ;;  %v8659_v13 = vld [vmem:[#allocation7 + $0xc0] sm:$0xf] }
 0x219   :  { %v3049_v52 = vpop.f32.mrf.mxu2  ;;  %v3091_v14 = vpop.f32.mrf.mxu1  ;;  %v8684_v51 = vor.u32 %v10678_v49, %v8683_v48  ;;  %v10656_v48 = vld [vmem:[#allocation7 + $0x4c] sm:$0xf]  ;;  %v8605_v49 = vld [vmem:[#allocation7 + $0x58] sm:$0xf0] }
 0x21a   :  { %v3050_v57 = vadd.f32 %v3049_v52, %v3036_v54  ;;  %v3180_v30 = vmax.f32 %v3062_v55, 0.0  ;;  %v3092_v20 = vadd.f32 %v3091_v14, %v3078_v17  ;;  %v8685_v52 = vld [vmem:[#allocation7 + $0xf8] sm:$0xf0]  ;;  %v10673_v55 = vld [vmem:[#allocation7 + $0xcc] sm:$0xf0]  ;;  %v8652_v14 = vor.u32 %v10670_v8, %v8651_v6 }
 0x21b   :  { %v8688_v54 = vor.u32 %v10676_v59, %v8685_v52  ;;  %3737 = vmatpush.bf16.msrb.mxu2 %v8684_v51  ;;  %v8660_v61 = vor.u32 %v10673_v55, %v8659_v13  ;;  %v8629_v17 = vld [vmem:[#allocation7 + $0x90] sm:$0xf0]  ;;  %v8608_v51 = vor.u32 %v10656_v48, %v8605_v49  ;;  %v10653_v59 = vld [vmem:[#allocation7 + $0x2c] sm:$0xf0]  ;;  %v10651_v52 = vld [vmem:[#allocation7 + $0x24] sm:$0xf] }
 0x21c   :  { %v8581_v13 = vld [vmem:[#allocation7 + $0x30] sm:$0xf0]  ;;  %v8573_v8 = vld [vmem:[#allocation7 + $0x18] sm:$0xf0]  ;;  %v10779_v48 = vld [vmem:[#allocation9 + $0x31c] sm:$0xf0] }
 0x21d   :  { %3751 = vmatpush.bf16.msrb.mxu3 %v8688_v54  ;;  %3710 = vmatpush.bf16.msrb.mxu0 %v8660_v61  ;;  %v8580_v54 = vor.u32 %v10653_v59, %v8579_v50  ;;  %v8584_v55 = vor.u32 %v10651_v52, %v8581_v13  ;;  %v10652_v61 = vld [vmem:[#allocation7 + $0x2c] sm:$0xf]  ;;  %v10915_v49 = vld [vmem:[#allocation9 + $0x75c] sm:$0xf0] }
 0x21e   :  { %v9331_v52 = vld [vmem:[#allocation9 + $0x500] sm:$0xf] }
 0x21f   :  { %v3063_v41 = vpop.f32.mrf.mxu3 }
 0x220   :  { %v3064_v10 = vadd.f32 %v3063_v41, %v3050_v57  ;;  %v10671_v57 = vld [vmem:[#allocation7 + $0xc4] sm:$0xf]  ;;  %v8661_v41 = vld [vmem:[#allocation7 + $0xd0] sm:$0xf0] }
 0x222   :  { %v3184_v62 = vmax.f32 %v3064_v10, 0.0  ;;  %v8664_v10 = vor.u32 %v10671_v57, %v8661_v41  ;;  %v8587_v57 = vld [vmem:[#allocation7 + $0x28] sm:$0xf]  ;;  %v10654_v41 = vld [vmem:[#allocation7 + $0x34] sm:$0xf0] }
 0x224   :  { %v3188_v1 = vpack.c.bf16 %v3184_v62, %v3180_v30  ;;  %v10674_v30 = vld [vmem:[#allocation7 + $0xd4] sm:$0xf0]  ;;  %v10672_v62 = vld [vmem:[#allocation7 + $0xcc] sm:$0xf]  ;;  %3724 = vmatpush.bf16.msrb.mxu1 %v8664_v10  ;;  %v8588_v10 = vor.u32 %v10654_v41, %v8587_v57  ;;  %v10907_v57 = vld [vmem:[#allocation9 + $0x71c] sm:$0xf0] }
 0x225   :  { %v8672_v4 = vor.u32 %v10672_v62, %v8669_v2  ;;  %v8563_v62 = vld [vmem:[#allocation7] sm:$0xf]  ;;  %v10647_v2 = vld [vmem:[#allocation7 + $0x4] sm:$0xf] }
 0x226   :  { %3486 = vmatmul.bf16.vlgmr.msra.gmra.mxu2 %v3188_v1  ;;  %v8668_v1 = vor.u32 %v10674_v30, %v8667_v21  ;;  %v8589_v21 = vld [vmem:[#allocation7 + $0x38] sm:$0xf0] }
 0x227   :  { %3752 = vmatpush.bf16.msrb.mxu3 %v8672_v4  ;;  %v8592_v30 = vor.u32 %v10652_v61, %v8589_v21  ;;  %v8571_v4 = vld [vmem:[#allocation7 + $0x8] sm:$0xf]  ;;  %v10707_v21 = vld [vmem:[#allocation9 + $0xdc] sm:$0xf0] }
 0x228   :  { %3738 = vmatpush.bf16.msrb.mxu2 %v8668_v1  ;;  %3725 = vmatpush.bf16.msrb.mxu1 %v8648_v11  ;;  %v10649_v1 = vld [vmem:[#allocation7 + $0xc] sm:$0xf0]  ;;  %v8572_v6 = vor.u32 %v10650_v5, %v8571_v4  ;;  %v10739_v11 = vld [vmem:[#allocation9 + $0x1dc] sm:$0xf0] }
 0x229   :  { %v10835_v4 = vld [vmem:[#allocation9 + $0x4dc] sm:$0xf0] }
 0x22a   :  { %v9555_v5 = vld [vmem:[#allocation9 + $0x6c0] sm:$0xf] }
 0x22b   :  { %v3131_v12 = vpop.f32.mrf.mxu0 }
 0x22c   :  { %3739 = vmatpush.bf16.msrb.mxu2 %v8652_v14  ;;  %v9171_v14 = vld [vmem:[#allocation9 + $0x3c0] sm:$0xf] }
 0x231   :  { %v3103_v7 = vpop.f32.mrf.mxu2  ;;  %v3145_v22 = vpop.f32.mrf.mxu1 }
 0x232   :  { %v3104_v0 = vadd.f32 %v3103_v7, %v3090_v60  ;;  %v8644_v7 = vor.u32 %v10669_v3, %v8643_v58  ;;  %v8564_v58 = vor.u32 %v10649_v1, %v8563_v62  ;;  %v8565_v3 = vld [vmem:[#allocation7 + $0x10] sm:$0xf0]  ;;  %v10771_v62 = vld [vmem:[#allocation9 + $0x2dc] sm:$0xf0] }
 0x233   :  { %v3133_v29 = vpop.f32.mrf.mxu0  ;;  %v8568_v42 = vor.u32 %v10647_v2, %v8565_v3 }
 0x234   :  { %3711 = vmatpush.bf16.msrb.mxu0 %v8644_v7  ;;  %v10648_v7 = vld [vmem:[#allocation7 + $0xc] sm:$0xf] }
 0x237   :  { %v3117_v9 = vpop.f32.mrf.mxu3 }
 0x238   :  { %v3118_v19 = vadd.f32 %v3117_v9, %v3104_v0  ;;  %v8653_v9 = vld [vmem:[#allocation7 + $0xb8] sm:$0xf0]  ;;  %v10664_v0 = vld [vmem:[#allocation7 + $0x8c] sm:$0xf] }
 0x239   :  { %v3105_v15 = vpop.f32.mrf.mxu2  ;;  %v3147_v28 = vpop.f32.mrf.mxu1  ;;  %v8656_v60 = vor.u32 %v10668_v35, %v8653_v9  ;;  %v8576_v35 = vor.u32 %v10648_v7, %v8573_v8  ;;  %v8915_v9 = vld [vmem:[#allocation9 + $0x1c0] sm:$0xf] }
 0x23a   :  { %v3106_v23 = vadd.f32 %v3105_v15, %v3092_v20  ;;  %v3132_v27 = vadd.f32 %v3131_v12, %v3118_v19  ;;  %v8627_v15 = vld [vmem:[#allocation7 + $0x80] sm:$0xf]  ;;  %v10663_v12 = vld [vmem:[#allocation7 + $0x84] sm:$0xf]  ;;  %v10666_v20 = vld [vmem:[#allocation7 + $0x94] sm:$0xf0] }
 0x23b   :  { %v8628_v19 = vor.u32 %v10665_v16, %v8627_v15  ;;  %3753 = vmatpush.bf16.msrb.mxu3 %v8656_v60  ;;  %v8916_v15 = vor.u32 %v10739_v11, %v8915_v9  ;;  %v10803_v16 = vld [vmem:[#allocation9 + $0x3dc] sm:$0xf0] }
 0x23c   :  { %v3146_v33 = vadd.f32 %v3145_v22, %v3132_v27  ;;  %v8637_v22 = vld [vmem:[#allocation7 + $0x98] sm:$0xf0]  ;;  %v10661_v27 = vld [vmem:[#allocation7 + $0x6c] sm:$0xf0]  ;;  %v10731_v60 = vld [vmem:[#allocation9 + $0x19c] sm:$0xf0] }
 0x23d   :  { %3712 = vmatpush.bf16.msrb.mxu0 %v8628_v19  ;;  %v10867_v19 = vld [vmem:[#allocation9 + $0x5dc] sm:$0xf0] }
 0x23e   :  { %v8755_v7 = vld [vmem:[#allocation9 + $0x80] sm:$0xf] }
 0x23f   :  { %v3119_v18 = vpop.f32.mrf.mxu3  ;;  %v10699_v8 = vld [vmem:[#allocation9 + $0x9c] sm:$0xf0] }
 0x240   :  { %v3120_v26 = vadd.f32 %v3119_v18, %v3106_v23  ;;  %v8635_v18 = vld [vmem:[#allocation7 + $0x88] sm:$0xf]  ;;  %v8632_v23 = vor.u32 %v10663_v12, %v8629_v17  ;;  %v8883_v12 = vld [vmem:[#allocation9 + $0x180] sm:$0xf]  ;;  %v9172_v17 = vor.u32 %v10803_v16, %v9171_v14 }
 0x241   :  { %v9011_v9 = vld [vmem:[#allocation9 + $0x280] sm:$0xf] }
 0x242   :  { %v3134_v53 = vadd.f32 %v3133_v29, %v3120_v26  ;;  %v8611_v26 = vld [vmem:[#allocation7 + $0x60] sm:$0xf]  ;;  %v10659_v29 = vld [vmem:[#allocation7 + $0x64] sm:$0xf]  ;;  %3726 = vmatpush.bf16.msrb.mxu1 %v8632_v23 }
 0x243   :  { %v9683_v23 = vld [vmem:[#allocation9 + $0x7c0] sm:$0xf] }
 0x244   :  { %v3148_v36 = vadd.f32 %v3147_v28, %v3134_v53  ;;  %v8613_v53 = vld [vmem:[#allocation7 + $0x70] sm:$0xf0]  ;;  %v10662_v28 = vld [vmem:[#allocation7 + $0x74] sm:$0xf0]  ;;  %v10763_v11 = vld [vmem:[#allocation9 + $0x29c] sm:$0xf0] }
 0x251   :  { %v3159_v25 = vpop.f32.mrf.mxu2 }
 0x252   :  { %v3160_v34 = vadd.f32 %v3159_v25, %v3146_v33  ;;  %v8636_v25 = vor.u32 %v10666_v20, %v8635_v18  ;;  %v8619_v33 = vld [vmem:[#allocation7 + $0x68] sm:$0xf]  ;;  %v9139_v18 = vld [vmem:[#allocation9 + $0x380] sm:$0xf] }
 0x253   :  { %v10795_v20 = vld [vmem:[#allocation9 + $0x39c] sm:$0xf0] }
 0x254   :  { %3740 = vmatpush.bf16.msrb.mxu2 %v8636_v25  ;;  %v10931_v25 = vld [vmem:[#allocation9 + $0x7dc] sm:$0xf0] }
 0x257   :  { %v3173_v31 = vpop.f32.mrf.mxu3 }
 0x258   :  { %v3174_v32 = vadd.f32 %v3173_v31, %v3160_v34  ;;  %v8640_v31 = vor.u32 %v10664_v0, %v8637_v22  ;;  %v8621_v34 = vld [vmem:[#allocation7 + $0x78] sm:$0xf0]  ;;  %v9427_v0 = vld [vmem:[#allocation9 + $0x5c0] sm:$0xf]  ;;  %v8884_v22 = vor.u32 %v10731_v60, %v8883_v12 }
 0x259   :  { %v3161_v24 = vpop.f32.mrf.mxu2  ;;  %v9267_v60 = vld [vmem:[#allocation9 + $0x480] sm:$0xf] }
 0x25a   :  { %v3162_v38 = vadd.f32 %v3161_v24, %v3148_v36  ;;  %v3181_v40 = vmax.f32 %v3174_v32, 0.0  ;;  %v10660_v24 = vld [vmem:[#allocation7 + $0x6c] sm:$0xf]  ;;  %v8612_v36 = vor.u32 %v10661_v27, %v8611_v26  ;;  %v8616_v32 = vor.u32 %v10659_v29, %v8613_v53  ;;  %3754 = vmatpush.bf16.msrb.mxu3 %v8640_v31  ;;  %v8851_v31 = vld [vmem:[#allocation9 + $0x140] sm:$0xf] }
 0x25b   :  { %v9140_v26 = vor.u32 %v10795_v20, %v9139_v18  ;;  %v9428_v27 = vor.u32 %v10867_v19, %v9427_v0  ;;  %v9684_v29 = vor.u32 %v10931_v25, %v9683_v23  ;;  %v10723_v53 = vld [vmem:[#allocation9 + $0x15c] sm:$0xf0]  ;;  %v9012_v19 = vor.u32 %v10763_v11, %v9011_v9 }
 0x25c   :  { %3713 = vmatpush.bf16.msrb.mxu0 %v8612_v36  ;;  %3727 = vmatpush.bf16.msrb.mxu1 %v8616_v32  ;;  %v9651_v32 = vld [vmem:[#allocation9 + $0x780] sm:$0xf] }
 0x25d   :  { %v10827_v18 = vld [vmem:[#allocation9 + $0x49c] sm:$0xf0] }
 0x25e   :  { %v9523_v20 = vld [vmem:[#allocation9 + $0x680] sm:$0xf] }
 0x25f   :  { %v3175_v39 = vpop.f32.mrf.mxu3  ;;  %v10891_v0 = vld [vmem:[#allocation9 + $0x69c] sm:$0xf0] }
 0x260   :  { %v3176_v37 = vadd.f32 %v3175_v39, %v3162_v38  ;;  %v8620_v38 = vor.u32 %v10662_v28, %v8619_v33  ;;  %v8624_v39 = vor.u32 %v10660_v24, %v8621_v34  ;;  %v9107_v33 = vld [vmem:[#allocation9 + $0x340] sm:$0xf] }
 0x261   :  { %v10787_v28 = vld [vmem:[#allocation9 + $0x35c] sm:$0xf0] }
 0x262   :  { %v3185_v56 = vmax.f32 %v3176_v37, 0.0  ;;  %3741 = vmatpush.bf16.msrb.mxu2 %v8620_v38  ;;  %3755 = vmatpush.bf16.msrb.mxu3 %v8624_v39  ;;  %v8595_v37 = vld [vmem:[#allocation7 + $0x40] sm:$0xf]  ;;  %v8852_v39 = vor.u32 %v10723_v53, %v8851_v31 }
 0x263   :  { %v9395_v24 = vld [vmem:[#allocation9 + $0x580] sm:$0xf]  ;;  %v3473_v50 = vpop.f32.mrf.mxu1 }
 0x264   :  { %v3189_v63 = vpack.c.bf16 %v3185_v56, %v3181_v40  ;;  %v10657_v40 = vld [vmem:[#allocation7 + $0x4c] sm:$0xf0]  ;;  %v10655_v56 = vld [vmem:[#allocation7 + $0x44] sm:$0xf]  ;;  %v10859_v34 = vld [vmem:[#allocation9 + $0x59c] sm:$0xf0] }
 0x265   :  { %v8600_v46 = vor.u32 %v10655_v56, %v8597_v43  ;;  %v9396_v36 = vor.u32 %v10859_v34, %v9395_v24  ;;  %v10923_v38 = vld [vmem:[#allocation9 + $0x79c] sm:$0xf0]  ;;  %v9108_v43 = vor.u32 %v10787_v28, %v9107_v33  ;;  %v9268_v33 = vor.u32 %v10827_v18, %v9267_v60  ;;  %v10719_v18 = vld [vmem:[#allocation9 + $0x144] sm:$0xf] }
 0x266   :  { %3500 = vmatmul.bf16.vlgmr.msra.gmra.mxu3 %v3189_v63  ;;  %v8596_v63 = vor.u32 %v10657_v40, %v8595_v37  ;;  %3742 = vmatpush.bf16.msrb.mxu2 %v8604_v47  ;;  %v9652_v37 = vor.u32 %v10923_v38, %v9651_v32  ;;  %v8819_v40 = vld [vmem:[#allocation9 + $0x100] sm:$0xf]  ;;  %v9524_v28 = vor.u32 %v10891_v0, %v9523_v20  ;;  %v8853_v20 = vld [vmem:[#allocation9 + $0x160] sm:$0xf0] }
 0x267   :  { %3728 = vmatpush.bf16.msrb.mxu1 %v8600_v46  ;;  %3756 = vmatpush.bf16.msrb.mxu3 %v8608_v51  ;;  %v10715_v56 = vld [vmem:[#allocation9 + $0x11c] sm:$0xf0]  ;;  %v9364_v51 = vor.u32 %v10851_v45, %v9363_v44  ;;  %v10783_v0 = vld [vmem:[#allocation9 + $0x344] sm:$0xf] }
 0x268   :  { %3714 = vmatpush.bf16.msrb.mxu0 %v8596_v63  ;;  %v3459_v63 = vpop.f32.mrf.mxu0  ;;  %v9619_v46 = vld [vmem:[#allocation9 + $0x740] sm:$0xf]  ;;  %v8820_v13 = vor.u32 %v10715_v56, %v8819_v40 }
 0x269   :  { %v9075_v47 = vld [vmem:[#allocation9 + $0x300] sm:$0xf]  ;;  %v9620_v59 = vor.u32 %v10915_v49, %v9619_v46  ;;  %v8917_v49 = vld [vmem:[#allocation9 + $0x1e0] sm:$0xf0] }
 0x26a   :  { %3743 = vmatpush.bf16.msrb.mxu2 %v8588_v10  ;;  %v9076_v61 = vor.u32 %v10779_v48, %v9075_v47  ;;  %v8787_v10 = vld [vmem:[#allocation9 + $0xc0] sm:$0xf]  ;;  %v10735_v48 = vld [vmem:[#allocation9 + $0x1c4] sm:$0xf] }
 0x26b   :  { %3729 = vmatpush.bf16.msrb.mxu1 %v8584_v55  ;;  %3757 = vmatpush.bf16.msrb.mxu3 %v8592_v30  ;;  %v9587_v55 = vld [vmem:[#allocation9 + $0x700] sm:$0xf]  ;;  %v8788_v3 = vor.u32 %v10707_v21, %v8787_v10  ;;  %v10863_v10 = vld [vmem:[#allocation9 + $0x5c4] sm:$0xf] }
 0x26c   :  { %3715 = vmatpush.bf16.msrb.mxu0 %v8580_v54  ;;  %v10843_v54 = vld [vmem:[#allocation9 + $0x51c] sm:$0xf0]  ;;  %v9588_v2 = vor.u32 %v10907_v57, %v9587_v55 }
 0x26d   :  { %v9043_v30 = vld [vmem:[#allocation9 + $0x2c0] sm:$0xf]  ;;  %v9332_v1 = vor.u32 %v10843_v54, %v9331_v52  ;;  %v9173_v54 = vld [vmem:[#allocation9 + $0x3e0] sm:$0xf0] }
 0x26e   :  { %3744 = vmatpush.bf16.msrb.mxu2 %v8572_v6  ;;  %v9044_v6 = vor.u32 %v10771_v62, %v9043_v30  ;;  %v8723_v23 = vld [vmem:[#allocation9 + $0x40] sm:$0xf] }
 0x26f   :  { %3730 = vmatpush.bf16.msrb.mxu1 %v8568_v42  ;;  %3758 = vmatpush.bf16.msrb.mxu3 %v8576_v35  ;;  %v10899_v42 = vld [vmem:[#allocation9 + $0x6dc] sm:$0xf0] }
 0x270   :  { %3716 = vmatpush.bf16.msrb.mxu0 %v8564_v58  ;;  %v9299_v58 = vld [vmem:[#allocation9 + $0x4c0] sm:$0xf]  ;;  %v3461_v14 = vpop.f32.mrf.mxu0  ;;  %v9556_v12 = vor.u32 %v10899_v42, %v9555_v5  ;;  %v10727_v5 = vld [vmem:[#allocation9 + $0x184] sm:$0xf] }
 0x271   :  { %v11077_v35 = vld [vmem:[%s11666_s6] ss:$0 sm:$0xff]  ;;  %v9300_v16 = vor.u32 %v10835_v4, %v9299_v58  ;;  %v9685_v58 = vld [vmem:[#allocation9 + $0x7e0] sm:$0xf0] }
 0x272   :  { %5359 = vmatpush.bf16.msra.mxu2 %v9428_v27  ;;  %v10691_v25 = vld [vmem:[#allocation9 + $0x5c] sm:$0xf0]  ;;  %v3462_v27 = vadd.f32 %v11077_v35, %v3461_v14  ;;  %v8885_v42 = vld [vmem:[#allocation9 + $0x1a0] sm:$0xf0] }
 0x273   :  { %5345 = vmatpush.bf16.msra.mxu1 %v9172_v17  ;;  %5373 = vmatpush.bf16.msra.mxu3 %v9684_v29  ;;  %v8756_v17 = vor.u32 %v10699_v8, %v8755_v7  ;;  %v8979_v29 = vld [vmem:[#allocation9 + $0x240] sm:$0xf]  ;;  %v8724_v32 = vor.u32 %v10691_v25, %v8723_v23  ;;  %v9141_v7 = vld [vmem:[#allocation9 + $0x3a0] sm:$0xf0]  ;;  %v8888_v60 = vor.u32 %v10727_v5, %v8885_v42 }
 0x274   :  { %5331 = vmatpush.bf16.msra.mxu0 %v8916_v15  ;;  %v10755_v31 = vld [vmem:[#allocation9 + $0x25c] sm:$0xf0]  ;;  %v10855_v14 = vld [vmem:[#allocation9 + $0x584] sm:$0xf]  ;;  %v8856_v25 = vor.u32 %v10719_v18, %v8853_v20 }
 0x275   :  { %v9235_v24 = vld [vmem:[#allocation9 + $0x440] sm:$0xf]  ;;  %v8980_v40 = vor.u32 %v10755_v31, %v8979_v29  ;;  %v8821_v29 = vld [vmem:[#allocation9 + $0x120] sm:$0xf0] }
 0x276   :  { %5360 = vmatpush.bf16.msra.mxu2 %v9396_v36  ;;  %v10819_v38 = vld [vmem:[#allocation9 + $0x45c] sm:$0xf0]  ;;  %v10775_v31 = vld [vmem:[#allocation9 + $0x304] sm:$0xf] }
 0x277   :  { %5346 = vmatpush.bf16.msra.mxu1 %v9140_v26  ;;  %5374 = vmatpush.bf16.msra.mxu3 %v9652_v37  ;;  %v3460_v26 = vadd.f32 %v11077_v35, %v3459_v63  ;;  %v10883_v37 = vld [vmem:[#allocation9 + $0x65c] sm:$0xf0]  ;;  %v10823_v5 = vld [vmem:[#allocation9 + $0x484] sm:$0xf] }
 0x278   :  { %5332 = vmatpush.bf16.msra.mxu0 %v8884_v22  ;;  %v3475_v22 = vpop.f32.mrf.mxu1  ;;  %v8691_v56 = vld [vmem:[#allocation9] sm:$0xf]  ;;  %v9269_v42 = vld [vmem:[#allocation9 + $0x4a0] sm:$0xf0] }
 0x279   :  { %v3474_v34 = vadd.f32 %v3473_v50, %v3460_v26  ;;  %v3476_v36 = vadd.f32 %v3475_v22, %v3462_v27  ;;  %v10683_v44 = vld [vmem:[#allocation9 + $0x1c] sm:$0xf0]  ;;  %v10799_v50 = vld [vmem:[#allocation9 + $0x3c4] sm:$0xf] }
 0x27a   :  { %5361 = vmatpush.bf16.msra.mxu2 %v9364_v51  ;;  %v8947_v45 = vld [vmem:[#allocation9 + $0x200] sm:$0xf]  ;;  %v9236_v51 = vor.u32 %v10819_v38, %v9235_v24  ;;  %v8692_v30 = vor.u32 %v10683_v44, %v8691_v56  ;;  %v9176_v4 = vor.u32 %v10799_v50, %v9173_v54  ;;  %v9109_v22 = vld [vmem:[#allocation9 + $0x360] sm:$0xf0] }
 0x27b   :  { %5347 = vmatpush.bf16.msra.mxu1 %v9108_v43  ;;  %5375 = vmatpush.bf16.msra.mxu3 %v9620_v59  ;;  %v10747_v46 = vld [vmem:[#allocation9 + $0x21c] sm:$0xf0]  ;;  %v9112_v26 = vor.u32 %v10783_v0, %v9109_v22  ;;  %v10711_v27 = vld [vmem:[#allocation9 + $0x104] sm:$0xf] }
 0x27c   :  { %5333 = vmatpush.bf16.msra.mxu0 %v8852_v39  ;;  %v9491_v39 = vld [vmem:[#allocation9 + $0x640] sm:$0xf]  ;;  %v8948_v62 = vor.u32 %v10747_v46, %v8947_v45  ;;  %v10847_v24 = vld [vmem:[#allocation9 + $0x544] sm:$0xf] }
 0x27d   :  { %v9492_v59 = vor.u32 %v10883_v37, %v9491_v39  ;;  %v9203_v55 = vld [vmem:[#allocation9 + $0x400] sm:$0xf]  ;;  %v9621_v38 = vld [vmem:[#allocation9 + $0x760] sm:$0xf0] }
 0x27e   :  { %5362 = vmatpush.bf16.msra.mxu2 %v9332_v1  ;;  %v10811_v57 = vld [vmem:[#allocation9 + $0x41c] sm:$0xf0]  ;;  %v9429_v1 = vld [vmem:[#allocation9 + $0x5e0] sm:$0xf0] }
 0x27f   :  { %5348 = vmatpush.bf16.msra.mxu1 %v9076_v61  ;;  %5376 = vmatpush.bf16.msra.mxu3 %v9588_v2  ;;  %v10875_v61 = vld [vmem:[#allocation9 + $0x61c] sm:$0xf0]  ;;  %v10927_v2 = vld [vmem:[#allocation9 + $0x7c4] sm:$0xf]  ;;  %v9204_v8 = vor.u32 %v10811_v57, %v9203_v55  ;;  %v9432_v9 = vor.u32 %v10863_v10, %v9429_v1 }
 0x280   :  { %5334 = vmatpush.bf16.msra.mxu0 %v8820_v13  ;;  %v9688_v11 = vor.u32 %v10927_v2, %v9685_v58  ;;  %v10703_v37 = vld [vmem:[#allocation9 + $0xc4] sm:$0xf] }
 0x281   :  { %v10839_v45 = vld [vmem:[#allocation9 + $0x504] sm:$0xf] }
 0x282   :  { %5363 = vmatpush.bf16.msra.mxu2 %v9300_v16  ;;  %v10919_v16 = vld [vmem:[#allocation9 + $0x784] sm:$0xf] }
 0x283   :  { %5349 = vmatpush.bf16.msra.mxu1 %v9044_v6  ;;  %5377 = vmatpush.bf16.msra.mxu3 %v9556_v12  ;;  %v10791_v6 = vld [vmem:[#allocation9 + $0x384] sm:$0xf] }
 0x284   :  { %5335 = vmatpush.bf16.msra.mxu0 %v8788_v3  ;;  %v8920_v3 = vor.u32 %v10735_v48, %v8917_v49  ;;  %v9653_v12 = vld [vmem:[#allocation9 + $0x7a0] sm:$0xf0] }
 0x285   :  { %v9656_v23 = vor.u32 %v10919_v16, %v9653_v12  ;;  %v9333_v46 = vld [vmem:[#allocation9 + $0x520] sm:$0xf0] }
 0x286   :  { %5364 = vmatpush.bf16.msra.mxu2 %v9268_v33  ;;  %v8824_v33 = vor.u32 %v10711_v27, %v8821_v29  ;;  %v9336_v48 = vor.u32 %v10839_v45, %v9333_v46  ;;  %v9589_v49 = vld [vmem:[#allocation9 + $0x720] sm:$0xf0]  ;;  %v10804_v45 = vld [vmem:[#allocation9 + $0x3e4] sm:$0xf0] }
 0x287   :  { %5350 = vmatpush.bf16.msra.mxu1 %v9012_v19  ;;  %5378 = vmatpush.bf16.msra.mxu3 %v9524_v28  ;;  %v9013_v54 = vld [vmem:[#allocation9 + $0x2a0] sm:$0xf0] }
 0x288   :  { %5336 = vmatpush.bf16.msra.mxu0 %v8756_v17  ;;  %v9144_v17 = vor.u32 %v10791_v6, %v9141_v7  ;;  %v10831_v57 = vld [vmem:[#allocation9 + $0x4c4] sm:$0xf]  ;;  %v9272_v7 = vor.u32 %v10823_v5, %v9269_v42 }
 0x289   :  { %v10895_v10 = vld [vmem:[#allocation9 + $0x6c4] sm:$0xf] }
 0x28a   :  { %5365 = vmatpush.bf16.msra.mxu2 %v9236_v51  ;;  %v10695_v51 = vld [vmem:[#allocation9 + $0x84] sm:$0xf] }
 0x28b   :  { %5351 = vmatpush.bf16.msra.mxu1 %v8980_v40  ;;  %5379 = vmatpush.bf16.msra.mxu3 %v9492_v59  ;;  %v8789_v40 = vld [vmem:[#allocation9 + $0xe0] sm:$0xf0] }
 0x28c   :  { %5337 = vmatpush.bf16.msra.mxu0 %v8724_v32  ;;  %v8792_v56 = vor.u32 %v10703_v37, %v8789_v40  ;;  %v8757_v59 = vld [vmem:[#allocation9 + $0xa0] sm:$0xf0]  ;;  %v8923_v40 = vld [vmem:[#allocation9 + $0x1c8] sm:$0xf] }
 0x28d   :  { %v8725_v1 = vld [vmem:[#allocation9 + $0x60] sm:$0xf0] }
 0x28e   :  { %5366 = vmatpush.bf16.msra.mxu2 %v9204_v8  ;;  %v10751_v2 = vld [vmem:[#allocation9 + $0x244] sm:$0xf] }
 0x28f   :  { %5352 = vmatpush.bf16.msra.mxu1 %v8948_v62  ;;  %v10687_v62 = vld [vmem:[#allocation9 + $0x44] sm:$0xf] }
 0x290   :  { %5338 = vmatpush.bf16.msra.mxu0 %v8692_v30  ;;  %v8728_v58 = vor.u32 %v10687_v62, %v8725_v1  ;;  %v10887_v6 = vld [vmem:[#allocation9 + $0x684] sm:$0xf] }
 0x291   :  { %v9525_v8 = vld [vmem:[#allocation9 + $0x6a0] sm:$0xf0] }
 0x292   :  { %v8949_v16 = vld [vmem:[#allocation9 + $0x220] sm:$0xf0] }
 0x293   :  { %v10879_v18 = vld [vmem:[#allocation9 + $0x644] sm:$0xf] }
 0x294   :  { %v9493_v20 = vld [vmem:[#allocation9 + $0x660] sm:$0xf0] }
 0x295   :  { %v9496_v22 = vor.u32 %v10879_v18, %v9493_v20  ;;  %v9461_v27 = vld [vmem:[#allocation9 + $0x620] sm:$0xf0]  ;;  %v9403_v18 = vld [vmem:[#allocation9 + $0x588] sm:$0xf] }
 0x296   :  { %v10860_v20 = vld [vmem:[#allocation9 + $0x5a4] sm:$0xf0] }
 0x2a9   :  { %v3487_v41 = vpop.f32.mrf.mxu2 }
 0x2aa   :  { %v3488_v63 = vadd.f32 %v3487_v41, %v3474_v34  ;;  %v9459_v41 = vld [vmem:[#allocation9 + $0x600] sm:$0xf]  ;;  %v9365_v34 = vld [vmem:[#allocation9 + $0x560] sm:$0xf0] }
 0x2ab   :  { %v9460_v35 = vor.u32 %v10875_v61, %v9459_v41  ;;  %v9368_v32 = vor.u32 %v10847_v24, %v9365_v34  ;;  %v9301_v41 = vld [vmem:[#allocation9 + $0x4e0] sm:$0xf0] }
 0x2ac   :  { %v9304_v61 = vor.u32 %v10831_v57, %v9301_v41  ;;  %v9147_v41 = vld [vmem:[#allocation9 + $0x388] sm:$0xf] }
 0x2ad   :  { %5380 = vmatpush.bf16.msra.mxu3 %v9460_v35  ;;  %v9528_v35 = vor.u32 %v10887_v6, %v9525_v8  ;;  %v10932_v6 = vld [vmem:[#allocation9 + $0x7e4] sm:$0xf0] }
 0x2ae   :  { %v10724_v8 = vld [vmem:[#allocation9 + $0x164] sm:$0xf0] }
 0x2b1   :  { %v3489_v53 = vpop.f32.mrf.mxu2 }
 0x2b2   :  { %v3490_v43 = vadd.f32 %v3489_v53, %v3476_v36  ;;  %v9077_v53 = vld [vmem:[#allocation9 + $0x320] sm:$0xf0] }
 0x2b3   :  { %v9080_v28 = vor.u32 %v10775_v31, %v9077_v53  ;;  %v10911_v36 = vld [vmem:[#allocation9 + $0x744] sm:$0xf]  ;;  %v3539_v31 = vld [vmem:[%s11668_s8] sm:$0xf] }
 0x2b4   :  { %v9624_v39 = vor.u32 %v10911_v36, %v9621_v38  ;;  %v3542_v24 = vperm.slane %v3539_v31, 1  ;;  %v3543_v46 = vperm.slane %v3539_v31, 2 }
 0x2e9   :  { %v3501_v15 = vpop.f32.mrf.mxu3 }
 0x2ea   :  { %v3502_v52 = vadd.f32 %v3501_v15, %v3488_v63  ;;  %v9397_v15 = vld [vmem:[#allocation9 + $0x5a0] sm:$0xf0] }
 0x2eb   :  { %v9400_v19 = vor.u32 %v10855_v14, %v9397_v15  ;;  %v10767_v63 = vld [vmem:[#allocation9 + $0x2c4] sm:$0xf] }
 0x2ec   :  { %v10743_v14 = vld [vmem:[#allocation9 + $0x204] sm:$0xf] }
 0x2ed   :  { %v8952_v12 = vor.u32 %v10743_v14, %v8949_v16 }
 0x2f1   :  { %v3503_v47 = vpop.f32.mrf.mxu3 }
 0x2f2   :  { %v3504_v13 = vadd.f32 %v3503_v47, %v3490_v43  ;;  %v9045_v43 = vld [vmem:[#allocation9 + $0x2e0] sm:$0xf0] }
 0x2f3   :  { %v9048_v44 = vor.u32 %v10767_v63, %v9045_v43  ;;  %v10903_v47 = vld [vmem:[#allocation9 + $0x704] sm:$0xf]  ;;  %v10740_v43 = vld [vmem:[#allocation9 + $0x1e4] sm:$0xf0] }
 0x2f4   :  { %v3506_v21 = vpack.c.bf16 %v3504_v13, %v3502_v52  ;;  %v9592_v50 = vor.u32 %v10903_v47, %v9589_v49  ;;  %v10759_v52 = vld [vmem:[#allocation9 + $0x284] sm:$0xf]  ;;  %v8760_v13 = vor.u32 %v10695_v51, %v8757_v59  ;;  %v3544_v47 = vperm.slane %v3539_v31, 3 }
 0x2f5   :  { %v9016_v55 = vor.u32 %v10759_v52, %v9013_v54  ;;  %v8924_v59 = vor.u32 %v10740_v43, %v8923_v40  ;;  %v10732_v54 = vld [vmem:[#allocation9 + $0x1a4] sm:$0xf0] }
 0x2f6   :  { %3717 = vmatmul.bf16.vlgmr.msrb.gmra.mxu0 %v3506_v21  ;;  %3731 = vmatmul.bf16.vlgmr.msrb.gmra.mxu1 %v3506_v21  ;;  %v9051_v40 = vld [vmem:[#allocation9 + $0x2c8] sm:$0xf] }
 0x2f7   :  { %3745 = vmatmul.bf16.vlgmr.msrb.gmra.mxu2 %v3506_v21  ;;  %3759 = vmatmul.bf16.vlgmr.msrb.gmra.mxu3 %v3506_v21  ;;  %v9557_v21 = vld [vmem:[#allocation9 + $0x6e0] sm:$0xf0] }
 0x2f8   :  { %5387 = vmatpush.bf16.msrb.mxu0 %v8920_v3  ;;  %5401 = vmatpush.bf16.msrb.mxu1 %v9176_v4  ;;  %v9560_v30 = vor.u32 %v10895_v10, %v9557_v21  ;;  %v8981_v3 = vld [vmem:[#allocation9 + $0x260] sm:$0xf0] }
 0x2f9   :  { %5415 = vmatpush.bf16.msrb.mxu2 %v9432_v9  ;;  %5429 = vmatpush.bf16.msrb.mxu3 %v9688_v11  ;;  %v8984_v4 = vor.u32 %v10751_v2, %v8981_v3  ;;  %v10679_v9 = vld [vmem:[#allocation9 + $0x4] sm:$0xf]  ;;  %v9435_v2 = vld [vmem:[#allocation9 + $0x5c8] sm:$0xf] }
 0x2fa   :  { %v8693_v11 = vld [vmem:[#allocation9 + $0x20] sm:$0xf0]  ;;  %v9691_v3 = vld [vmem:[#allocation9 + $0x7c8] sm:$0xf] }
 0x2fb   :  { %v8696_v15 = vor.u32 %v10679_v9, %v8693_v11  ;;  %v10788_v9 = vld [vmem:[#allocation9 + $0x364] sm:$0xf0] }
 0x2fc   :  { %5388 = vmatpush.bf16.msrb.mxu0 %v8888_v60  ;;  %5402 = vmatpush.bf16.msrb.mxu1 %v9144_v17  ;;  %v10815_v60 = vld [vmem:[#allocation9 + $0x444] sm:$0xf] }
 0x2fd   :  { %5416 = vmatpush.bf16.msrb.mxu2 %v9400_v19  ;;  %5430 = vmatpush.bf16.msrb.mxu3 %v9656_v23  ;;  %v9237_v17 = vld [vmem:[#allocation9 + $0x460] sm:$0xf0] }
 0x2fe   :  { %v9240_v0 = vor.u32 %v10815_v60, %v9237_v17  ;;  %v10807_v19 = vld [vmem:[#allocation9 + $0x404] sm:$0xf]  ;;  %v9692_v60 = vor.u32 %v10932_v6, %v9691_v3  ;;  %v10756_v3 = vld [vmem:[#allocation9 + $0x264] sm:$0xf0] }
 0x2ff   :  { %v9205_v23 = vld [vmem:[#allocation9 + $0x420] sm:$0xf0]  ;;  %v10828_v6 = vld [vmem:[#allocation9 + $0x4a4] sm:$0xf0] }
 0x300   :  { %5389 = vmatpush.bf16.msrb.mxu0 %v8856_v25  ;;  %5403 = vmatpush.bf16.msrb.mxu1 %v9112_v26  ;;  %v9208_v25 = vor.u32 %v10807_v19, %v9205_v23  ;;  %v10871_v26 = vld [vmem:[#allocation9 + $0x604] sm:$0xf]  ;;  %v9659_v23 = vld [vmem:[#allocation9 + $0x788] sm:$0xf] }
 0x301   :  { %5417 = vmatpush.bf16.msrb.mxu2 %v9368_v32  ;;  %5431 = vmatpush.bf16.msrb.mxu3 %v9624_v39  ;;  %v9464_v29 = vor.u32 %v10871_v26, %v9461_v27  ;;  %v8827_v26 = vld [vmem:[#allocation9 + $0x108] sm:$0xf] }
 0x302   :  { %v10716_v27 = vld [vmem:[#allocation9 + $0x124] sm:$0xf0] }
 0x304   :  { %5390 = vmatpush.bf16.msrb.mxu0 %v8824_v33  ;;  %5404 = vmatpush.bf16.msrb.mxu1 %v9080_v28  ;;  %v3541_v28 = vperm.slane %v3539_v31, 0  ;;  %v10780_v31 = vld [vmem:[#allocation9 + $0x324] sm:$0xf0] }
 0x305   :  { %5418 = vmatpush.bf16.msrb.mxu2 %v9336_v48  ;;  %5432 = vmatpush.bf16.msrb.mxu3 %v9592_v50 }
 0x308   :  { %5391 = vmatpush.bf16.msrb.mxu0 %v8792_v56  ;;  %5405 = vmatpush.bf16.msrb.mxu1 %v9048_v44  ;;  %v9179_v44 = vld [vmem:[#allocation9 + $0x3c8] sm:$0xf] }
 0x309   :  { %5419 = vmatpush.bf16.msrb.mxu2 %v9304_v61  ;;  %5433 = vmatpush.bf16.msrb.mxu3 %v9560_v30  ;;  %v9180_v52 = vor.u32 %v10804_v45, %v9179_v44  ;;  %v10796_v61 = vld [vmem:[#allocation9 + $0x3a4] sm:$0xf0] }
 0x30a   :  { %v9148_v42 = vor.u32 %v10796_v61, %v9147_v41  ;;  %v9339_v44 = vld [vmem:[#allocation9 + $0x508] sm:$0xf] }
 0x30b   :  { %v10844_v45 = vld [vmem:[#allocation9 + $0x524] sm:$0xf0] }
 0x30c   :  { %5392 = vmatpush.bf16.msrb.mxu0 %v8760_v13  ;;  %5406 = vmatpush.bf16.msrb.mxu1 %v9016_v55  ;;  %v8891_v13 = vld [vmem:[#allocation9 + $0x188] sm:$0xf] }
 0x30d   :  { %5420 = vmatpush.bf16.msrb.mxu2 %v9272_v7  ;;  %5434 = vmatpush.bf16.msrb.mxu3 %v9528_v35  ;;  %v8892_v1 = vor.u32 %v10732_v54, %v8891_v13  ;;  %v8859_v7 = vld [vmem:[#allocation9 + $0x148] sm:$0xf]  ;;  %v9340_v13 = vor.u32 %v10844_v45, %v9339_v44  ;;  %v10928_v44 = vld [vmem:[#allocation9 + $0x7cc] sm:$0xf] }
 0x30e   :  { %v9115_v35 = vld [vmem:[#allocation9 + $0x348] sm:$0xf]  ;;  %v8860_v17 = vor.u32 %v10724_v8, %v8859_v7  ;;  %v9693_v45 = vld [vmem:[#allocation9 + $0x7e8] sm:$0xf0] }
 0x30f   :  { %v9116_v19 = vor.u32 %v10788_v9, %v9115_v35  ;;  %v9307_v41 = vld [vmem:[#allocation9 + $0x4c8] sm:$0xf] }
 0x310   :  { %5393 = vmatpush.bf16.msrb.mxu0 %v8728_v58  ;;  %5407 = vmatpush.bf16.msrb.mxu1 %v8984_v4  ;;  %v10868_v58 = vld [vmem:[#allocation9 + $0x5e4] sm:$0xf0] }
 0x311   :  { %5421 = vmatpush.bf16.msrb.mxu2 %v9240_v0  ;;  %5435 = vmatpush.bf16.msrb.mxu3 %v9496_v22  ;;  %v10836_v61 = vld [vmem:[#allocation9 + $0x4e4] sm:$0xf0] }
 0x312   :  { %v9531_v7 = vld [vmem:[#allocation9 + $0x688] sm:$0xf] }
 0x313   :  { %v10892_v8 = vld [vmem:[#allocation9 + $0x6a4] sm:$0xf0] }
 0x314   :  { %5394 = vmatpush.bf16.msrb.mxu0 %v8696_v15  ;;  %5408 = vmatpush.bf16.msrb.mxu1 %v8952_v12  ;;  %v9436_v12 = vor.u32 %v10868_v58, %v9435_v2  ;;  %v10692_v2 = vld [vmem:[#allocation9 + $0x64] sm:$0xf0] }
 0x315   :  { %5422 = vmatpush.bf16.msrb.mxu2 %v9208_v25  ;;  %5436 = vmatpush.bf16.msrb.mxu3 %v9464_v29  ;;  %v10924_v25 = vld [vmem:[#allocation9 + $0x7a4] sm:$0xf0] }
 0x316   :  { %v9083_v29 = vld [vmem:[#allocation9 + $0x308] sm:$0xf] }
 0x317   :  { %v8987_v58 = vld [vmem:[#allocation9 + $0x248] sm:$0xf] }
 0x318   :  { %v8988_v9 = vor.u32 %v10756_v3, %v8987_v58  ;;  %v10776_v58 = vld [vmem:[#allocation9 + $0x30c] sm:$0xf] }
 0x319   :  { %v9085_v3 = vld [vmem:[#allocation9 + $0x328] sm:$0xf0] }
 0x373   :  { %v3718_v53 = vpop.f32.mrf.mxu0  ;;  %v3732_v33 = vpop.f32.mrf.mxu1 }
 0x374   :  { %v3719_v34 = vadd.f32 %v3718_v53, %v3541_v28  ;;  %v3733_v36 = vadd.f32 %v3732_v33, %v3542_v24  ;;  %v9404_v53 = vor.u32 %v10860_v20, %v9403_v18  ;;  %v9660_v33 = vor.u32 %v10924_v25, %v9659_v23  ;;  %v10800_v20 = vld [vmem:[#allocation9 + $0x3cc] sm:$0xf]  ;;  %v9243_v23 = vld [vmem:[#allocation9 + $0x448] sm:$0xf] }
 0x375   :  { %v9532_v18 = vor.u32 %v10892_v8, %v9531_v7  ;;  %v10820_v25 = vld [vmem:[#allocation9 + $0x464] sm:$0xf0]  ;;  %v10912_v7 = vld [vmem:[#allocation9 + $0x74c] sm:$0xf] }
 0x376   :  { %v3765_v48 = vmax.f32 %v3719_v34, 0.0  ;;  %v3766_v49 = vmax.f32 %v3733_v36, 0.0  ;;  %v9084_v34 = vor.u32 %v10780_v31, %v9083_v29  ;;  %v10852_v36 = vld [vmem:[#allocation9 + $0x564] sm:$0xf0]  ;;  %v9629_v8 = vld [vmem:[#allocation9 + $0x768] sm:$0xf0] }
 0x37a   :  { %v3746_v32 = vpop.f32.mrf.mxu2  ;;  %v3760_v38 = vpop.f32.mrf.mxu3 }
 0x37b   :  { %v3720_v39 = vpop.f32.mrf.mxu0  ;;  %v3734_v37 = vpop.f32.mrf.mxu1  ;;  %v3747_v10 = vadd.f32 %v3746_v32, %v3543_v46  ;;  %v3761_v21 = vadd.f32 %v3760_v38, %v3544_v47  ;;  %v9627_v32 = vld [vmem:[#allocation9 + $0x748] sm:$0xf] }
 0x37c   :  { %v3721_v56 = vadd.f32 %v3720_v39, %v3541_v28  ;;  %v3735_v63 = vadd.f32 %v3734_v37, %v3542_v24  ;;  %v9371_v28 = vld [vmem:[#allocation9 + $0x548] sm:$0xf]  ;;  %v8828_v24 = vor.u32 %v10716_v27, %v8827_v26 }
 0x37d   :  { %v3767_v11 = vmax.f32 %v3747_v10, 0.0  ;;  %v3768_v14 = vmax.f32 %v3761_v21, 0.0  ;;  %v10916_v38 = vld [vmem:[#allocation9 + $0x764] sm:$0xf0] }
 0x37e   :  { %v3769_v50 = vmax.f32 %v3721_v56, 0.0  ;;  %v3770_v51 = vmax.f32 %v3735_v63, 0.0  ;;  %v8795_v39 = vld [vmem:[#allocation9 + $0xc8] sm:$0xf]  ;;  %v9372_v63 = vor.u32 %v10852_v36, %v9371_v28  ;;  %v9628_v43 = vor.u32 %v10916_v38, %v9627_v32  ;;  %v10728_v28 = vld [vmem:[#allocation9 + $0x18c] sm:$0xf] }
 0x37f   :  { %v10708_v37 = vld [vmem:[#allocation9 + $0xe4] sm:$0xf0]  ;;  %v9244_v36 = vor.u32 %v10820_v25, %v9243_v23  ;;  %v9149_v38 = vld [vmem:[#allocation9 + $0x3a8] sm:$0xf0] }
 0x380   :  { %v11481_v55 = vpack.c.bf16 %v3769_v50, %v3765_v48  ;;  %v11483_v57 = vpack.c.bf16 %v3770_v51, %v3766_v49  ;;  %v10772_v56 = vld [vmem:[#allocation9 + $0x2e4] sm:$0xf0]  ;;  %v8796_v48 = vor.u32 %v10708_v37, %v8795_v39 }
 0x381   :  { %v9052_v49 = vor.u32 %v10772_v56, %v9051_v40  ;;  %v8763_v50 = vld [vmem:[#allocation9 + $0x88] sm:$0xf] }
 0x382   :  { %v3748_v30 = vpop.f32.mrf.mxu2  ;;  %v3762_v62 = vpop.f32.mrf.mxu3  ;;  %5339 = vmatmul.bf16.vlgmr.msra.gmra.mxu0 %v11481_v55  ;;  %5353 = vmatmul.bf16.vlgmr.msra.gmra.mxu1 %v11483_v57  ;;  %v10700_v51 = vld [vmem:[#allocation9 + $0xa4] sm:$0xf0] }
 0x383   :  { %v3749_v4 = vadd.f32 %v3748_v30, %v3543_v46  ;;  %v3763_v5 = vadd.f32 %v3762_v62, %v3544_v47  ;;  %5443 = vmatpush.bf16.msra.mxu0 %v8924_v59  ;;  %5457 = vmatpush.bf16.msra.mxu1 %v9180_v52  ;;  %v9595_v46 = vld [vmem:[#allocation9 + $0x708] sm:$0xf]  ;;  %v8764_v30 = vor.u32 %v10700_v51, %v8763_v50  ;;  %v8861_v51 = vld [vmem:[#allocation9 + $0x168] sm:$0xf0] }
 0x384   :  { %v10908_v47 = vld [vmem:[#allocation9 + $0x724] sm:$0xf0] }
 0x385   :  { %v3771_v15 = vmax.f32 %v3749_v4, 0.0  ;;  %v3772_v16 = vmax.f32 %v3763_v5, 0.0  ;;  %v9019_v59 = vld [vmem:[#allocation9 + $0x288] sm:$0xf]  ;;  %v9596_v54 = vor.u32 %v10908_v47, %v9595_v46  ;;  %v9308_v4 = vor.u32 %v10836_v61, %v9307_v41  ;;  %v10856_v41 = vld [vmem:[#allocation9 + $0x58c] sm:$0xf] }
 0x386   :  { %v10764_v52 = vld [vmem:[#allocation9 + $0x2a4] sm:$0xf0]  ;;  %v9405_v61 = vld [vmem:[#allocation9 + $0x5a8] sm:$0xf0] }
 0x387   :  { %v11487_v0 = vpack.c.bf16 %v3771_v15, %v3767_v11  ;;  %v11489_v22 = vpack.c.bf16 %v3772_v16, %v3768_v14  ;;  %5444 = vmatpush.bf16.msra.mxu0 %v8892_v1  ;;  %5458 = vmatpush.bf16.msra.mxu1 %v9148_v42  ;;  %v9563_v10 = vld [vmem:[#allocation9 + $0x6c8] sm:$0xf]  ;;  %v9020_v62 = vor.u32 %v10764_v52, %v9019_v59  ;;  %v10784_v59 = vld [vmem:[#allocation9 + $0x34c] sm:$0xf] }
 0x388   :  { %v10900_v21 = vld [vmem:[#allocation9 + $0x6e4] sm:$0xf0]  ;;  %v9117_v52 = vld [vmem:[#allocation9 + $0x368] sm:$0xf0] }
 0x389   :  { %5367 = vmatmul.bf16.vlgmr.msra.gmra.mxu2 %v11487_v0  ;;  %5381 = vmatmul.bf16.vlgmr.msra.gmra.mxu3 %v11489_v22  ;;  %v8731_v1 = vld [vmem:[#allocation9 + $0x48] sm:$0xf]  ;;  %v9564_v5 = vor.u32 %v10900_v21, %v9563_v10  ;;  %v10920_v10 = vld [vmem:[#allocation9 + $0x78c] sm:$0xf] }
 0x38a   :  { %5471 = vmatpush.bf16.msra.mxu2 %v9436_v12  ;;  %5485 = vmatpush.bf16.msra.mxu3 %v9692_v60  ;;  %v9275_v42 = vld [vmem:[#allocation9 + $0x488] sm:$0xf]  ;;  %v8732_v35 = vor.u32 %v10692_v2, %v8731_v1  ;;  %v10736_v12 = vld [vmem:[#allocation9 + $0x1cc] sm:$0xf] }
 0x38b   :  { %5445 = vmatpush.bf16.msra.mxu0 %v8860_v17  ;;  %5459 = vmatpush.bf16.msra.mxu1 %v9116_v19  ;;  %v8699_v11 = vld [vmem:[#allocation9 + $0x8] sm:$0xf]  ;;  %v8925_v60 = vld [vmem:[#allocation9 + $0x1e8] sm:$0xf0]  ;;  %v9276_v17 = vor.u32 %v10828_v6, %v9275_v42 }
 0x38c   :  { %v10684_v14 = vld [vmem:[#allocation9 + $0x24] sm:$0xf0]  ;;  %v9181_v19 = vld [vmem:[#allocation9 + $0x3e8] sm:$0xf0] }
 0x38d   :  { %v8955_v15 = vld [vmem:[#allocation9 + $0x208] sm:$0xf]  ;;  %v8700_v29 = vor.u32 %v10684_v14, %v8699_v11  ;;  %v9661_v21 = vld [vmem:[#allocation9 + $0x7a8] sm:$0xf0] }
 0x38e   :  { %5472 = vmatpush.bf16.msra.mxu2 %v9404_v53  ;;  %5486 = vmatpush.bf16.msra.mxu3 %v9660_v33  ;;  %v10748_v16 = vld [vmem:[#allocation9 + $0x224] sm:$0xf0]  ;;  %v8928_v53 = vor.u32 %v10736_v12, %v8925_v60  ;;  %v9184_v33 = vor.u32 %v10800_v20, %v9181_v19  ;;  %v10712_v1 = vld [vmem:[#allocation9 + $0x10c] sm:$0xf]  ;;  %v9632_v60 = vor.u32 %v10912_v7, %v9629_v8  ;;  %v9155_v7 = vld [vmem:[#allocation9 + $0x390] sm:$0xf] }
 0x38f   :  { %5446 = vmatpush.bf16.msra.mxu0 %v8828_v24  ;;  %5460 = vmatpush.bf16.msra.mxu1 %v9084_v34  ;;  %v9499_v26 = vld [vmem:[#allocation9 + $0x648] sm:$0xf]  ;;  %v8956_v31 = vor.u32 %v10748_v16, %v8955_v15  ;;  %v8893_v24 = vld [vmem:[#allocation9 + $0x1a8] sm:$0xf0] }
 0x390   :  { %v10884_v27 = vld [vmem:[#allocation9 + $0x664] sm:$0xf0]  ;;  %v10792_v34 = vld [vmem:[#allocation9 + $0x38c] sm:$0xf]  ;;  %v8896_v46 = vor.u32 %v10728_v28, %v8893_v24 }
 0x391   :  { %v9500_v32 = vor.u32 %v10884_v27, %v9499_v26  ;;  %v9211_v39 = vld [vmem:[#allocation9 + $0x408] sm:$0xf]  ;;  %v9152_v47 = vor.u32 %v10792_v34, %v9149_v38  ;;  %v8829_v2 = vld [vmem:[#allocation9 + $0x128] sm:$0xf0] }
 0x392   :  { %5473 = vmatpush.bf16.msra.mxu2 %v9372_v63  ;;  %5487 = vmatpush.bf16.msra.mxu3 %v9628_v43  ;;  %v10812_v37 = vld [vmem:[#allocation9 + $0x424] sm:$0xf0]  ;;  %v10864_v63 = vld [vmem:[#allocation9 + $0x5cc] sm:$0xf] }
 0x393   :  { %5395 = vmatmul.bf16.vlgmr.msrb.gmra.mxu0 %v11481_v55  ;;  %5409 = vmatmul.bf16.vlgmr.msrb.gmra.mxu1 %v11483_v57  ;;  %v9467_v40 = vld [vmem:[#allocation9 + $0x608] sm:$0xf]  ;;  %v9437_v43 = vld [vmem:[#allocation9 + $0x5e8] sm:$0xf0] }
 0x394   :  { %5447 = vmatpush.bf16.msra.mxu0 %v8796_v48  ;;  %5461 = vmatpush.bf16.msra.mxu1 %v9052_v49  ;;  %v10876_v56 = vld [vmem:[#allocation9 + $0x624] sm:$0xf0]  ;;  %v10720_v48 = vld [vmem:[#allocation9 + $0x14c] sm:$0xf]  ;;  %v9212_v49 = vor.u32 %v10812_v37, %v9211_v39 }
 0x395   :  { %v9468_v50 = vor.u32 %v10876_v56, %v9467_v40  ;;  %v10848_v42 = vld [vmem:[#allocation9 + $0x54c] sm:$0xf] }
 0x396   :  { %5474 = vmatpush.bf16.msra.mxu2 %v9340_v13  ;;  %5488 = vmatpush.bf16.msra.mxu3 %v9596_v54  ;;  %v9440_v13 = vor.u32 %v10864_v63, %v9437_v43  ;;  %v9696_v54 = vor.u32 %v10928_v44, %v9693_v45  ;;  %v9373_v6 = vld [vmem:[#allocation9 + $0x568] sm:$0xf0] }
 0x397   :  { %v10704_v11 = vld [vmem:[#allocation9 + $0xcc] sm:$0xf]  ;;  %v9376_v12 = vor.u32 %v10848_v42, %v9373_v6  ;;  %v8899_v42 = vld [vmem:[#allocation9 + $0x190] sm:$0xf] }
 0x398   :  { %5448 = vmatpush.bf16.msra.mxu0 %v8764_v30  ;;  %5462 = vmatpush.bf16.msra.mxu1 %v9020_v62  ;;  %v8864_v30 = vor.u32 %v10720_v48, %v8861_v51  ;;  %v9120_v62 = vor.u32 %v10784_v59, %v9117_v52  ;;  %v8797_v14 = vld [vmem:[#allocation9 + $0xe8] sm:$0xf0]  ;;  %v10733_v6 = vld [vmem:[#allocation9 + $0x1ac] sm:$0xf0] }
 0x399   :  { %5423 = vmatmul.bf16.vlgmr.msrb.gmra.mxu2 %v11487_v0  ;;  %5437 = vmatmul.bf16.vlgmr.msrb.gmra.mxu3 %v11489_v22  ;;  %v10768_v15 = vld [vmem:[#allocation9 + $0x2cc] sm:$0xf]  ;;  %v8800_v23 = vor.u32 %v10704_v11, %v8797_v14 }
 0x39a   :  { %5475 = vmatpush.bf16.msra.mxu2 %v9308_v4  ;;  %5489 = vmatpush.bf16.msra.mxu3 %v9564_v5  ;;  %v9408_v4 = vor.u32 %v10856_v41, %v9405_v61  ;;  %v9664_v5 = vor.u32 %v10920_v10, %v9661_v21  ;;  %v9053_v16 = vld [vmem:[#allocation9 + $0x2e8] sm:$0xf0]  ;;  %v9187_v10 = vld [vmem:[#allocation9 + $0x3d0] sm:$0xf] }
 0x39b   :  { %v10904_v20 = vld [vmem:[#allocation9 + $0x70c] sm:$0xf]  ;;  %v9056_v25 = vor.u32 %v10768_v15, %v9053_v16  ;;  %v10805_v21 = vld [vmem:[#allocation9 + $0x3ec] sm:$0xf0] }
 0x39c   :  { %5449 = vmatpush.bf16.msra.mxu0 %v8732_v35  ;;  %5463 = vmatpush.bf16.msra.mxu1 %v8988_v9  ;;  %v8832_v35 = vor.u32 %v10712_v1, %v8829_v2  ;;  %v9088_v9 = vor.u32 %v10776_v58, %v9085_v3  ;;  %v9597_v19 = vld [vmem:[#allocation9 + $0x728] sm:$0xf0] }
 0x39d   :  { %v10696_v26 = vld [vmem:[#allocation9 + $0x8c] sm:$0xf] }
 0x39e   :  { %5476 = vmatpush.bf16.msra.mxu2 %v9276_v17  ;;  %5490 = vmatpush.bf16.msra.mxu3 %v9532_v18  ;;  %v10840_v17 = vld [vmem:[#allocation9 + $0x50c] sm:$0xf] }
 0x39f   :  { %v9341_v18 = vld [vmem:[#allocation9 + $0x528] sm:$0xf0] }
 0x3a0   :  { %5450 = vmatpush.bf16.msra.mxu0 %v8700_v29  ;;  %5464 = vmatpush.bf16.msra.mxu1 %v8956_v31  ;;  %v8765_v27 = vld [vmem:[#allocation9 + $0xa8] sm:$0xf0] }
 0x3a1   :  { %v10760_v29 = vld [vmem:[#allocation9 + $0x28c] sm:$0xf] }
 0x3a2   :  { %5477 = vmatpush.bf16.msra.mxu2 %v9244_v36  ;;  %5491 = vmatpush.bf16.msra.mxu3 %v9500_v32  ;;  %v9021_v31 = vld [vmem:[#allocation9 + $0x2a8] sm:$0xf0]  ;;  %v8768_v32 = vor.u32 %v10696_v26, %v8765_v27  ;;  %v8867_v26 = vld [vmem:[#allocation9 + $0x150] sm:$0xf] }
 0x3a3   :  { %5451 = vmatmul.bf16.vlgmr.msra.gmra.mxu0 %v11481_v55  ;;  %5465 = vmatmul.bf16.vlgmr.msra.gmra.mxu1 %v11483_v57  ;;  %v10832_v28 = vld [vmem:[#allocation9 + $0x4cc] sm:$0xf]  ;;  %v9024_v38 = vor.u32 %v10760_v29, %v9021_v31  ;;  %v10725_v27 = vld [vmem:[#allocation9 + $0x16c] sm:$0xf0] }
 0x3a4   :  { %5499 = vmatpush.bf16.msrb.mxu0 %v8928_v53  ;;  %5513 = vmatpush.bf16.msrb.mxu1 %v9184_v33  ;;  %v9344_v53 = vor.u32 %v10840_v17, %v9341_v18  ;;  %v9600_v33 = vor.u32 %v10904_v20, %v9597_v19  ;;  %v9309_v24 = vld [vmem:[#allocation9 + $0x4e8] sm:$0xf0]  ;;  %v9699_v17 = vld [vmem:[#allocation9 + $0x7d0] sm:$0xf]  ;;  %v8900_v20 = vor.u32 %v10733_v6, %v8899_v42 }
 0x3a5   :  { %v10896_v34 = vld [vmem:[#allocation9 + $0x6cc] sm:$0xf]  ;;  %v9312_v63 = vor.u32 %v10832_v28, %v9309_v24  ;;  %v10933_v18 = vld [vmem:[#allocation9 + $0x7ec] sm:$0xf0] }
 0x3a6   :  { %5478 = vmatpush.bf16.msra.mxu2 %v9212_v49  ;;  %5492 = vmatpush.bf16.msra.mxu3 %v9468_v50  ;;  %v9565_v36 = vld [vmem:[#allocation9 + $0x6e8] sm:$0xf0]  ;;  %v9700_v31 = vor.u32 %v10933_v18, %v9699_v17  ;;  %v9411_v28 = vld [vmem:[#allocation9 + $0x590] sm:$0xf] }
 0x3a7   :  { %v10688_v39 = vld [vmem:[#allocation9 + $0x4c] sm:$0xf]  ;;  %v9568_v43 = vor.u32 %v10896_v34, %v9565_v36  ;;  %v10861_v24 = vld [vmem:[#allocation9 + $0x5ac] sm:$0xf0] }
 0x3a8   :  { %5500 = vmatpush.bf16.msrb.mxu0 %v8896_v46  ;;  %5514 = vmatpush.bf16.msrb.mxu1 %v9152_v47  ;;  %v8733_v37 = vld [vmem:[#allocation9 + $0x68] sm:$0xf0]  ;;  %v9667_v34 = vld [vmem:[#allocation9 + $0x790] sm:$0xf] }
 0x3a9   :  { %5479 = vmatmul.bf16.vlgmr.msra.gmra.mxu2 %v11487_v0  ;;  %5493 = vmatmul.bf16.vlgmr.msra.gmra.mxu3 %v11489_v22  ;;  %v10752_v40 = vld [vmem:[#allocation9 + $0x24c] sm:$0xf]  ;;  %v8736_v48 = vor.u32 %v10688_v39, %v8733_v37  ;;  %v10925_v36 = vld [vmem:[#allocation9 + $0x7ac] sm:$0xf0] }
 0x3aa   :  { %5527 = vmatpush.bf16.msrb.mxu2 %v9440_v13  ;;  %5541 = vmatpush.bf16.msrb.mxu3 %v9696_v54  ;;  %v8989_v56 = vld [vmem:[#allocation9 + $0x268] sm:$0xf0]  ;;  %v8931_v13 = vld [vmem:[#allocation9 + $0x1d0] sm:$0xf] }
 0x3ab   :  { %v10824_v44 = vld [vmem:[#allocation9 + $0x48c] sm:$0xf]  ;;  %v8992_v49 = vor.u32 %v10752_v40, %v8989_v56  ;;  %v10741_v54 = vld [vmem:[#allocation9 + $0x1ec] sm:$0xf0]  ;;  %v9412_v40 = vor.u32 %v10861_v24, %v9411_v28  ;;  %v9668_v56 = vor.u32 %v10925_v36, %v9667_v34  ;;  %v10737_v28 = vld [vmem:[#allocation9 + $0x1d4] sm:$0xf] }
 0x3ac   :  { %5501 = vmatpush.bf16.msrb.mxu0 %v8864_v30  ;;  %5515 = vmatpush.bf16.msrb.mxu1 %v9120_v62  ;;  %v9277_v45 = vld [vmem:[#allocation9 + $0x4a8] sm:$0xf0]  ;;  %v8835_v39 = vld [vmem:[#allocation9 + $0x110] sm:$0xf]  ;;  %v8933_v24 = vld [vmem:[#allocation9 + $0x1f0] sm:$0xf0] }
 0x3ad   :  { %v10888_v46 = vld [vmem:[#allocation9 + $0x68c] sm:$0xf]  ;;  %v9280_v41 = vor.u32 %v10824_v44, %v9277_v45  ;;  %v10717_v37 = vld [vmem:[#allocation9 + $0x12c] sm:$0xf0]  ;;  %v10801_v34 = vld [vmem:[#allocation9 + $0x3d4] sm:$0xf] }
 0x3ae   :  { %5528 = vmatpush.bf16.msrb.mxu2 %v9408_v4  ;;  %5542 = vmatpush.bf16.msrb.mxu3 %v9664_v5  ;;  %v9533_v47 = vld [vmem:[#allocation9 + $0x6a8] sm:$0xf0]  ;;  %v8932_v4 = vor.u32 %v10741_v54, %v8931_v13  ;;  %v9188_v5 = vor.u32 %v10805_v21, %v9187_v10  ;;  %v9379_v44 = vld [vmem:[#allocation9 + $0x550] sm:$0xf]  ;;  %v9189_v36 = vld [vmem:[#allocation9 + $0x3f0] sm:$0xf0] }
 0x3af   :  { %v10680_v50 = vld [vmem:[#allocation9 + $0xc] sm:$0xf]  ;;  %v9536_v61 = vor.u32 %v10888_v46, %v9533_v47  ;;  %v10853_v45 = vld [vmem:[#allocation9 + $0x56c] sm:$0xf0] }
 0x3b0   :  { %5502 = vmatpush.bf16.msrb.mxu0 %v8832_v35  ;;  %5516 = vmatpush.bf16.msrb.mxu1 %v9088_v9  ;;  %v8701_v51 = vld [vmem:[#allocation9 + $0x28] sm:$0xf0]  ;;  %v10797_v9 = vld [vmem:[#allocation9 + $0x3ac] sm:$0xf0] }
 0x3b1   :  { %v10744_v59 = vld [vmem:[#allocation9 + $0x20c] sm:$0xf]  ;;  %v8704_v58 = vor.u32 %v10680_v50, %v8701_v51  ;;  %v9156_v19 = vor.u32 %v10797_v9, %v9155_v7  ;;  %v9635_v46 = vld [vmem:[#allocation9 + $0x750] sm:$0xf] }
 0x3b2   :  { %5529 = vmatpush.bf16.msrb.mxu2 %v9376_v12  ;;  %5543 = vmatpush.bf16.msrb.mxu3 %v9632_v60  ;;  %v8957_v52 = vld [vmem:[#allocation9 + $0x228] sm:$0xf0]  ;;  %v9443_v12 = vld [vmem:[#allocation9 + $0x5d0] sm:$0xf] }
 0x3b3   :  { %v10816_v30 = vld [vmem:[#allocation9 + $0x44c] sm:$0xf]  ;;  %v8960_v3 = vor.u32 %v10744_v59, %v8957_v52  ;;  %v10869_v60 = vld [vmem:[#allocation9 + $0x5ec] sm:$0xf0]  ;;  %v9380_v59 = vor.u32 %v10853_v45, %v9379_v44  ;;  %v10729_v44 = vld [vmem:[#allocation9 + $0x194] sm:$0xf] }
 0x3b4   :  { %5503 = vmatpush.bf16.msrb.mxu0 %v8800_v23  ;;  %5517 = vmatpush.bf16.msrb.mxu1 %v9056_v25  ;;  %v9245_v62 = vld [vmem:[#allocation9 + $0x468] sm:$0xf0]  ;;  %v9444_v29 = vor.u32 %v10869_v60, %v9443_v12  ;;  %v10917_v47 = vld [vmem:[#allocation9 + $0x76c] sm:$0xf0]  ;;  %v8901_v45 = vld [vmem:[#allocation9 + $0x1b0] sm:$0xf0] }
 0x3b5   :  { %v10880_v1 = vld [vmem:[#allocation9 + $0x64c] sm:$0xf]  ;;  %v9248_v8 = vor.u32 %v10816_v30, %v9245_v62  ;;  %v8803_v50 = vld [vmem:[#allocation9 + $0xd0] sm:$0xf]  ;;  %v9636_v52 = vor.u32 %v10917_v47, %v9635_v46  ;;  %v10793_v46 = vld [vmem:[#allocation9 + $0x394] sm:$0xf] }
 0x3b6   :  { %5530 = vmatpush.bf16.msrb.mxu2 %v9344_v53  ;;  %5544 = vmatpush.bf16.msrb.mxu3 %v9600_v33  ;;  %v9501_v2 = vld [vmem:[#allocation9 + $0x668] sm:$0xf0]  ;;  %v9123_v53 = vld [vmem:[#allocation9 + $0x350] sm:$0xf] }
 0x3b7   :  { %v9504_v35 = vor.u32 %v10880_v1, %v9501_v2  ;;  %v10808_v11 = vld [vmem:[#allocation9 + $0x40c] sm:$0xf]  ;;  %v10789_v33 = vld [vmem:[#allocation9 + $0x36c] sm:$0xf0] }
 0x3b8   :  { %5504 = vmatpush.bf16.msrb.mxu0 %v8768_v32  ;;  %5518 = vmatpush.bf16.msrb.mxu1 %v9024_v38  ;;  %v9213_v14 = vld [vmem:[#allocation9 + $0x428] sm:$0xf0]  ;;  %v8868_v32 = vor.u32 %v10725_v27, %v8867_v26  ;;  %v9124_v38 = vor.u32 %v10789_v33, %v9123_v53  ;;  %v10709_v51 = vld [vmem:[#allocation9 + $0xec] sm:$0xf0] }
 0x3b9   :  { %v10872_v15 = vld [vmem:[#allocation9 + $0x60c] sm:$0xf]  ;;  %v9216_v23 = vor.u32 %v10808_v11, %v9213_v14  ;;  %v9059_v13 = vld [vmem:[#allocation9 + $0x2d0] sm:$0xf]  ;;  %v8804_v30 = vor.u32 %v10709_v51, %v8803_v50 }
 0x3ba   :  { %5531 = vmatpush.bf16.msrb.mxu2 %v9312_v63  ;;  %5545 = vmatpush.bf16.msrb.mxu3 %v9568_v43  ;;  %v9469_v16 = vld [vmem:[#allocation9 + $0x628] sm:$0xf0]  ;;  %v9091_v63 = vld [vmem:[#allocation9 + $0x310] sm:$0xf] }
 0x3bb   :  { %v9472_v25 = vor.u32 %v10872_v15, %v9469_v16  ;;  %v10781_v43 = vld [vmem:[#allocation9 + $0x32c] sm:$0xf0] }
 0x3bc   :  { %5505 = vmatpush.bf16.msrb.mxu0 %v8736_v48  ;;  %5519 = vmatpush.bf16.msrb.mxu1 %v8992_v49  ;;  %v8836_v48 = vor.u32 %v10717_v37, %v8835_v39  ;;  %v9092_v49 = vor.u32 %v10781_v43, %v9091_v63  ;;  %v10773_v54 = vld [vmem:[#allocation9 + $0x2ec] sm:$0xf0]  ;;  %v8936_v63 = vor.u32 %v10737_v28, %v8933_v24  ;;  %v10841_v28 = vld [vmem:[#allocation9 + $0x514] sm:$0xf] }
 0x3bd   :  { %v9603_v10 = vld [vmem:[#allocation9 + $0x710] sm:$0xf]  ;;  %v9060_v62 = vor.u32 %v10773_v54, %v9059_v13  ;;  %v9192_v43 = vor.u32 %v10801_v34, %v9189_v36  ;;  %v10865_v13 = vld [vmem:[#allocation9 + $0x5d4] sm:$0xf] }
 0x3be   :  { %5532 = vmatpush.bf16.msrb.mxu2 %v9280_v41  ;;  %5546 = vmatpush.bf16.msrb.mxu3 %v9536_v61  ;;  %v9347_v41 = vld [vmem:[#allocation9 + $0x510] sm:$0xf]  ;;  %v9445_v54 = vld [vmem:[#allocation9 + $0x5f0] sm:$0xf0] }
 0x3bf   :  { %v10845_v61 = vld [vmem:[#allocation9 + $0x52c] sm:$0xf0]  ;;  %v9349_v24 = vld [vmem:[#allocation9 + $0x530] sm:$0xf0] }
 0x3c0   :  { %5506 = vmatpush.bf16.msrb.mxu0 %v8704_v58  ;;  %5520 = vmatpush.bf16.msrb.mxu1 %v8960_v3  ;;  %v10909_v21 = vld [vmem:[#allocation9 + $0x72c] sm:$0xf0]  ;;  %v9348_v58 = vor.u32 %v10845_v61, %v9347_v41  ;;  %v10929_v41 = vld [vmem:[#allocation9 + $0x7d4] sm:$0xf] }
 0x3c1   :  { %v8771_v1 = vld [vmem:[#allocation9 + $0x90] sm:$0xf]  ;;  %v9604_v3 = vor.u32 %v10909_v21, %v9603_v10  ;;  %v9701_v61 = vld [vmem:[#allocation9 + $0x7f0] sm:$0xf0]  ;;  %v8904_v10 = vor.u32 %v10729_v44, %v8901_v45 }
 0x3c2   :  { %5533 = vmatpush.bf16.msrb.mxu2 %v9248_v8  ;;  %5547 = vmatpush.bf16.msrb.mxu3 %v9504_v35  ;;  %v10701_v2 = vld [vmem:[#allocation9 + $0xac] sm:$0xf0]  ;;  %v10905_v34 = vld [vmem:[#allocation9 + $0x714] sm:$0xf] }
 0x3c3   :  { %5507 = vmatmul.bf16.vlgmr.msrb.gmra.mxu0 %v11481_v55  ;;  %5521 = vmatmul.bf16.vlgmr.msrb.gmra.mxu1 %v11483_v57  ;;  %v9315_v42 = vld [vmem:[#allocation9 + $0x4d0] sm:$0xf]  ;;  %v8772_v35 = vor.u32 %v10701_v2, %v8771_v1  ;;  %v10721_v1 = vld [vmem:[#allocation9 + $0x154] sm:$0xf] }
 0x3c4   :  { %5555 = vmatpush.bf16.msra.mxu0 %v8932_v4  ;;  %5569 = vmatpush.bf16.msra.mxu1 %v9188_v5  ;;  %v9027_v4 = vld [vmem:[#allocation9 + $0x290] sm:$0xf]  ;;  %v8869_v2 = vld [vmem:[#allocation9 + $0x170] sm:$0xf0] }
 0x3c5   :  { %v10765_v5 = vld [vmem:[#allocation9 + $0x2ac] sm:$0xf0]  ;;  %v9605_v36 = vld [vmem:[#allocation9 + $0x730] sm:$0xf0] }
 0x3c6   :  { %5534 = vmatpush.bf16.msrb.mxu2 %v9216_v23  ;;  %5548 = vmatpush.bf16.msrb.mxu3 %v9472_v25  ;;  %v10837_v6 = vld [vmem:[#allocation9 + $0x4ec] sm:$0xf0]  ;;  %v9028_v9 = vor.u32 %v10765_v5, %v9027_v4  ;;  %v10785_v4 = vld [vmem:[#allocation9 + $0x354] sm:$0xf] }
 0x3c7   :  { %v9571_v7 = vld [vmem:[#allocation9 + $0x6d0] sm:$0xf]  ;;  %v9316_v15 = vor.u32 %v10837_v6, %v9315_v42  ;;  %v9125_v5 = vld [vmem:[#allocation9 + $0x370] sm:$0xf0] }
 0x3c8   :  { %5556 = vmatpush.bf16.msra.mxu0 %v8900_v20  ;;  %5570 = vmatpush.bf16.msra.mxu1 %v9156_v19  ;;  %v10901_v8 = vld [vmem:[#allocation9 + $0x6ec] sm:$0xf0]  ;;  %v10857_v42 = vld [vmem:[#allocation9 + $0x594] sm:$0xf] }
 0x3c9   :  { %5535 = vmatmul.bf16.vlgmr.msrb.gmra.mxu2 %v11487_v0  ;;  %5549 = vmatmul.bf16.vlgmr.msrb.gmra.mxu3 %v11489_v22  ;;  %v8739_v11 = vld [vmem:[#allocation9 + $0x50] sm:$0xf]  ;;  %v9572_v16 = vor.u32 %v10901_v8, %v9571_v7  ;;  %v9413_v6 = vld [vmem:[#allocation9 + $0x5b0] sm:$0xf0] }
 0x3ca   :  { %5583 = vmatpush.bf16.msra.mxu2 %v9444_v29  ;;  %5597 = vmatpush.bf16.msra.mxu3 %v9700_v31  ;;  %v10693_v14 = vld [vmem:[#allocation9 + $0x6c] sm:$0xf0]  ;;  %v10921_v7 = vld [vmem:[#allocation9 + $0x794] sm:$0xf] }
 0x3cb   :  { %v8995_v12 = vld [vmem:[#allocation9 + $0x250] sm:$0xf]  ;;  %v8740_v23 = vor.u32 %v10693_v14, %v8739_v11  ;;  %v9669_v8 = vld [vmem:[#allocation9 + $0x7b0] sm:$0xf0] }
 0x3cc   :  { %5557 = vmatpush.bf16.msra.mxu0 %v8868_v32  ;;  %5571 = vmatpush.bf16.msra.mxu1 %v9124_v38  ;;  %v10757_v60 = vld [vmem:[#allocation9 + $0x26c] sm:$0xf0]  ;;  %v10713_v11 = vld [vmem:[#allocation9 + $0x114] sm:$0xf] }
 0x3cd   :  { %v9283_v17 = vld [vmem:[#allocation9 + $0x490] sm:$0xf]  ;;  %v8996_v25 = vor.u32 %v10757_v60, %v8995_v12  ;;  %v8837_v14 = vld [vmem:[#allocation9 + $0x130] sm:$0xf0] }
 0x3ce   :  { %5584 = vmatpush.bf16.msra.mxu2 %v9412_v40  ;;  %5598 = vmatpush.bf16.msra.mxu3 %v9668_v56  ;;  %v10829_v18 = vld [vmem:[#allocation9 + $0x4ac] sm:$0xf0]  ;;  %v10777_v12 = vld [vmem:[#allocation9 + $0x314] sm:$0xf] }
 0x3cf   :  { %v9539_v20 = vld [vmem:[#allocation9 + $0x690] sm:$0xf]  ;;  %v9284_v31 = vor.u32 %v10829_v18, %v9283_v17  ;;  %v9093_v60 = vld [vmem:[#allocation9 + $0x330] sm:$0xf0] }
 0x3d0   :  { %5558 = vmatpush.bf16.msra.mxu0 %v8836_v48  ;;  %5572 = vmatpush.bf16.msra.mxu1 %v9092_v49  ;;  %v10893_v19 = vld [vmem:[#allocation9 + $0x6ac] sm:$0xf0]  ;;  %v9157_v49 = vld [vmem:[#allocation9 + $0x3b0] sm:$0xf0] }
 0x3d1   :  { %v8707_v26 = vld [vmem:[#allocation9 + $0x10] sm:$0xf]  ;;  %v9540_v53 = vor.u32 %v10893_v19, %v9539_v20  ;;  %v9160_v21 = vor.u32 %v10793_v46, %v9157_v49  ;;  %v10849_v17 = vld [vmem:[#allocation9 + $0x554] sm:$0xf] }
 0x3d2   :  { %5585 = vmatpush.bf16.msra.mxu2 %v9380_v59  ;;  %5599 = vmatpush.bf16.msra.mxu3 %v9636_v52  ;;  %v10685_v27 = vld [vmem:[#allocation9 + $0x2c] sm:$0xf0]  ;;  %v9381_v18 = vld [vmem:[#allocation9 + $0x570] sm:$0xf0] }
 0x3d3   :  { %v8963_v29 = vld [vmem:[#allocation9 + $0x210] sm:$0xf]  ;;  %v8708_v40 = vor.u32 %v10685_v27, %v8707_v26  ;;  %v10913_v20 = vld [vmem:[#allocation9 + $0x754] sm:$0xf] }
 0x3d4   :  { %5559 = vmatpush.bf16.msra.mxu0 %v8804_v30  ;;  %5573 = vmatpush.bf16.msra.mxu1 %v9060_v62  ;;  %v10749_v33 = vld [vmem:[#allocation9 + $0x22c] sm:$0xf0]  ;;  %v9637_v19 = vld [vmem:[#allocation9 + $0x770] sm:$0xf0] }
 0x3d5   :  { %v9251_v32 = vld [vmem:[#allocation9 + $0x450] sm:$0xf]  ;;  %v8964_v56 = vor.u32 %v10749_v33, %v8963_v29  ;;  %v10705_v26 = vld [vmem:[#allocation9 + $0xd4] sm:$0xf]  ;;  %v9384_v29 = vor.u32 %v10849_v17, %v9381_v18  ;;  %v8907_v17 = vld [vmem:[#allocation9 + $0x198] sm:$0xf] }
 0x3d6   :  { %5586 = vmatpush.bf16.msra.mxu2 %v9348_v58  ;;  %5600 = vmatpush.bf16.msra.mxu3 %v9604_v3  ;;  %v10821_v38 = vld [vmem:[#allocation9 + $0x46c] sm:$0xf0]  ;;  %v9448_v58 = vor.u32 %v10865_v13, %v9445_v54  ;;  %v9704_v3 = vor.u32 %v10929_v41, %v9701_v61  ;;  %v8805_v27 = vld [vmem:[#allocation9 + $0xf0] sm:$0xf0]  ;;  %v10734_v18 = vld [vmem:[#allocation9 + $0x1b4] sm:$0xf0] }
 0x3d7   :  { %v9507_v39 = vld [vmem:[#allocation9 + $0x650] sm:$0xf]  ;;  %v9252_v47 = vor.u32 %v10821_v38, %v9251_v32  ;;  %v9061_v33 = vld [vmem:[#allocation9 + $0x2f0] sm:$0xf0]  ;;  %v8808_v32 = vor.u32 %v10705_v26, %v8805_v27 }
 0x3d8   :  { %5560 = vmatpush.bf16.msra.mxu0 %v8772_v35  ;;  %5574 = vmatpush.bf16.msra.mxu1 %v9028_v9  ;;  %v10885_v37 = vld [vmem:[#allocation9 + $0x66c] sm:$0xf0]  ;;  %v8872_v35 = vor.u32 %v10721_v1, %v8869_v2  ;;  %v9128_v9 = vor.u32 %v10785_v4, %v9125_v5  ;;  %v10833_v44 = vld [vmem:[#allocation9 + $0x4d4] sm:$0xf] }
 0x3d9   :  { %v9508_v48 = vor.u32 %v10885_v37, %v9507_v39  ;;  %v9219_v50 = vld [vmem:[#allocation9 + $0x410] sm:$0xf]  ;;  %v10697_v39 = vld [vmem:[#allocation9 + $0x94] sm:$0xf] }
 0x3da   :  { %5587 = vmatpush.bf16.msra.mxu2 %v9316_v15  ;;  %5601 = vmatpush.bf16.msra.mxu3 %v9572_v16  ;;  %v10813_v51 = vld [vmem:[#allocation9 + $0x42c] sm:$0xf0]  ;;  %v9416_v15 = vor.u32 %v10857_v42, %v9413_v6  ;;  %v9672_v16 = vor.u32 %v10921_v7, %v9669_v8  ;;  %v8773_v37 = vld [vmem:[#allocation9 + $0xb0] sm:$0xf0]  ;;  %v8939_v42 = vld [vmem:[#allocation9 + $0x1d8] sm:$0xf] }
 0x3db   :  { %v9475_v59 = vld [vmem:[#allocation9 + $0x610] sm:$0xf]  ;;  %v9220_v30 = vor.u32 %v10813_v51, %v9219_v50  ;;  %v9317_v45 = vld [vmem:[#allocation9 + $0x4f0] sm:$0xf0]  ;;  %v10742_v6 = vld [vmem:[#allocation9 + $0x1f4] sm:$0xf0] }
 0x3dc   :  { %5561 = vmatpush.bf16.msra.mxu0 %v8740_v23  ;;  %5575 = vmatpush.bf16.msra.mxu1 %v8996_v25  ;;  %v10877_v52 = vld [vmem:[#allocation9 + $0x62c] sm:$0xf0]  ;;  %v8840_v23 = vor.u32 %v10713_v11, %v8837_v14  ;;  %v9096_v25 = vor.u32 %v10777_v12, %v9093_v60  ;;  %v10897_v46 = vld [vmem:[#allocation9 + $0x6d4] sm:$0xf]  ;;  %v9195_v7 = vld [vmem:[#allocation9 + $0x3d8] sm:$0xf]  ;;  %v8940_v12 = vor.u32 %v10742_v6, %v8939_v42 }
 0x3dd   :  { %v9476_v62 = vor.u32 %v10877_v52, %v9475_v59  ;;  %v10689_v50 = vld [vmem:[#allocation9 + $0x54] sm:$0xf]  ;;  %v9320_v59 = vor.u32 %v10833_v44, %v9317_v45  ;;  %v10806_v8 = vld [vmem:[#allocation9 + $0x3f4] sm:$0xf0] }
 0x3de   :  { %5588 = vmatpush.bf16.msra.mxu2 %v9284_v31  ;;  %5602 = vmatpush.bf16.msra.mxu3 %v9540_v53  ;;  %v9640_v31 = vor.u32 %v10913_v20, %v9637_v19  ;;  %v10769_v53 = vld [vmem:[#allocation9 + $0x2d4] sm:$0xf]  ;;  %v9196_v60 = vor.u32 %v10806_v8, %v9195_v7  ;;  %v9163_v20 = vld [vmem:[#allocation9 + $0x398] sm:$0xf] }
 0x3df   :  { %v9064_v38 = vor.u32 %v10769_v53, %v9061_v33  ;;  %v8741_v51 = vld [vmem:[#allocation9 + $0x70] sm:$0xf0]  ;;  %v9451_v53 = vld [vmem:[#allocation9 + $0x5d8] sm:$0xf] }
 0x3e0   :  { %5562 = vmatpush.bf16.msra.mxu0 %v8708_v40  ;;  %5576 = vmatpush.bf16.msra.mxu1 %v8964_v56  ;;  %v9352_v40 = vor.u32 %v10841_v28, %v9349_v24  ;;  %v9608_v56 = vor.u32 %v10905_v34, %v9605_v36  ;;  %v10753_v13 = vld [vmem:[#allocation9 + $0x254] sm:$0xf]  ;;  %v10870_v33 = vld [vmem:[#allocation9 + $0x5f4] sm:$0xf0]  ;;  %v8908_v34 = vor.u32 %v10734_v18, %v8907_v17 }
 0x3e1   :  { %v8997_v54 = vld [vmem:[#allocation9 + $0x270] sm:$0xf0]  ;;  %v9707_v28 = vld [vmem:[#allocation9 + $0x7d8] sm:$0xf] }
 0x3e2   :  { %5589 = vmatpush.bf16.msra.mxu2 %v9252_v47  ;;  %5603 = vmatpush.bf16.msra.mxu3 %v9508_v48  ;;  %v9573_v47 = vld [vmem:[#allocation9 + $0x6f0] sm:$0xf0]  ;;  %v8776_v48 = vor.u32 %v10697_v39, %v8773_v37  ;;  %v10934_v24 = vld [vmem:[#allocation9 + $0x7f4] sm:$0xf0] }
 0x3e3   :  { %5563 = vmatmul.bf16.vlgmr.msra.gmra.mxu0 %v11481_v55  ;;  %5577 = vmatmul.bf16.vlgmr.msra.gmra.mxu1 %v11483_v57  ;;  %v9576_v52 = vor.u32 %v10897_v46, %v9573_v47  ;;  %v10825_v41 = vld [vmem:[#allocation9 + $0x494] sm:$0xf]  ;;  %v8875_v39 = vld [vmem:[#allocation9 + $0x158] sm:$0xf] }
 0x3e4   :  { %5611 = vmatpush.bf16.msrb.mxu0 %v8936_v63  ;;  %5625 = vmatpush.bf16.msrb.mxu1 %v9192_v43  ;;  %v10761_v63 = vld [vmem:[#allocation9 + $0x294] sm:$0xf]  ;;  %v10726_v37 = vld [vmem:[#allocation9 + $0x174] sm:$0xf0] }
 0x3e5   :  { %v9029_v43 = vld [vmem:[#allocation9 + $0x2b0] sm:$0xf0]  ;;  %v9419_v44 = vld [vmem:[#allocation9 + $0x598] sm:$0xf] }
 0x3e6   :  { %5590 = vmatpush.bf16.msra.mxu2 %v9220_v30  ;;  %5604 = vmatpush.bf16.msra.mxu3 %v9476_v62  ;;  %v9032_v49 = vor.u32 %v10761_v63, %v9029_v43  ;;  %v9285_v61 = vld [vmem:[#allocation9 + $0x4b0] sm:$0xf0]  ;;  %v8744_v30 = vor.u32 %v10689_v50, %v8741_v51  ;;  %v9000_v62 = vor.u32 %v10753_v13, %v8997_v54  ;;  %v9131_v63 = vld [vmem:[#allocation9 + $0x358] sm:$0xf] }
 0x3e7   :  { %v10681_v1 = vld [vmem:[#allocation9 + $0x14] sm:$0xf]  ;;  %v10790_v43 = vld [vmem:[#allocation9 + $0x374] sm:$0xf0] }
 0x3e8   :  { %5612 = vmatpush.bf16.msrb.mxu0 %v8904_v10  ;;  %5626 = vmatpush.bf16.msrb.mxu1 %v9160_v21  ;;  %v10889_v10 = vld [vmem:[#allocation9 + $0x694] sm:$0xf]  ;;  %v10862_v45 = vld [vmem:[#allocation9 + $0x5b4] sm:$0xf0] }
 0x3e9   :  { %5591 = vmatmul.bf16.vlgmr.msra.gmra.mxu2 %v11487_v0  ;;  %5605 = vmatmul.bf16.vlgmr.msra.gmra.mxu3 %v11489_v22  ;;  %v9541_v21 = vld [vmem:[#allocation9 + $0x6b0] sm:$0xf0]  ;;  %v9675_v46 = vld [vmem:[#allocation9 + $0x798] sm:$0xf] }
 0x3ea   :  { %5639 = vmatpush.bf16.msrb.mxu2 %v9448_v58  ;;  %5653 = vmatpush.bf16.msrb.mxu3 %v9704_v3  ;;  %v8709_v2 = vld [vmem:[#allocation9 + $0x30] sm:$0xf0]  ;;  %v9288_v3 = vor.u32 %v10825_v41, %v9285_v61  ;;  %v9544_v4 = vor.u32 %v10889_v10, %v9541_v21  ;;  %v10926_v47 = vld [vmem:[#allocation9 + $0x7b4] sm:$0xf0] }
 0x3eb   :  { %v10745_v58 = vld [vmem:[#allocation9 + $0x214] sm:$0xf]  ;;  %v8843_v50 = vld [vmem:[#allocation9 + $0x118] sm:$0xf] }
 0x3ec   :  { %5613 = vmatpush.bf16.msrb.mxu0 %v8872_v35  ;;  %5627 = vmatpush.bf16.msrb.mxu1 %v9128_v9  ;;  %v8965_v5 = vld [vmem:[#allocation9 + $0x230] sm:$0xf0]  ;;  %v10718_v51 = vld [vmem:[#allocation9 + $0x134] sm:$0xf0] }
 0x3ed   :  { %v10817_v35 = vld [vmem:[#allocation9 + $0x454] sm:$0xf]  ;;  %v9099_v13 = vld [vmem:[#allocation9 + $0x318] sm:$0xf] }
 0x3ee   :  { %5640 = vmatpush.bf16.msrb.mxu2 %v9416_v15  ;;  %5654 = vmatpush.bf16.msrb.mxu3 %v9672_v16  ;;  %v9253_v9 = vld [vmem:[#allocation9 + $0x470] sm:$0xf0]  ;;  %v8712_v15 = vor.u32 %v10681_v1, %v8709_v2  ;;  %v8968_v16 = vor.u32 %v10745_v58, %v8965_v5  ;;  %v10782_v54 = vld [vmem:[#allocation9 + $0x334] sm:$0xf0] }
 0x3ef   :  { %v10881_v11 = vld [vmem:[#allocation9 + $0x654] sm:$0xf]  ;;  %v9256_v19 = vor.u32 %v10817_v35, %v9253_v9  ;;  %v9387_v41 = vld [vmem:[#allocation9 + $0x558] sm:$0xf] }
 0x3f0   :  { %5614 = vmatpush.bf16.msrb.mxu0 %v8840_v23  ;;  %5628 = vmatpush.bf16.msrb.mxu1 %v9096_v25  ;;  %v9509_v14 = vld [vmem:[#allocation9 + $0x670] sm:$0xf0]  ;;  %v10798_v25 = vld [vmem:[#allocation9 + $0x3b4] sm:$0xf0] }
 0x3f1   :  { %v9512_v23 = vor.u32 %v10881_v11, %v9509_v14  ;;  %v10809_v26 = vld [vmem:[#allocation9 + $0x414] sm:$0xf]  ;;  %v9164_v36 = vor.u32 %v10798_v25, %v9163_v20  ;;  %v10854_v61 = vld [vmem:[#allocation9 + $0x574] sm:$0xf0] }
 0x3f2   :  { %5641 = vmatpush.bf16.msrb.mxu2 %v9384_v29  ;;  %5655 = vmatpush.bf16.msrb.mxu3 %v9640_v31  ;;  %v9221_v27 = vld [vmem:[#allocation9 + $0x430] sm:$0xf0]  ;;  %v9643_v10 = vld [vmem:[#allocation9 + $0x758] sm:$0xf] }
 0x3f3   :  { %v10873_v29 = vld [vmem:[#allocation9 + $0x614] sm:$0xf]  ;;  %v10918_v21 = vld [vmem:[#allocation9 + $0x774] sm:$0xf0] }
 0x3f4   :  { %5615 = vmatpush.bf16.msrb.mxu0 %v8808_v32  ;;  %5629 = vmatpush.bf16.msrb.mxu1 %v9064_v38  ;;  %v9477_v31 = vld [vmem:[#allocation9 + $0x630] sm:$0xf0]  ;;  %v9224_v32 = vor.u32 %v10809_v26, %v9221_v27  ;;  %v8811_v1 = vld [vmem:[#allocation9 + $0xd8] sm:$0xf] }
 0x3f5   :  { %v9480_v38 = vor.u32 %v10873_v29, %v9477_v31  ;;  %v10710_v2 = vld [vmem:[#allocation9 + $0xf4] sm:$0xf0] }
 0x3f6   :  { %5642 = vmatpush.bf16.msrb.mxu2 %v9352_v40  ;;  %5656 = vmatpush.bf16.msrb.mxu3 %v9608_v56  ;;  %v9452_v40 = vor.u32 %v10870_v33, %v9451_v53  ;;  %v9708_v56 = vor.u32 %v10934_v24, %v9707_v28  ;;  %v9067_v5 = vld [vmem:[#allocation9 + $0x2d8] sm:$0xf]  ;;  %v8812_v9 = vor.u32 %v10710_v2, %v8811_v1  ;;  %v8909_v1 = vld [vmem:[#allocation9 + $0x1b8] sm:$0xf0] }
 0x3f7   :  { %v10774_v42 = vld [vmem:[#allocation9 + $0x2f4] sm:$0xf0]  ;;  %v10794_v2 = vld [vmem:[#allocation9 + $0x39c] sm:$0xf] }
 0x3f8   :  { %5616 = vmatpush.bf16.msrb.mxu0 %v8776_v48  ;;  %5630 = vmatpush.bf16.msrb.mxu1 %v9032_v49  ;;  %v8876_v48 = vor.u32 %v10726_v37, %v8875_v39  ;;  %v9132_v49 = vor.u32 %v10790_v43, %v9131_v63  ;;  %v9355_v6 = vld [vmem:[#allocation9 + $0x518] sm:$0xf]  ;;  %v9068_v11 = vor.u32 %v10774_v42, %v9067_v5  ;;  %v9165_v42 = vld [vmem:[#allocation9 + $0x3b8] sm:$0xf0] }
 0x3f9   :  { %v10846_v7 = vld [vmem:[#allocation9 + $0x534] sm:$0xf0] }
 0x3fa   :  { %5643 = vmatpush.bf16.msrb.mxu2 %v9320_v59  ;;  %5657 = vmatpush.bf16.msrb.mxu3 %v9576_v52  ;;  %v9420_v59 = vor.u32 %v10862_v45, %v9419_v44  ;;  %v9676_v52 = vor.u32 %v10926_v47, %v9675_v46  ;;  %v9611_v8 = vld [vmem:[#allocation9 + $0x718] sm:$0xf] }
 0x3fb   :  { %v10910_v35 = vld [vmem:[#allocation9 + $0x734] sm:$0xf0] }
 0x3fc   :  { %5617 = vmatpush.bf16.msrb.mxu0 %v8744_v30  ;;  %5631 = vmatpush.bf16.msrb.mxu1 %v9000_v62  ;;  %v8844_v30 = vor.u32 %v10718_v51, %v8843_v50  ;;  %v9100_v62 = vor.u32 %v10782_v54, %v9099_v13  ;;  %v8779_v14 = vld [vmem:[#allocation9 + $0x98] sm:$0xf]  ;;  %v8941_v50 = vld [vmem:[#allocation9 + $0x1f8] sm:$0xf0] }
 0x3fd   :  { %v10766_v17 = vld [vmem:[#allocation9 + $0x2b4] sm:$0xf0]  ;;  %v10802_v51 = vld [vmem:[#allocation9 + $0x3dc] sm:$0xf] }
 0x3fe   :  { %5644 = vmatpush.bf16.msrb.mxu2 %v9288_v3  ;;  %5658 = vmatpush.bf16.msrb.mxu3 %v9544_v4  ;;  %v9388_v3 = vor.u32 %v10854_v61, %v9387_v41  ;;  %v9644_v4 = vor.u32 %v10918_v21, %v9643_v10  ;;  %v9323_v18 = vld [vmem:[#allocation9 + $0x4d8] sm:$0xf] }
 0x3ff   :  { %v11513_v58 = vpop.f32.mrf.mxu0  ;;  %v10838_v20 = vld [vmem:[#allocation9 + $0x4f4] sm:$0xf0]  ;;  %v11515_v25 = vpop.f32.mrf.mxu1 }
 0x400   :  { %5618 = vmatpush.bf16.msrb.mxu0 %v8712_v15  ;;  %5632 = vmatpush.bf16.msrb.mxu1 %v8968_v16  ;;  %v10702_v15 = vld [vmem:[#allocation9 + $0xb4] sm:$0xf0]  ;;  %v9356_v16 = vor.u32 %v10846_v7, %v9355_v6  ;;  %v9324_v53 = vor.u32 %v10838_v20, %v9323_v18 }
 0x401   :  { %v8780_v26 = vor.u32 %v10702_v15, %v8779_v14  ;;  %v8747_v29 = vld [vmem:[#allocation9 + $0x58] sm:$0xf]  ;;  %v10930_v14 = vld [vmem:[#allocation9 + $0x7dc] sm:$0xf] }
 0x402   :  { %5645 = vmatpush.bf16.msrb.mxu2 %v9256_v19  ;;  %5659 = vmatpush.bf16.msrb.mxu3 %v9512_v23  ;;  %v9579_v19 = vld [vmem:[#allocation9 + $0x6d8] sm:$0xf]  ;;  %v9709_v15 = vld [vmem:[#allocation9 + $0x7f8] sm:$0xf0] }
 0x403   :  { %5619 = vmatmul.bf16.vlgmr.msrb.gmra.mxu0 %v11481_v55  ;;  %5633 = vmatmul.bf16.vlgmr.msrb.gmra.mxu1 %v11483_v57  ;;  %v10902_v23 = vld [vmem:[#allocation9 + $0x6f4] sm:$0xf0] }
 0x404   :  { %5667 = vmatpush.bf16.msra.mxu0 %v8940_v12  ;;  %5681 = vmatpush.bf16.msra.mxu1 %v9196_v60  ;;  %v9612_v12 = vor.u32 %v10910_v35, %v9611_v8  ;;  %v9035_v60 = vld [vmem:[#allocation9 + $0x298] sm:$0xf]  ;;  %v9580_v33 = vor.u32 %v10902_v23, %v9579_v19  ;;  %v10722_v23 = vld [vmem:[#allocation9 + $0x15c] sm:$0xf] }
 0x405   :  { %v9036_v27 = vor.u32 %v10766_v17, %v9035_v60  ;;  %v10694_v31 = vld [vmem:[#allocation9 + $0x74] sm:$0xf0]  ;;  %v9168_v60 = vor.u32 %v10794_v2, %v9165_v42  ;;  %v9357_v2 = vld [vmem:[#allocation9 + $0x538] sm:$0xf0] }
 0x406   :  { %5646 = vmatpush.bf16.msrb.mxu2 %v9224_v32  ;;  %5660 = vmatpush.bf16.msrb.mxu3 %v9480_v38  ;;  %v9003_v28 = vld [vmem:[#allocation9 + $0x258] sm:$0xf] }
 0x407   :  { %v10758_v24 = vld [vmem:[#allocation9 + $0x274] sm:$0xf0]  ;;  %v11517_v39 = vpop.f32.mrf.mxu0 }
 0x408   :  { %5668 = vmatpush.bf16.msra.mxu0 %v8908_v34  ;;  %5682 = vmatpush.bf16.msra.mxu1 %v9164_v36  ;;  %v9291_v34 = vld [vmem:[#allocation9 + $0x498] sm:$0xf]  ;;  %v9004_v63 = vor.u32 %v10758_v24, %v9003_v28  ;;  %v9421_v28 = vld [vmem:[#allocation9 + $0x5b8] sm:$0xf0] }
 0x409   :  { %5647 = vmatmul.bf16.vlgmr.msrb.gmra.mxu2 %v11487_v0  ;;  %5661 = vmatmul.bf16.vlgmr.msrb.gmra.mxu3 %v11489_v22  ;;  %v10830_v36 = vld [vmem:[#allocation9 + $0x4b4] sm:$0xf0]  ;;  %v10922_v24 = vld [vmem:[#allocation9 + $0x79c] sm:$0xf] }
 0x40a   :  { %5695 = vmatpush.bf16.msra.mxu2 %v9452_v40  ;;  %5709 = vmatpush.bf16.msra.mxu3 %v9708_v56  ;;  %v9547_v32 = vld [vmem:[#allocation9 + $0x698] sm:$0xf]  ;;  %v8748_v56 = vor.u32 %v10694_v31, %v8747_v29  ;;  %v9292_v46 = vor.u32 %v10830_v36, %v9291_v34  ;;  %v9712_v29 = vor.u32 %v10930_v14, %v9709_v15  ;;  %v10786_v31 = vld [vmem:[#allocation9 + $0x35c] sm:$0xf] }
 0x40b   :  { %v10894_v38 = vld [vmem:[#allocation9 + $0x6b4] sm:$0xf0]  ;;  %v9677_v34 = vld [vmem:[#allocation9 + $0x7b8] sm:$0xf0] }
 0x40c   :  { %5669 = vmatpush.bf16.msra.mxu0 %v8876_v48  ;;  %5683 = vmatpush.bf16.msra.mxu1 %v9132_v49  ;;  %v11519_v37 = vpop.f32.mrf.mxu2  ;;  %v11521_v40 = vpop.f32.mrf.mxu3  ;;  %v8715_v43 = vld [vmem:[#allocation9 + $0x18] sm:$0xf]  ;;  %v9548_v47 = vor.u32 %v10894_v38, %v9547_v32  ;;  %v10738_v49 = vld [vmem:[#allocation9 + $0x1dc] sm:$0xf] }
 0x40d   :  { %v10686_v44 = vld [vmem:[#allocation9 + $0x34] sm:$0xf0]  ;;  %v8944_v21 = vor.u32 %v10738_v49, %v8941_v50  ;;  %v10714_v38 = vld [vmem:[#allocation9 + $0x11c] sm:$0xf] }
 0x40e   :  { %5696 = vmatpush.bf16.msra.mxu2 %v9420_v59  ;;  %5710 = vmatpush.bf16.msra.mxu3 %v9676_v52  ;;  %v8971_v45 = vld [vmem:[#allocation9 + $0x218] sm:$0xf]  ;;  %v9197_v59 = vld [vmem:[#allocation9 + $0x3f8] sm:$0xf0]  ;;  %v8716_v61 = vor.u32 %v10686_v44, %v8715_v43  ;;  %v9680_v43 = vor.u32 %v10922_v24, %v9677_v34 }
 0x40f   :  { %v10750_v48 = vld [vmem:[#allocation9 + $0x234] sm:$0xf0]  ;;  %v10778_v44 = vld [vmem:[#allocation9 + $0x31c] sm:$0xf] }
 0x410   :  { %5670 = vmatpush.bf16.msra.mxu0 %v8844_v30  ;;  %5684 = vmatpush.bf16.msra.mxu1 %v9100_v62  ;;  %v9259_v52 = vld [vmem:[#allocation9 + $0x458] sm:$0xf]  ;;  %v8972_v10 = vor.u32 %v10750_v48, %v8971_v45  ;;  %v9200_v30 = vor.u32 %v10802_v51, %v9197_v59  ;;  %v10730_v62 = vld [vmem:[#allocation9 + $0x19c] sm:$0xf] }
 0x411   :  { %v10822_v13 = vld [vmem:[#allocation9 + $0x474] sm:$0xf0]  ;;  %v9101_v45 = vld [vmem:[#allocation9 + $0x338] sm:$0xf0] }
 0x412   :  { %5697 = vmatpush.bf16.msra.mxu2 %v9388_v3  ;;  %5711 = vmatpush.bf16.msra.mxu3 %v9644_v4  ;;  %v9515_v54 = vld [vmem:[#allocation9 + $0x658] sm:$0xf]  ;;  %v11523_v3 = vpop.f32.mrf.mxu1  ;;  %v9260_v4 = vor.u32 %v10822_v13, %v9259_v52  ;;  %v9389_v48 = vld [vmem:[#allocation9 + $0x578] sm:$0xf0]  ;;  %v9104_v59 = vor.u32 %v10778_v44, %v9101_v45 }
 0x413   :  { %v10886_v41 = vld [vmem:[#allocation9 + $0x674] sm:$0xf0]  ;;  %v10914_v49 = vld [vmem:[#allocation9 + $0x75c] sm:$0xf] }
 0x414   :  { %5671 = vmatpush.bf16.msra.mxu0 %v8812_v9  ;;  %5685 = vmatpush.bf16.msra.mxu1 %v9068_v11  ;;  %v9516_v5 = vor.u32 %v10886_v41, %v9515_v54  ;;  %v9227_v6 = vld [vmem:[#allocation9 + $0x418] sm:$0xf]  ;;  %v10866_v9 = vld [vmem:[#allocation9 + $0x5dc] sm:$0xf]  ;;  %v11527_v17 = vpop.f32.mrf.mxu2  ;;  %v11529_v18 = vpop.f32.mrf.mxu3 }
 0x415   :  { %v10814_v7 = vld [vmem:[#allocation9 + $0x434] sm:$0xf0]  ;;  %v9453_v11 = vld [vmem:[#allocation9 + $0x5f8] sm:$0xf0] }
 0x416   :  { %5698 = vmatpush.bf16.msra.mxu2 %v9356_v16  ;;  %5712 = vmatpush.bf16.msra.mxu3 %v9612_v12  ;;  %v9483_v8 = vld [vmem:[#allocation9 + $0x618] sm:$0xf]  ;;  %v11525_v16 = vpop.f32.mrf.mxu0  ;;  %v8912_v12 = vor.u32 %v10730_v62, %v8909_v1  ;;  %v9228_v20 = vor.u32 %v10814_v7, %v9227_v6  ;;  %v9645_v50 = vld [vmem:[#allocation9 + $0x778] sm:$0xf0] }
 0x417   :  { %v10878_v35 = vld [vmem:[#allocation9 + $0x634] sm:$0xf0]  ;;  %v10706_v52 = vld [vmem:[#allocation9 + $0xdc] sm:$0xf] }
 0x418   :  { %5672 = vmatpush.bf16.msra.mxu0 %v8780_v26  ;;  %5686 = vmatpush.bf16.msra.mxu1 %v9036_v27  ;;  %v9484_v19 = vor.u32 %v10878_v35, %v9483_v8  ;;  %v8877_v26 = vld [vmem:[#allocation9 + $0x178] sm:$0xf0]  ;;  %v9456_v27 = vor.u32 %v10866_v9, %v9453_v11 }
 0x419   :  { %v8880_v36 = vor.u32 %v10722_v23, %v8877_v26  ;;  %v8813_v13 = vld [vmem:[#allocation9 + $0xf8] sm:$0xf0] }
 0x41a   :  { %5699 = vmatpush.bf16.msra.mxu2 %v9324_v53  ;;  %5713 = vmatpush.bf16.msra.mxu3 %v9580_v33  ;;  %v9133_v53 = vld [vmem:[#allocation9 + $0x378] sm:$0xf0]  ;;  %v8816_v42 = vor.u32 %v10706_v52, %v8813_v13  ;;  %v10950_v52 = vld [vmem:[#allocation10 + $0x74] sm:$0xf0]  ;;  %v9835_v13 = vld [vmem:[#allocation10 + $0xf0] sm:$0xf] }
 0x41b   :  { %v10858_v33 = vld [vmem:[#allocation9 + $0x59c] sm:$0xf]  ;;  %v9136_v32 = vor.u32 %v10786_v31, %v9133_v53 }
 0x41c   :  { %5673 = vmatpush.bf16.msra.mxu0 %v8748_v56  ;;  %5687 = vmatpush.bf16.msra.mxu1 %v9004_v63  ;;  %v8845_v56 = vld [vmem:[#allocation9 + $0x138] sm:$0xf0]  ;;  %v9424_v63 = vor.u32 %v10858_v33, %v9421_v28  ;;  %v11539_v62 = vpop.f32.mrf.mxu2  ;;  %v11541_v1 = vpop.f32.mrf.mxu3 }
 0x41d   :  { %v8848_v51 = vor.u32 %v10714_v38, %v8845_v56  ;;  %v10698_v7 = vld [vmem:[#allocation9 + $0x9c] sm:$0xf] }
 0x41e   :  { %5700 = vmatpush.bf16.msra.mxu2 %v9292_v46  ;;  %5714 = vmatpush.bf16.msra.mxu3 %v9548_v47  ;;  %v10850_v46 = vld [vmem:[#allocation9 + $0x55c] sm:$0xf]  ;;  %v11533_v47 = vpop.f32.mrf.mxu1  ;;  %v11537_v54 = vpop.f32.mrf.mxu0 }
 0x41f   :  { %v9392_v41 = vor.u32 %v10850_v46, %v9389_v48  ;;  %v8781_v8 = vld [vmem:[#allocation9 + $0xb8] sm:$0xf0] }
 0x420   :  { %5674 = vmatpush.bf16.msra.mxu0 %v8716_v61  ;;  %5688 = vmatpush.bf16.msra.mxu1 %v8972_v10  ;;  %v9648_v61 = vor.u32 %v10914_v49, %v9645_v50  ;;  %v10770_v10 = vld [vmem:[#allocation9 + $0x2dc] sm:$0xf]  ;;  %v8784_v23 = vor.u32 %v10698_v7, %v8781_v8  ;;  %v9763_v7 = vld [vmem:[#allocation10 + $0x60] sm:$0xf]  ;;  %v10948_v8 = vld [vmem:[#allocation10 + $0x64] sm:$0xf0] }
 0x421   :  { %v10762_v11 = vld [vmem:[#allocation9 + $0x29c] sm:$0xf] }
 0x422   :  { %5701 = vmatpush.bf16.msra.mxu2 %v9260_v4  ;;  %5715 = vmatpush.bf16.msra.mxu3 %v9516_v5  ;;  %v10906_v4 = vld [vmem:[#allocation9 + $0x71c] sm:$0xf] }
 0x423   :  { %5675 = vmatmul.bf16.vlgmr.msra.gmra.mxu0 %v11481_v55  ;;  %5689 = vmatmul.bf16.vlgmr.msra.gmra.mxu1 %v11483_v57  ;;  %v9613_v5 = vld [vmem:[#allocation9 + $0x738] sm:$0xf0] }
 0x424   :  { %5723 = vmatpush.bf16.msrb.mxu0 %v8944_v21  ;;  %5737 = vmatpush.bf16.msrb.mxu1 %v9200_v30  ;;  %v9069_v21 = vld [vmem:[#allocation9 + $0x2f8] sm:$0xf0]  ;;  %v9616_v9 = vor.u32 %v10906_v4, %v9613_v5  ;;  %v11547_v56 = vpop.f32.mrf.mxu2 }
 0x425   :  { %v10842_v30 = vld [vmem:[#allocation9 + $0x51c] sm:$0xf]  ;;  %v9072_v6 = vor.u32 %v10770_v10, %v9069_v21 }
 0x426   :  { %5702 = vmatpush.bf16.msra.mxu2 %v9228_v20  ;;  %5716 = vmatpush.bf16.msra.mxu3 %v9484_v19  ;;  %v9360_v35 = vor.u32 %v10842_v30, %v9357_v2  ;;  %v9037_v14 = vld [vmem:[#allocation9 + $0x2b8] sm:$0xf0]  ;;  %v11543_v19 = vpop.f32.mrf.mxu1  ;;  %v11545_v38 = vpop.f32.mrf.mxu0  ;;  %v11554_v2 = vld [vmem:[%s11670_s10] sm:$0xff] }
 0x427   :  { %v10834_v15 = vld [vmem:[#allocation9 + $0x4dc] sm:$0xf]  ;;  %v9040_v26 = vor.u32 %v10762_v11, %v9037_v14 }
 0x428   :  { %5724 = vmatpush.bf16.msrb.mxu0 %v8912_v12  ;;  %5738 = vmatpush.bf16.msrb.mxu1 %v9168_v60  ;;  %v9325_v12 = vld [vmem:[#allocation9 + $0x4f8] sm:$0xf0] }
 0x429   :  { %5703 = vmatmul.bf16.vlgmr.msra.gmra.mxu2 %v11487_v0  ;;  %5717 = vmatmul.bf16.vlgmr.msra.gmra.mxu3 %v11489_v22  ;;  %v10898_v60 = vld [vmem:[#allocation9 + $0x6dc] sm:$0xf]  ;;  %v9328_v31 = vor.u32 %v10834_v15, %v9325_v12  ;;  %v10964_v15 = vld [vmem:[#allocation10 + $0xe4] sm:$0xf0] }
 0x42a   :  { %5751 = vmatpush.bf16.msrb.mxu2 %v9456_v27  ;;  %5765 = vmatpush.bf16.msrb.mxu3 %v9712_v29  ;;  %v9581_v20 = vld [vmem:[#allocation9 + $0x6f8] sm:$0xf0] }
 0x42b   :  { %v10690_v27 = vld [vmem:[#allocation9 + $0x5c] sm:$0xf]  ;;  %v9584_v53 = vor.u32 %v10898_v60, %v9581_v20 }
 0x42c   :  { %5725 = vmatpush.bf16.msrb.mxu0 %v8880_v36  ;;  %5739 = vmatpush.bf16.msrb.mxu1 %v9136_v32  ;;  %v8749_v29 = vld [vmem:[#allocation9 + $0x78] sm:$0xf0] }
 0x42d   :  { %v10754_v33 = vld [vmem:[#allocation9 + $0x25c] sm:$0xf] }
 0x42e   :  { %5752 = vmatpush.bf16.msrb.mxu2 %v9424_v63  ;;  %5766 = vmatpush.bf16.msrb.mxu3 %v9680_v43  ;;  %v9005_v28 = vld [vmem:[#allocation9 + $0x278] sm:$0xf0]  ;;  %v11549_v63 = vpop.f32.mrf.mxu3  ;;  %v8752_v43 = vor.u32 %v10690_v27, %v8749_v29  ;;  %v10982_v27 = vld [vmem:[#allocation10 + $0x174] sm:$0xf0]  ;;  %v9963_v29 = vld [vmem:[#allocation10 + $0x1f0] sm:$0xf] }
 0x42f   :  { %v10826_v24 = vld [vmem:[#allocation9 + $0x49c] sm:$0xf]  ;;  %v9008_v44 = vor.u32 %v10754_v33, %v9005_v28  ;;  %v11559_v33 = vpop.f32.mrf.mxu0  ;;  %v9764_v28 = vor.u32 %v10948_v8, %v9763_v7  ;;  %v9883_v7 = vld [vmem:[#allocation10 + $0x150] sm:$0xf] }
 0x430   :  { %5726 = vmatpush.bf16.msrb.mxu0 %v8848_v51  ;;  %5740 = vmatpush.bf16.msrb.mxu1 %v9104_v59  ;;  %v9293_v34 = vld [vmem:[#allocation9 + $0x4b8] sm:$0xf0]  ;;  %v9771_v59 = vld [vmem:[#allocation10 + $0x70] sm:$0xf] }
 0x431   :  { %v10890_v36 = vld [vmem:[#allocation9 + $0x69c] sm:$0xf]  ;;  %v9296_v49 = vor.u32 %v10826_v24, %v9293_v34  ;;  %v11561_v34 = vpop.f32.mrf.mxu2  ;;  %v9947_v8 = vld [vmem:[#allocation10 + $0x1d0] sm:$0xf] }
 0x432   :  { %5753 = vmatpush.bf16.msrb.mxu2 %v9392_v41  ;;  %5767 = vmatpush.bf16.msrb.mxu3 %v9648_v61  ;;  %v9549_v32 = vld [vmem:[#allocation9 + $0x6b8] sm:$0xf0]  ;;  %v10966_v41 = vld [vmem:[#allocation10 + $0xf4] sm:$0xf0] }
 0x433   :  { %v10682_v45 = vld [vmem:[#allocation9 + $0x1c] sm:$0xf]  ;;  %v9552_v50 = vor.u32 %v10890_v36, %v9549_v32 }
 0x434   :  { %5727 = vmatpush.bf16.msrb.mxu0 %v8816_v42  ;;  %5741 = vmatpush.bf16.msrb.mxu1 %v9072_v6  ;;  %v8717_v46 = vld [vmem:[#allocation9 + $0x38] sm:$0xf0]  ;;  %v9772_v42 = vor.u32 %v10950_v52, %v9771_v59  ;;  %v9836_v6 = vor.u32 %v10966_v41, %v9835_v13  ;;  %v10980_v59 = vld [vmem:[#allocation10 + $0x164] sm:$0xf0]  ;;  %v9955_v52 = vld [vmem:[#allocation10 + $0x1e0] sm:$0xf] }
 0x435   :  { %v10746_v48 = vld [vmem:[#allocation9 + $0x21c] sm:$0xf]  ;;  %v8720_v4 = vor.u32 %v10682_v45, %v8717_v46  ;;  %v10946_v45 = vld [vmem:[#allocation10 + $0x54] sm:$0xf0]  ;;  %v10996_v13 = vld [vmem:[#allocation10 + $0x1e4] sm:$0xf0] }
 0x436   :  { %5754 = vmatpush.bf16.msrb.mxu2 %v9360_v35  ;;  %5768 = vmatpush.bf16.msrb.mxu3 %v9616_v9  ;;  %v8973_v51 = vld [vmem:[#allocation9 + $0x238] sm:$0xf0]  ;;  %v9827_v35 = vld [vmem:[#allocation10 + $0xe0] sm:$0xf]  ;;  %v11556_v9 = vpop.f32.mrf.mxu1  ;;  %v11563_v36 = vpop.f32.mrf.mxu3 }
 0x437   :  { %v10818_v61 = vld [vmem:[#allocation9 + $0x45c] sm:$0xf]  ;;  %v8976_v5 = vor.u32 %v10746_v48, %v8973_v51  ;;  %v9828_v24 = vor.u32 %v10964_v15, %v9827_v35  ;;  %v9819_v48 = vld [vmem:[#allocation10 + $0xd0] sm:$0xf]  ;;  %v9891_v51 = vld [vmem:[#allocation10 + $0x160] sm:$0xf] }
 0x438   :  { %5728 = vmatpush.bf16.msrb.mxu0 %v8784_v23  ;;  %5742 = vmatpush.bf16.msrb.mxu1 %v9040_v26  ;;  %v9261_v10 = vld [vmem:[#allocation9 + $0x478] sm:$0xf0]  ;;  %v9899_v26 = vld [vmem:[#allocation10 + $0x170] sm:$0xf]  ;;  %v10994_v35 = vld [vmem:[#allocation10 + $0x1d4] sm:$0xf0] }
 0x439   :  { %v10882_v21 = vld [vmem:[#allocation9 + $0x65c] sm:$0xf]  ;;  %v9264_v11 = vor.u32 %v10818_v61, %v9261_v10  ;;  %v9900_v46 = vor.u32 %v10982_v27, %v9899_v26  ;;  %v4036_v10 = vperm.slane %v11554_v2, 1  ;;  %v10942_v26 = vld [vmem:[#allocation10 + $0x34] sm:$0xf0] }
 0x43a   :  { %5755 = vmatpush.bf16.msrb.mxu2 %v9328_v31  ;;  %5769 = vmatpush.bf16.msrb.mxu3 %v9584_v53  ;;  %v9517_v30 = vld [vmem:[#allocation9 + $0x678] sm:$0xf0]  ;;  %v10998_v31 = vld [vmem:[#allocation10 + $0x1f4] sm:$0xf0]  ;;  %v4035_v53 = vperm.slane %v11554_v2, 0 }
 0x43b   :  { %v9520_v14 = vor.u32 %v10882_v21, %v9517_v30  ;;  %v10810_v12 = vld [vmem:[#allocation9 + $0x41c] sm:$0xf]  ;;  %v9747_v21 = vld [vmem:[#allocation10 + $0x40] sm:$0xf]  ;;  %v10944_v30 = vld [vmem:[#allocation10 + $0x44] sm:$0xf0]  ;;  %v5399_v27 = vadd.f32 %v11537_v54, %v4036_v10 }
 0x43c   :  { %5729 = vmatpush.bf16.msrb.mxu0 %v8752_v43  ;;  %5743 = vmatpush.bf16.msrb.mxu1 %v9008_v44  ;;  %v9229_v60 = vld [vmem:[#allocation9 + $0x438] sm:$0xf0]  ;;  %v9755_v44 = vld [vmem:[#allocation10 + $0x50] sm:$0xf]  ;;  %v5341_v41 = vadd.f32 %v11513_v58, %v4035_v53  ;;  %v5343_v61 = vadd.f32 %v11517_v39, %v4035_v53  ;;  %v10978_v39 = vld [vmem:[#allocation10 + $0x154] sm:$0xf0]  ;;  %v11579_v53 = vpop.f32.mrf.mxu2 }
 0x43d   :  { %v10874_v20 = vld [vmem:[#allocation9 + $0x61c] sm:$0xf]  ;;  %v9232_v32 = vor.u32 %v10810_v12, %v9229_v60  ;;  %v5397_v12 = vadd.f32 %v11525_v16, %v4036_v10  ;;  %v9748_v60 = vor.u32 %v10944_v30, %v9747_v21  ;;  %v4037_v54 = vperm.slane %v11554_v2, 2  ;;  %v9931_v10 = vld [vmem:[#allocation10 + $0x1b0] sm:$0xf] }
 0x43e   :  { %5756 = vmatpush.bf16.msrb.mxu2 %v9296_v49  ;;  %5770 = vmatpush.bf16.msrb.mxu3 %v9552_v50  ;;  %v9485_v23 = vld [vmem:[#allocation9 + $0x638] sm:$0xf0]  ;;  %v10962_v49 = vld [vmem:[#allocation10 + $0xd4] sm:$0xf0]  ;;  %v9964_v50 = vor.u32 %v10998_v31, %v9963_v29  ;;  %v11570_v58 = vpop.f32.mrf.mxu1  ;;  %v9803_v29 = vld [vmem:[#allocation10 + $0xb0] sm:$0xf]  ;;  %v9948_v31 = vor.u32 %v10994_v35, %v9947_v8  ;;  %v11581_v16 = vpop.f32.mrf.mxu3 }
 0x43f   :  { %v9488_v43 = vor.u32 %v10874_v20, %v9485_v23  ;;  %v9739_v23 = vld [vmem:[#allocation10 + $0x30] sm:$0xf]  ;;  %v5455_v30 = vadd.f32 %v11559_v33, %v4037_v54  ;;  %v5453_v33 = vadd.f32 %v11545_v38, %v4037_v54  ;;  %v9779_v38 = vld [vmem:[#allocation10 + $0x80] sm:$0xf] }
 0x440   :  { %5730 = vmatpush.bf16.msrb.mxu0 %v8720_v4  ;;  %5744 = vmatpush.bf16.msrb.mxu1 %v8976_v5  ;;  %v9892_v4 = vor.u32 %v10980_v59, %v9891_v51  ;;  %v9811_v5 = vld [vmem:[#allocation10 + $0xc0] sm:$0xf]  ;;  %v5508_v15 = vpop.f32.mrf.mxu0  ;;  %v9851_v54 = vld [vmem:[#allocation10 + $0x110] sm:$0xf] }
 0x441   :  { %v9795_v59 = vld [vmem:[#allocation10 + $0xa0] sm:$0xf] }
 0x442   :  { %5757 = vmatpush.bf16.msrb.mxu2 %v9264_v11  ;;  %5771 = vmatpush.bf16.msrb.mxu3 %v9520_v14  ;;  %v5355_v11 = vadd.f32 %v11515_v25, %v5341_v41  ;;  %v5357_v14 = vadd.f32 %v11523_v3, %v5343_v61  ;;  %v9884_v25 = vor.u32 %v10978_v39, %v9883_v7  ;;  %v10958_v3 = vld [vmem:[#allocation10 + $0xb4] sm:$0xf0] }
 0x443   :  { %5731 = vmatmul.bf16.vlgmr.msrb.gmra.mxu0 %v11481_v55  ;;  %5745 = vmatmul.bf16.vlgmr.msrb.gmra.mxu1 %v11483_v57  ;;  %v9756_v55 = vor.u32 %v10946_v45, %v9755_v44  ;;  %v9820_v57 = vor.u32 %v10962_v49, %v9819_v48  ;;  %v5411_v44 = vadd.f32 %v11533_v47, %v5397_v12  ;;  %v4038_v45 = vperm.slane %v11554_v2, 3  ;;  %v10940_v49 = vld [vmem:[#allocation10 + $0x24] sm:$0xf0]  ;;  %v10974_v61 = vld [vmem:[#allocation10 + $0x134] sm:$0xf0] }
 0x444   :  { %6577 = vmatpush.bf16.msra.mxu0 %v9772_v42  ;;  %6591 = vmatpush.bf16.msra.mxu1 %v9836_v6  ;;  %v10960_v42 = vld [vmem:[#allocation10 + $0xc4] sm:$0xf0]  ;;  %v9956_v6 = vor.u32 %v10996_v13, %v9955_v52  ;;  %v9804_v48 = vor.u32 %v10958_v3, %v9803_v29  ;;  %v9867_v13 = vld [vmem:[#allocation10 + $0x130] sm:$0xf] }
 0x445   :  { %v9812_v20 = vor.u32 %v10960_v42, %v9811_v5  ;;  %v10956_v52 = vld [vmem:[#allocation10 + $0xa4] sm:$0xf0]  ;;  %v5425_v21 = vadd.f32 %v11539_v62, %v5411_v44  ;;  %v9723_v42 = vld [vmem:[#allocation10 + $0x10] sm:$0xf]  ;;  %v5509_v7 = vadd.f32 %v5508_v15, %v4038_v45  ;;  %v9868_v8 = vor.u32 %v10974_v61, %v9867_v13  ;;  %v10970_v44 = vld [vmem:[#allocation10 + $0x114] sm:$0xf0] }
 0x446   :  { %5758 = vmatpush.bf16.msrb.mxu2 %v9232_v32  ;;  %5772 = vmatpush.bf16.msrb.mxu3 %v9488_v43  ;;  %v10992_v32 = vld [vmem:[#allocation10 + $0x1c4] sm:$0xf0]  ;;  %v5371_v43 = vadd.f32 %v11527_v17, %v5357_v14  ;;  %v5522_v47 = vpop.f32.mrf.mxu1  ;;  %v9796_v5 = vor.u32 %v10956_v52, %v9795_v59 }
 0x447   :  { %v10972_v62 = vld [vmem:[#allocation10 + $0x124] sm:$0xf0]  ;;  %v5439_v15 = vadd.f32 %v11541_v1, %v5425_v21  ;;  %v11014_v1 = vld [vmem:[#allocation10 + $0x274] sm:$0xf0]  ;;  %v9843_v21 = vld [vmem:[#allocation10 + $0x100] sm:$0xf] }
 0x448   :  { %6578 = vmatpush.bf16.msra.mxu0 %v9764_v28  ;;  %6592 = vmatpush.bf16.msra.mxu1 %v9828_v24  ;;  %v10976_v28 = vld [vmem:[#allocation10 + $0x144] sm:$0xf0]  ;;  %v9939_v24 = vld [vmem:[#allocation10 + $0x1c0] sm:$0xf]  ;;  %v5510_v39 = vpop.f32.mrf.mxu0 }
 0x449   :  { %5759 = vmatmul.bf16.vlgmr.msrb.gmra.mxu2 %v11487_v0  ;;  %5773 = vmatmul.bf16.vlgmr.msrb.gmra.mxu3 %v11489_v22  ;;  %v9875_v0 = vld [vmem:[#allocation10 + $0x140] sm:$0xf]  ;;  %v5369_v22 = vadd.f32 %v11519_v37, %v5355_v11  ;;  %v9940_v17 = vor.u32 %v10992_v32, %v9939_v24  ;;  %v10952_v24 = vld [vmem:[#allocation10 + $0x84] sm:$0xf0]  ;;  %v5780_v13 = vmax.f32 %v5439_v15, 0.0 }
 0x44a   :  { %6605 = vmatpush.bf16.msra.mxu2 %v9900_v46  ;;  %6619 = vmatpush.bf16.msra.mxu3 %v9964_v50  ;;  %v9740_v46 = vor.u32 %v10942_v26, %v9739_v23  ;;  %v9731_v37 = vld [vmem:[#allocation10 + $0x20] sm:$0xf]  ;;  %v5413_v50 = vadd.f32 %v11543_v19, %v5399_v27  ;;  %v9876_v51 = vor.u32 %v10976_v28, %v9875_v0  ;;  %v10936_v0 = vld [vmem:[#allocation10 + $0x4] sm:$0xf0] }
 0x44b   :  { %v11589_v41 = vadd.f32 %v11521_v40, %v5369_v22  ;;  %v10938_v40 = vld [vmem:[#allocation10 + $0x14] sm:$0xf0]  ;;  %v9859_v11 = vld [vmem:[#allocation10 + $0x120] sm:$0xf]  ;;  %v5469_v27 = vadd.f32 %v11570_v58, %v5455_v30  ;;  %v5523_v22 = vadd.f32 %v5522_v47, %v5509_v7  ;;  %v5511_v28 = vadd.f32 %v5510_v39, %v4038_v45  ;;  %v11012_v61 = vld [vmem:[#allocation10 + $0x264] sm:$0xf0] }
 0x44c   :  { %6579 = vmatpush.bf16.msra.mxu0 %v9756_v55  ;;  %6593 = vmatpush.bf16.msra.mxu1 %v9820_v57  ;;  %v10990_v55 = vld [vmem:[#allocation10 + $0x1b4] sm:$0xf0]  ;;  %v11592_v57 = vadd.f32 %v11529_v18, %v5371_v43  ;;  %v5427_v19 = vadd.f32 %v11547_v56, %v5413_v50  ;;  %v5536_v14 = vpop.f32.mrf.mxu2  ;;  %v5550_v12 = vpop.f32.mrf.mxu3  ;;  %v9860_v3 = vor.u32 %v10972_v62, %v9859_v11  ;;  %v10027_v43 = vld [vmem:[#allocation10 + $0x270] sm:$0xf]  ;;  %v10019_v47 = vld [vmem:[#allocation10 + $0x260] sm:$0xf] }
 0x44d   :  { %v10954_v18 = vld [vmem:[#allocation10 + $0x94] sm:$0xf0]  ;;  %v9932_v35 = vor.u32 %v10990_v55, %v9931_v10  ;;  %v5779_v56 = vmax.f32 %v11589_v41, 0.0  ;;  %v5483_v58 = vadd.f32 %v11579_v53, %v5469_v27  ;;  %v9852_v53 = vor.u32 %v10970_v44, %v9851_v54  ;;  %v10147_v54 = vld [vmem:[#allocation10 + $0x360] sm:$0xf] }
 0x44e   :  { %6606 = vmatpush.bf16.msra.mxu2 %v9892_v4  ;;  %6620 = vmatpush.bf16.msra.mxu3 %v9956_v6  ;;  %v9732_v4 = vor.u32 %v10940_v49, %v9731_v37  ;;  %v9787_v6 = vld [vmem:[#allocation10 + $0x90] sm:$0xf]  ;;  %v5787_v23 = vmax.f32 %v11592_v57, 0.0  ;;  %v5441_v26 = vadd.f32 %v11549_v63, %v5427_v19  ;;  %v5467_v63 = vadd.f32 %v11556_v9, %v5453_v33  ;;  %v10986_v37 = vld [vmem:[#allocation10 + $0x194] sm:$0xf0]  ;;  %v5524_v59 = vpop.f32.mrf.mxu1 }
 0x44f   :  { %v9788_v29 = vor.u32 %v10954_v18, %v9787_v6  ;;  %v10091_v49 = vld [vmem:[#allocation10 + $0x2f0] sm:$0xf]  ;;  %v11030_v50 = vld [vmem:[#allocation10 + $0x2f4] sm:$0xf0]  ;;  %v5525_v41 = vadd.f32 %v5524_v59, %v5511_v28  ;;  %v10028_v9 = vor.u32 %v11014_v1, %v10027_v43  ;;  %v5497_v10 = vadd.f32 %v11581_v16, %v5483_v58  ;;  %v10968_v19 = vld [vmem:[#allocation10 + $0x104] sm:$0xf0] }
 0x450   :  { %6580 = vmatpush.bf16.msra.mxu0 %v9748_v60  ;;  %6594 = vmatpush.bf16.msra.mxu1 %v9812_v20  ;;  %v9923_v60 = vld [vmem:[#allocation10 + $0x1a0] sm:$0xf]  ;;  %v10988_v20 = vld [vmem:[#allocation10 + $0x1a4] sm:$0xf0]  ;;  %v5481_v45 = vadd.f32 %v11561_v34, %v5467_v63  ;;  %v10092_v30 = vor.u32 %v11030_v50, %v10091_v49  ;;  %v11607_v7 = vpack.c.bf16 %v5787_v23, %v5779_v56  ;;  %v11026_v23 = vld [vmem:[#allocation10 + $0x2d4] sm:$0xf0] }
 0x451   :  { %v9924_v32 = vor.u32 %v10988_v20, %v9923_v60  ;;  %v9907_v34 = vld [vmem:[#allocation10 + $0x180] sm:$0xf]  ;;  %v11028_v6 = vld [vmem:[#allocation10 + $0x2e4] sm:$0xf0]  ;;  %v9844_v11 = vor.u32 %v10968_v19, %v9843_v21  ;;  %v5789_v62 = vmax.f32 %v5497_v10, 0.0  ;;  %v4039_v49 = vperm.slane %v11554_v2, 4 }
 0x452   :  { %6607 = vmatpush.bf16.msra.mxu2 %v9884_v25  ;;  %6621 = vmatpush.bf16.msra.mxu3 %v9948_v31  ;;  %v9724_v25 = vor.u32 %v10938_v40, %v9723_v42  ;;  %v9715_v31 = vld [vmem:[#allocation10] sm:$0xf]  ;;  %v10984_v42 = vld [vmem:[#allocation10 + $0x184] sm:$0xf0]  ;;  %v11046_v28 = vld [vmem:[#allocation10 + $0x374] sm:$0xf0] }
 0x453   :  { %v9716_v52 = vor.u32 %v10936_v0, %v9715_v31  ;;  %v10083_v40 = vld [vmem:[#allocation10 + $0x2e0] sm:$0xf]  ;;  %v9908_v33 = vor.u32 %v10984_v42, %v9907_v34  ;;  %v9995_v1 = vld [vmem:[#allocation10 + $0x230] sm:$0xf]  ;;  %v11006_v63 = vld [vmem:[#allocation10 + $0x234] sm:$0xf0] }
 0x454   :  { %6581 = vmatpush.bf16.msra.mxu0 %v9740_v46  ;;  %6595 = vmatpush.bf16.msra.mxu1 %v9804_v48  ;;  %v9915_v46 = vld [vmem:[#allocation10 + $0x190] sm:$0xf]  ;;  %v5537_v48 = vadd.f32 %v5536_v14, %v5523_v22  ;;  %v5538_v55 = vpop.f32.mrf.mxu2  ;;  %v5552_v16 = vpop.f32.mrf.mxu3  ;;  %v10084_v56 = vor.u32 %v11028_v6, %v10083_v40  ;;  %v10067_v0 = vld [vmem:[#allocation10 + $0x2c0] sm:$0xf]  ;;  %v11044_v44 = vld [vmem:[#allocation10 + $0x364] sm:$0xf0]  ;;  %v9996_v50 = vor.u32 %v11006_v63, %v9995_v1 }
 0x455   :  { %v9916_v57 = vor.u32 %v10986_v37, %v9915_v46  ;;  %v10011_v14 = vld [vmem:[#allocation10 + $0x250] sm:$0xf]  ;;  %v10148_v37 = vor.u32 %v11044_v44, %v10147_v54  ;;  %v11002_v10 = vld [vmem:[#allocation10 + $0x214] sm:$0xf0]  ;;  %v10963_v1 = vld [vmem:[#allocation10 + $0xe4] sm:$0xf] }
 0x456   :  { %6608 = vmatpush.bf16.msra.mxu2 %v9876_v51  ;;  %6622 = vmatpush.bf16.msra.mxu3 %v9940_v17  ;;  %v5788_v51 = vmax.f32 %v5441_v26, 0.0  ;;  %v9780_v17 = vor.u32 %v10952_v24, %v9779_v38  ;;  %v11024_v38 = vld [vmem:[#allocation10 + $0x2c4] sm:$0xf0]  ;;  %v10155_v22 = vld [vmem:[#allocation10 + $0x370] sm:$0xf] }
 0x457   :  { %v10156_v24 = vor.u32 %v11046_v28, %v10155_v22  ;;  %v10068_v58 = vor.u32 %v11024_v38, %v10067_v0  ;;  %v10059_v46 = vld [vmem:[#allocation10 + $0x2b0] sm:$0xf]  ;;  %v11018_v34 = vld [vmem:[#allocation10 + $0x294] sm:$0xf0]  ;;  %v9765_v22 = vld [vmem:[#allocation10 + $0x68] sm:$0xf0] }
 0x458   :  { %6582 = vmatpush.bf16.msra.mxu0 %v9732_v4  ;;  %6596 = vmatpush.bf16.msra.mxu1 %v9796_v5  ;;  %v5551_v4 = vadd.f32 %v5550_v12, %v5537_v48  ;;  %v5539_v5 = vadd.f32 %v5538_v55, %v5525_v41  ;;  %v11609_v39 = vpack.c.bf16 %v5788_v51, %v5780_v13  ;;  %v11010_v12 = vld [vmem:[#allocation10 + $0x254] sm:$0xf0]  ;;  %v9987_v51 = vld [vmem:[#allocation10 + $0x220] sm:$0xf]  ;;  %v10139_v13 = vld [vmem:[#allocation10 + $0x350] sm:$0xf] }
 0x459   :  { %v10012_v27 = vor.u32 %v11010_v12, %v10011_v14  ;;  %v11022_v48 = vld [vmem:[#allocation10 + $0x2b4] sm:$0xf0]  ;;  %v11016_v12 = vld [vmem:[#allocation10 + $0x284] sm:$0xf0]  ;;  %v9829_v63 = vld [vmem:[#allocation10 + $0xe8] sm:$0xf0] }
 0x45a   :  { %6609 = vmatpush.bf16.msra.mxu2 %v9868_v8  ;;  %6623 = vmatpush.bf16.msra.mxu3 %v9932_v35  ;;  %v5495_v8 = vadd.f32 %v11563_v36, %v5481_v45  ;;  %v5553_v18 = vadd.f32 %v5552_v16, %v5539_v5  ;;  %v10020_v35 = vor.u32 %v11012_v61, %v10019_v47  ;;  %v5782_v60 = vmax.f32 %v5551_v4, 0.0  ;;  %v10075_v36 = vld [vmem:[#allocation10 + $0x2d0] sm:$0xf]  ;;  %v11004_v45 = vld [vmem:[#allocation10 + $0x224] sm:$0xf0] }
 0x45b   :  { %v10076_v31 = vor.u32 %v11026_v23, %v10075_v36  ;;  %v10060_v59 = vor.u32 %v11022_v48, %v10059_v46  ;;  %v11042_v41 = vld [vmem:[#allocation10 + $0x354] sm:$0xf0]  ;;  %v9988_v47 = vor.u32 %v11004_v45, %v9987_v51  ;;  %v9979_v61 = vld [vmem:[#allocation10 + $0x210] sm:$0xf]  ;;  %v11040_v4 = vld [vmem:[#allocation10 + $0x344] sm:$0xf0]  ;;  %v9832_v51 = vor.u32 %v10963_v1, %v9829_v63 }
 0x45c   :  { %6583 = vmatpush.bf16.msra.mxu0 %v9724_v25  ;;  %6597 = vmatpush.bf16.msra.mxu1 %v9788_v29  ;;  %v5790_v20 = vmax.f32 %v5553_v18, 0.0  ;;  %v5781_v15 = vmax.f32 %v5495_v8, 0.0  ;;  %v10003_v29 = vld [vmem:[#allocation10 + $0x240] sm:$0xf]  ;;  %v9980_v6 = vor.u32 %v11002_v10, %v9979_v61  ;;  %v11000_v16 = vld [vmem:[#allocation10 + $0x204] sm:$0xf0] }
 0x45d   :  { %v9971_v8 = vld [vmem:[#allocation10 + $0x200] sm:$0xf]  ;;  %v10949_v18 = vld [vmem:[#allocation10 + $0x74] sm:$0xf]  ;;  %v9837_v36 = vld [vmem:[#allocation10 + $0xf8] sm:$0xf0] }
 0x45e   :  { %6610 = vmatpush.bf16.msra.mxu2 %v9860_v3  ;;  %6624 = vmatpush.bf16.msra.mxu3 %v9924_v32  ;;  %v11614_v26 = vpack.c.bf16 %v5790_v20, %v5782_v60  ;;  %v11616_v25 = vpack.c.bf16 %v5789_v62, %v5781_v15  ;;  %v11008_v3 = vld [vmem:[#allocation10 + $0x244] sm:$0xf0]  ;;  %v10035_v62 = vld [vmem:[#allocation10 + $0x280] sm:$0xf]  ;;  %v11038_v60 = vld [vmem:[#allocation10 + $0x334] sm:$0xf0] }
 0x45f   :  { %v10004_v43 = vor.u32 %v11008_v3, %v10003_v29  ;;  %v10965_v20 = vld [vmem:[#allocation10 + $0xf4] sm:$0xf]  ;;  %v10036_v0 = vor.u32 %v11016_v12, %v10035_v62  ;;  %v10107_v45 = vld [vmem:[#allocation10 + $0x310] sm:$0xf]  ;;  %v9749_v10 = vld [vmem:[#allocation10 + $0x48] sm:$0xf0] }
 0x460   :  { %6584 = vmatpush.bf16.msra.mxu0 %v9716_v52  ;;  %6598 = vmatpush.bf16.msra.mxu1 %v9780_v17  ;;  %v5564_v32 = vpop.f32.mrf.mxu0  ;;  %v10051_v52 = vld [vmem:[#allocation10 + $0x2a0] sm:$0xf]  ;;  %v11020_v17 = vld [vmem:[#allocation10 + $0x2a4] sm:$0xf0]  ;;  %v9840_v28 = vor.u32 %v10965_v20, %v9837_v36  ;;  %v10979_v20 = vld [vmem:[#allocation10 + $0x164] sm:$0xf] }
 0x461   :  { %v10052_v55 = vor.u32 %v11020_v17, %v10051_v52  ;;  %v5565_v21 = vadd.f32 %v5564_v32, %v4039_v49  ;;  %v11036_v32 = vld [vmem:[#allocation10 + $0x324] sm:$0xf0]  ;;  %v10961_v52 = vld [vmem:[#allocation10 + $0xd4] sm:$0xf]  ;;  %v9821_v17 = vld [vmem:[#allocation10 + $0xd8] sm:$0xf0] }
 0x462   :  { %6611 = vmatpush.bf16.msra.mxu2 %v9852_v53  ;;  %6625 = vmatpush.bf16.msra.mxu3 %v9916_v57  ;;  %v10140_v53 = vor.u32 %v11042_v41, %v10139_v13  ;;  %v10043_v57 = vld [vmem:[#allocation10 + $0x290] sm:$0xf]  ;;  %v11060_v12 = vld [vmem:[#allocation10 + $0x3e4] sm:$0xf0]  ;;  %v9893_v36 = vld [vmem:[#allocation10 + $0x168] sm:$0xf0] }
 0x463   :  { %6585 = vmatmul.bf16.vlgmr.msra.gmra.mxu0 %v11607_v7  ;;  %6599 = vmatmul.bf16.vlgmr.msra.gmra.mxu1 %v11609_v39 }
 0x464   :  { %6633 = vmatpush.bf16.msrb.mxu0 %v10028_v9  ;;  %6647 = vmatpush.bf16.msrb.mxu1 %v10092_v30  ;;  %v5578_v9 = vpop.f32.mrf.mxu1  ;;  %v10131_v30 = vld [vmem:[#allocation10 + $0x340] sm:$0xf] }
 0x465   :  { %v10132_v40 = vor.u32 %v11040_v4, %v10131_v30  ;;  %v10219_v4 = vld [vmem:[#allocation10 + $0x3f0] sm:$0xf] }
 0x466   :  { %6612 = vmatpush.bf16.msra.mxu2 %v9844_v11  ;;  %6626 = vmatpush.bf16.msra.mxu3 %v9908_v33  ;;  %v10044_v11 = vor.u32 %v11018_v34, %v10043_v57  ;;  %v5579_v33 = vadd.f32 %v5578_v9, %v5565_v21  ;;  %v10099_v57 = vld [vmem:[#allocation10 + $0x300] sm:$0xf]  ;;  %v11032_v21 = vld [vmem:[#allocation10 + $0x304] sm:$0xf0]  ;;  %v9813_v34 = vld [vmem:[#allocation10 + $0xc8] sm:$0xf0] }
 0x467   :  { %v10100_v30 = vor.u32 %v11032_v21, %v10099_v57  ;;  %v10951_v21 = vld [vmem:[#allocation10 + $0x84] sm:$0xf] }
 0x468   :  { %6634 = vmatpush.bf16.msrb.mxu0 %v10020_v35  ;;  %6648 = vmatpush.bf16.msrb.mxu1 %v10084_v56  ;;  %v5566_v19 = vpop.f32.mrf.mxu0  ;;  %v9773_v35 = vld [vmem:[#allocation10 + $0x78] sm:$0xf0]  ;;  %v10123_v56 = vld [vmem:[#allocation10 + $0x330] sm:$0xf] }
 0x469   :  { %6613 = vmatmul.bf16.vlgmr.msra.gmra.mxu2 %v11616_v25  ;;  %6627 = vmatmul.bf16.vlgmr.msra.gmra.mxu3 %v11614_v26  ;;  %v5567_v14 = vadd.f32 %v5566_v19, %v4039_v49  ;;  %v10124_v23 = vor.u32 %v11038_v60, %v10123_v56  ;;  %v9776_v3 = vor.u32 %v10949_v18, %v9773_v35  ;;  %v10959_v19 = vld [vmem:[#allocation10 + $0xc4] sm:$0xf]  ;;  %v9805_v56 = vld [vmem:[#allocation10 + $0xb8] sm:$0xf0] }
 0x46a   :  { %6661 = vmatpush.bf16.msrb.mxu2 %v10156_v24  ;;  %v10115_v24 = vld [vmem:[#allocation10 + $0x320] sm:$0xf]  ;;  %v9816_v62 = vor.u32 %v10959_v19, %v9813_v34  ;;  %v9781_v19 = vld [vmem:[#allocation10 + $0x88] sm:$0xf0]  ;;  %v10187_v34 = vld [vmem:[#allocation10 + $0x3b0] sm:$0xf] }
 0x46c   :  { %6635 = vmatpush.bf16.msrb.mxu0 %v10012_v27  ;;  %6649 = vmatpush.bf16.msrb.mxu1 %v10076_v31  ;;  %v5592_v5 = vpop.f32.mrf.mxu2  ;;  %v5606_v42 = vpop.f32.mrf.mxu3  ;;  %v9972_v27 = vor.u32 %v11000_v16, %v9971_v8  ;;  %v10947_v31 = vld [vmem:[#allocation10 + $0x64] sm:$0xf]  ;;  %v10941_v8 = vld [vmem:[#allocation10 + $0x34] sm:$0xf]  ;;  %v9741_v16 = vld [vmem:[#allocation10 + $0x38] sm:$0xf0] }
 0x46d   :  { %v5593_v15 = vadd.f32 %v5592_v5, %v5579_v33  ;;  %v5580_v29 = vpop.f32.mrf.mxu1  ;;  %v9768_v48 = vor.u32 %v10947_v31, %v9765_v22  ;;  %v11062_v5 = vld [vmem:[#allocation10 + $0x3f4] sm:$0xf0]  ;;  %v10957_v33 = vld [vmem:[#allocation10 + $0xb4] sm:$0xf]  ;;  %v10955_v31 = vld [vmem:[#allocation10 + $0xa4] sm:$0xf] }
 0x46e   :  { %6662 = vmatpush.bf16.msrb.mxu2 %v10148_v37  ;;  %v5581_v38 = vadd.f32 %v5580_v29, %v5567_v14  ;;  %v10945_v37 = vld [vmem:[#allocation10 + $0x54] sm:$0xf]  ;;  %v10220_v18 = vor.u32 %v11062_v5, %v10219_v4  ;;  %v10211_v14 = vld [vmem:[#allocation10 + $0x3e0] sm:$0xf]  ;;  %v9733_v29 = vld [vmem:[#allocation10 + $0x28] sm:$0xf0] }
 0x46f   :  { %v5607_v54 = vadd.f32 %v5606_v42, %v5593_v15  ;;  %v10981_v42 = vld [vmem:[#allocation10 + $0x174] sm:$0xf]  ;;  %v10212_v60 = vor.u32 %v11060_v12, %v10211_v14  ;;  %v9744_v15 = vor.u32 %v10941_v8, %v9741_v16  ;;  %v11058_v22 = vld [vmem:[#allocation10 + $0x3d4] sm:$0xf0]  ;;  %v10179_v12 = vld [vmem:[#allocation10 + $0x3a0] sm:$0xf] }
 0x470   :  { %6636 = vmatpush.bf16.msrb.mxu0 %v10004_v43  ;;  %6650 = vmatpush.bf16.msrb.mxu1 %v10068_v58  ;;  %v10116_v58 = vor.u32 %v11036_v32, %v10115_v24  ;;  %v4040_v24 = vperm.slane %v11554_v2, 5  ;;  %v10973_v4 = vld [vmem:[#allocation10 + $0x134] sm:$0xf] }
 0x471   :  { %v5783_v41 = vmax.f32 %v5607_v54, 0.0  ;;  %6675 = vmatpush.bf16.msrb.mxu3 %v10220_v18 }
 0x472   :  { %6663 = vmatpush.bf16.msrb.mxu2 %v10140_v53 }
 0x474   :  { %6637 = vmatpush.bf16.msrb.mxu0 %v9996_v50  ;;  %6651 = vmatpush.bf16.msrb.mxu1 %v10060_v59  ;;  %v5594_v43 = vpop.f32.mrf.mxu2  ;;  %v5608_v46 = vpop.f32.mrf.mxu3  ;;  %v9757_v50 = vld [vmem:[#allocation10 + $0x58] sm:$0xf0]  ;;  %v11034_v59 = vld [vmem:[#allocation10 + $0x314] sm:$0xf0] }
 0x475   :  { %v5595_v44 = vadd.f32 %v5594_v43, %v5581_v38  ;;  %v10108_v13 = vor.u32 %v11034_v59, %v10107_v45  ;;  %v9760_v53 = vor.u32 %v10945_v37, %v9757_v50  ;;  %6676 = vmatpush.bf16.msrb.mxu3 %v10212_v60  ;;  %v10203_v38 = vld [vmem:[#allocation10 + $0x3d0] sm:$0xf]  ;;  %v9885_v43 = vld [vmem:[#allocation10 + $0x158] sm:$0xf0]  ;;  %v11056_v50 = vld [vmem:[#allocation10 + $0x3c4] sm:$0xf0] }
 0x476   :  { %6664 = vmatpush.bf16.msrb.mxu2 %v10132_v40  ;;  %v9901_v40 = vld [vmem:[#allocation10 + $0x178] sm:$0xf0]  ;;  %v10204_v32 = vor.u32 %v11058_v22, %v10203_v38  ;;  %v10971_v60 = vld [vmem:[#allocation10 + $0x124] sm:$0xf] }
 0x477   :  { %v5609_v49 = vadd.f32 %v5608_v46, %v5595_v44  ;;  %v9904_v35 = vor.u32 %v10981_v42, %v9901_v40  ;;  %v9725_v44 = vld [vmem:[#allocation10 + $0x18] sm:$0xf0] }
 0x478   :  { %6638 = vmatpush.bf16.msrb.mxu0 %v9988_v47  ;;  %6652 = vmatpush.bf16.msrb.mxu1 %v10052_v55  ;;  %v10943_v47 = vld [vmem:[#allocation10 + $0x44] sm:$0xf]  ;;  %v9824_v55 = vor.u32 %v10961_v52, %v9821_v17  ;;  %v9789_v37 = vld [vmem:[#allocation10 + $0x98] sm:$0xf0]  ;;  %v9877_v52 = vld [vmem:[#allocation10 + $0x148] sm:$0xf0] }
 0x479   :  { %v5791_v9 = vmax.f32 %v5609_v49, 0.0  ;;  %6677 = vmatpush.bf16.msrb.mxu3 %v10204_v32  ;;  %v10195_v49 = vld [vmem:[#allocation10 + $0x3c0] sm:$0xf]  ;;  %v10013_v38 = vld [vmem:[#allocation10 + $0x258] sm:$0xf0] }
 0x47a   :  { %6665 = vmatpush.bf16.msrb.mxu2 %v10124_v23  ;;  %v9896_v23 = vor.u32 %v10979_v20, %v9893_v36  ;;  %v10196_v2 = vor.u32 %v11056_v50, %v10195_v49  ;;  %v10969_v32 = vld [vmem:[#allocation10 + $0x114] sm:$0xf]  ;;  %v11007_v49 = vld [vmem:[#allocation10 + $0x244] sm:$0xf]  ;;  %v10005_v50 = vld [vmem:[#allocation10 + $0x248] sm:$0xf0] }
 0x47b   :  { %v11621_v61 = vpack.c.bf16 %v5791_v9, %v5783_v41  ;;  %v10935_v9 = vld [vmem:[#allocation10 + $0x4] sm:$0xf] }
 0x47c   :  { %6639 = vmatpush.bf16.msrb.mxu0 %v9980_v6  ;;  %6653 = vmatpush.bf16.msrb.mxu1 %v10044_v11  ;;  %v9752_v6 = vor.u32 %v10943_v47, %v9749_v10  ;;  %v11013_v47 = vld [vmem:[#allocation10 + $0x274] sm:$0xf] }
 0x47d   :  { %6678 = vmatpush.bf16.msrb.mxu3 %v10196_v2  ;;  %v10967_v2 = vld [vmem:[#allocation10 + $0x104] sm:$0xf] }
 0x47e   :  { %6666 = vmatpush.bf16.msrb.mxu2 %v10116_v58  ;;  %v10937_v58 = vld [vmem:[#allocation10 + $0x14] sm:$0xf] }
 0x47f   :  { %v9728_v41 = vor.u32 %v10937_v58, %v9725_v44 }
 0x480   :  { %6640 = vmatpush.bf16.msrb.mxu0 %v9972_v27  ;;  %6654 = vmatpush.bf16.msrb.mxu1 %v10036_v0  ;;  %v5620_v11 = vpop.f32.mrf.mxu0  ;;  %v10939_v27 = vld [vmem:[#allocation10 + $0x24] sm:$0xf]  ;;  %v9797_v0 = vld [vmem:[#allocation10 + $0xa8] sm:$0xf0]  ;;  %v5634_v1 = vpop.f32.mrf.mxu1 }
 0x481   :  { %v9736_v63 = vor.u32 %v10939_v27, %v9733_v29  ;;  %v9800_v46 = vor.u32 %v10955_v31, %v9797_v0  ;;  %v5621_v45 = vadd.f32 %v5620_v11, %v4040_v24  ;;  %v11011_v11 = vld [vmem:[#allocation10 + $0x264] sm:$0xf]  ;;  %v11009_v0 = vld [vmem:[#allocation10 + $0x254] sm:$0xf] }
 0x482   :  { %6667 = vmatpush.bf16.msrb.mxu2 %v10108_v13 }
 0x483   :  { %6641 = vmatmul.bf16.vlgmr.msrb.gmra.mxu0 %v11621_v61  ;;  %v5635_v5 = vadd.f32 %v5634_v1, %v5621_v45  ;;  %v11029_v1 = vld [vmem:[#allocation10 + $0x2f4] sm:$0xf]  ;;  %v10163_v45 = vld [vmem:[#allocation10 + $0x380] sm:$0xf] }
 0x484   :  { %6689 = vmatpush.bf16.msra.mxu0 %v9776_v3  ;;  %6703 = vmatpush.bf16.msra.mxu1 %v9840_v28  ;;  %v9808_v3 = vor.u32 %v10957_v33, %v9805_v56  ;;  %v10977_v28 = vld [vmem:[#allocation10 + $0x154] sm:$0xf]  ;;  %v9784_v33 = vor.u32 %v10951_v21, %v9781_v19  ;;  %v11052_v56 = vld [vmem:[#allocation10 + $0x3a4] sm:$0xf0]  ;;  %v9997_v21 = vld [vmem:[#allocation10 + $0x238] sm:$0xf0] }
 0x485   :  { %v9888_v54 = vor.u32 %v10977_v28, %v9885_v43  ;;  %v10180_v36 = vor.u32 %v11052_v56, %v10179_v12  ;;  %v10171_v28 = vld [vmem:[#allocation10 + $0x390] sm:$0xf]  ;;  %v11632_v12 = vld [vmem:[%s11670_s10] sm:$0xff] }
 0x486   :  { %6668 = vmatpush.bf16.msrb.mxu2 %v10100_v30  ;;  %v11054_v30 = vld [vmem:[#allocation10 + $0x3b4] sm:$0xf0]  ;;  %v4041_v56 = vperm.slane %v11632_v12, 6 }
 0x487   :  { %v10188_v40 = vor.u32 %v11054_v30, %v10187_v34  ;;  %v11025_v34 = vld [vmem:[#allocation10 + $0x2d4] sm:$0xf] }
 0x488   :  { %6690 = vmatpush.bf16.msra.mxu0 %v9768_v48  ;;  %6704 = vmatpush.bf16.msra.mxu1 %v9832_v51  ;;  %v10953_v48 = vld [vmem:[#allocation10 + $0x94] sm:$0xf]  ;;  %v10975_v51 = vld [vmem:[#allocation10 + $0x144] sm:$0xf]  ;;  %v5622_v59 = vpop.f32.mrf.mxu0  ;;  %v5636_v14 = vpop.f32.mrf.mxu1 }
 0x489   :  { %v9880_v10 = vor.u32 %v10975_v51, %v9877_v52  ;;  %v9792_v57 = vor.u32 %v10953_v48, %v9789_v37  ;;  %v5623_v42 = vadd.f32 %v5622_v59, %v4040_v24  ;;  %6679 = vmatpush.bf16.msrb.mxu3 %v10188_v40  ;;  %v11050_v24 = vld [vmem:[#allocation10 + $0x394] sm:$0xf0]  ;;  %v10016_v37 = vor.u32 %v11009_v0, %v10013_v38  ;;  %v11048_v59 = vld [vmem:[#allocation10 + $0x384] sm:$0xf0] }
 0x48a   :  { %6717 = vmatpush.bf16.msra.mxu2 %v9904_v35  ;;  %v10172_v58 = vor.u32 %v11050_v24, %v10171_v28 }
 0x48b   :  { %v5637_v20 = vadd.f32 %v5636_v14, %v5623_v42  ;;  %v9957_v42 = vld [vmem:[#allocation10 + $0x1e8] sm:$0xf0] }
 0x48c   :  { %6691 = vmatpush.bf16.msra.mxu0 %v9760_v53  ;;  %6705 = vmatpush.bf16.msra.mxu1 %v9824_v55  ;;  %v5648_v17 = vpop.f32.mrf.mxu2  ;;  %v5662_v13 = vpop.f32.mrf.mxu3  ;;  %v9717_v53 = vld [vmem:[#allocation10 + $0x8] sm:$0xf0]  ;;  %v10029_v55 = vld [vmem:[#allocation10 + $0x278] sm:$0xf0] }
 0x48d   :  { %v9720_v8 = vor.u32 %v10935_v9, %v9717_v53  ;;  %v5649_v18 = vadd.f32 %v5648_v17, %v5635_v5  ;;  %v10032_v35 = vor.u32 %v11013_v47, %v10029_v55  ;;  %6680 = vmatpush.bf16.msrb.mxu3 %v10180_v36  ;;  %v10085_v17 = vld [vmem:[#allocation10 + $0x2e8] sm:$0xf0]  ;;  %v10997_v53 = vld [vmem:[#allocation10 + $0x1f4] sm:$0xf]  ;;  %v9965_v47 = vld [vmem:[#allocation10 + $0x1f8] sm:$0xf0] }
 0x48e   :  { %6718 = vmatpush.bf16.msra.mxu2 %v9896_v23  ;;  %v9861_v23 = vld [vmem:[#allocation10 + $0x128] sm:$0xf0]  ;;  %v9968_v55 = vor.u32 %v10997_v53, %v9965_v47  ;;  %v10995_v5 = vld [vmem:[#allocation10 + $0x1e4] sm:$0xf]  ;;  %v11001_v36 = vld [vmem:[#allocation10 + $0x214] sm:$0xf] }
 0x48f   :  { %v9864_v27 = vor.u32 %v10971_v60, %v9861_v23  ;;  %v5663_v29 = vadd.f32 %v5662_v13, %v5649_v18  ;;  %v10164_v13 = vor.u32 %v11048_v59, %v10163_v45  ;;  %v9960_v40 = vor.u32 %v10995_v5, %v9957_v42  ;;  %v9981_v23 = vld [vmem:[#allocation10 + $0x218] sm:$0xf0]  ;;  %v11017_v45 = vld [vmem:[#allocation10 + $0x294] sm:$0xf] }
 0x490   :  { %6692 = vmatpush.bf16.msra.mxu0 %v9752_v6  ;;  %6706 = vmatpush.bf16.msra.mxu1 %v9816_v62  ;;  %v9869_v6 = vld [vmem:[#allocation10 + $0x138] sm:$0xf0]  ;;  %v10021_v62 = vld [vmem:[#allocation10 + $0x268] sm:$0xf0]  ;;  %v9984_v28 = vor.u32 %v11001_v36, %v9981_v23  ;;  %v11045_v5 = vld [vmem:[#allocation10 + $0x374] sm:$0xf] }
 0x491   :  { %v9872_v16 = vor.u32 %v10973_v4, %v9869_v6  ;;  %v10024_v31 = vor.u32 %v11011_v11, %v10021_v62  ;;  %6681 = vmatpush.bf16.msrb.mxu3 %v10172_v58  ;;  %v10077_v4 = vld [vmem:[#allocation10 + $0x2d8] sm:$0xf0]  ;;  %v10069_v11 = vld [vmem:[#allocation10 + $0x2c8] sm:$0xf0]  ;;  %v10993_v62 = vld [vmem:[#allocation10 + $0x1d4] sm:$0xf] }
 0x492   :  { %6719 = vmatpush.bf16.msra.mxu2 %v9888_v54  ;;  %v9853_v54 = vld [vmem:[#allocation10 + $0x118] sm:$0xf0]  ;;  %v10080_v18 = vor.u32 %v11025_v34, %v10077_v4  ;;  %v11019_v58 = vld [vmem:[#allocation10 + $0x2a4] sm:$0xf] }
 0x493   :  { %v9856_v44 = vor.u32 %v10969_v32, %v9853_v54  ;;  %v10053_v54 = vld [vmem:[#allocation10 + $0x2a8] sm:$0xf0]  ;;  %v10157_v42 = vld [vmem:[#allocation10 + $0x378] sm:$0xf0]  ;;  %v11039_v23 = vld [vmem:[#allocation10 + $0x344] sm:$0xf] }
 0x494   :  { %6693 = vmatpush.bf16.msra.mxu0 %v9744_v15  ;;  %6707 = vmatpush.bf16.msra.mxu1 %v9808_v3  ;;  %v5650_v15 = vpop.f32.mrf.mxu2  ;;  %v5664_v22 = vpop.f32.mrf.mxu3 }
 0x495   :  { %v5651_v3 = vadd.f32 %v5650_v15, %v5637_v20  ;;  %6682 = vmatpush.bf16.msrb.mxu3 %v10164_v13 }
 0x496   :  { %6720 = vmatpush.bf16.msra.mxu2 %v9880_v10  ;;  %v10008_v10 = vor.u32 %v11007_v49, %v10005_v50 }
 0x497   :  { %v5665_v43 = vadd.f32 %v5664_v22, %v5651_v3  ;;  %v10991_v3 = vld [vmem:[#allocation10 + $0x1c4] sm:$0xf] }
 0x498   :  { %6694 = vmatpush.bf16.msra.mxu0 %v9736_v63  ;;  %6708 = vmatpush.bf16.msra.mxu1 %v9800_v46  ;;  %v10093_v63 = vld [vmem:[#allocation10 + $0x2f8] sm:$0xf0]  ;;  %v5784_v46 = vmax.f32 %v5663_v29, 0.0 }
 0x499   :  { %v5792_v48 = vmax.f32 %v5665_v43, 0.0  ;;  %v10096_v51 = vor.u32 %v11029_v1, %v10093_v63  ;;  %6731 = vmatpush.bf16.msra.mxu3 %v9968_v55  ;;  %v10061_v29 = vld [vmem:[#allocation10 + $0x2b8] sm:$0xf0]  ;;  %v10999_v43 = vld [vmem:[#allocation10 + $0x204] sm:$0xf] }
 0x49a   :  { %6721 = vmatpush.bf16.msra.mxu2 %v9872_v16  ;;  %v9989_v16 = vld [vmem:[#allocation10 + $0x228] sm:$0xf0] }
 0x49b   :  { %v11626_v52 = vpack.c.bf16 %v5792_v48, %v5784_v46  ;;  %v9973_v1 = vld [vmem:[#allocation10 + $0x208] sm:$0xf0]  ;;  %v9933_v46 = vld [vmem:[#allocation10 + $0x1b8] sm:$0xf0] }
 0x49c   :  { %6695 = vmatpush.bf16.msra.mxu0 %v9728_v41  ;;  %6709 = vmatpush.bf16.msra.mxu1 %v9792_v57  ;;  %v9845_v41 = vld [vmem:[#allocation10 + $0x108] sm:$0xf0]  ;;  %v11005_v57 = vld [vmem:[#allocation10 + $0x234] sm:$0xf]  ;;  %v9976_v50 = vor.u32 %v10999_v43, %v9973_v1 }
 0x49d   :  { %v9848_v9 = vor.u32 %v10967_v2, %v9845_v41  ;;  %6655 = vmatmul.bf16.vlgmr.msrb.gmra.mxu1 %v11626_v52  ;;  %v10000_v6 = vor.u32 %v11005_v57, %v9997_v21  ;;  %6732 = vmatpush.bf16.msra.mxu3 %v9960_v40  ;;  %v10045_v2 = vld [vmem:[#allocation10 + $0x298] sm:$0xf0]  ;;  %v10985_v21 = vld [vmem:[#allocation10 + $0x194] sm:$0xf]  ;;  %v10117_v43 = vld [vmem:[#allocation10 + $0x328] sm:$0xf0] }
 0x49e   :  { %6722 = vmatpush.bf16.msra.mxu2 %v9864_v27  ;;  %v11021_v27 = vld [vmem:[#allocation10 + $0x2b4] sm:$0xf]  ;;  %v10048_v47 = vor.u32 %v11017_v45, %v10045_v2  ;;  %v11031_v45 = vld [vmem:[#allocation10 + $0x304] sm:$0xf] }
 0x49f   :  { %v10064_v63 = vor.u32 %v11021_v27, %v10061_v29  ;;  %v4042_v27 = vperm.slane %v11632_v12, 7 }
 0x4a0   :  { %6696 = vmatpush.bf16.msra.mxu0 %v9720_v8  ;;  %6710 = vmatpush.bf16.msra.mxu1 %v9784_v33  ;;  %v5676_v30 = vpop.f32.mrf.mxu0  ;;  %v11003_v8 = vld [vmem:[#allocation10 + $0x224] sm:$0xf]  ;;  %v9949_v33 = vld [vmem:[#allocation10 + $0x1d8] sm:$0xf0]  ;;  %v5690_v20 = vpop.f32.mrf.mxu1 }
 0x4a1   :  { %v9952_v14 = vor.u32 %v10993_v62, %v9949_v33  ;;  %v9992_v60 = vor.u32 %v11003_v8, %v9989_v16  ;;  %v5677_v38 = vadd.f32 %v5676_v30, %v4041_v56  ;;  %v10983_v16 = vld [vmem:[#allocation10 + $0x184] sm:$0xf]  ;;  %v10149_v33 = vld [vmem:[#allocation10 + $0x368] sm:$0xf0] }
 0x4a2   :  { %6723 = vmatpush.bf16.msra.mxu2 %v9856_v44  ;;  %v10989_v44 = vld [vmem:[#allocation10 + $0x1b4] sm:$0xf]  ;;  %v11043_v62 = vld [vmem:[#allocation10 + $0x364] sm:$0xf] }
 0x4a3   :  { %6697 = vmatmul.bf16.vlgmr.msra.gmra.mxu0 %v11607_v7  ;;  %v11027_v7 = vld [vmem:[#allocation10 + $0x2e4] sm:$0xf]  ;;  %6733 = vmatpush.bf16.msra.mxu3 %v9952_v14  ;;  %v9936_v48 = vor.u32 %v10989_v44, %v9933_v46  ;;  %v10109_v44 = vld [vmem:[#allocation10 + $0x318] sm:$0xf0] }
 0x4a4   :  { %6745 = vmatpush.bf16.msrb.mxu0 %v10032_v35  ;;  %6759 = vmatpush.bf16.msrb.mxu1 %v10096_v51  ;;  %v10088_v19 = vor.u32 %v11027_v7, %v10085_v17  ;;  %v11023_v35 = vld [vmem:[#allocation10 + $0x2c4] sm:$0xf]  ;;  %v10056_v51 = vor.u32 %v11019_v58, %v10053_v54  ;;  %v9925_v17 = vld [vmem:[#allocation10 + $0x1a8] sm:$0xf0]  ;;  %v11033_v54 = vld [vmem:[#allocation10 + $0x314] sm:$0xf] }
 0x4a5   :  { %v10072_v15 = vor.u32 %v11023_v35, %v10069_v11  ;;  %v10987_v7 = vld [vmem:[#allocation10 + $0x1a4] sm:$0xf]  ;;  %v9909_v35 = vld [vmem:[#allocation10 + $0x188] sm:$0xf0] }
 0x4a6   :  { %6724 = vmatpush.bf16.msra.mxu2 %v9848_v9  ;;  %v9928_v41 = vor.u32 %v10987_v7, %v9925_v17  ;;  %v9912_v14 = vor.u32 %v10983_v16, %v9909_v35  ;;  %v11061_v17 = vld [vmem:[#allocation10 + $0x3f4] sm:$0xf]  ;;  %v10173_v35 = vld [vmem:[#allocation10 + $0x398] sm:$0xf0] }
 0x4a8   :  { %6746 = vmatpush.bf16.msrb.mxu0 %v10024_v31  ;;  %6760 = vmatpush.bf16.msrb.mxu1 %v10088_v19  ;;  %v9941_v31 = vld [vmem:[#allocation10 + $0x1c8] sm:$0xf0]  ;;  %v5678_v22 = vpop.f32.mrf.mxu0  ;;  %v5692_v13 = vpop.f32.mrf.mxu1  ;;  %v9917_v19 = vld [vmem:[#allocation10 + $0x198] sm:$0xf0] }
 0x4a9   :  { %v9944_v0 = vor.u32 %v10991_v3, %v9941_v31  ;;  %v5679_v49 = vadd.f32 %v5678_v22, %v4041_v56  ;;  %v9920_v30 = vor.u32 %v10985_v21, %v9917_v19  ;;  %v11037_v31 = vld [vmem:[#allocation10 + $0x334] sm:$0xf]  ;;  %v10205_v21 = vld [vmem:[#allocation10 + $0x3d8] sm:$0xf0] }
 0x4ab   :  { %6734 = vmatpush.bf16.msra.mxu3 %v9944_v0  ;;  %v5693_v9 = vadd.f32 %v5692_v13, %v5679_v49  ;;  %v10125_v0 = vld [vmem:[#allocation10 + $0x338] sm:$0xf0]  ;;  %v10112_v49 = vor.u32 %v11033_v54, %v10109_v44 }
 0x4ac   :  { %6747 = vmatpush.bf16.msrb.mxu0 %v10016_v37  ;;  %6761 = vmatpush.bf16.msrb.mxu1 %v10080_v18  ;;  %v5704_v24 = vpop.f32.mrf.mxu2  ;;  %v5718_v32 = vpop.f32.mrf.mxu3  ;;  %v5691_v37 = vadd.f32 %v5690_v20, %v5677_v38  ;;  %v10160_v18 = vor.u32 %v11045_v5, %v10157_v42  ;;  %v10141_v20 = vld [vmem:[#allocation10 + $0x358] sm:$0xf0]  ;;  %v11053_v5 = vld [vmem:[#allocation10 + $0x3b4] sm:$0xf] }
 0x4ad   :  { %6711 = vmatmul.bf16.vlgmr.msra.gmra.mxu1 %v11609_v39  ;;  %v10037_v39 = vld [vmem:[#allocation10 + $0x288] sm:$0xf0]  ;;  %v10221_v13 = vld [vmem:[#allocation10 + $0x3f8] sm:$0xf0] }
 0x4ae   :  { %v5705_v59 = vadd.f32 %v5704_v24, %v5691_v37  ;;  %v10189_v42 = vld [vmem:[#allocation10 + $0x3b8] sm:$0xf0] }
 0x4af   :  { %6735 = vmatpush.bf16.msra.mxu3 %v9936_v48 }
 0x4b0   :  { %6748 = vmatpush.bf16.msrb.mxu0 %v10008_v10  ;;  %6762 = vmatpush.bf16.msrb.mxu1 %v10072_v15  ;;  %v11015_v10 = vld [vmem:[#allocation10 + $0x284] sm:$0xf]  ;;  %v5719_v55 = vadd.f32 %v5718_v32, %v5705_v59  ;;  %v10133_v15 = vld [vmem:[#allocation10 + $0x348] sm:$0xf0]  ;;  %v10128_v32 = vor.u32 %v11037_v31, %v10125_v0 }
 0x4b1   :  { %v10040_v40 = vor.u32 %v11015_v10, %v10037_v39  ;;  %v10136_v3 = vor.u32 %v11039_v23, %v10133_v15  ;;  %v10101_v59 = vld [vmem:[#allocation10 + $0x308] sm:$0xf0]  ;;  %v11059_v10 = vld [vmem:[#allocation10 + $0x3e4] sm:$0xf]  ;;  %v11057_v39 = vld [vmem:[#allocation10 + $0x3d4] sm:$0xf] }
 0x4b2   :  { %v10208_v19 = vor.u32 %v11057_v39, %v10205_v21 }
 0x4b3   :  { %6736 = vmatpush.bf16.msra.mxu3 %v9928_v41 }
 0x4b4   :  { %6749 = vmatpush.bf16.msrb.mxu0 %v10000_v6  ;;  %6763 = vmatpush.bf16.msrb.mxu1 %v10064_v63  ;;  %v5706_v53 = vpop.f32.mrf.mxu2  ;;  %v5720_v34 = vpop.f32.mrf.mxu3  ;;  %v5785_v6 = vmax.f32 %v5719_v55, 0.0  ;;  %v10213_v55 = vld [vmem:[#allocation10 + $0x3e8] sm:$0xf0] }
 0x4b5   :  { %v5707_v57 = vadd.f32 %v5706_v53, %v5693_v9  ;;  %v10224_v53 = vor.u32 %v11061_v17, %v10221_v13 }
 0x4b7   :  { %v5721_v4 = vadd.f32 %v5720_v34, %v5707_v57  ;;  %6737 = vmatpush.bf16.msra.mxu3 %v9920_v30  ;;  %v10216_v57 = vor.u32 %v11059_v10, %v10213_v55  ;;  %v11055_v34 = vld [vmem:[#allocation10 + $0x3c4] sm:$0xf]  ;;  %v10197_v30 = vld [vmem:[#allocation10 + $0x3c8] sm:$0xf0] }
 0x4b8   :  { %6750 = vmatpush.bf16.msrb.mxu0 %v9992_v60  ;;  %6764 = vmatpush.bf16.msrb.mxu1 %v10056_v51  ;;  %v11041_v60 = vld [vmem:[#allocation10 + $0x354] sm:$0xf] }
 0x4b9   :  { %v5793_v8 = vmax.f32 %v5721_v4, 0.0  ;;  %v10144_v36 = vor.u32 %v11041_v60, %v10141_v20  ;;  %v10200_v4 = vor.u32 %v11055_v34, %v10197_v30  ;;  %v5931_v20 = vld [vmem:[%s11672_s12] sm:$0x3] }
 0x4ba   :  { %v5933_v23 = vperm.slane %v5931_v20, 0  ;;  %v5934_v13 = vperm.slane %v5931_v20, 1 }
 0x4bb   :  { %v11637_v11 = vpack.c.bf16 %v5793_v8, %v5785_v6  ;;  %6738 = vmatpush.bf16.msra.mxu3 %v9912_v14  ;;  %v11051_v6 = vld [vmem:[#allocation10 + $0x3a4] sm:$0xf]  ;;  %v10181_v8 = vld [vmem:[#allocation10 + $0x3a8] sm:$0xf0] }
 0x4bc   :  { %6751 = vmatpush.bf16.msrb.mxu0 %v9984_v28  ;;  %6765 = vmatpush.bf16.msrb.mxu1 %v10048_v47  ;;  %v10184_v16 = vor.u32 %v11051_v6, %v10181_v8 }
 0x4bd   :  { %6669 = vmatmul.bf16.vlgmr.msrb.gmra.mxu2 %v11637_v11 }
 0x4be   :  { %6773 = vmatpush.bf16.msrb.mxu2 %v10160_v18  ;;  %v11049_v18 = vld [vmem:[#allocation10 + $0x394] sm:$0xf] }
 0x4c0   :  { %6752 = vmatpush.bf16.msrb.mxu0 %v9976_v50  ;;  %6766 = vmatpush.bf16.msrb.mxu1 %v10040_v40  ;;  %v5732_v56 = vpop.f32.mrf.mxu0  ;;  %v5746_v29 = vpop.f32.mrf.mxu1  ;;  %v10192_v40 = vor.u32 %v11053_v5, %v10189_v42 }
 0x4c1   :  { %v5733_v38 = vadd.f32 %v5732_v56, %v4042_v27 }
 0x4c3   :  { %6753 = vmatmul.bf16.vlgmr.msrb.gmra.mxu0 %v11621_v61  ;;  %v10152_v61 = vor.u32 %v11043_v62, %v10149_v33  ;;  %6767 = vmatmul.bf16.vlgmr.msrb.gmra.mxu1 %v11626_v52  ;;  %v11035_v52 = vld [vmem:[#allocation10 + $0x324] sm:$0xf]  ;;  %v5747_v1 = vadd.f32 %v5746_v29, %v5733_v38  ;;  %v10165_v33 = vld [vmem:[#allocation10 + $0x388] sm:$0xf0] }
 0x4c4   :  { %v10120_v58 = vor.u32 %v11035_v52, %v10117_v43  ;;  %v11047_v62 = vld [vmem:[#allocation10 + $0x384] sm:$0xf] }
 0x4c5   :  { %6774 = vmatpush.bf16.msrb.mxu2 %v10152_v61  ;;  %v10168_v14 = vor.u32 %v11047_v62, %v10165_v33 }
 0x4c8   :  { %v5734_v22 = vpop.f32.mrf.mxu0  ;;  %v5748_v46 = vpop.f32.mrf.mxu1 }
 0x4c9   :  { %6775 = vmatpush.bf16.msrb.mxu2 %v10144_v36  ;;  %v5735_v63 = vadd.f32 %v5734_v22, %v4042_v27 }
 0x4cb   :  { %v5749_v48 = vadd.f32 %v5748_v46, %v5735_v63 }
 0x4cc   :  { %v5760_v28 = vpop.f32.mrf.mxu2  ;;  %v5774_v24 = vpop.f32.mrf.mxu3 }
 0x4cd   :  { %6776 = vmatpush.bf16.msrb.mxu2 %v10136_v3  ;;  %v5761_v12 = vadd.f32 %v5760_v28, %v5747_v1 }
 0x4ce   :  { %6725 = vmatmul.bf16.vlgmr.msra.gmra.mxu2 %v11616_v25  ;;  %v10104_v25 = vor.u32 %v11031_v45, %v10101_v59 }
 0x4cf   :  { %v5775_v50 = vadd.f32 %v5774_v24, %v5761_v12 }
 0x4d1   :  { %6777 = vmatpush.bf16.msrb.mxu2 %v10128_v32  ;;  %v5786_v41 = vmax.f32 %v5775_v50, 0.0 }
 0x4d4   :  { %v5762_v37 = vpop.f32.mrf.mxu2  ;;  %v5776_v2 = vpop.f32.mrf.mxu3 }
 0x4d5   :  { %6778 = vmatpush.bf16.msrb.mxu2 %v10120_v58  ;;  %v5763_v51 = vadd.f32 %v5762_v37, %v5749_v48 }
 0x4d7   :  { %v5777_v7 = vadd.f32 %v5776_v2, %v5763_v51 }
 0x4d9   :  { %6779 = vmatpush.bf16.msrb.mxu2 %v10112_v49  ;;  %v5794_v9 = vmax.f32 %v5777_v7, 0.0 }
 0x4db   :  { %v5802_v47 = vpack.c.bf16 %v5794_v9, %v5786_v41 }
 0x4dd   :  { %6780 = vmatpush.bf16.msrb.mxu2 %v10104_v25  ;;  %6683 = vmatmul.bf16.vlgmr.msrb.gmra.mxu3 %v5802_v47 }
 0x4de   :  { %6787 = vmatpush.bf16.msrb.mxu3 %v10224_v53 }
 0x4e0   :  { %6781 = vmatmul.bf16.vlgmr.msrb.gmra.mxu2 %v11637_v11  ;;  %v10176_v11 = vor.u32 %v11049_v18, %v10173_v35  ;;  %v6586_v61 = vpop.f32.mrf.mxu0  ;;  %v6600_v56 = vpop.f32.mrf.mxu1 }
 0x4e1   :  { %v6587_v29 = vadd.f32 %v6586_v61, %v5933_v23 }
 0x4e2   :  { %6788 = vmatpush.bf16.msrb.mxu3 %v10216_v57 }
 0x4e3   :  { %v6601_v0 = vadd.f32 %v6600_v56, %v6587_v29 }
 0x4e6   :  { %6789 = vmatpush.bf16.msrb.mxu3 %v10208_v19 }
 0x4e8   :  { %v6602_v36 = vpop.f32.mrf.mxu1 }
 0x4ea   :  { %6790 = vmatpush.bf16.msrb.mxu3 %v10200_v4 }
 0x4ec   :  { %v6614_v60 = vpop.f32.mrf.mxu2  ;;  %v6628_v27 = vpop.f32.mrf.mxu3 }
 0x4ed   :  { %6739 = vmatmul.bf16.vlgmr.msra.gmra.mxu3 %v11614_v26  ;;  %v6588_v26 = vpop.f32.mrf.mxu0  ;;  %v6615_v22 = vadd.f32 %v6614_v60, %v6601_v0 }
 0x4ee   :  { %6791 = vmatpush.bf16.msrb.mxu3 %v10192_v40  ;;  %v6589_v28 = vadd.f32 %v6588_v26, %v5933_v23 }
 0x4ef   :  { %v6629_v32 = vadd.f32 %v6628_v27, %v6615_v22 }
 0x4f0   :  { %v6603_v1 = vadd.f32 %v6602_v36, %v6589_v28 }
 0x4f2   :  { %6792 = vmatpush.bf16.msrb.mxu3 %v10184_v16 }
 0x4f4   :  { %v6616_v15 = vpop.f32.mrf.mxu2  ;;  %v6630_v24 = vpop.f32.mrf.mxu3 }
 0x4f5   :  { %v6617_v58 = vadd.f32 %v6616_v15, %v6603_v1 }
 0x4f6   :  { %6793 = vmatpush.bf16.msrb.mxu3 %v10176_v11 }
 0x4f7   :  { %v6631_v48 = vadd.f32 %v6630_v24, %v6617_v58 }
 0x4fa   :  { %6794 = vmatpush.bf16.msrb.mxu3 %v10168_v14 }
 0x4fd   :  { %6795 = vmatmul.bf16.vlgmr.msrb.gmra.mxu3 %v5802_v47 }
 0x500   :  { %v6642_v3 = vpop.f32.mrf.mxu0 }
 0x501   :  { %v6643_v63 = vadd.f32 %v6642_v3, %v6629_v32 }
 0x508   :  { %v6644_v52 = vpop.f32.mrf.mxu0 }
 0x509   :  { %v6645_v50 = vadd.f32 %v6644_v52, %v6631_v48 }
 0x51a   :  { %v6656_v31 = vpop.f32.mrf.mxu1 }
 0x51b   :  { %v6657_v12 = vadd.f32 %v6656_v31, %v6643_v63 }
 0x520   :  { %v6698_v49 = vpop.f32.mrf.mxu0 }
 0x521   :  { %v6699_v10 = vadd.f32 %v6698_v49, %v5934_v13 }
 0x522   :  { %v6658_v43 = vpop.f32.mrf.mxu1 }
 0x523   :  { %v6659_v59 = vadd.f32 %v6658_v43, %v6645_v50 }
 0x528   :  { %v6700_v53 = vpop.f32.mrf.mxu0 }
 0x529   :  { %v6701_v40 = vadd.f32 %v6700_v53, %v5934_v13 }
 0x52a   :  { %v6712_v45 = vpop.f32.mrf.mxu1 }
 0x52b   :  { %v6713_v57 = vadd.f32 %v6712_v45, %v6699_v10 }
 0x532   :  { %v6714_v55 = vpop.f32.mrf.mxu1 }
 0x533   :  { %v6715_v8 = vadd.f32 %v6714_v55, %v6701_v40 }
 0x540   :  { %v6670_v38 = vpop.f32.mrf.mxu2  ;;  %v6754_v5 = vpop.f32.mrf.mxu0 }
 0x541   :  { %v6671_v44 = vadd.f32 %v6670_v38, %v6657_v12  ;;  %v6768_v35 = vpop.f32.mrf.mxu1 }
 0x548   :  { %v6672_v54 = vpop.f32.mrf.mxu2  ;;  %v6756_v29 = vpop.f32.mrf.mxu0 }
 0x549   :  { %v6673_v2 = vadd.f32 %v6672_v54, %v6659_v59  ;;  %v6770_v43 = vpop.f32.mrf.mxu1 }
 0x551   :  { %v6726_v7 = vpop.f32.mrf.mxu2 }
 0x552   :  { %v6727_v21 = vadd.f32 %v6726_v7, %v6713_v57 }
 0x559   :  { %v6728_v19 = vpop.f32.mrf.mxu2 }
 0x55a   :  { %v6729_v33 = vadd.f32 %v6728_v19, %v6715_v8 }
 0x560   :  { %v6684_v46 = vpop.f32.mrf.mxu3 }
 0x561   :  { %v6685_v37 = vadd.f32 %v6684_v46, %v6671_v44 }
 0x563   :  { %v10225_v51 = vmul.f32 -1.442695, %v6685_v37  ;;  %v6782_v23 = vpop.f32.mrf.mxu2 }
 0x565   :  { %11078 = vpow2.f32 %v10225_v51 }
 0x568   :  { %v6686_v17 = vpop.f32.mrf.mxu3 }
 0x569   :  { %v6687_v25 = vadd.f32 %v6686_v17, %v6673_v2 }
 0x56b   :  { %v11079_v41 = vpop.eup %11078  ;;  %v10227_v9 = vmul.f32 -1.442695, %v6687_v25  ;;  %v6784_v46 = vpop.f32.mrf.mxu2 }
 0x56c   :  { %v6813_v47 = vadd.f32 1.0, %v11079_v41 }
 0x56d   :  { %11080 = vpow2.f32 %v10227_v9 }
 0x56e   :  { %11082 = vrcp.f32 %v6813_v47  ;;  %v6828_v11 = vand.u32 2147483648, %v6813_v47  ;;  %v6826_v61 = vand.u32 2147483647, %v6813_v47  ;;  %vm6822_vm1 = vweird.f32 %v6813_v47 }
 0x570   :  { %v6740_v39 = vpop.f32.mrf.mxu3  ;;  %v6829_v36 = vor.u32 1.1754944e-38, %v6828_v11  ;;  %vm6827_vm3 = vcmp.eq.f32.partialorder %v6826_v61, 8.507059e+37 }
 0x571   :  { %v6741_v30 = vadd.f32 %v6740_v39, %v6727_v21 }
 0x573   :  { %v11081_v34 = vpop.eup %11080  ;;  %v6755_v18 = vadd.f32 %v6754_v5, %v6741_v30 }
 0x574   :  { %v11083_v4 = vpop.eup %11082  ;;  %v6815_v42 = vadd.f32 1.0, %v11081_v34 }
 0x575   :  { %v6818_v6 = vmul.f32 %v11083_v4, %v6813_v47  ;;  %vm6823_vm0 = vweird.f32 %v11083_v4  ;;  %v6769_v20 = vadd.f32 %v6768_v35, %v6755_v18 }
 0x576   :  { %11084 = vrcp.f32 %v6815_v42  ;;  %vm6824_vm2 = vmor %vm6822_vm1, %vm6823_vm0  ;;  %v6858_v22 = vand.u32 2147483648, %v6815_v42  ;;  %v6856_v32 = vand.u32 2147483647, %v6815_v42  ;;  %vm6852_vm5 = vweird.f32 %v6815_v42 }
 0x577   :  { %v6819_v16 = vsub.f32 1.0, %v6818_v6  ;;  %v6783_v38 = vadd.f32 %v6782_v23, %v6769_v20 }
 0x578   :  { %v6742_v62 = vpop.f32.mrf.mxu3  ;;  %v6859_v12 = vor.u32 1.1754944e-38, %v6858_v22  ;;  %vm6857_vm7 = vcmp.eq.f32.partialorder %v6856_v32, 8.507059e+37 }
 0x579   :  { %v6820_v14 = vmul.f32 %v11083_v4, %v6819_v16  ;;  %v6743_v60 = vadd.f32 %v6742_v62, %v6729_v33 }
 0x57b   :  { %v6821_v56 = vadd.f32 %v11083_v4, %v6820_v14  ;;  %v6757_v0 = vadd.f32 %v6756_v29, %v6743_v60 }
 0x57c   :  { %v11085_v26 = vpop.eup %11084 }
 0x57d   :  { %v6825_v15 = vsel %vm6824_vm2, %v11083_v4, %v6821_v56  ;;  %v6848_v27 = vmul.f32 %v11085_v26, %v6815_v42  ;;  %vm6853_vm4 = vweird.f32 %v11085_v26  ;;  %v6771_v58 = vadd.f32 %v6770_v43, %v6757_v0 }
 0x57e   :  { %v6830_v3 = vsel %vm6827_vm3, %v6829_v36, %v6825_v15  ;;  %vm6854_vm6 = vmor %vm6852_vm5, %vm6853_vm4 }
 0x57f   :  { %6877 = vst [vmem:[%s11673_s13] sm:$0xff] %v6830_v3  ;;  %v6849_v31 = vsub.f32 1.0, %v6848_v27  ;;  %v6785_v48 = vadd.f32 %v6784_v46, %v6771_v58 }
 0x580   :  { %v6796_v28 = vpop.f32.mrf.mxu3 }
 0x581   :  { %v6850_v24 = vmul.f32 %v11085_v26, %v6849_v31  ;;  %v6797_v52 = vadd.f32 %v6796_v28, %v6783_v38 }
 0x583   :  { %v6851_v1 = vadd.f32 %v11085_v26, %v6850_v24  ;;  %v10226_v63 = vmul.f32 -1.442695, %v6797_v52 }
 0x585   :  { %v6855_v54 = vsel %vm6854_vm6, %v11085_v26, %v6851_v1  ;;  %11086 = vpow2.f32 %v10226_v63 }
 0x586   :  { %v6860_v44 = vsel %vm6857_vm7, %v6859_v12, %v6855_v54 }
 0x587   :  { %6879 = vst [vmem:[%s11673_s13 + $0x10] sm:$0xff] %v6860_v44 }
 0x588   :  { %v6798_v37 = vpop.f32.mrf.mxu3 }
 0x589   :  { %v6799_v49 = vadd.f32 %v6798_v37, %v6785_v48 }
 0x58b   :  { %v11087_v50 = vpop.eup %11086  ;;  %v10228_v51 = vmul.f32 -1.442695, %v6799_v49 }
 0x58c   :  { %v6814_v45 = vadd.f32 1.0, %v11087_v50 }
 0x58d   :  { %11088 = vpow2.f32 %v10228_v51 }
 0x58e   :  { %11090 = vrcp.f32 %v6814_v45  ;;  %v6843_v25 = vand.u32 2147483648, %v6814_v45  ;;  %v6841_v9 = vand.u32 2147483647, %v6814_v45  ;;  %vm6837_vm9 = vweird.f32 %v6814_v45 }
 0x590   :  { %v6844_v10 = vor.u32 1.1754944e-38, %v6843_v25  ;;  %vm6842_vm11 = vcmp.eq.f32.partialorder %v6841_v9, 8.507059e+37 }
 0x593   :  { %v11089_v59 = vpop.eup %11088 }
 0x594   :  { %v11091_v2 = vpop.eup %11090  ;;  %v6816_v7 = vadd.f32 1.0, %v11089_v59 }
 0x595   :  { %v6833_v17 = vmul.f32 %v11091_v2, %v6814_v45  ;;  %vm6838_vm8 = vweird.f32 %v11091_v2 }
 0x596   :  { %11092 = vrcp.f32 %v6816_v7  ;;  %vm6839_vm10 = vmor %vm6837_vm9, %vm6838_vm8  ;;  %v6873_v19 = vand.u32 2147483648, %v6816_v7  ;;  %v6871_v30 = vand.u32 2147483647, %v6816_v7  ;;  %vm6867_vm13 = vweird.f32 %v6816_v7 }
 0x597   :  { %v6834_v13 = vsub.f32 1.0, %v6833_v17 }
 0x598   :  { %v6874_v5 = vor.u32 1.1754944e-38, %v6873_v19  ;;  %vm6872_vm15 = vcmp.eq.f32.partialorder %v6871_v30, 8.507059e+37 }
 0x599   :  { %v6835_v41 = vmul.f32 %v11091_v2, %v6834_v13 }
 0x59b   :  { %v6836_v53 = vadd.f32 %v11091_v2, %v6835_v41 }
 0x59c   :  { %v11093_v47 = vpop.eup %11092 }
 0x59d   :  { %v6840_v55 = vsel %vm6839_vm10, %v11091_v2, %v6836_v53  ;;  %v6863_v57 = vmul.f32 %v11093_v47, %v6816_v7  ;;  %vm6868_vm12 = vweird.f32 %v11093_v47 }
 0x59e   :  { %v6845_v39 = vsel %vm6842_vm11, %v6844_v10, %v6840_v55  ;;  %vm6869_vm14 = vmor %vm6867_vm13, %vm6868_vm12 }
 0x59f   :  { %6878 = vst [vmem:[%s11673_s13 + $0x8] sm:$0xff] %v6845_v39  ;;  %v6864_v21 = vsub.f32 1.0, %v6863_v57 }
 0x5a1   :  { %v6865_v34 = vmul.f32 %v11093_v47, %v6864_v21 }
 0x5a3   :  { %v6866_v4 = vadd.f32 %v11093_v47, %v6865_v34 }
 0x5a5   :  { %v6870_v42 = vsel %vm6869_vm14, %v11093_v47, %v6866_v4 }
 0x5a6   :  { %v6875_v40 = vsel %vm6872_vm15, %v6874_v5, %v6870_v42 }
 0x5a7   :  { %6880 = vst [vmem:[%s11673_s13 + $0x18] sm:$0xff] %v6875_v40 }
 0x5a8   :  { %6885 = vsyncpa [#allocation3], 1 }
 0x5a9   :  { %6886 = vsyncpa [#allocation5], 1 }
 0x5aa   :  { %6887 = vsyncpa [#allocation8], 1 }
 0x5ab   :  { %6888 = vsyncpa [#allocation11], 1 }

</bundles_post_ra>
